<compile_context>
chip_gen: v5e
topology: v5e:2x2
jax: 0.10.0
libtpu: 0.0.40
codegen_flags: <defaults>
</compile_context>

<pallas_src>
import functools

import jax
import jax.numpy as jnp
from jax import lax
from jax.experimental import pallas as pl
from jax.experimental.pallas import tpu as pltpu


# ----------------------------- padding helpers -------------------------------

def _round_up(n, m):
    return ((n + m - 1) // m) * m


def _pad_axis(x, axis, target):
    pad = target - x.shape[axis]
    if pad <= 0:
        return x
    widths = [(0, 0)] * x.ndim
    widths[axis] = (0, pad)
    return jnp.pad(x, widths)


def _pad_sections(w, n_sections, sec_in, sec_out):
    """Zero-pad each of n_sections contiguous blocks of the last axis sec_in -> sec_out."""
    parts = []
    for s in range(n_sections):
        parts.append(_pad_axis(w[..., s * sec_in:(s + 1) * sec_in], -1, sec_out))
    return jnp.concatenate(parts, axis=-1)


def _device_kind():
    try:
        return jax.devices()[0].device_kind.lower()
    except Exception:
        return ""


# --------------------------------- kernel ------------------------------------

def pqmatcher_kernel(bf16_ew, subtract_max,
                     up_ref, wpup_ref, upwg_ref, wquq_ref, uq_ref, mask_ref,
                     wrec_ref, vvec_ref, wgbot_ref, wih_u_ref, wih_c_ref,
                     bih_ref, bhh_ref, out_ref, v_scratch):
    """Grid = (batch_block, time_chunk); GRU state carried across time chunks in v_scratch."""
    T, Bb, Ip = up_ref.shape                     # time-leading chunk layout
    Hp = v_scratch.shape[1]
    f32, bf16 = jnp.float32, jnp.bfloat16

    @pl.when(pl.program_id(1) == 0)              # new batch block -> reset recurrent state
    def _():
        v_scratch[...] = jnp.zeros_like(v_scratch)

    # Small, loop-invariant values.  The LARGE resident refs (Wq(Uq), Uq) are
    # deliberately read through the refs inside the step body, not hoisted here.
    valid = mask_ref[...] > 0.0                  # (Bb, Lq)
    valid_f = valid.astype(f32)
    neg = f32(-1e30)

    def step(t, v):
        upi = up_ref[t]                          # (Bb, Ip)  f32
        wup = wpup_ref[t]                        # (Bb, Hp)  f32  (precomputed Wp(Upi))
        gpre_u = upwg_ref[t]                     # (Bb, 2Ip) f32  (precomputed Upi @ Wg_top)

        # Recurrent projections fused into one MXU push: v @ [Wv | W_hh].
        vrec = jnp.dot(v.astype(bf16), wrec_ref[...], preferred_element_type=f32)  # (Bb, 4Hp)
        wvv = vrec[:, :Hp]
        gh = vrec[:, Hp:] + bhh_ref[...]

        # Attention over the question.  tanh / x*V in bf16 on v6e/v7x (bf16 EUP),
        # f32 on v5e; reductions and softmax always in f32.
        bias = wup + wvv                                                   # (Bb, Hp) f32
        if bf16_ew:
            x = jnp.tanh(wquq_ref[...] + bias.astype(bf16)[:, None, :])    # (Bb, Lq, Hp) bf16
            prod = x * vvec_ref[...].astype(bf16).reshape(1, 1, Hp)
            s = jnp.sum(prod.astype(f32), axis=-1)                         # (Bb, Lq) f32
        else:
            x = jnp.tanh(wquq_ref[...].astype(f32) + bias[:, None, :])
            s = jnp.sum(x * vvec_ref[...].reshape(1, 1, Hp), axis=-1)

        s_m = jnp.where(valid, s, neg)
        if subtract_max:
            # Optional: s is bounded by ||V||_1, so this is droppable when that is small.
            s_m = s_m - jnp.max(s_m, axis=1, keepdims=True)
        e = jnp.exp(s_m) * valid_f
        denom = jnp.sum(e, axis=1, keepdims=True)
        a = e * pl.reciprocal(denom + 1e-30, approx=True)                  # (Bb, Lq)

        # Attention-pooled question context (MXU batched matvec over Lq).
        # (VPU reformulation only if a bundle dump shows MXU co-binding.)
        c = jnp.einsum('bxq,bqi->bxi', a.astype(bf16)[:, None, :], uq_ref[...],
                       preferred_element_type=f32)[:, 0, :]                # (Bb, Ip)

        # Gate via split matmuls (no lane-axis concat); Upi half precomputed.
        gpre = gpre_u + jnp.dot(c.astype(bf16), wgbot_ref[...],
                                preferred_element_type=f32)
        g = jax.nn.sigmoid(gpre)                                           # (Bb, 2Ip)
        gu = g[:, :Ip] * upi
        gc = g[:, Ip:] * c

        # GRUCell (PyTorch gate order r, z, n).
        gi = (jnp.dot(gu.astype(bf16), wih_u_ref[...], preferred_element_type=f32)
              + jnp.dot(gc.astype(bf16), wih_c_ref[...], preferred_element_type=f32)
              + bih_ref[...])                                              # (Bb, 3Hp)
        i_r, i_z, i_n = gi[:, :Hp], gi[:, Hp:2 * Hp], gi[:, 2 * Hp:]
        h_r, h_z, h_n = gh[:, :Hp], gh[:, Hp:2 * Hp], gh[:, 2 * Hp:]
        r_gate = jax.nn.sigmoid(i_r + h_r)
        z_gate = jax.nn.sigmoid(i_z + h_z)
        n_gate = jnp.tanh(i_n + r_gate * h_n)
        v_new = (1.0 - z_gate) * n_gate + z_gate * v                       # (Bb, Hp)

        out_ref[t] = v_new                                                 # full (8,128) store
        return v_new

    v_scratch[...] = lax.fori_loop(0, T, step, v_scratch[...], unroll=True)


# -------------------------------- wrapper -------------------------------------

def pqmatcher_forward(Up, Uq, Uq_mask, params, *, time_block=8, batch_block=8,
                      subtract_softmax_max=True, bf16_elementwise=None,
                      vmem_limit_bytes=None):
    """Up: (B, lp, I), Uq: (B, lq, I), Uq_mask: (B, lq) -> (B, lp, H)."""
    f32, bf16 = jnp.float32, jnp.bfloat16
    B, lp, I = Up.shape
    _, lq, _ = Uq.shape
    H = params["Wp"].shape[1]

    # Generation-aware defaults (bf16 EUP path and VMEM headroom).
    kind = _device_kind()
    is_v7 = ("v7" in kind) or ("7x" in kind)
    if bf16_elementwise is None:
        bf16_elementwise = ("v6" in kind) or is_v7
    if vmem_limit_bytes is None:
        vmem_limit_bytes = (56 if is_v7 else 100) * 1024 * 1024

    # (8, 128)-aligned padded sizes.
    T = time_block
    Bb = _round_up(batch_block, 8)
    Bp = _round_up(B, Bb)
    Lp = _round_up(lp, T)
    Lq = _round_up(lq, 8)
    Ip = _round_up(I, 128)
    Hp = _round_up(H, 128)

    # Pad inputs (zero pad: padded lanes / rows stay exactly zero through the math).
    Up_p = _pad_axis(_pad_axis(_pad_axis(Up.astype(f32), 0, Bp), 1, Lp), 2, Ip)
    Uq_p = _pad_axis(_pad_axis(_pad_axis(Uq.astype(f32), 0, Bp), 1, Lq), 2, Ip)
    mask_p = _pad_axis(_pad_axis(Uq_mask.astype(f32), 0, Bp), 1, Lq)

    # Pad / repack weights (gate-section-aware padding for Wg / GRU weights).
    Wp_p = _pad_axis(_pad_axis(params["Wp"], 0, Ip), 1, Hp)
    Wq_p = _pad_axis(_pad_axis(params["Wq"], 0, Ip), 1, Hp)
    Wv_p = _pad_axis(_pad_axis(params["Wv"], 0, Hp), 1, Hp)
    V_p = _pad_axis(params["V"].reshape(1, H), 1, Hp)
    Wg = params["Wg"]
    Wg_top = _pad_axis(_pad_sections(Wg[:I, :], 2, I, Ip), 0, Ip)       # (Ip, 2Ip)
    Wg_bot = _pad_axis(_pad_sections(Wg[I:, :], 2, I, Ip), 0, Ip)       # (Ip, 2Ip)
    Wih = params["W_ih"]
    Wih_u = _pad_axis(_pad_sections(Wih[:I, :], 3, H, Hp), 0, Ip)       # (Ip, 3Hp)
    Wih_c = _pad_axis(_pad_sections(Wih[I:, :], 3, H, Hp), 0, Ip)       # (Ip, 3Hp)
    Whh_p = _pad_axis(_pad_sections(params["W_hh"], 3, H, Hp), 0, Hp)   # (Hp, 3Hp)
    Wrec = jnp.concatenate([Wv_p, Whh_p], axis=1)                       # (Hp, 4Hp) fused
    bih_p = _pad_sections(params["b_ih"], 3, H, Hp)
    bhh_p = _pad_sections(params["b_hh"], 3, H, Hp)

    # Hoist time-invariant projections out of the recurrence (single large XLA
    # matmuls, bf16 operands / f32 accumulation).  Wq(Uq) is kept in bf16: it is
    # the dominant resident tensor and is re-read every recurrence step.
    Uq_bf = Uq_p.astype(bf16)
    WqUq = jnp.einsum('bqi,ih->bqh', Uq_bf, Wq_p.astype(bf16),
                      preferred_element_type=f32).astype(bf16)          # (Bp, Lq, Hp) bf16
    # Time-leading layout for the chunked per-step tensors (clean leading-axis
    # indexing / full-tile stores in-kernel).
    Up_t = jnp.transpose(Up_p, (1, 0, 2))                               # (Lp, Bp, Ip)
    Up_t_bf = Up_t.astype(bf16)
    WpUp_t = jnp.einsum('tbi,ih->tbh', Up_t_bf, Wp_p.astype(bf16),
                        preferred_element_type=f32)                     # (Lp, Bp, Hp)
    UpWg_t = jnp.einsum('tbi,ig->tbg', Up_t_bf, Wg_top.astype(bf16),
                        preferred_element_type=f32)                     # (Lp, Bp, 2Ip)

    tmap = lambda b, t: (t, b, 0)      # time-chunked, per-batch-block tensors
    bmap3 = lambda b, t: (b, 0, 0)     # question residents: depend on batch block only
    bmap2 = lambda b, t: (b, 0)
    cmap2 = lambda b, t: (0, 0)        # weights / biases: fully constant
    single = pl.Buffered(1)            # single-buffer the (near-)constant inputs

    in_specs = [
        pl.BlockSpec((T, Bb, Ip), tmap),                                  # Up chunk
        pl.BlockSpec((T, Bb, Hp), tmap),                                  # Wp(Up) chunk
        pl.BlockSpec((T, Bb, 2 * Ip), tmap),                              # Up @ Wg_top chunk
        pl.BlockSpec((Bb, Lq, Hp), bmap3, pipeline_mode=single),          # Wq(Uq)  bf16 resident
        pl.BlockSpec((Bb, Lq, Ip), bmap3, pipeline_mode=single),          # Uq      bf16 resident
        pl.BlockSpec((Bb, Lq), bmap2, pipeline_mode=single),              # mask
        pl.BlockSpec((Hp, 4 * Hp), cmap2, pipeline_mode=single),          # [Wv | W_hh] fused
        pl.BlockSpec((1, Hp), cmap2, pipeline_mode=single),               # V
        pl.BlockSpec((Ip, 2 * Ip), cmap2, pipeline_mode=single),          # Wg bottom half
        pl.BlockSpec((Ip, 3 * Hp), cmap2, pipeline_mode=single),          # W_ih (Upi half)
        pl.BlockSpec((Ip, 3 * Hp), cmap2, pipeline_mode=single),          # W_ih (context half)
        pl.BlockSpec((1, 3 * Hp), cmap2, pipeline_mode=single),           # b_ih
        pl.BlockSpec((1, 3 * Hp), cmap2, pipeline_mode=single),           # b_hh
    ]
    out_specs = pl.BlockSpec((T, Bb, Hp), tmap)

    kernel = functools.partial(pqmatcher_kernel, bool(bf16_elementwise),
                               bool(subtract_softmax_max))

    out = pl.pallas_call(
        kernel,
        grid=(Bp // Bb, Lp // T),                 # batch blocks (parallel) x time chunks
        in_specs=in_specs,
        out_specs=out_specs,
        out_shape=jax.ShapeDtypeStruct((Lp, Bp, Hp), f32),
        scratch_shapes=[pltpu.VMEM((Bb, Hp), f32)],
        compiler_params=pltpu.CompilerParams(
            dimension_semantics=("parallel", "arbitrary"),  # recurrence runs in time order
            vmem_limit_bytes=vmem_limit_bytes),
    )(
        Up_t, WpUp_t, UpWg_t, WqUq, Uq_bf, mask_p,
        Wrec.astype(bf16), V_p.astype(f32), Wg_bot.astype(bf16),
        Wih_u.astype(bf16), Wih_c.astype(bf16),
        bih_p.astype(f32), bhh_p.astype(f32),
    )
    # dropout: eval-mode identity
    return jnp.transpose(out[:lp, :B, :H], (1, 0, 2))


# --------------------------- pure-JAX reference --------------------------------

def pqmatcher_reference(Up, Uq, Uq_mask, params):
    B, lp, I = Up.shape
    H = params["Wp"].shape[1]
    Wp, Wq, Wv = params["Wp"], params["Wq"], params["Wv"]
    Vv = params["V"].reshape(-1)
    Wg, W_ih, W_hh = params["Wg"], params["W_ih"], params["W_hh"]
    b_ih, b_hh = params["b_ih"], params["b_hh"]
    WqUq = jnp.einsum('bqi,ih->bqh', Uq, Wq)
    valid = Uq_mask > 0
    v = jnp.zeros((B, H), jnp.float32)
    outs = []
    for i in range(lp):
        upi = Up[:, i, :]
        x = jnp.tanh(WqUq + (upi @ Wp + v @ Wv)[:, None, :])
        s = jnp.sum(x * Vv, axis=-1)
        s_m = jnp.where(valid, s, -1e30)
        e = jnp.exp(s_m - s_m.max(axis=1, keepdims=True)) * valid
        a = e / (e.sum(axis=1, keepdims=True) + 1e-30)
        c = jnp.einsum('bq,bqi->bi', a, Uq)
        r = jnp.concatenate([upi, c], axis=1)
        c_ = jax.nn.sigmoid(r @ Wg) * r
        gi = c_ @ W_ih + b_ih
        gh = v @ W_hh + b_hh
        i_r, i_z, i_n = gi[:, :H], gi[:, H:2 * H], gi[:, 2 * H:]
        h_r, h_z, h_n = gh[:, :H], gh[:, H:2 * H], gh[:, 2 * H:]
        rg = jax.nn.sigmoid(i_r + h_r)
        zg = jax.nn.sigmoid(i_z + h_z)
        ng = jnp.tanh(i_n + rg * h_n)
        v = (1.0 - zg) * ng + zg * v
        outs.append(v)
    return jnp.stack(outs, axis=1)


def init_params(key, in_size, hidden_size):
    ks = jax.random.split(key, 8)
    scale = 0.1
    # Linear weights stored as (in, out) so the math is x @ W.
    return {
        "Wp":  scale * jax.random.normal(ks[0], (in_size, hidden_size), jnp.float32),
        "Wq":  scale * jax.random.normal(ks[1], (in_size, hidden_size), jnp.float32),
        "Wv":  scale * jax.random.normal(ks[2], (hidden_size, hidden_size), jnp.float32),
        "V":   scale * jax.random.normal(ks[3], (1, hidden_size), jnp.float32),
        "Wg":  scale * jax.random.normal(ks[4], (2 * in_size, 2 * in_size), jnp.float32),
        "W_ih": scale * jax.random.normal(ks[5], (2 * in_size, 3 * hidden_size), jnp.float32),
        "W_hh": scale * jax.random.normal(ks[6], (hidden_size, 3 * hidden_size), jnp.float32),
        "b_ih": scale * jax.random.normal(ks[7], (1, 3 * hidden_size), jnp.float32),
        "b_hh": jnp.zeros((1, 3 * hidden_size), jnp.float32),
    }


if __name__ == "__main__":
    B, lp, lq, in_size, hidden = 2, 8, 8, 16, 32

    key = jax.random.PRNGKey(0)
    k_up, k_uq, k_param = jax.random.split(key, 3)

    Up = jax.random.normal(k_up, (B, lp, in_size), jnp.float32)
    Uq = jax.random.normal(k_uq, (B, lq, in_size), jnp.float32)
    # mask: row 0 fully valid, row 1 has only the first 5 question positions valid
    Uq_mask = jnp.stack([
        jnp.ones((lq,), jnp.float32),
        (jnp.arange(lq) < 5).astype(jnp.float32),
    ], axis=0)

    params = init_params(k_param, in_size, hidden)

    vs = jax.jit(pqmatcher_forward)(Up, Uq, Uq_mask, params)
    jax.block_until_ready(vs)
    assert vs.shape == (B, lp, hidden)
    assert bool(jnp.all(jnp.isfinite(vs)))

    ref = pqmatcher_reference(Up, Uq, Uq_mask, params)
    err = float(jnp.max(jnp.abs(vs - ref)))
    assert err < 5e-2, f"max abs err vs reference: {err}"
    print("KERNEL_OK")
</pallas_src>

<mosaic_0001>
module attributes {stable_mosaic.version = 11 : i64} {
  func.func @pqmatcher_kernel(%arg0: i32, %arg1: i32, %arg2: memref<8x8x128xf32, #tpu.memory_space<vmem>>, %arg3: memref<8x8x128xf32, #tpu.memory_space<vmem>>, %arg4: memref<8x8x256xf32, #tpu.memory_space<vmem>>, %arg5: memref<8x8x128xbf16, #tpu.memory_space<vmem>>, %arg6: memref<8x8x128xbf16, #tpu.memory_space<vmem>>, %arg7: memref<8x8xf32, #tpu.memory_space<vmem>>, %arg8: memref<128x512xbf16, #tpu.memory_space<vmem>>, %arg9: memref<1x128xf32, #tpu.memory_space<vmem>>, %arg10: memref<128x256xbf16, #tpu.memory_space<vmem>>, %arg11: memref<128x384xbf16, #tpu.memory_space<vmem>>, %arg12: memref<128x384xbf16, #tpu.memory_space<vmem>>, %arg13: memref<1x384xf32, #tpu.memory_space<vmem>>, %arg14: memref<1x384xf32, #tpu.memory_space<vmem>>, %arg15: memref<8x8x128xf32, #tpu.memory_space<vmem>>, %arg16: memref<8x128xf32, #tpu.memory_space<vmem>>) attributes {dimension_semantics = [#tpu.dimension_semantics<parallel>, #tpu.dimension_semantics<arbitrary>], iteration_bounds = array<i64: 1, 1>, scalar_prefetch = 0 : i64, scratch_operands = 1 : i64, tpu.core_type = #tpu.core_type<tc>, window_params = [{transform_indices = @transform_0, window_bounds = array<i64: 8, 8, 128>}, {transform_indices = @transform_1, window_bounds = array<i64: 8, 8, 128>}, {transform_indices = @transform_2, window_bounds = array<i64: 8, 8, 256>}, {pipeline_mode = #tpu.pipeline_mode<synchronous>, transform_indices = @transform_3, window_bounds = array<i64: 8, 8, 128>}, {pipeline_mode = #tpu.pipeline_mode<synchronous>, transform_indices = @transform_4, window_bounds = array<i64: 8, 8, 128>}, {pipeline_mode = #tpu.pipeline_mode<synchronous>, transform_indices = @transform_5, window_bounds = array<i64: 8, 8>}, {pipeline_mode = #tpu.pipeline_mode<synchronous>, transform_indices = @transform_6, window_bounds = array<i64: 128, 512>}, {pipeline_mode = #tpu.pipeline_mode<synchronous>, transform_indices = @transform_7, window_bounds = array<i64: 1, 128>}, {pipeline_mode = #tpu.pipeline_mode<synchronous>, transform_indices = @transform_8, window_bounds = array<i64: 128, 256>}, {pipeline_mode = #tpu.pipeline_mode<synchronous>, transform_indices = @transform_9, window_bounds = array<i64: 128, 384>}, {pipeline_mode = #tpu.pipeline_mode<synchronous>, transform_indices = @transform_10, window_bounds = array<i64: 128, 384>}, {pipeline_mode = #tpu.pipeline_mode<synchronous>, transform_indices = @transform_11, window_bounds = array<i64: 1, 384>}, {pipeline_mode = #tpu.pipeline_mode<synchronous>, transform_indices = @transform_12, window_bounds = array<i64: 1, 384>}, {transform_indices = @transform_13, window_bounds = array<i64: 8, 8, 128>}]} {
    %c0_i32 = arith.constant 0 : i32
    %0 = arith.cmpi eq, %arg1, %c0_i32 : i32
    %1 = arith.extui %0 : i1 to i32
    %c0_i32_0 = arith.constant 0 : i32
    %2 = arith.cmpi ne, %1, %c0_i32_0 : i32
    scf.if %2 {
      %cst_336 = arith.constant 0.000000e+00 : f32
      %826 = vector.broadcast %cst_336 : f32 to vector<8x128xf32>
      %c0_337 = arith.constant 0 : index
      %c0_338 = arith.constant 0 : index
      %827 = vector.load %arg16[%c0_337, %c0_338] : memref<8x128xf32, #tpu.memory_space<vmem>>, vector<8x128xf32>
      tpu.vector_store %arg16[%c0_337, %c0_338], %826 {strides = array<i32>} : memref<8x128xf32, #tpu.memory_space<vmem>>, vector<8x128xf32>,
    } else {
    }
    %c0 = arith.constant 0 : index
    %c0_1 = arith.constant 0 : index
    %3 = vector.load %arg7[%c0, %c0_1] : memref<8x8xf32, #tpu.memory_space<vmem>>, vector<8x8xf32>
    %cst = arith.constant 0.000000e+00 : f32
    %4 = vector.broadcast %cst : f32 to vector<8x8xf32>
    %5 = arith.cmpf ogt, %3, %4 : vector<8x8xf32>
    %6 = arith.extui %5 : vector<8x8xi1> to vector<8x8xi32>
    %7 = arith.sitofp %6 : vector<8x8xi32> to vector<8x8xf32>
    %c0_2 = arith.constant 0 : index
    %c0_3 = arith.constant 0 : index
    %8 = vector.load %arg16[%c0_2, %c0_3] : memref<8x128xf32, #tpu.memory_space<vmem>>, vector<8x128xf32>
    %cst_4 = arith.constant -1.000000e+30 : f32
    %c0_i32_5 = arith.constant 0 : i32
    %9 = arith.index_cast %c0_i32_5 : i32 to index
    %c0_6 = arith.constant 0 : index
    %c0_7 = arith.constant 0 : index
    %10 = vector.load %arg2[%9, %c0_6, %c0_7] : memref<8x8x128xf32, #tpu.memory_space<vmem>>, vector<1x8x128xf32>
    %11 = vector.shape_cast %10 : vector<1x8x128xf32> to vector<8x128xf32>
    %12 = arith.index_cast %c0_i32_5 : i32 to index
    %c0_8 = arith.constant 0 : index
    %c0_9 = arith.constant 0 : index
    %13 = vector.load %arg3[%12, %c0_8, %c0_9] : memref<8x8x128xf32, #tpu.memory_space<vmem>>, vector<1x8x128xf32>
    %14 = vector.shape_cast %13 : vector<1x8x128xf32> to vector<8x128xf32>
    %15 = arith.index_cast %c0_i32_5 : i32 to index
    %c0_10 = arith.constant 0 : index
    %c0_11 = arith.constant 0 : index
    %16 = vector.load %arg4[%15, %c0_10, %c0_11] : memref<8x8x256xf32, #tpu.memory_space<vmem>>, vector<1x8x256xf32>
    %17 = vector.shape_cast %16 : vector<1x8x256xf32> to vector<8x256xf32>
    %18 = arith.truncf %8 : vector<8x128xf32> to vector<8x128xbf16>
    %c0_12 = arith.constant 0 : index
    %c0_13 = arith.constant 0 : index
    %19 = vector.load %arg8[%c0_12, %c0_13] : memref<128x512xbf16, #tpu.memory_space<vmem>>, vector<128x512xbf16>
    %cst_14 = arith.constant dense<0.000000e+00> : vector<8x512xf32>
    %20 = tpu.matmul %18, %19, %cst_14 {dimension_numbers = #tpu.dot_dimension_numbers<[1], [0], [0], [1], [0, 0, 1, 1], [], []>} : vector<8x128xbf16>, vector<128x512xbf16>, vector<8x512xf32> -> vector<8x512xf32>
    %21 = vector.extract_strided_slice %20 {offsets = [0, 0], sizes = [8, 128], strides = [1, 1]} : vector<8x512xf32> to vector<8x128xf32>
    %22 = vector.extract_strided_slice %20 {offsets = [0, 128], sizes = [8, 384], strides = [1, 1]} : vector<8x512xf32> to vector<8x384xf32>
    %c0_15 = arith.constant 0 : index
    %c0_16 = arith.constant 0 : index
    %23 = vector.load %arg14[%c0_15, %c0_16] : memref<1x384xf32, #tpu.memory_space<vmem>>, vector<1x384xf32>
    %24 = vector.broadcast %23 : vector<1x384xf32> to vector<8x384xf32>
    %25 = arith.addf %22, %24 : vector<8x384xf32>
    %26 = arith.addf %14, %21 : vector<8x128xf32>
    %c0_17 = arith.constant 0 : index
    %c0_18 = arith.constant 0 : index
    %c0_19 = arith.constant 0 : index
    %27 = vector.load %arg5[%c0_17, %c0_18, %c0_19] : memref<8x8x128xbf16, #tpu.memory_space<vmem>>, vector<8x8x128xbf16>
    %28 = arith.extf %27 : vector<8x8x128xbf16> to vector<8x8x128xf32>
    %29 = vector.shape_cast %26 : vector<8x128xf32> to vector<8x1x128xf32>
    %30 = vector.broadcast %29 : vector<8x1x128xf32> to vector<8x8x128xf32>
    %31 = arith.addf %28, %30 : vector<8x8x128xf32>
    %32 = math.tanh %31 : vector<8x8x128xf32>
    %c0_20 = arith.constant 0 : index
    %c0_21 = arith.constant 0 : index
    %33 = vector.load %arg9[%c0_20, %c0_21] : memref<1x128xf32, #tpu.memory_space<vmem>>, vector<1x128xf32>
    %34 = vector.shape_cast %33 : vector<1x128xf32> to vector<1x1x128xf32>
    %35 = vector.broadcast %34 : vector<1x1x128xf32> to vector<8x8x128xf32>
    %36 = arith.mulf %32, %35 : vector<8x8x128xf32>
    %cst_22 = arith.constant dense<0.000000e+00> : vector<8x8xf32>
    %37 = vector.multi_reduction <add>, %36, %cst_22 [2] : vector<8x8x128xf32> to vector<8x8xf32>
    %38 = vector.broadcast %cst_4 : f32 to vector<8x8xf32>
    %39 = arith.select %5, %37, %38 : vector<8x8xi1>, vector<8x8xf32>
    %cst_23 = arith.constant dense<0xFF800000> : vector<8xf32>
    %40 = vector.multi_reduction <maximumf>, %39, %cst_23 [1] : vector<8x8xf32> to vector<8xf32>
    %41 = vector.shape_cast %40 : vector<8xf32> to vector<8x1xf32>
    %42 = vector.broadcast %41 : vector<8x1xf32> to vector<8x8xf32>
    %43 = arith.subf %39, %42 : vector<8x8xf32>
    %44 = math.exp %43 : vector<8x8xf32>
    %45 = arith.mulf %44, %7 : vector<8x8xf32>
    %cst_24 = arith.constant dense<0.000000e+00> : vector<8xf32>
    %46 = vector.multi_reduction <add>, %45, %cst_24 [1] : vector<8x8xf32> to vector<8xf32>
    %47 = vector.shape_cast %46 : vector<8xf32> to vector<8x1xf32>
    %cst_25 = arith.constant 1.000000e-30 : f32
    %48 = vector.broadcast %cst_25 : f32 to vector<8x1xf32>
    %49 = arith.addf %47, %48 : vector<8x1xf32>
    %50 = tpu.reciprocal %49 {approx = true} : vector<8x1xf32> -> vector<8x1xf32>
    %51 = vector.broadcast %50 : vector<8x1xf32> to vector<8x8xf32>
    %52 = arith.mulf %45, %51 : vector<8x8xf32>
    %53 = arith.truncf %52 : vector<8x8xf32> to vector<8x8xbf16>
    %54 = vector.shape_cast %53 : vector<8x8xbf16> to vector<8x1x8xbf16>
    %c0_26 = arith.constant 0 : index
    %c0_27 = arith.constant 0 : index
    %c0_28 = arith.constant 0 : index
    %55 = vector.load %arg6[%c0_26, %c0_27, %c0_28] : memref<8x8x128xbf16, #tpu.memory_space<vmem>>, vector<8x8x128xbf16>
    "tpu.trace_start"() <{level = 10 : i32, message = "bxq,bqi->bxi"}> : () -> ()
    %cst_29 = arith.constant dense<0.000000e+00> : vector<8x1x128xf32>
    %56 = tpu.matmul %54, %55, %cst_29 {dimension_numbers = #tpu.dot_dimension_numbers<[2], [1], [1], [2], [0, 0, 0, 1, 1, 2], [0], [0]>} : vector<8x1x8xbf16>, vector<8x8x128xbf16>, vector<8x1x128xf32> -> vector<8x1x128xf32>
    "tpu.trace_stop"() : () -> ()
    %57 = vector.shape_cast %56 : vector<8x1x128xf32> to vector<8x128xf32>
    %58 = arith.truncf %57 : vector<8x128xf32> to vector<8x128xbf16>
    %c0_30 = arith.constant 0 : index
    %c0_31 = arith.constant 0 : index
    %59 = vector.load %arg10[%c0_30, %c0_31] : memref<128x256xbf16, #tpu.memory_space<vmem>>, vector<128x256xbf16>
    %cst_32 = arith.constant dense<0.000000e+00> : vector<8x256xf32>
    %60 = tpu.matmul %58, %59, %cst_32 {dimension_numbers = #tpu.dot_dimension_numbers<[1], [0], [0], [1], [0, 0, 1, 1], [], []>} : vector<8x128xbf16>, vector<128x256xbf16>, vector<8x256xf32> -> vector<8x256xf32>
    %61 = arith.addf %17, %60 : vector<8x256xf32>
    %62 = arith.negf %61 : vector<8x256xf32>
    %63 = math.exp %62 : vector<8x256xf32>
    %cst_33 = arith.constant 1.000000e+00 : f32
    %64 = vector.broadcast %cst_33 : f32 to vector<8x256xf32>
    %65 = arith.addf %64, %63 : vector<8x256xf32>
    %66 = arith.divf %64, %65 : vector<8x256xf32>
    %67 = vector.extract_strided_slice %66 {offsets = [0, 0], sizes = [8, 128], strides = [1, 1]} : vector<8x256xf32> to vector<8x128xf32>
    %68 = arith.mulf %67, %11 : vector<8x128xf32>
    %69 = vector.extract_strided_slice %66 {offsets = [0, 128], sizes = [8, 128], strides = [1, 1]} : vector<8x256xf32> to vector<8x128xf32>
    %70 = arith.mulf %69, %57 : vector<8x128xf32>
    %71 = arith.truncf %68 : vector<8x128xf32> to vector<8x128xbf16>
    %c0_34 = arith.constant 0 : index
    %c0_35 = arith.constant 0 : index
    %72 = vector.load %arg11[%c0_34, %c0_35] : memref<128x384xbf16, #tpu.memory_space<vmem>>, vector<128x384xbf16>
    %cst_36 = arith.constant dense<0.000000e+00> : vector<8x384xf32>
    %73 = tpu.matmul %71, %72, %cst_36 {dimension_numbers = #tpu.dot_dimension_numbers<[1], [0], [0], [1], [0, 0, 1, 1], [], []>} : vector<8x128xbf16>, vector<128x384xbf16>, vector<8x384xf32> -> vector<8x384xf32>
    %74 = arith.truncf %70 : vector<8x128xf32> to vector<8x128xbf16>
    %c0_37 = arith.constant 0 : index
    %c0_38 = arith.constant 0 : index
    %75 = vector.load %arg12[%c0_37, %c0_38] : memref<128x384xbf16, #tpu.memory_space<vmem>>, vector<128x384xbf16>
    %cst_39 = arith.constant dense<0.000000e+00> : vector<8x384xf32>
    %76 = tpu.matmul %74, %75, %cst_39 {dimension_numbers = #tpu.dot_dimension_numbers<[1], [0], [0], [1], [0, 0, 1, 1], [], []>} : vector<8x128xbf16>, vector<128x384xbf16>, vector<8x384xf32> -> vector<8x384xf32>
    %77 = arith.addf %73, %76 : vector<8x384xf32>
    %c0_40 = arith.constant 0 : index
    %c0_41 = arith.constant 0 : index
    %78 = vector.load %arg13[%c0_40, %c0_41] : memref<1x384xf32, #tpu.memory_space<vmem>>, vector<1x384xf32>
    %79 = vector.broadcast %78 : vector<1x384xf32> to vector<8x384xf32>
    %80 = arith.addf %77, %79 : vector<8x384xf32>
    %81 = vector.extract_strided_slice %80 {offsets = [0, 0], sizes = [8, 128], strides = [1, 1]} : vector<8x384xf32> to vector<8x128xf32>
    %82 = vector.extract_strided_slice %80 {offsets = [0, 128], sizes = [8, 128], strides = [1, 1]} : vector<8x384xf32> to vector<8x128xf32>
    %83 = vector.extract_strided_slice %80 {offsets = [0, 256], sizes = [8, 128], strides = [1, 1]} : vector<8x384xf32> to vector<8x128xf32>
    %84 = vector.extract_strided_slice %25 {offsets = [0, 0], sizes = [8, 128], strides = [1, 1]} : vector<8x384xf32> to vector<8x128xf32>
    %85 = vector.extract_strided_slice %25 {offsets = [0, 128], sizes = [8, 128], strides = [1, 1]} : vector<8x384xf32> to vector<8x128xf32>
    %86 = vector.extract_strided_slice %25 {offsets = [0, 256], sizes = [8, 128], strides = [1, 1]} : vector<8x384xf32> to vector<8x128xf32>
    %87 = arith.addf %81, %84 : vector<8x128xf32>
    %88 = arith.negf %87 : vector<8x128xf32>
    %89 = math.exp %88 : vector<8x128xf32>
    %cst_42 = arith.constant 1.000000e+00 : f32
    %90 = vector.broadcast %cst_42 : f32 to vector<8x128xf32>
    %91 = arith.addf %90, %89 : vector<8x128xf32>
    %92 = arith.divf %90, %91 : vector<8x128xf32>
    %93 = arith.addf %82, %85 : vector<8x128xf32>
    %94 = arith.negf %93 : vector<8x128xf32>
    %95 = math.exp %94 : vector<8x128xf32>
    %cst_43 = arith.constant 1.000000e+00 : f32
    %96 = vector.broadcast %cst_43 : f32 to vector<8x128xf32>
    %97 = arith.addf %96, %95 : vector<8x128xf32>
    %98 = arith.divf %96, %97 : vector<8x128xf32>
    %99 = arith.mulf %92, %86 : vector<8x128xf32>
    %100 = arith.addf %83, %99 : vector<8x128xf32>
    %101 = math.tanh %100 : vector<8x128xf32>
    %cst_44 = arith.constant 1.000000e+00 : f32
    %102 = vector.broadcast %cst_44 : f32 to vector<8x128xf32>
    %103 = arith.subf %102, %98 : vector<8x128xf32>
    %104 = arith.mulf %103, %101 : vector<8x128xf32>
    %105 = arith.mulf %98, %8 : vector<8x128xf32>
    %106 = arith.addf %104, %105 : vector<8x128xf32>
    %107 = arith.index_cast %c0_i32_5 : i32 to index
    %c0_45 = arith.constant 0 : index
    %c0_46 = arith.constant 0 : index
    %108 = vector.load %arg15[%107, %c0_45, %c0_46] : memref<8x8x128xf32, #tpu.memory_space<vmem>>, vector<1x8x128xf32>
    %109 = vector.shape_cast %108 : vector<1x8x128xf32> to vector<8x128xf32>
    %110 = vector.shape_cast %106 : vector<8x128xf32> to vector<1x8x128xf32>
    tpu.vector_store %arg15[%107, %c0_45, %c0_46], %110 {strides = array<i32>} : memref<8x8x128xf32, #tpu.memory_space<vmem>>, vector<1x8x128xf32>,
    %c1_i32 = arith.constant 1 : i32
    %111 = arith.index_cast %c1_i32 : i32 to index
    %c0_47 = arith.constant 0 : index
    %c0_48 = arith.constant 0 : index
    %112 = vector.load %arg2[%111, %c0_47, %c0_48] : memref<8x8x128xf32, #tpu.memory_space<vmem>>, vector<1x8x128xf32>
    %113 = vector.shape_cast %112 : vector<1x8x128xf32> to vector<8x128xf32>
    %114 = arith.index_cast %c1_i32 : i32 to index
    %c0_49 = arith.constant 0 : index
    %c0_50 = arith.constant 0 : index
    %115 = vector.load %arg3[%114, %c0_49, %c0_50] : memref<8x8x128xf32, #tpu.memory_space<vmem>>, vector<1x8x128xf32>
    %116 = vector.shape_cast %115 : vector<1x8x128xf32> to vector<8x128xf32>
    %117 = arith.index_cast %c1_i32 : i32 to index
    %c0_51 = arith.constant 0 : index
    %c0_52 = arith.constant 0 : index
    %118 = vector.load %arg4[%117, %c0_51, %c0_52] : memref<8x8x256xf32, #tpu.memory_space<vmem>>, vector<1x8x256xf32>
    %119 = vector.shape_cast %118 : vector<1x8x256xf32> to vector<8x256xf32>
    %120 = arith.truncf %106 : vector<8x128xf32> to vector<8x128xbf16>
    %c0_53 = arith.constant 0 : index
    %c0_54 = arith.constant 0 : index
    %121 = vector.load %arg8[%c0_53, %c0_54] : memref<128x512xbf16, #tpu.memory_space<vmem>>, vector<128x512xbf16>
    %cst_55 = arith.constant dense<0.000000e+00> : vector<8x512xf32>
    %122 = tpu.matmul %120, %121, %cst_55 {dimension_numbers = #tpu.dot_dimension_numbers<[1], [0], [0], [1], [0, 0, 1, 1], [], []>} : vector<8x128xbf16>, vector<128x512xbf16>, vector<8x512xf32> -> vector<8x512xf32>
    %123 = vector.extract_strided_slice %122 {offsets = [0, 0], sizes = [8, 128], strides = [1, 1]} : vector<8x512xf32> to vector<8x128xf32>
    %124 = vector.extract_strided_slice %122 {offsets = [0, 128], sizes = [8, 384], strides = [1, 1]} : vector<8x512xf32> to vector<8x384xf32>
    %c0_56 = arith.constant 0 : index
    %c0_57 = arith.constant 0 : index
    %125 = vector.load %arg14[%c0_56, %c0_57] : memref<1x384xf32, #tpu.memory_space<vmem>>, vector<1x384xf32>
    %126 = vector.broadcast %125 : vector<1x384xf32> to vector<8x384xf32>
    %127 = arith.addf %124, %126 : vector<8x384xf32>
    %128 = arith.addf %116, %123 : vector<8x128xf32>
    %c0_58 = arith.constant 0 : index
    %c0_59 = arith.constant 0 : index
    %c0_60 = arith.constant 0 : index
    %129 = vector.load %arg5[%c0_58, %c0_59, %c0_60] : memref<8x8x128xbf16, #tpu.memory_space<vmem>>, vector<8x8x128xbf16>
    %130 = arith.extf %129 : vector<8x8x128xbf16> to vector<8x8x128xf32>
    %131 = vector.shape_cast %128 : vector<8x128xf32> to vector<8x1x128xf32>
    %132 = vector.broadcast %131 : vector<8x1x128xf32> to vector<8x8x128xf32>
    %133 = arith.addf %130, %132 : vector<8x8x128xf32>
    %134 = math.tanh %133 : vector<8x8x128xf32>
    %c0_61 = arith.constant 0 : index
    %c0_62 = arith.constant 0 : index
    %135 = vector.load %arg9[%c0_61, %c0_62] : memref<1x128xf32, #tpu.memory_space<vmem>>, vector<1x128xf32>
    %136 = vector.shape_cast %135 : vector<1x128xf32> to vector<1x1x128xf32>
    %137 = vector.broadcast %136 : vector<1x1x128xf32> to vector<8x8x128xf32>
    %138 = arith.mulf %134, %137 : vector<8x8x128xf32>
    %cst_63 = arith.constant dense<0.000000e+00> : vector<8x8xf32>
    %139 = vector.multi_reduction <add>, %138, %cst_63 [2] : vector<8x8x128xf32> to vector<8x8xf32>
    %140 = vector.broadcast %cst_4 : f32 to vector<8x8xf32>
    %141 = arith.select %5, %139, %140 : vector<8x8xi1>, vector<8x8xf32>
    %cst_64 = arith.constant dense<0xFF800000> : vector<8xf32>
    %142 = vector.multi_reduction <maximumf>, %141, %cst_64 [1] : vector<8x8xf32> to vector<8xf32>
    %143 = vector.shape_cast %142 : vector<8xf32> to vector<8x1xf32>
    %144 = vector.broadcast %143 : vector<8x1xf32> to vector<8x8xf32>
    %145 = arith.subf %141, %144 : vector<8x8xf32>
    %146 = math.exp %145 : vector<8x8xf32>
    %147 = arith.mulf %146, %7 : vector<8x8xf32>
    %cst_65 = arith.constant dense<0.000000e+00> : vector<8xf32>
    %148 = vector.multi_reduction <add>, %147, %cst_65 [1] : vector<8x8xf32> to vector<8xf32>
    %149 = vector.shape_cast %148 : vector<8xf32> to vector<8x1xf32>
    %cst_66 = arith.constant 1.000000e-30 : f32
    %150 = vector.broadcast %cst_66 : f32 to vector<8x1xf32>
    %151 = arith.addf %149, %150 : vector<8x1xf32>
    %152 = tpu.reciprocal %151 {approx = true} : vector<8x1xf32> -> vector<8x1xf32>
    %153 = vector.broadcast %152 : vector<8x1xf32> to vector<8x8xf32>
    %154 = arith.mulf %147, %153 : vector<8x8xf32>
    %155 = arith.truncf %154 : vector<8x8xf32> to vector<8x8xbf16>
    %156 = vector.shape_cast %155 : vector<8x8xbf16> to vector<8x1x8xbf16>
    %c0_67 = arith.constant 0 : index
    %c0_68 = arith.constant 0 : index
    %c0_69 = arith.constant 0 : index
    %157 = vector.load %arg6[%c0_67, %c0_68, %c0_69] : memref<8x8x128xbf16, #tpu.memory_space<vmem>>, vector<8x8x128xbf16>
    "tpu.trace_start"() <{level = 10 : i32, message = "bxq,bqi->bxi"}> : () -> ()
    %cst_70 = arith.constant dense<0.000000e+00> : vector<8x1x128xf32>
    %158 = tpu.matmul %156, %157, %cst_70 {dimension_numbers = #tpu.dot_dimension_numbers<[2], [1], [1], [2], [0, 0, 0, 1, 1, 2], [0], [0]>} : vector<8x1x8xbf16>, vector<8x8x128xbf16>, vector<8x1x128xf32> -> vector<8x1x128xf32>
    "tpu.trace_stop"() : () -> ()
    %159 = vector.shape_cast %158 : vector<8x1x128xf32> to vector<8x128xf32>
    %160 = arith.truncf %159 : vector<8x128xf32> to vector<8x128xbf16>
    %c0_71 = arith.constant 0 : index
    %c0_72 = arith.constant 0 : index
    %161 = vector.load %arg10[%c0_71, %c0_72] : memref<128x256xbf16, #tpu.memory_space<vmem>>, vector<128x256xbf16>
    %cst_73 = arith.constant dense<0.000000e+00> : vector<8x256xf32>
    %162 = tpu.matmul %160, %161, %cst_73 {dimension_numbers = #tpu.dot_dimension_numbers<[1], [0], [0], [1], [0, 0, 1, 1], [], []>} : vector<8x128xbf16>, vector<128x256xbf16>, vector<8x256xf32> -> vector<8x256xf32>
    %163 = arith.addf %119, %162 : vector<8x256xf32>
    %164 = arith.negf %163 : vector<8x256xf32>
    %165 = math.exp %164 : vector<8x256xf32>
    %cst_74 = arith.constant 1.000000e+00 : f32
    %166 = vector.broadcast %cst_74 : f32 to vector<8x256xf32>
    %167 = arith.addf %166, %165 : vector<8x256xf32>
    %168 = arith.divf %166, %167 : vector<8x256xf32>
    %169 = vector.extract_strided_slice %168 {offsets = [0, 0], sizes = [8, 128], strides = [1, 1]} : vector<8x256xf32> to vector<8x128xf32>
    %170 = arith.mulf %169, %113 : vector<8x128xf32>
    %171 = vector.extract_strided_slice %168 {offsets = [0, 128], sizes = [8, 128], strides = [1, 1]} : vector<8x256xf32> to vector<8x128xf32>
    %172 = arith.mulf %171, %159 : vector<8x128xf32>
    %173 = arith.truncf %170 : vector<8x128xf32> to vector<8x128xbf16>
    %c0_75 = arith.constant 0 : index
    %c0_76 = arith.constant 0 : index
    %174 = vector.load %arg11[%c0_75, %c0_76] : memref<128x384xbf16, #tpu.memory_space<vmem>>, vector<128x384xbf16>
    %cst_77 = arith.constant dense<0.000000e+00> : vector<8x384xf32>
    %175 = tpu.matmul %173, %174, %cst_77 {dimension_numbers = #tpu.dot_dimension_numbers<[1], [0], [0], [1], [0, 0, 1, 1], [], []>} : vector<8x128xbf16>, vector<128x384xbf16>, vector<8x384xf32> -> vector<8x384xf32>
    %176 = arith.truncf %172 : vector<8x128xf32> to vector<8x128xbf16>
    %c0_78 = arith.constant 0 : index
    %c0_79 = arith.constant 0 : index
    %177 = vector.load %arg12[%c0_78, %c0_79] : memref<128x384xbf16, #tpu.memory_space<vmem>>, vector<128x384xbf16>
    %cst_80 = arith.constant dense<0.000000e+00> : vector<8x384xf32>
    %178 = tpu.matmul %176, %177, %cst_80 {dimension_numbers = #tpu.dot_dimension_numbers<[1], [0], [0], [1], [0, 0, 1, 1], [], []>} : vector<8x128xbf16>, vector<128x384xbf16>, vector<8x384xf32> -> vector<8x384xf32>
    %179 = arith.addf %175, %178 : vector<8x384xf32>
    %c0_81 = arith.constant 0 : index
    %c0_82 = arith.constant 0 : index
    %180 = vector.load %arg13[%c0_81, %c0_82] : memref<1x384xf32, #tpu.memory_space<vmem>>, vector<1x384xf32>
    %181 = vector.broadcast %180 : vector<1x384xf32> to vector<8x384xf32>
    %182 = arith.addf %179, %181 : vector<8x384xf32>
    %183 = vector.extract_strided_slice %182 {offsets = [0, 0], sizes = [8, 128], strides = [1, 1]} : vector<8x384xf32> to vector<8x128xf32>
    %184 = vector.extract_strided_slice %182 {offsets = [0, 128], sizes = [8, 128], strides = [1, 1]} : vector<8x384xf32> to vector<8x128xf32>
    %185 = vector.extract_strided_slice %182 {offsets = [0, 256], sizes = [8, 128], strides = [1, 1]} : vector<8x384xf32> to vector<8x128xf32>
    %186 = vector.extract_strided_slice %127 {offsets = [0, 0], sizes = [8, 128], strides = [1, 1]} : vector<8x384xf32> to vector<8x128xf32>
    %187 = vector.extract_strided_slice %127 {offsets = [0, 128], sizes = [8, 128], strides = [1, 1]} : vector<8x384xf32> to vector<8x128xf32>
    %188 = vector.extract_strided_slice %127 {offsets = [0, 256], sizes = [8, 128], strides = [1, 1]} : vector<8x384xf32> to vector<8x128xf32>
    %189 = arith.addf %183, %186 : vector<8x128xf32>
    %190 = arith.negf %189 : vector<8x128xf32>
    %191 = math.exp %190 : vector<8x128xf32>
    %cst_83 = arith.constant 1.000000e+00 : f32
    %192 = vector.broadcast %cst_83 : f32 to vector<8x128xf32>
    %193 = arith.addf %192, %191 : vector<8x128xf32>
    %194 = arith.divf %192, %193 : vector<8x128xf32>
    %195 = arith.addf %184, %187 : vector<8x128xf32>
    %196 = arith.negf %195 : vector<8x128xf32>
    %197 = math.exp %196 : vector<8x128xf32>
    %cst_84 = arith.constant 1.000000e+00 : f32
    %198 = vector.broadcast %cst_84 : f32 to vector<8x128xf32>
    %199 = arith.addf %198, %197 : vector<8x128xf32>
    %200 = arith.divf %198, %199 : vector<8x128xf32>
    %201 = arith.mulf %194, %188 : vector<8x128xf32>
    %202 = arith.addf %185, %201 : vector<8x128xf32>
    %203 = math.tanh %202 : vector<8x128xf32>
    %cst_85 = arith.constant 1.000000e+00 : f32
    %204 = vector.broadcast %cst_85 : f32 to vector<8x128xf32>
    %205 = arith.subf %204, %200 : vector<8x128xf32>
    %206 = arith.mulf %205, %203 : vector<8x128xf32>
    %207 = arith.mulf %200, %106 : vector<8x128xf32>
    %208 = arith.addf %206, %207 : vector<8x128xf32>
    %209 = arith.index_cast %c1_i32 : i32 to index
    %c0_86 = arith.constant 0 : index
    %c0_87 = arith.constant 0 : index
    %210 = vector.load %arg15[%209, %c0_86, %c0_87] : memref<8x8x128xf32, #tpu.memory_space<vmem>>, vector<1x8x128xf32>
    %211 = vector.shape_cast %210 : vector<1x8x128xf32> to vector<8x128xf32>
    %212 = vector.shape_cast %208 : vector<8x128xf32> to vector<1x8x128xf32>
    tpu.vector_store %arg15[%209, %c0_86, %c0_87], %212 {strides = array<i32>} : memref<8x8x128xf32, #tpu.memory_space<vmem>>, vector<1x8x128xf32>,
    %c2_i32 = arith.constant 2 : i32
    %213 = arith.index_cast %c2_i32 : i32 to index
    %c0_88 = arith.constant 0 : index
    %c0_89 = arith.constant 0 : index
    %214 = vector.load %arg2[%213, %c0_88, %c0_89] : memref<8x8x128xf32, #tpu.memory_space<vmem>>, vector<1x8x128xf32>
    %215 = vector.shape_cast %214 : vector<1x8x128xf32> to vector<8x128xf32>
    %216 = arith.index_cast %c2_i32 : i32 to index
    %c0_90 = arith.constant 0 : index
    %c0_91 = arith.constant 0 : index
    %217 = vector.load %arg3[%216, %c0_90, %c0_91] : memref<8x8x128xf32, #tpu.memory_space<vmem>>, vector<1x8x128xf32>
    %218 = vector.shape_cast %217 : vector<1x8x128xf32> to vector<8x128xf32>
    %219 = arith.index_cast %c2_i32 : i32 to index
    %c0_92 = arith.constant 0 : index
    %c0_93 = arith.constant 0 : index
    %220 = vector.load %arg4[%219, %c0_92, %c0_93] : memref<8x8x256xf32, #tpu.memory_space<vmem>>, vector<1x8x256xf32>
    %221 = vector.shape_cast %220 : vector<1x8x256xf32> to vector<8x256xf32>
    %222 = arith.truncf %208 : vector<8x128xf32> to vector<8x128xbf16>
    %c0_94 = arith.constant 0 : index
    %c0_95 = arith.constant 0 : index
    %223 = vector.load %arg8[%c0_94, %c0_95] : memref<128x512xbf16, #tpu.memory_space<vmem>>, vector<128x512xbf16>
    %cst_96 = arith.constant dense<0.000000e+00> : vector<8x512xf32>
    %224 = tpu.matmul %222, %223, %cst_96 {dimension_numbers = #tpu.dot_dimension_numbers<[1], [0], [0], [1], [0, 0, 1, 1], [], []>} : vector<8x128xbf16>, vector<128x512xbf16>, vector<8x512xf32> -> vector<8x512xf32>
    %225 = vector.extract_strided_slice %224 {offsets = [0, 0], sizes = [8, 128], strides = [1, 1]} : vector<8x512xf32> to vector<8x128xf32>
    %226 = vector.extract_strided_slice %224 {offsets = [0, 128], sizes = [8, 384], strides = [1, 1]} : vector<8x512xf32> to vector<8x384xf32>
    %c0_97 = arith.constant 0 : index
    %c0_98 = arith.constant 0 : index
    %227 = vector.load %arg14[%c0_97, %c0_98] : memref<1x384xf32, #tpu.memory_space<vmem>>, vector<1x384xf32>
    %228 = vector.broadcast %227 : vector<1x384xf32> to vector<8x384xf32>
    %229 = arith.addf %226, %228 : vector<8x384xf32>
    %230 = arith.addf %218, %225 : vector<8x128xf32>
    %c0_99 = arith.constant 0 : index
    %c0_100 = arith.constant 0 : index
    %c0_101 = arith.constant 0 : index
    %231 = vector.load %arg5[%c0_99, %c0_100, %c0_101] : memref<8x8x128xbf16, #tpu.memory_space<vmem>>, vector<8x8x128xbf16>
    %232 = arith.extf %231 : vector<8x8x128xbf16> to vector<8x8x128xf32>
    %233 = vector.shape_cast %230 : vector<8x128xf32> to vector<8x1x128xf32>
    %234 = vector.broadcast %233 : vector<8x1x128xf32> to vector<8x8x128xf32>
    %235 = arith.addf %232, %234 : vector<8x8x128xf32>
    %236 = math.tanh %235 : vector<8x8x128xf32>
    %c0_102 = arith.constant 0 : index
    %c0_103 = arith.constant 0 : index
    %237 = vector.load %arg9[%c0_102, %c0_103] : memref<1x128xf32, #tpu.memory_space<vmem>>, vector<1x128xf32>
    %238 = vector.shape_cast %237 : vector<1x128xf32> to vector<1x1x128xf32>
    %239 = vector.broadcast %238 : vector<1x1x128xf32> to vector<8x8x128xf32>
    %240 = arith.mulf %236, %239 : vector<8x8x128xf32>
    %cst_104 = arith.constant dense<0.000000e+00> : vector<8x8xf32>
    %241 = vector.multi_reduction <add>, %240, %cst_104 [2] : vector<8x8x128xf32> to vector<8x8xf32>
    %242 = vector.broadcast %cst_4 : f32 to vector<8x8xf32>
    %243 = arith.select %5, %241, %242 : vector<8x8xi1>, vector<8x8xf32>
    %cst_105 = arith.constant dense<0xFF800000> : vector<8xf32>
    %244 = vector.multi_reduction <maximumf>, %243, %cst_105 [1] : vector<8x8xf32> to vector<8xf32>
    %245 = vector.shape_cast %244 : vector<8xf32> to vector<8x1xf32>
    %246 = vector.broadcast %245 : vector<8x1xf32> to vector<8x8xf32>
    %247 = arith.subf %243, %246 : vector<8x8xf32>
    %248 = math.exp %247 : vector<8x8xf32>
    %249 = arith.mulf %248, %7 : vector<8x8xf32>
    %cst_106 = arith.constant dense<0.000000e+00> : vector<8xf32>
    %250 = vector.multi_reduction <add>, %249, %cst_106 [1] : vector<8x8xf32> to vector<8xf32>
    %251 = vector.shape_cast %250 : vector<8xf32> to vector<8x1xf32>
    %cst_107 = arith.constant 1.000000e-30 : f32
    %252 = vector.broadcast %cst_107 : f32 to vector<8x1xf32>
    %253 = arith.addf %251, %252 : vector<8x1xf32>
    %254 = tpu.reciprocal %253 {approx = true} : vector<8x1xf32> -> vector<8x1xf32>
    %255 = vector.broadcast %254 : vector<8x1xf32> to vector<8x8xf32>
    %256 = arith.mulf %249, %255 : vector<8x8xf32>
    %257 = arith.truncf %256 : vector<8x8xf32> to vector<8x8xbf16>
    %258 = vector.shape_cast %257 : vector<8x8xbf16> to vector<8x1x8xbf16>
    %c0_108 = arith.constant 0 : index
    %c0_109 = arith.constant 0 : index
    %c0_110 = arith.constant 0 : index
    %259 = vector.load %arg6[%c0_108, %c0_109, %c0_110] : memref<8x8x128xbf16, #tpu.memory_space<vmem>>, vector<8x8x128xbf16>
    "tpu.trace_start"() <{level = 10 : i32, message = "bxq,bqi->bxi"}> : () -> ()
    %cst_111 = arith.constant dense<0.000000e+00> : vector<8x1x128xf32>
    %260 = tpu.matmul %258, %259, %cst_111 {dimension_numbers = #tpu.dot_dimension_numbers<[2], [1], [1], [2], [0, 0, 0, 1, 1, 2], [0], [0]>} : vector<8x1x8xbf16>, vector<8x8x128xbf16>, vector<8x1x128xf32> -> vector<8x1x128xf32>
    "tpu.trace_stop"() : () -> ()
    %261 = vector.shape_cast %260 : vector<8x1x128xf32> to vector<8x128xf32>
    %262 = arith.truncf %261 : vector<8x128xf32> to vector<8x128xbf16>
    %c0_112 = arith.constant 0 : index
    %c0_113 = arith.constant 0 : index
    %263 = vector.load %arg10[%c0_112, %c0_113] : memref<128x256xbf16, #tpu.memory_space<vmem>>, vector<128x256xbf16>
    %cst_114 = arith.constant dense<0.000000e+00> : vector<8x256xf32>
    %264 = tpu.matmul %262, %263, %cst_114 {dimension_numbers = #tpu.dot_dimension_numbers<[1], [0], [0], [1], [0, 0, 1, 1], [], []>} : vector<8x128xbf16>, vector<128x256xbf16>, vector<8x256xf32> -> vector<8x256xf32>
    %265 = arith.addf %221, %264 : vector<8x256xf32>
    %266 = arith.negf %265 : vector<8x256xf32>
    %267 = math.exp %266 : vector<8x256xf32>
    %cst_115 = arith.constant 1.000000e+00 : f32
    %268 = vector.broadcast %cst_115 : f32 to vector<8x256xf32>
    %269 = arith.addf %268, %267 : vector<8x256xf32>
    %270 = arith.divf %268, %269 : vector<8x256xf32>
    %271 = vector.extract_strided_slice %270 {offsets = [0, 0], sizes = [8, 128], strides = [1, 1]} : vector<8x256xf32> to vector<8x128xf32>
    %272 = arith.mulf %271, %215 : vector<8x128xf32>
    %273 = vector.extract_strided_slice %270 {offsets = [0, 128], sizes = [8, 128], strides = [1, 1]} : vector<8x256xf32> to vector<8x128xf32>
    %274 = arith.mulf %273, %261 : vector<8x128xf32>
    %275 = arith.truncf %272 : vector<8x128xf32> to vector<8x128xbf16>
    %c0_116 = arith.constant 0 : index
    %c0_117 = arith.constant 0 : index
    %276 = vector.load %arg11[%c0_116, %c0_117] : memref<128x384xbf16, #tpu.memory_space<vmem>>, vector<128x384xbf16>
    %cst_118 = arith.constant dense<0.000000e+00> : vector<8x384xf32>
    %277 = tpu.matmul %275, %276, %cst_118 {dimension_numbers = #tpu.dot_dimension_numbers<[1], [0], [0], [1], [0, 0, 1, 1], [], []>} : vector<8x128xbf16>, vector<128x384xbf16>, vector<8x384xf32> -> vector<8x384xf32>
    %278 = arith.truncf %274 : vector<8x128xf32> to vector<8x128xbf16>
    %c0_119 = arith.constant 0 : index
    %c0_120 = arith.constant 0 : index
    %279 = vector.load %arg12[%c0_119, %c0_120] : memref<128x384xbf16, #tpu.memory_space<vmem>>, vector<128x384xbf16>
    %cst_121 = arith.constant dense<0.000000e+00> : vector<8x384xf32>
    %280 = tpu.matmul %278, %279, %cst_121 {dimension_numbers = #tpu.dot_dimension_numbers<[1], [0], [0], [1], [0, 0, 1, 1], [], []>} : vector<8x128xbf16>, vector<128x384xbf16>, vector<8x384xf32> -> vector<8x384xf32>
    %281 = arith.addf %277, %280 : vector<8x384xf32>
    %c0_122 = arith.constant 0 : index
    %c0_123 = arith.constant 0 : index
    %282 = vector.load %arg13[%c0_122, %c0_123] : memref<1x384xf32, #tpu.memory_space<vmem>>, vector<1x384xf32>
    %283 = vector.broadcast %282 : vector<1x384xf32> to vector<8x384xf32>
    %284 = arith.addf %281, %283 : vector<8x384xf32>
    %285 = vector.extract_strided_slice %284 {offsets = [0, 0], sizes = [8, 128], strides = [1, 1]} : vector<8x384xf32> to vector<8x128xf32>
    %286 = vector.extract_strided_slice %284 {offsets = [0, 128], sizes = [8, 128], strides = [1, 1]} : vector<8x384xf32> to vector<8x128xf32>
    %287 = vector.extract_strided_slice %284 {offsets = [0, 256], sizes = [8, 128], strides = [1, 1]} : vector<8x384xf32> to vector<8x128xf32>
    %288 = vector.extract_strided_slice %229 {offsets = [0, 0], sizes = [8, 128], strides = [1, 1]} : vector<8x384xf32> to vector<8x128xf32>
    %289 = vector.extract_strided_slice %229 {offsets = [0, 128], sizes = [8, 128], strides = [1, 1]} : vector<8x384xf32> to vector<8x128xf32>
    %290 = vector.extract_strided_slice %229 {offsets = [0, 256], sizes = [8, 128], strides = [1, 1]} : vector<8x384xf32> to vector<8x128xf32>
    %291 = arith.addf %285, %288 : vector<8x128xf32>
    %292 = arith.negf %291 : vector<8x128xf32>
    %293 = math.exp %292 : vector<8x128xf32>
    %cst_124 = arith.constant 1.000000e+00 : f32
    %294 = vector.broadcast %cst_124 : f32 to vector<8x128xf32>
    %295 = arith.addf %294, %293 : vector<8x128xf32>
    %296 = arith.divf %294, %295 : vector<8x128xf32>
    %297 = arith.addf %286, %289 : vector<8x128xf32>
    %298 = arith.negf %297 : vector<8x128xf32>
    %299 = math.exp %298 : vector<8x128xf32>
    %cst_125 = arith.constant 1.000000e+00 : f32
    %300 = vector.broadcast %cst_125 : f32 to vector<8x128xf32>
    %301 = arith.addf %300, %299 : vector<8x128xf32>
    %302 = arith.divf %300, %301 : vector<8x128xf32>
    %303 = arith.mulf %296, %290 : vector<8x128xf32>
    %304 = arith.addf %287, %303 : vector<8x128xf32>
    %305 = math.tanh %304 : vector<8x128xf32>
    %cst_126 = arith.constant 1.000000e+00 : f32
    %306 = vector.broadcast %cst_126 : f32 to vector<8x128xf32>
    %307 = arith.subf %306, %302 : vector<8x128xf32>
    %308 = arith.mulf %307, %305 : vector<8x128xf32>
    %309 = arith.mulf %302, %208 : vector<8x128xf32>
    %310 = arith.addf %308, %309 : vector<8x128xf32>
    %311 = arith.index_cast %c2_i32 : i32 to index
    %c0_127 = arith.constant 0 : index
    %c0_128 = arith.constant 0 : index
    %312 = vector.load %arg15[%311, %c0_127, %c0_128] : memref<8x8x128xf32, #tpu.memory_space<vmem>>, vector<1x8x128xf32>
    %313 = vector.shape_cast %312 : vector<1x8x128xf32> to vector<8x128xf32>
    %314 = vector.shape_cast %310 : vector<8x128xf32> to vector<1x8x128xf32>
    tpu.vector_store %arg15[%311, %c0_127, %c0_128], %314 {strides = array<i32>} : memref<8x8x128xf32, #tpu.memory_space<vmem>>, vector<1x8x128xf32>,
    %c3_i32 = arith.constant 3 : i32
    %315 = arith.index_cast %c3_i32 : i32 to index
    %c0_129 = arith.constant 0 : index
    %c0_130 = arith.constant 0 : index
    %316 = vector.load %arg2[%315, %c0_129, %c0_130] : memref<8x8x128xf32, #tpu.memory_space<vmem>>, vector<1x8x128xf32>
    %317 = vector.shape_cast %316 : vector<1x8x128xf32> to vector<8x128xf32>
    %318 = arith.index_cast %c3_i32 : i32 to index
    %c0_131 = arith.constant 0 : index
    %c0_132 = arith.constant 0 : index
    %319 = vector.load %arg3[%318, %c0_131, %c0_132] : memref<8x8x128xf32, #tpu.memory_space<vmem>>, vector<1x8x128xf32>
    %320 = vector.shape_cast %319 : vector<1x8x128xf32> to vector<8x128xf32>
    %321 = arith.index_cast %c3_i32 : i32 to index
    %c0_133 = arith.constant 0 : index
    %c0_134 = arith.constant 0 : index
    %322 = vector.load %arg4[%321, %c0_133, %c0_134] : memref<8x8x256xf32, #tpu.memory_space<vmem>>, vector<1x8x256xf32>
    %323 = vector.shape_cast %322 : vector<1x8x256xf32> to vector<8x256xf32>
    %324 = arith.truncf %310 : vector<8x128xf32> to vector<8x128xbf16>
    %c0_135 = arith.constant 0 : index
    %c0_136 = arith.constant 0 : index
    %325 = vector.load %arg8[%c0_135, %c0_136] : memref<128x512xbf16, #tpu.memory_space<vmem>>, vector<128x512xbf16>
    %cst_137 = arith.constant dense<0.000000e+00> : vector<8x512xf32>
    %326 = tpu.matmul %324, %325, %cst_137 {dimension_numbers = #tpu.dot_dimension_numbers<[1], [0], [0], [1], [0, 0, 1, 1], [], []>} : vector<8x128xbf16>, vector<128x512xbf16>, vector<8x512xf32> -> vector<8x512xf32>
    %327 = vector.extract_strided_slice %326 {offsets = [0, 0], sizes = [8, 128], strides = [1, 1]} : vector<8x512xf32> to vector<8x128xf32>
    %328 = vector.extract_strided_slice %326 {offsets = [0, 128], sizes = [8, 384], strides = [1, 1]} : vector<8x512xf32> to vector<8x384xf32>
    %c0_138 = arith.constant 0 : index
    %c0_139 = arith.constant 0 : index
    %329 = vector.load %arg14[%c0_138, %c0_139] : memref<1x384xf32, #tpu.memory_space<vmem>>, vector<1x384xf32>
    %330 = vector.broadcast %329 : vector<1x384xf32> to vector<8x384xf32>
    %331 = arith.addf %328, %330 : vector<8x384xf32>
    %332 = arith.addf %320, %327 : vector<8x128xf32>
    %c0_140 = arith.constant 0 : index
    %c0_141 = arith.constant 0 : index
    %c0_142 = arith.constant 0 : index
    %333 = vector.load %arg5[%c0_140, %c0_141, %c0_142] : memref<8x8x128xbf16, #tpu.memory_space<vmem>>, vector<8x8x128xbf16>
    %334 = arith.extf %333 : vector<8x8x128xbf16> to vector<8x8x128xf32>
    %335 = vector.shape_cast %332 : vector<8x128xf32> to vector<8x1x128xf32>
    %336 = vector.broadcast %335 : vector<8x1x128xf32> to vector<8x8x128xf32>
    %337 = arith.addf %334, %336 : vector<8x8x128xf32>
    %338 = math.tanh %337 : vector<8x8x128xf32>
    %c0_143 = arith.constant 0 : index
    %c0_144 = arith.constant 0 : index
    %339 = vector.load %arg9[%c0_143, %c0_144] : memref<1x128xf32, #tpu.memory_space<vmem>>, vector<1x128xf32>
    %340 = vector.shape_cast %339 : vector<1x128xf32> to vector<1x1x128xf32>
    %341 = vector.broadcast %340 : vector<1x1x128xf32> to vector<8x8x128xf32>
    %342 = arith.mulf %338, %341 : vector<8x8x128xf32>
    %cst_145 = arith.constant dense<0.000000e+00> : vector<8x8xf32>
    %343 = vector.multi_reduction <add>, %342, %cst_145 [2] : vector<8x8x128xf32> to vector<8x8xf32>
    %344 = vector.broadcast %cst_4 : f32 to vector<8x8xf32>
    %345 = arith.select %5, %343, %344 : vector<8x8xi1>, vector<8x8xf32>
    %cst_146 = arith.constant dense<0xFF800000> : vector<8xf32>
    %346 = vector.multi_reduction <maximumf>, %345, %cst_146 [1] : vector<8x8xf32> to vector<8xf32>
    %347 = vector.shape_cast %346 : vector<8xf32> to vector<8x1xf32>
    %348 = vector.broadcast %347 : vector<8x1xf32> to vector<8x8xf32>
    %349 = arith.subf %345, %348 : vector<8x8xf32>
    %350 = math.exp %349 : vector<8x8xf32>
    %351 = arith.mulf %350, %7 : vector<8x8xf32>
    %cst_147 = arith.constant dense<0.000000e+00> : vector<8xf32>
    %352 = vector.multi_reduction <add>, %351, %cst_147 [1] : vector<8x8xf32> to vector<8xf32>
    %353 = vector.shape_cast %352 : vector<8xf32> to vector<8x1xf32>
    %cst_148 = arith.constant 1.000000e-30 : f32
    %354 = vector.broadcast %cst_148 : f32 to vector<8x1xf32>
    %355 = arith.addf %353, %354 : vector<8x1xf32>
    %356 = tpu.reciprocal %355 {approx = true} : vector<8x1xf32> -> vector<8x1xf32>
    %357 = vector.broadcast %356 : vector<8x1xf32> to vector<8x8xf32>
    %358 = arith.mulf %351, %357 : vector<8x8xf32>
    %359 = arith.truncf %358 : vector<8x8xf32> to vector<8x8xbf16>
    %360 = vector.shape_cast %359 : vector<8x8xbf16> to vector<8x1x8xbf16>
    %c0_149 = arith.constant 0 : index
    %c0_150 = arith.constant 0 : index
    %c0_151 = arith.constant 0 : index
    %361 = vector.load %arg6[%c0_149, %c0_150, %c0_151] : memref<8x8x128xbf16, #tpu.memory_space<vmem>>, vector<8x8x128xbf16>
    "tpu.trace_start"() <{level = 10 : i32, message = "bxq,bqi->bxi"}> : () -> ()
    %cst_152 = arith.constant dense<0.000000e+00> : vector<8x1x128xf32>
    %362 = tpu.matmul %360, %361, %cst_152 {dimension_numbers = #tpu.dot_dimension_numbers<[2], [1], [1], [2], [0, 0, 0, 1, 1, 2], [0], [0]>} : vector<8x1x8xbf16>, vector<8x8x128xbf16>, vector<8x1x128xf32> -> vector<8x1x128xf32>
    "tpu.trace_stop"() : () -> ()
    %363 = vector.shape_cast %362 : vector<8x1x128xf32> to vector<8x128xf32>
    %364 = arith.truncf %363 : vector<8x128xf32> to vector<8x128xbf16>
    %c0_153 = arith.constant 0 : index
    %c0_154 = arith.constant 0 : index
    %365 = vector.load %arg10[%c0_153, %c0_154] : memref<128x256xbf16, #tpu.memory_space<vmem>>, vector<128x256xbf16>
    %cst_155 = arith.constant dense<0.000000e+00> : vector<8x256xf32>
    %366 = tpu.matmul %364, %365, %cst_155 {dimension_numbers = #tpu.dot_dimension_numbers<[1], [0], [0], [1], [0, 0, 1, 1], [], []>} : vector<8x128xbf16>, vector<128x256xbf16>, vector<8x256xf32> -> vector<8x256xf32>
    %367 = arith.addf %323, %366 : vector<8x256xf32>
    %368 = arith.negf %367 : vector<8x256xf32>
    %369 = math.exp %368 : vector<8x256xf32>
    %cst_156 = arith.constant 1.000000e+00 : f32
    %370 = vector.broadcast %cst_156 : f32 to vector<8x256xf32>
    %371 = arith.addf %370, %369 : vector<8x256xf32>
    %372 = arith.divf %370, %371 : vector<8x256xf32>
    %373 = vector.extract_strided_slice %372 {offsets = [0, 0], sizes = [8, 128], strides = [1, 1]} : vector<8x256xf32> to vector<8x128xf32>
    %374 = arith.mulf %373, %317 : vector<8x128xf32>
    %375 = vector.extract_strided_slice %372 {offsets = [0, 128], sizes = [8, 128], strides = [1, 1]} : vector<8x256xf32> to vector<8x128xf32>
    %376 = arith.mulf %375, %363 : vector<8x128xf32>
    %377 = arith.truncf %374 : vector<8x128xf32> to vector<8x128xbf16>
    %c0_157 = arith.constant 0 : index
    %c0_158 = arith.constant 0 : index
    %378 = vector.load %arg11[%c0_157, %c0_158] : memref<128x384xbf16, #tpu.memory_space<vmem>>, vector<128x384xbf16>
    %cst_159 = arith.constant dense<0.000000e+00> : vector<8x384xf32>
    %379 = tpu.matmul %377, %378, %cst_159 {dimension_numbers = #tpu.dot_dimension_numbers<[1], [0], [0], [1], [0, 0, 1, 1], [], []>} : vector<8x128xbf16>, vector<128x384xbf16>, vector<8x384xf32> -> vector<8x384xf32>
    %380 = arith.truncf %376 : vector<8x128xf32> to vector<8x128xbf16>
    %c0_160 = arith.constant 0 : index
    %c0_161 = arith.constant 0 : index
    %381 = vector.load %arg12[%c0_160, %c0_161] : memref<128x384xbf16, #tpu.memory_space<vmem>>, vector<128x384xbf16>
    %cst_162 = arith.constant dense<0.000000e+00> : vector<8x384xf32>
    %382 = tpu.matmul %380, %381, %cst_162 {dimension_numbers = #tpu.dot_dimension_numbers<[1], [0], [0], [1], [0, 0, 1, 1], [], []>} : vector<8x128xbf16>, vector<128x384xbf16>, vector<8x384xf32> -> vector<8x384xf32>
    %383 = arith.addf %379, %382 : vector<8x384xf32>
    %c0_163 = arith.constant 0 : index
    %c0_164 = arith.constant 0 : index
    %384 = vector.load %arg13[%c0_163, %c0_164] : memref<1x384xf32, #tpu.memory_space<vmem>>, vector<1x384xf32>
    %385 = vector.broadcast %384 : vector<1x384xf32> to vector<8x384xf32>
    %386 = arith.addf %383, %385 : vector<8x384xf32>
    %387 = vector.extract_strided_slice %386 {offsets = [0, 0], sizes = [8, 128], strides = [1, 1]} : vector<8x384xf32> to vector<8x128xf32>
    %388 = vector.extract_strided_slice %386 {offsets = [0, 128], sizes = [8, 128], strides = [1, 1]} : vector<8x384xf32> to vector<8x128xf32>
    %389 = vector.extract_strided_slice %386 {offsets = [0, 256], sizes = [8, 128], strides = [1, 1]} : vector<8x384xf32> to vector<8x128xf32>
    %390 = vector.extract_strided_slice %331 {offsets = [0, 0], sizes = [8, 128], strides = [1, 1]} : vector<8x384xf32> to vector<8x128xf32>
    %391 = vector.extract_strided_slice %331 {offsets = [0, 128], sizes = [8, 128], strides = [1, 1]} : vector<8x384xf32> to vector<8x128xf32>
    %392 = vector.extract_strided_slice %331 {offsets = [0, 256], sizes = [8, 128], strides = [1, 1]} : vector<8x384xf32> to vector<8x128xf32>
    %393 = arith.addf %387, %390 : vector<8x128xf32>
    %394 = arith.negf %393 : vector<8x128xf32>
    %395 = math.exp %394 : vector<8x128xf32>
    %cst_165 = arith.constant 1.000000e+00 : f32
    %396 = vector.broadcast %cst_165 : f32 to vector<8x128xf32>
    %397 = arith.addf %396, %395 : vector<8x128xf32>
    %398 = arith.divf %396, %397 : vector<8x128xf32>
    %399 = arith.addf %388, %391 : vector<8x128xf32>
    %400 = arith.negf %399 : vector<8x128xf32>
    %401 = math.exp %400 : vector<8x128xf32>
    %cst_166 = arith.constant 1.000000e+00 : f32
    %402 = vector.broadcast %cst_166 : f32 to vector<8x128xf32>
    %403 = arith.addf %402, %401 : vector<8x128xf32>
    %404 = arith.divf %402, %403 : vector<8x128xf32>
    %405 = arith.mulf %398, %392 : vector<8x128xf32>
    %406 = arith.addf %389, %405 : vector<8x128xf32>
    %407 = math.tanh %406 : vector<8x128xf32>
    %cst_167 = arith.constant 1.000000e+00 : f32
    %408 = vector.broadcast %cst_167 : f32 to vector<8x128xf32>
    %409 = arith.subf %408, %404 : vector<8x128xf32>
    %410 = arith.mulf %409, %407 : vector<8x128xf32>
    %411 = arith.mulf %404, %310 : vector<8x128xf32>
    %412 = arith.addf %410, %411 : vector<8x128xf32>
    %413 = arith.index_cast %c3_i32 : i32 to index
    %c0_168 = arith.constant 0 : index
    %c0_169 = arith.constant 0 : index
    %414 = vector.load %arg15[%413, %c0_168, %c0_169] : memref<8x8x128xf32, #tpu.memory_space<vmem>>, vector<1x8x128xf32>
    %415 = vector.shape_cast %414 : vector<1x8x128xf32> to vector<8x128xf32>
    %416 = vector.shape_cast %412 : vector<8x128xf32> to vector<1x8x128xf32>
    tpu.vector_store %arg15[%413, %c0_168, %c0_169], %416 {strides = array<i32>} : memref<8x8x128xf32, #tpu.memory_space<vmem>>, vector<1x8x128xf32>,
    %c4_i32 = arith.constant 4 : i32
    %417 = arith.index_cast %c4_i32 : i32 to index
    %c0_170 = arith.constant 0 : index
    %c0_171 = arith.constant 0 : index
    %418 = vector.load %arg2[%417, %c0_170, %c0_171] : memref<8x8x128xf32, #tpu.memory_space<vmem>>, vector<1x8x128xf32>
    %419 = vector.shape_cast %418 : vector<1x8x128xf32> to vector<8x128xf32>
    %420 = arith.index_cast %c4_i32 : i32 to index
    %c0_172 = arith.constant 0 : index
    %c0_173 = arith.constant 0 : index
    %421 = vector.load %arg3[%420, %c0_172, %c0_173] : memref<8x8x128xf32, #tpu.memory_space<vmem>>, vector<1x8x128xf32>
    %422 = vector.shape_cast %421 : vector<1x8x128xf32> to vector<8x128xf32>
    %423 = arith.index_cast %c4_i32 : i32 to index
    %c0_174 = arith.constant 0 : index
    %c0_175 = arith.constant 0 : index
    %424 = vector.load %arg4[%423, %c0_174, %c0_175] : memref<8x8x256xf32, #tpu.memory_space<vmem>>, vector<1x8x256xf32>
    %425 = vector.shape_cast %424 : vector<1x8x256xf32> to vector<8x256xf32>
    %426 = arith.truncf %412 : vector<8x128xf32> to vector<8x128xbf16>
    %c0_176 = arith.constant 0 : index
    %c0_177 = arith.constant 0 : index
    %427 = vector.load %arg8[%c0_176, %c0_177] : memref<128x512xbf16, #tpu.memory_space<vmem>>, vector<128x512xbf16>
    %cst_178 = arith.constant dense<0.000000e+00> : vector<8x512xf32>
    %428 = tpu.matmul %426, %427, %cst_178 {dimension_numbers = #tpu.dot_dimension_numbers<[1], [0], [0], [1], [0, 0, 1, 1], [], []>} : vector<8x128xbf16>, vector<128x512xbf16>, vector<8x512xf32> -> vector<8x512xf32>
    %429 = vector.extract_strided_slice %428 {offsets = [0, 0], sizes = [8, 128], strides = [1, 1]} : vector<8x512xf32> to vector<8x128xf32>
    %430 = vector.extract_strided_slice %428 {offsets = [0, 128], sizes = [8, 384], strides = [1, 1]} : vector<8x512xf32> to vector<8x384xf32>
    %c0_179 = arith.constant 0 : index
    %c0_180 = arith.constant 0 : index
    %431 = vector.load %arg14[%c0_179, %c0_180] : memref<1x384xf32, #tpu.memory_space<vmem>>, vector<1x384xf32>
    %432 = vector.broadcast %431 : vector<1x384xf32> to vector<8x384xf32>
    %433 = arith.addf %430, %432 : vector<8x384xf32>
    %434 = arith.addf %422, %429 : vector<8x128xf32>
    %c0_181 = arith.constant 0 : index
    %c0_182 = arith.constant 0 : index
    %c0_183 = arith.constant 0 : index
    %435 = vector.load %arg5[%c0_181, %c0_182, %c0_183] : memref<8x8x128xbf16, #tpu.memory_space<vmem>>, vector<8x8x128xbf16>
    %436 = arith.extf %435 : vector<8x8x128xbf16> to vector<8x8x128xf32>
    %437 = vector.shape_cast %434 : vector<8x128xf32> to vector<8x1x128xf32>
    %438 = vector.broadcast %437 : vector<8x1x128xf32> to vector<8x8x128xf32>
    %439 = arith.addf %436, %438 : vector<8x8x128xf32>
    %440 = math.tanh %439 : vector<8x8x128xf32>
    %c0_184 = arith.constant 0 : index
    %c0_185 = arith.constant 0 : index
    %441 = vector.load %arg9[%c0_184, %c0_185] : memref<1x128xf32, #tpu.memory_space<vmem>>, vector<1x128xf32>
    %442 = vector.shape_cast %441 : vector<1x128xf32> to vector<1x1x128xf32>
    %443 = vector.broadcast %442 : vector<1x1x128xf32> to vector<8x8x128xf32>
    %444 = arith.mulf %440, %443 : vector<8x8x128xf32>
    %cst_186 = arith.constant dense<0.000000e+00> : vector<8x8xf32>
    %445 = vector.multi_reduction <add>, %444, %cst_186 [2] : vector<8x8x128xf32> to vector<8x8xf32>
    %446 = vector.broadcast %cst_4 : f32 to vector<8x8xf32>
    %447 = arith.select %5, %445, %446 : vector<8x8xi1>, vector<8x8xf32>
    %cst_187 = arith.constant dense<0xFF800000> : vector<8xf32>
    %448 = vector.multi_reduction <maximumf>, %447, %cst_187 [1] : vector<8x8xf32> to vector<8xf32>
    %449 = vector.shape_cast %448 : vector<8xf32> to vector<8x1xf32>
    %450 = vector.broadcast %449 : vector<8x1xf32> to vector<8x8xf32>
    %451 = arith.subf %447, %450 : vector<8x8xf32>
    %452 = math.exp %451 : vector<8x8xf32>
    %453 = arith.mulf %452, %7 : vector<8x8xf32>
    %cst_188 = arith.constant dense<0.000000e+00> : vector<8xf32>
    %454 = vector.multi_reduction <add>, %453, %cst_188 [1] : vector<8x8xf32> to vector<8xf32>
    %455 = vector.shape_cast %454 : vector<8xf32> to vector<8x1xf32>
    %cst_189 = arith.constant 1.000000e-30 : f32
    %456 = vector.broadcast %cst_189 : f32 to vector<8x1xf32>
    %457 = arith.addf %455, %456 : vector<8x1xf32>
    %458 = tpu.reciprocal %457 {approx = true} : vector<8x1xf32> -> vector<8x1xf32>
    %459 = vector.broadcast %458 : vector<8x1xf32> to vector<8x8xf32>
    %460 = arith.mulf %453, %459 : vector<8x8xf32>
    %461 = arith.truncf %460 : vector<8x8xf32> to vector<8x8xbf16>
    %462 = vector.shape_cast %461 : vector<8x8xbf16> to vector<8x1x8xbf16>
    %c0_190 = arith.constant 0 : index
    %c0_191 = arith.constant 0 : index
    %c0_192 = arith.constant 0 : index
    %463 = vector.load %arg6[%c0_190, %c0_191, %c0_192] : memref<8x8x128xbf16, #tpu.memory_space<vmem>>, vector<8x8x128xbf16>
    "tpu.trace_start"() <{level = 10 : i32, message = "bxq,bqi->bxi"}> : () -> ()
    %cst_193 = arith.constant dense<0.000000e+00> : vector<8x1x128xf32>
    %464 = tpu.matmul %462, %463, %cst_193 {dimension_numbers = #tpu.dot_dimension_numbers<[2], [1], [1], [2], [0, 0, 0, 1, 1, 2], [0], [0]>} : vector<8x1x8xbf16>, vector<8x8x128xbf16>, vector<8x1x128xf32> -> vector<8x1x128xf32>
    "tpu.trace_stop"() : () -> ()
    %465 = vector.shape_cast %464 : vector<8x1x128xf32> to vector<8x128xf32>
    %466 = arith.truncf %465 : vector<8x128xf32> to vector<8x128xbf16>
    %c0_194 = arith.constant 0 : index
    %c0_195 = arith.constant 0 : index
    %467 = vector.load %arg10[%c0_194, %c0_195] : memref<128x256xbf16, #tpu.memory_space<vmem>>, vector<128x256xbf16>
    %cst_196 = arith.constant dense<0.000000e+00> : vector<8x256xf32>
    %468 = tpu.matmul %466, %467, %cst_196 {dimension_numbers = #tpu.dot_dimension_numbers<[1], [0], [0], [1], [0, 0, 1, 1], [], []>} : vector<8x128xbf16>, vector<128x256xbf16>, vector<8x256xf32> -> vector<8x256xf32>
    %469 = arith.addf %425, %468 : vector<8x256xf32>
    %470 = arith.negf %469 : vector<8x256xf32>
    %471 = math.exp %470 : vector<8x256xf32>
    %cst_197 = arith.constant 1.000000e+00 : f32
    %472 = vector.broadcast %cst_197 : f32 to vector<8x256xf32>
    %473 = arith.addf %472, %471 : vector<8x256xf32>
    %474 = arith.divf %472, %473 : vector<8x256xf32>
    %475 = vector.extract_strided_slice %474 {offsets = [0, 0], sizes = [8, 128], strides = [1, 1]} : vector<8x256xf32> to vector<8x128xf32>
    %476 = arith.mulf %475, %419 : vector<8x128xf32>
    %477 = vector.extract_strided_slice %474 {offsets = [0, 128], sizes = [8, 128], strides = [1, 1]} : vector<8x256xf32> to vector<8x128xf32>
    %478 = arith.mulf %477, %465 : vector<8x128xf32>
    %479 = arith.truncf %476 : vector<8x128xf32> to vector<8x128xbf16>
    %c0_198 = arith.constant 0 : index
    %c0_199 = arith.constant 0 : index
    %480 = vector.load %arg11[%c0_198, %c0_199] : memref<128x384xbf16, #tpu.memory_space<vmem>>, vector<128x384xbf16>
    %cst_200 = arith.constant dense<0.000000e+00> : vector<8x384xf32>
    %481 = tpu.matmul %479, %480, %cst_200 {dimension_numbers = #tpu.dot_dimension_numbers<[1], [0], [0], [1], [0, 0, 1, 1], [], []>} : vector<8x128xbf16>, vector<128x384xbf16>, vector<8x384xf32> -> vector<8x384xf32>
    %482 = arith.truncf %478 : vector<8x128xf32> to vector<8x128xbf16>
    %c0_201 = arith.constant 0 : index
    %c0_202 = arith.constant 0 : index
    %483 = vector.load %arg12[%c0_201, %c0_202] : memref<128x384xbf16, #tpu.memory_space<vmem>>, vector<128x384xbf16>
    %cst_203 = arith.constant dense<0.000000e+00> : vector<8x384xf32>
    %484 = tpu.matmul %482, %483, %cst_203 {dimension_numbers = #tpu.dot_dimension_numbers<[1], [0], [0], [1], [0, 0, 1, 1], [], []>} : vector<8x128xbf16>, vector<128x384xbf16>, vector<8x384xf32> -> vector<8x384xf32>
    %485 = arith.addf %481, %484 : vector<8x384xf32>
    %c0_204 = arith.constant 0 : index
    %c0_205 = arith.constant 0 : index
    %486 = vector.load %arg13[%c0_204, %c0_205] : memref<1x384xf32, #tpu.memory_space<vmem>>, vector<1x384xf32>
    %487 = vector.broadcast %486 : vector<1x384xf32> to vector<8x384xf32>
    %488 = arith.addf %485, %487 : vector<8x384xf32>
    %489 = vector.extract_strided_slice %488 {offsets = [0, 0], sizes = [8, 128], strides = [1, 1]} : vector<8x384xf32> to vector<8x128xf32>
    %490 = vector.extract_strided_slice %488 {offsets = [0, 128], sizes = [8, 128], strides = [1, 1]} : vector<8x384xf32> to vector<8x128xf32>
    %491 = vector.extract_strided_slice %488 {offsets = [0, 256], sizes = [8, 128], strides = [1, 1]} : vector<8x384xf32> to vector<8x128xf32>
    %492 = vector.extract_strided_slice %433 {offsets = [0, 0], sizes = [8, 128], strides = [1, 1]} : vector<8x384xf32> to vector<8x128xf32>
    %493 = vector.extract_strided_slice %433 {offsets = [0, 128], sizes = [8, 128], strides = [1, 1]} : vector<8x384xf32> to vector<8x128xf32>
    %494 = vector.extract_strided_slice %433 {offsets = [0, 256], sizes = [8, 128], strides = [1, 1]} : vector<8x384xf32> to vector<8x128xf32>
    %495 = arith.addf %489, %492 : vector<8x128xf32>
    %496 = arith.negf %495 : vector<8x128xf32>
    %497 = math.exp %496 : vector<8x128xf32>
    %cst_206 = arith.constant 1.000000e+00 : f32
    %498 = vector.broadcast %cst_206 : f32 to vector<8x128xf32>
    %499 = arith.addf %498, %497 : vector<8x128xf32>
    %500 = arith.divf %498, %499 : vector<8x128xf32>
    %501 = arith.addf %490, %493 : vector<8x128xf32>
    %502 = arith.negf %501 : vector<8x128xf32>
    %503 = math.exp %502 : vector<8x128xf32>
    %cst_207 = arith.constant 1.000000e+00 : f32
    %504 = vector.broadcast %cst_207 : f32 to vector<8x128xf32>
    %505 = arith.addf %504, %503 : vector<8x128xf32>
    %506 = arith.divf %504, %505 : vector<8x128xf32>
    %507 = arith.mulf %500, %494 : vector<8x128xf32>
    %508 = arith.addf %491, %507 : vector<8x128xf32>
    %509 = math.tanh %508 : vector<8x128xf32>
    %cst_208 = arith.constant 1.000000e+00 : f32
    %510 = vector.broadcast %cst_208 : f32 to vector<8x128xf32>
    %511 = arith.subf %510, %506 : vector<8x128xf32>
    %512 = arith.mulf %511, %509 : vector<8x128xf32>
    %513 = arith.mulf %506, %412 : vector<8x128xf32>
    %514 = arith.addf %512, %513 : vector<8x128xf32>
    %515 = arith.index_cast %c4_i32 : i32 to index
    %c0_209 = arith.constant 0 : index
    %c0_210 = arith.constant 0 : index
    %516 = vector.load %arg15[%515, %c0_209, %c0_210] : memref<8x8x128xf32, #tpu.memory_space<vmem>>, vector<1x8x128xf32>
    %517 = vector.shape_cast %516 : vector<1x8x128xf32> to vector<8x128xf32>
    %518 = vector.shape_cast %514 : vector<8x128xf32> to vector<1x8x128xf32>
    tpu.vector_store %arg15[%515, %c0_209, %c0_210], %518 {strides = array<i32>} : memref<8x8x128xf32, #tpu.memory_space<vmem>>, vector<1x8x128xf32>,
    %c5_i32 = arith.constant 5 : i32
    %519 = arith.index_cast %c5_i32 : i32 to index
    %c0_211 = arith.constant 0 : index
    %c0_212 = arith.constant 0 : index
    %520 = vector.load %arg2[%519, %c0_211, %c0_212] : memref<8x8x128xf32, #tpu.memory_space<vmem>>, vector<1x8x128xf32>
    %521 = vector.shape_cast %520 : vector<1x8x128xf32> to vector<8x128xf32>
    %522 = arith.index_cast %c5_i32 : i32 to index
    %c0_213 = arith.constant 0 : index
    %c0_214 = arith.constant 0 : index
    %523 = vector.load %arg3[%522, %c0_213, %c0_214] : memref<8x8x128xf32, #tpu.memory_space<vmem>>, vector<1x8x128xf32>
    %524 = vector.shape_cast %523 : vector<1x8x128xf32> to vector<8x128xf32>
    %525 = arith.index_cast %c5_i32 : i32 to index
    %c0_215 = arith.constant 0 : index
    %c0_216 = arith.constant 0 : index
    %526 = vector.load %arg4[%525, %c0_215, %c0_216] : memref<8x8x256xf32, #tpu.memory_space<vmem>>, vector<1x8x256xf32>
    %527 = vector.shape_cast %526 : vector<1x8x256xf32> to vector<8x256xf32>
    %528 = arith.truncf %514 : vector<8x128xf32> to vector<8x128xbf16>
    %c0_217 = arith.constant 0 : index
    %c0_218 = arith.constant 0 : index
    %529 = vector.load %arg8[%c0_217, %c0_218] : memref<128x512xbf16, #tpu.memory_space<vmem>>, vector<128x512xbf16>
    %cst_219 = arith.constant dense<0.000000e+00> : vector<8x512xf32>
    %530 = tpu.matmul %528, %529, %cst_219 {dimension_numbers = #tpu.dot_dimension_numbers<[1], [0], [0], [1], [0, 0, 1, 1], [], []>} : vector<8x128xbf16>, vector<128x512xbf16>, vector<8x512xf32> -> vector<8x512xf32>
    %531 = vector.extract_strided_slice %530 {offsets = [0, 0], sizes = [8, 128], strides = [1, 1]} : vector<8x512xf32> to vector<8x128xf32>
    %532 = vector.extract_strided_slice %530 {offsets = [0, 128], sizes = [8, 384], strides = [1, 1]} : vector<8x512xf32> to vector<8x384xf32>
    %c0_220 = arith.constant 0 : index
    %c0_221 = arith.constant 0 : index
    %533 = vector.load %arg14[%c0_220, %c0_221] : memref<1x384xf32, #tpu.memory_space<vmem>>, vector<1x384xf32>
    %534 = vector.broadcast %533 : vector<1x384xf32> to vector<8x384xf32>
    %535 = arith.addf %532, %534 : vector<8x384xf32>
    %536 = arith.addf %524, %531 : vector<8x128xf32>
    %c0_222 = arith.constant 0 : index
    %c0_223 = arith.constant 0 : index
    %c0_224 = arith.constant 0 : index
    %537 = vector.load %arg5[%c0_222, %c0_223, %c0_224] : memref<8x8x128xbf16, #tpu.memory_space<vmem>>, vector<8x8x128xbf16>
    %538 = arith.extf %537 : vector<8x8x128xbf16> to vector<8x8x128xf32>
    %539 = vector.shape_cast %536 : vector<8x128xf32> to vector<8x1x128xf32>
    %540 = vector.broadcast %539 : vector<8x1x128xf32> to vector<8x8x128xf32>
    %541 = arith.addf %538, %540 : vector<8x8x128xf32>
    %542 = math.tanh %541 : vector<8x8x128xf32>
    %c0_225 = arith.constant 0 : index
    %c0_226 = arith.constant 0 : index
    %543 = vector.load %arg9[%c0_225, %c0_226] : memref<1x128xf32, #tpu.memory_space<vmem>>, vector<1x128xf32>
    %544 = vector.shape_cast %543 : vector<1x128xf32> to vector<1x1x128xf32>
    %545 = vector.broadcast %544 : vector<1x1x128xf32> to vector<8x8x128xf32>
    %546 = arith.mulf %542, %545 : vector<8x8x128xf32>
    %cst_227 = arith.constant dense<0.000000e+00> : vector<8x8xf32>
    %547 = vector.multi_reduction <add>, %546, %cst_227 [2] : vector<8x8x128xf32> to vector<8x8xf32>
    %548 = vector.broadcast %cst_4 : f32 to vector<8x8xf32>
    %549 = arith.select %5, %547, %548 : vector<8x8xi1>, vector<8x8xf32>
    %cst_228 = arith.constant dense<0xFF800000> : vector<8xf32>
    %550 = vector.multi_reduction <maximumf>, %549, %cst_228 [1] : vector<8x8xf32> to vector<8xf32>
    %551 = vector.shape_cast %550 : vector<8xf32> to vector<8x1xf32>
    %552 = vector.broadcast %551 : vector<8x1xf32> to vector<8x8xf32>
    %553 = arith.subf %549, %552 : vector<8x8xf32>
    %554 = math.exp %553 : vector<8x8xf32>
    %555 = arith.mulf %554, %7 : vector<8x8xf32>
    %cst_229 = arith.constant dense<0.000000e+00> : vector<8xf32>
    %556 = vector.multi_reduction <add>, %555, %cst_229 [1] : vector<8x8xf32> to vector<8xf32>
    %557 = vector.shape_cast %556 : vector<8xf32> to vector<8x1xf32>
    %cst_230 = arith.constant 1.000000e-30 : f32
    %558 = vector.broadcast %cst_230 : f32 to vector<8x1xf32>
    %559 = arith.addf %557, %558 : vector<8x1xf32>
    %560 = tpu.reciprocal %559 {approx = true} : vector<8x1xf32> -> vector<8x1xf32>
    %561 = vector.broadcast %560 : vector<8x1xf32> to vector<8x8xf32>
    %562 = arith.mulf %555, %561 : vector<8x8xf32>
    %563 = arith.truncf %562 : vector<8x8xf32> to vector<8x8xbf16>
    %564 = vector.shape_cast %563 : vector<8x8xbf16> to vector<8x1x8xbf16>
    %c0_231 = arith.constant 0 : index
    %c0_232 = arith.constant 0 : index
    %c0_233 = arith.constant 0 : index
    %565 = vector.load %arg6[%c0_231, %c0_232, %c0_233] : memref<8x8x128xbf16, #tpu.memory_space<vmem>>, vector<8x8x128xbf16>
    "tpu.trace_start"() <{level = 10 : i32, message = "bxq,bqi->bxi"}> : () -> ()
    %cst_234 = arith.constant dense<0.000000e+00> : vector<8x1x128xf32>
    %566 = tpu.matmul %564, %565, %cst_234 {dimension_numbers = #tpu.dot_dimension_numbers<[2], [1], [1], [2], [0, 0, 0, 1, 1, 2], [0], [0]>} : vector<8x1x8xbf16>, vector<8x8x128xbf16>, vector<8x1x128xf32> -> vector<8x1x128xf32>
    "tpu.trace_stop"() : () -> ()
    %567 = vector.shape_cast %566 : vector<8x1x128xf32> to vector<8x128xf32>
    %568 = arith.truncf %567 : vector<8x128xf32> to vector<8x128xbf16>
    %c0_235 = arith.constant 0 : index
    %c0_236 = arith.constant 0 : index
    %569 = vector.load %arg10[%c0_235, %c0_236] : memref<128x256xbf16, #tpu.memory_space<vmem>>, vector<128x256xbf16>
    %cst_237 = arith.constant dense<0.000000e+00> : vector<8x256xf32>
    %570 = tpu.matmul %568, %569, %cst_237 {dimension_numbers = #tpu.dot_dimension_numbers<[1], [0], [0], [1], [0, 0, 1, 1], [], []>} : vector<8x128xbf16>, vector<128x256xbf16>, vector<8x256xf32> -> vector<8x256xf32>
    %571 = arith.addf %527, %570 : vector<8x256xf32>
    %572 = arith.negf %571 : vector<8x256xf32>
    %573 = math.exp %572 : vector<8x256xf32>
    %cst_238 = arith.constant 1.000000e+00 : f32
    %574 = vector.broadcast %cst_238 : f32 to vector<8x256xf32>
    %575 = arith.addf %574, %573 : vector<8x256xf32>
    %576 = arith.divf %574, %575 : vector<8x256xf32>
    %577 = vector.extract_strided_slice %576 {offsets = [0, 0], sizes = [8, 128], strides = [1, 1]} : vector<8x256xf32> to vector<8x128xf32>
    %578 = arith.mulf %577, %521 : vector<8x128xf32>
    %579 = vector.extract_strided_slice %576 {offsets = [0, 128], sizes = [8, 128], strides = [1, 1]} : vector<8x256xf32> to vector<8x128xf32>
    %580 = arith.mulf %579, %567 : vector<8x128xf32>
    %581 = arith.truncf %578 : vector<8x128xf32> to vector<8x128xbf16>
    %c0_239 = arith.constant 0 : index
    %c0_240 = arith.constant 0 : index
    %582 = vector.load %arg11[%c0_239, %c0_240] : memref<128x384xbf16, #tpu.memory_space<vmem>>, vector<128x384xbf16>
    %cst_241 = arith.constant dense<0.000000e+00> : vector<8x384xf32>
    %583 = tpu.matmul %581, %582, %cst_241 {dimension_numbers = #tpu.dot_dimension_numbers<[1], [0], [0], [1], [0, 0, 1, 1], [], []>} : vector<8x128xbf16>, vector<128x384xbf16>, vector<8x384xf32> -> vector<8x384xf32>
    %584 = arith.truncf %580 : vector<8x128xf32> to vector<8x128xbf16>
    %c0_242 = arith.constant 0 : index
    %c0_243 = arith.constant 0 : index
    %585 = vector.load %arg12[%c0_242, %c0_243] : memref<128x384xbf16, #tpu.memory_space<vmem>>, vector<128x384xbf16>
    %cst_244 = arith.constant dense<0.000000e+00> : vector<8x384xf32>
    %586 = tpu.matmul %584, %585, %cst_244 {dimension_numbers = #tpu.dot_dimension_numbers<[1], [0], [0], [1], [0, 0, 1, 1], [], []>} : vector<8x128xbf16>, vector<128x384xbf16>, vector<8x384xf32> -> vector<8x384xf32>
    %587 = arith.addf %583, %586 : vector<8x384xf32>
    %c0_245 = arith.constant 0 : index
    %c0_246 = arith.constant 0 : index
    %588 = vector.load %arg13[%c0_245, %c0_246] : memref<1x384xf32, #tpu.memory_space<vmem>>, vector<1x384xf32>
    %589 = vector.broadcast %588 : vector<1x384xf32> to vector<8x384xf32>
    %590 = arith.addf %587, %589 : vector<8x384xf32>
    %591 = vector.extract_strided_slice %590 {offsets = [0, 0], sizes = [8, 128], strides = [1, 1]} : vector<8x384xf32> to vector<8x128xf32>
    %592 = vector.extract_strided_slice %590 {offsets = [0, 128], sizes = [8, 128], strides = [1, 1]} : vector<8x384xf32> to vector<8x128xf32>
    %593 = vector.extract_strided_slice %590 {offsets = [0, 256], sizes = [8, 128], strides = [1, 1]} : vector<8x384xf32> to vector<8x128xf32>
    %594 = vector.extract_strided_slice %535 {offsets = [0, 0], sizes = [8, 128], strides = [1, 1]} : vector<8x384xf32> to vector<8x128xf32>
    %595 = vector.extract_strided_slice %535 {offsets = [0, 128], sizes = [8, 128], strides = [1, 1]} : vector<8x384xf32> to vector<8x128xf32>
    %596 = vector.extract_strided_slice %535 {offsets = [0, 256], sizes = [8, 128], strides = [1, 1]} : vector<8x384xf32> to vector<8x128xf32>
    %597 = arith.addf %591, %594 : vector<8x128xf32>
    %598 = arith.negf %597 : vector<8x128xf32>
    %599 = math.exp %598 : vector<8x128xf32>
    %cst_247 = arith.constant 1.000000e+00 : f32
    %600 = vector.broadcast %cst_247 : f32 to vector<8x128xf32>
    %601 = arith.addf %600, %599 : vector<8x128xf32>
    %602 = arith.divf %600, %601 : vector<8x128xf32>
    %603 = arith.addf %592, %595 : vector<8x128xf32>
    %604 = arith.negf %603 : vector<8x128xf32>
    %605 = math.exp %604 : vector<8x128xf32>
    %cst_248 = arith.constant 1.000000e+00 : f32
    %606 = vector.broadcast %cst_248 : f32 to vector<8x128xf32>
    %607 = arith.addf %606, %605 : vector<8x128xf32>
    %608 = arith.divf %606, %607 : vector<8x128xf32>
    %609 = arith.mulf %602, %596 : vector<8x128xf32>
    %610 = arith.addf %593, %609 : vector<8x128xf32>
    %611 = math.tanh %610 : vector<8x128xf32>
    %cst_249 = arith.constant 1.000000e+00 : f32
    %612 = vector.broadcast %cst_249 : f32 to vector<8x128xf32>
    %613 = arith.subf %612, %608 : vector<8x128xf32>
    %614 = arith.mulf %613, %611 : vector<8x128xf32>
    %615 = arith.mulf %608, %514 : vector<8x128xf32>
    %616 = arith.addf %614, %615 : vector<8x128xf32>
    %617 = arith.index_cast %c5_i32 : i32 to index
    %c0_250 = arith.constant 0 : index
    %c0_251 = arith.constant 0 : index
    %618 = vector.load %arg15[%617, %c0_250, %c0_251] : memref<8x8x128xf32, #tpu.memory_space<vmem>>, vector<1x8x128xf32>
    %619 = vector.shape_cast %618 : vector<1x8x128xf32> to vector<8x128xf32>
    %620 = vector.shape_cast %616 : vector<8x128xf32> to vector<1x8x128xf32>
    tpu.vector_store %arg15[%617, %c0_250, %c0_251], %620 {strides = array<i32>} : memref<8x8x128xf32, #tpu.memory_space<vmem>>, vector<1x8x128xf32>,
    %c6_i32 = arith.constant 6 : i32
    %621 = arith.index_cast %c6_i32 : i32 to index
    %c0_252 = arith.constant 0 : index
    %c0_253 = arith.constant 0 : index
    %622 = vector.load %arg2[%621, %c0_252, %c0_253] : memref<8x8x128xf32, #tpu.memory_space<vmem>>, vector<1x8x128xf32>
    %623 = vector.shape_cast %622 : vector<1x8x128xf32> to vector<8x128xf32>
    %624 = arith.index_cast %c6_i32 : i32 to index
    %c0_254 = arith.constant 0 : index
    %c0_255 = arith.constant 0 : index
    %625 = vector.load %arg3[%624, %c0_254, %c0_255] : memref<8x8x128xf32, #tpu.memory_space<vmem>>, vector<1x8x128xf32>
    %626 = vector.shape_cast %625 : vector<1x8x128xf32> to vector<8x128xf32>
    %627 = arith.index_cast %c6_i32 : i32 to index
    %c0_256 = arith.constant 0 : index
    %c0_257 = arith.constant 0 : index
    %628 = vector.load %arg4[%627, %c0_256, %c0_257] : memref<8x8x256xf32, #tpu.memory_space<vmem>>, vector<1x8x256xf32>
    %629 = vector.shape_cast %628 : vector<1x8x256xf32> to vector<8x256xf32>
    %630 = arith.truncf %616 : vector<8x128xf32> to vector<8x128xbf16>
    %c0_258 = arith.constant 0 : index
    %c0_259 = arith.constant 0 : index
    %631 = vector.load %arg8[%c0_258, %c0_259] : memref<128x512xbf16, #tpu.memory_space<vmem>>, vector<128x512xbf16>
    %cst_260 = arith.constant dense<0.000000e+00> : vector<8x512xf32>
    %632 = tpu.matmul %630, %631, %cst_260 {dimension_numbers = #tpu.dot_dimension_numbers<[1], [0], [0], [1], [0, 0, 1, 1], [], []>} : vector<8x128xbf16>, vector<128x512xbf16>, vector<8x512xf32> -> vector<8x512xf32>
    %633 = vector.extract_strided_slice %632 {offsets = [0, 0], sizes = [8, 128], strides = [1, 1]} : vector<8x512xf32> to vector<8x128xf32>
    %634 = vector.extract_strided_slice %632 {offsets = [0, 128], sizes = [8, 384], strides = [1, 1]} : vector<8x512xf32> to vector<8x384xf32>
    %c0_261 = arith.constant 0 : index
    %c0_262 = arith.constant 0 : index
    %635 = vector.load %arg14[%c0_261, %c0_262] : memref<1x384xf32, #tpu.memory_space<vmem>>, vector<1x384xf32>
    %636 = vector.broadcast %635 : vector<1x384xf32> to vector<8x384xf32>
    %637 = arith.addf %634, %636 : vector<8x384xf32>
    %638 = arith.addf %626, %633 : vector<8x128xf32>
    %c0_263 = arith.constant 0 : index
    %c0_264 = arith.constant 0 : index
    %c0_265 = arith.constant 0 : index
    %639 = vector.load %arg5[%c0_263, %c0_264, %c0_265] : memref<8x8x128xbf16, #tpu.memory_space<vmem>>, vector<8x8x128xbf16>
    %640 = arith.extf %639 : vector<8x8x128xbf16> to vector<8x8x128xf32>
    %641 = vector.shape_cast %638 : vector<8x128xf32> to vector<8x1x128xf32>
    %642 = vector.broadcast %641 : vector<8x1x128xf32> to vector<8x8x128xf32>
    %643 = arith.addf %640, %642 : vector<8x8x128xf32>
    %644 = math.tanh %643 : vector<8x8x128xf32>
    %c0_266 = arith.constant 0 : index
    %c0_267 = arith.constant 0 : index
    %645 = vector.load %arg9[%c0_266, %c0_267] : memref<1x128xf32, #tpu.memory_space<vmem>>, vector<1x128xf32>
    %646 = vector.shape_cast %645 : vector<1x128xf32> to vector<1x1x128xf32>
    %647 = vector.broadcast %646 : vector<1x1x128xf32> to vector<8x8x128xf32>
    %648 = arith.mulf %644, %647 : vector<8x8x128xf32>
    %cst_268 = arith.constant dense<0.000000e+00> : vector<8x8xf32>
    %649 = vector.multi_reduction <add>, %648, %cst_268 [2] : vector<8x8x128xf32> to vector<8x8xf32>
    %650 = vector.broadcast %cst_4 : f32 to vector<8x8xf32>
    %651 = arith.select %5, %649, %650 : vector<8x8xi1>, vector<8x8xf32>
    %cst_269 = arith.constant dense<0xFF800000> : vector<8xf32>
    %652 = vector.multi_reduction <maximumf>, %651, %cst_269 [1] : vector<8x8xf32> to vector<8xf32>
    %653 = vector.shape_cast %652 : vector<8xf32> to vector<8x1xf32>
    %654 = vector.broadcast %653 : vector<8x1xf32> to vector<8x8xf32>
    %655 = arith.subf %651, %654 : vector<8x8xf32>
    %656 = math.exp %655 : vector<8x8xf32>
    %657 = arith.mulf %656, %7 : vector<8x8xf32>
    %cst_270 = arith.constant dense<0.000000e+00> : vector<8xf32>
    %658 = vector.multi_reduction <add>, %657, %cst_270 [1] : vector<8x8xf32> to vector<8xf32>
    %659 = vector.shape_cast %658 : vector<8xf32> to vector<8x1xf32>
    %cst_271 = arith.constant 1.000000e-30 : f32
    %660 = vector.broadcast %cst_271 : f32 to vector<8x1xf32>
    %661 = arith.addf %659, %660 : vector<8x1xf32>
    %662 = tpu.reciprocal %661 {approx = true} : vector<8x1xf32> -> vector<8x1xf32>
    %663 = vector.broadcast %662 : vector<8x1xf32> to vector<8x8xf32>
    %664 = arith.mulf %657, %663 : vector<8x8xf32>
    %665 = arith.truncf %664 : vector<8x8xf32> to vector<8x8xbf16>
    %666 = vector.shape_cast %665 : vector<8x8xbf16> to vector<8x1x8xbf16>
    %c0_272 = arith.constant 0 : index
    %c0_273 = arith.constant 0 : index
    %c0_274 = arith.constant 0 : index
    %667 = vector.load %arg6[%c0_272, %c0_273, %c0_274] : memref<8x8x128xbf16, #tpu.memory_space<vmem>>, vector<8x8x128xbf16>
    "tpu.trace_start"() <{level = 10 : i32, message = "bxq,bqi->bxi"}> : () -> ()
    %cst_275 = arith.constant dense<0.000000e+00> : vector<8x1x128xf32>
    %668 = tpu.matmul %666, %667, %cst_275 {dimension_numbers = #tpu.dot_dimension_numbers<[2], [1], [1], [2], [0, 0, 0, 1, 1, 2], [0], [0]>} : vector<8x1x8xbf16>, vector<8x8x128xbf16>, vector<8x1x128xf32> -> vector<8x1x128xf32>
    "tpu.trace_stop"() : () -> ()
    %669 = vector.shape_cast %668 : vector<8x1x128xf32> to vector<8x128xf32>
    %670 = arith.truncf %669 : vector<8x128xf32> to vector<8x128xbf16>
    %c0_276 = arith.constant 0 : index
    %c0_277 = arith.constant 0 : index
    %671 = vector.load %arg10[%c0_276, %c0_277] : memref<128x256xbf16, #tpu.memory_space<vmem>>, vector<128x256xbf16>
    %cst_278 = arith.constant dense<0.000000e+00> : vector<8x256xf32>
    %672 = tpu.matmul %670, %671, %cst_278 {dimension_numbers = #tpu.dot_dimension_numbers<[1], [0], [0], [1], [0, 0, 1, 1], [], []>} : vector<8x128xbf16>, vector<128x256xbf16>, vector<8x256xf32> -> vector<8x256xf32>
    %673 = arith.addf %629, %672 : vector<8x256xf32>
    %674 = arith.negf %673 : vector<8x256xf32>
    %675 = math.exp %674 : vector<8x256xf32>
    %cst_279 = arith.constant 1.000000e+00 : f32
    %676 = vector.broadcast %cst_279 : f32 to vector<8x256xf32>
    %677 = arith.addf %676, %675 : vector<8x256xf32>
    %678 = arith.divf %676, %677 : vector<8x256xf32>
    %679 = vector.extract_strided_slice %678 {offsets = [0, 0], sizes = [8, 128], strides = [1, 1]} : vector<8x256xf32> to vector<8x128xf32>
    %680 = arith.mulf %679, %623 : vector<8x128xf32>
    %681 = vector.extract_strided_slice %678 {offsets = [0, 128], sizes = [8, 128], strides = [1, 1]} : vector<8x256xf32> to vector<8x128xf32>
    %682 = arith.mulf %681, %669 : vector<8x128xf32>
    %683 = arith.truncf %680 : vector<8x128xf32> to vector<8x128xbf16>
    %c0_280 = arith.constant 0 : index
    %c0_281 = arith.constant 0 : index
    %684 = vector.load %arg11[%c0_280, %c0_281] : memref<128x384xbf16, #tpu.memory_space<vmem>>, vector<128x384xbf16>
    %cst_282 = arith.constant dense<0.000000e+00> : vector<8x384xf32>
    %685 = tpu.matmul %683, %684, %cst_282 {dimension_numbers = #tpu.dot_dimension_numbers<[1], [0], [0], [1], [0, 0, 1, 1], [], []>} : vector<8x128xbf16>, vector<128x384xbf16>, vector<8x384xf32> -> vector<8x384xf32>
    %686 = arith.truncf %682 : vector<8x128xf32> to vector<8x128xbf16>
    %c0_283 = arith.constant 0 : index
    %c0_284 = arith.constant 0 : index
    %687 = vector.load %arg12[%c0_283, %c0_284] : memref<128x384xbf16, #tpu.memory_space<vmem>>, vector<128x384xbf16>
    %cst_285 = arith.constant dense<0.000000e+00> : vector<8x384xf32>
    %688 = tpu.matmul %686, %687, %cst_285 {dimension_numbers = #tpu.dot_dimension_numbers<[1], [0], [0], [1], [0, 0, 1, 1], [], []>} : vector<8x128xbf16>, vector<128x384xbf16>, vector<8x384xf32> -> vector<8x384xf32>
    %689 = arith.addf %685, %688 : vector<8x384xf32>
    %c0_286 = arith.constant 0 : index
    %c0_287 = arith.constant 0 : index
    %690 = vector.load %arg13[%c0_286, %c0_287] : memref<1x384xf32, #tpu.memory_space<vmem>>, vector<1x384xf32>
    %691 = vector.broadcast %690 : vector<1x384xf32> to vector<8x384xf32>
    %692 = arith.addf %689, %691 : vector<8x384xf32>
    %693 = vector.extract_strided_slice %692 {offsets = [0, 0], sizes = [8, 128], strides = [1, 1]} : vector<8x384xf32> to vector<8x128xf32>
    %694 = vector.extract_strided_slice %692 {offsets = [0, 128], sizes = [8, 128], strides = [1, 1]} : vector<8x384xf32> to vector<8x128xf32>
    %695 = vector.extract_strided_slice %692 {offsets = [0, 256], sizes = [8, 128], strides = [1, 1]} : vector<8x384xf32> to vector<8x128xf32>
    %696 = vector.extract_strided_slice %637 {offsets = [0, 0], sizes = [8, 128], strides = [1, 1]} : vector<8x384xf32> to vector<8x128xf32>
    %697 = vector.extract_strided_slice %637 {offsets = [0, 128], sizes = [8, 128], strides = [1, 1]} : vector<8x384xf32> to vector<8x128xf32>
    %698 = vector.extract_strided_slice %637 {offsets = [0, 256], sizes = [8, 128], strides = [1, 1]} : vector<8x384xf32> to vector<8x128xf32>
    %699 = arith.addf %693, %696 : vector<8x128xf32>
    %700 = arith.negf %699 : vector<8x128xf32>
    %701 = math.exp %700 : vector<8x128xf32>
    %cst_288 = arith.constant 1.000000e+00 : f32
    %702 = vector.broadcast %cst_288 : f32 to vector<8x128xf32>
    %703 = arith.addf %702, %701 : vector<8x128xf32>
    %704 = arith.divf %702, %703 : vector<8x128xf32>
    %705 = arith.addf %694, %697 : vector<8x128xf32>
    %706 = arith.negf %705 : vector<8x128xf32>
    %707 = math.exp %706 : vector<8x128xf32>
    %cst_289 = arith.constant 1.000000e+00 : f32
    %708 = vector.broadcast %cst_289 : f32 to vector<8x128xf32>
    %709 = arith.addf %708, %707 : vector<8x128xf32>
    %710 = arith.divf %708, %709 : vector<8x128xf32>
    %711 = arith.mulf %704, %698 : vector<8x128xf32>
    %712 = arith.addf %695, %711 : vector<8x128xf32>
    %713 = math.tanh %712 : vector<8x128xf32>
    %cst_290 = arith.constant 1.000000e+00 : f32
    %714 = vector.broadcast %cst_290 : f32 to vector<8x128xf32>
    %715 = arith.subf %714, %710 : vector<8x128xf32>
    %716 = arith.mulf %715, %713 : vector<8x128xf32>
    %717 = arith.mulf %710, %616 : vector<8x128xf32>
    %718 = arith.addf %716, %717 : vector<8x128xf32>
    %719 = arith.index_cast %c6_i32 : i32 to index
    %c0_291 = arith.constant 0 : index
    %c0_292 = arith.constant 0 : index
    %720 = vector.load %arg15[%719, %c0_291, %c0_292] : memref<8x8x128xf32, #tpu.memory_space<vmem>>, vector<1x8x128xf32>
    %721 = vector.shape_cast %720 : vector<1x8x128xf32> to vector<8x128xf32>
    %722 = vector.shape_cast %718 : vector<8x128xf32> to vector<1x8x128xf32>
    tpu.vector_store %arg15[%719, %c0_291, %c0_292], %722 {strides = array<i32>} : memref<8x8x128xf32, #tpu.memory_space<vmem>>, vector<1x8x128xf32>,
    %c7_i32 = arith.constant 7 : i32
    %723 = arith.index_cast %c7_i32 : i32 to index
    %c0_293 = arith.constant 0 : index
    %c0_294 = arith.constant 0 : index
    %724 = vector.load %arg2[%723, %c0_293, %c0_294] : memref<8x8x128xf32, #tpu.memory_space<vmem>>, vector<1x8x128xf32>
    %725 = vector.shape_cast %724 : vector<1x8x128xf32> to vector<8x128xf32>
    %726 = arith.index_cast %c7_i32 : i32 to index
    %c0_295 = arith.constant 0 : index
    %c0_296 = arith.constant 0 : index
    %727 = vector.load %arg3[%726, %c0_295, %c0_296] : memref<8x8x128xf32, #tpu.memory_space<vmem>>, vector<1x8x128xf32>
    %728 = vector.shape_cast %727 : vector<1x8x128xf32> to vector<8x128xf32>
    %729 = arith.index_cast %c7_i32 : i32 to index
    %c0_297 = arith.constant 0 : index
    %c0_298 = arith.constant 0 : index
    %730 = vector.load %arg4[%729, %c0_297, %c0_298] : memref<8x8x256xf32, #tpu.memory_space<vmem>>, vector<1x8x256xf32>
    %731 = vector.shape_cast %730 : vector<1x8x256xf32> to vector<8x256xf32>
    %732 = arith.truncf %718 : vector<8x128xf32> to vector<8x128xbf16>
    %c0_299 = arith.constant 0 : index
    %c0_300 = arith.constant 0 : index
    %733 = vector.load %arg8[%c0_299, %c0_300] : memref<128x512xbf16, #tpu.memory_space<vmem>>, vector<128x512xbf16>
    %cst_301 = arith.constant dense<0.000000e+00> : vector<8x512xf32>
    %734 = tpu.matmul %732, %733, %cst_301 {dimension_numbers = #tpu.dot_dimension_numbers<[1], [0], [0], [1], [0, 0, 1, 1], [], []>} : vector<8x128xbf16>, vector<128x512xbf16>, vector<8x512xf32> -> vector<8x512xf32>
    %735 = vector.extract_strided_slice %734 {offsets = [0, 0], sizes = [8, 128], strides = [1, 1]} : vector<8x512xf32> to vector<8x128xf32>
    %736 = vector.extract_strided_slice %734 {offsets = [0, 128], sizes = [8, 384], strides = [1, 1]} : vector<8x512xf32> to vector<8x384xf32>
    %c0_302 = arith.constant 0 : index
    %c0_303 = arith.constant 0 : index
    %737 = vector.load %arg14[%c0_302, %c0_303] : memref<1x384xf32, #tpu.memory_space<vmem>>, vector<1x384xf32>
    %738 = vector.broadcast %737 : vector<1x384xf32> to vector<8x384xf32>
    %739 = arith.addf %736, %738 : vector<8x384xf32>
    %740 = arith.addf %728, %735 : vector<8x128xf32>
    %c0_304 = arith.constant 0 : index
    %c0_305 = arith.constant 0 : index
    %c0_306 = arith.constant 0 : index
    %741 = vector.load %arg5[%c0_304, %c0_305, %c0_306] : memref<8x8x128xbf16, #tpu.memory_space<vmem>>, vector<8x8x128xbf16>
    %742 = arith.extf %741 : vector<8x8x128xbf16> to vector<8x8x128xf32>
    %743 = vector.shape_cast %740 : vector<8x128xf32> to vector<8x1x128xf32>
    %744 = vector.broadcast %743 : vector<8x1x128xf32> to vector<8x8x128xf32>
    %745 = arith.addf %742, %744 : vector<8x8x128xf32>
    %746 = math.tanh %745 : vector<8x8x128xf32>
    %c0_307 = arith.constant 0 : index
    %c0_308 = arith.constant 0 : index
    %747 = vector.load %arg9[%c0_307, %c0_308] : memref<1x128xf32, #tpu.memory_space<vmem>>, vector<1x128xf32>
    %748 = vector.shape_cast %747 : vector<1x128xf32> to vector<1x1x128xf32>
    %749 = vector.broadcast %748 : vector<1x1x128xf32> to vector<8x8x128xf32>
    %750 = arith.mulf %746, %749 : vector<8x8x128xf32>
    %cst_309 = arith.constant dense<0.000000e+00> : vector<8x8xf32>
    %751 = vector.multi_reduction <add>, %750, %cst_309 [2] : vector<8x8x128xf32> to vector<8x8xf32>
    %752 = vector.broadcast %cst_4 : f32 to vector<8x8xf32>
    %753 = arith.select %5, %751, %752 : vector<8x8xi1>, vector<8x8xf32>
    %cst_310 = arith.constant dense<0xFF800000> : vector<8xf32>
    %754 = vector.multi_reduction <maximumf>, %753, %cst_310 [1] : vector<8x8xf32> to vector<8xf32>
    %755 = vector.shape_cast %754 : vector<8xf32> to vector<8x1xf32>
    %756 = vector.broadcast %755 : vector<8x1xf32> to vector<8x8xf32>
    %757 = arith.subf %753, %756 : vector<8x8xf32>
    %758 = math.exp %757 : vector<8x8xf32>
    %759 = arith.mulf %758, %7 : vector<8x8xf32>
    %cst_311 = arith.constant dense<0.000000e+00> : vector<8xf32>
    %760 = vector.multi_reduction <add>, %759, %cst_311 [1] : vector<8x8xf32> to vector<8xf32>
    %761 = vector.shape_cast %760 : vector<8xf32> to vector<8x1xf32>
    %cst_312 = arith.constant 1.000000e-30 : f32
    %762 = vector.broadcast %cst_312 : f32 to vector<8x1xf32>
    %763 = arith.addf %761, %762 : vector<8x1xf32>
    %764 = tpu.reciprocal %763 {approx = true} : vector<8x1xf32> -> vector<8x1xf32>
    %765 = vector.broadcast %764 : vector<8x1xf32> to vector<8x8xf32>
    %766 = arith.mulf %759, %765 : vector<8x8xf32>
    %767 = arith.truncf %766 : vector<8x8xf32> to vector<8x8xbf16>
    %768 = vector.shape_cast %767 : vector<8x8xbf16> to vector<8x1x8xbf16>
    %c0_313 = arith.constant 0 : index
    %c0_314 = arith.constant 0 : index
    %c0_315 = arith.constant 0 : index
    %769 = vector.load %arg6[%c0_313, %c0_314, %c0_315] : memref<8x8x128xbf16, #tpu.memory_space<vmem>>, vector<8x8x128xbf16>
    "tpu.trace_start"() <{level = 10 : i32, message = "bxq,bqi->bxi"}> : () -> ()
    %cst_316 = arith.constant dense<0.000000e+00> : vector<8x1x128xf32>
    %770 = tpu.matmul %768, %769, %cst_316 {dimension_numbers = #tpu.dot_dimension_numbers<[2], [1], [1], [2], [0, 0, 0, 1, 1, 2], [0], [0]>} : vector<8x1x8xbf16>, vector<8x8x128xbf16>, vector<8x1x128xf32> -> vector<8x1x128xf32>
    "tpu.trace_stop"() : () -> ()
    %771 = vector.shape_cast %770 : vector<8x1x128xf32> to vector<8x128xf32>
    %772 = arith.truncf %771 : vector<8x128xf32> to vector<8x128xbf16>
    %c0_317 = arith.constant 0 : index
    %c0_318 = arith.constant 0 : index
    %773 = vector.load %arg10[%c0_317, %c0_318] : memref<128x256xbf16, #tpu.memory_space<vmem>>, vector<128x256xbf16>
    %cst_319 = arith.constant dense<0.000000e+00> : vector<8x256xf32>
    %774 = tpu.matmul %772, %773, %cst_319 {dimension_numbers = #tpu.dot_dimension_numbers<[1], [0], [0], [1], [0, 0, 1, 1], [], []>} : vector<8x128xbf16>, vector<128x256xbf16>, vector<8x256xf32> -> vector<8x256xf32>
    %775 = arith.addf %731, %774 : vector<8x256xf32>
    %776 = arith.negf %775 : vector<8x256xf32>
    %777 = math.exp %776 : vector<8x256xf32>
    %cst_320 = arith.constant 1.000000e+00 : f32
    %778 = vector.broadcast %cst_320 : f32 to vector<8x256xf32>
    %779 = arith.addf %778, %777 : vector<8x256xf32>
    %780 = arith.divf %778, %779 : vector<8x256xf32>
    %781 = vector.extract_strided_slice %780 {offsets = [0, 0], sizes = [8, 128], strides = [1, 1]} : vector<8x256xf32> to vector<8x128xf32>
    %782 = arith.mulf %781, %725 : vector<8x128xf32>
    %783 = vector.extract_strided_slice %780 {offsets = [0, 128], sizes = [8, 128], strides = [1, 1]} : vector<8x256xf32> to vector<8x128xf32>
    %784 = arith.mulf %783, %771 : vector<8x128xf32>
    %785 = arith.truncf %782 : vector<8x128xf32> to vector<8x128xbf16>
    %c0_321 = arith.constant 0 : index
    %c0_322 = arith.constant 0 : index
    %786 = vector.load %arg11[%c0_321, %c0_322] : memref<128x384xbf16, #tpu.memory_space<vmem>>, vector<128x384xbf16>
    %cst_323 = arith.constant dense<0.000000e+00> : vector<8x384xf32>
    %787 = tpu.matmul %785, %786, %cst_323 {dimension_numbers = #tpu.dot_dimension_numbers<[1], [0], [0], [1], [0, 0, 1, 1], [], []>} : vector<8x128xbf16>, vector<128x384xbf16>, vector<8x384xf32> -> vector<8x384xf32>
    %788 = arith.truncf %784 : vector<8x128xf32> to vector<8x128xbf16>
    %c0_324 = arith.constant 0 : index
    %c0_325 = arith.constant 0 : index
    %789 = vector.load %arg12[%c0_324, %c0_325] : memref<128x384xbf16, #tpu.memory_space<vmem>>, vector<128x384xbf16>
    %cst_326 = arith.constant dense<0.000000e+00> : vector<8x384xf32>
    %790 = tpu.matmul %788, %789, %cst_326 {dimension_numbers = #tpu.dot_dimension_numbers<[1], [0], [0], [1], [0, 0, 1, 1], [], []>} : vector<8x128xbf16>, vector<128x384xbf16>, vector<8x384xf32> -> vector<8x384xf32>
    %791 = arith.addf %787, %790 : vector<8x384xf32>
    %c0_327 = arith.constant 0 : index
    %c0_328 = arith.constant 0 : index
    %792 = vector.load %arg13[%c0_327, %c0_328] : memref<1x384xf32, #tpu.memory_space<vmem>>, vector<1x384xf32>
    %793 = vector.broadcast %792 : vector<1x384xf32> to vector<8x384xf32>
    %794 = arith.addf %791, %793 : vector<8x384xf32>
    %795 = vector.extract_strided_slice %794 {offsets = [0, 0], sizes = [8, 128], strides = [1, 1]} : vector<8x384xf32> to vector<8x128xf32>
    %796 = vector.extract_strided_slice %794 {offsets = [0, 128], sizes = [8, 128], strides = [1, 1]} : vector<8x384xf32> to vector<8x128xf32>
    %797 = vector.extract_strided_slice %794 {offsets = [0, 256], sizes = [8, 128], strides = [1, 1]} : vector<8x384xf32> to vector<8x128xf32>
    %798 = vector.extract_strided_slice %739 {offsets = [0, 0], sizes = [8, 128], strides = [1, 1]} : vector<8x384xf32> to vector<8x128xf32>
    %799 = vector.extract_strided_slice %739 {offsets = [0, 128], sizes = [8, 128], strides = [1, 1]} : vector<8x384xf32> to vector<8x128xf32>
    %800 = vector.extract_strided_slice %739 {offsets = [0, 256], sizes = [8, 128], strides = [1, 1]} : vector<8x384xf32> to vector<8x128xf32>
    %801 = arith.addf %795, %798 : vector<8x128xf32>
    %802 = arith.negf %801 : vector<8x128xf32>
    %803 = math.exp %802 : vector<8x128xf32>
    %cst_329 = arith.constant 1.000000e+00 : f32
    %804 = vector.broadcast %cst_329 : f32 to vector<8x128xf32>
    %805 = arith.addf %804, %803 : vector<8x128xf32>
    %806 = arith.divf %804, %805 : vector<8x128xf32>
    %807 = arith.addf %796, %799 : vector<8x128xf32>
    %808 = arith.negf %807 : vector<8x128xf32>
    %809 = math.exp %808 : vector<8x128xf32>
    %cst_330 = arith.constant 1.000000e+00 : f32
    %810 = vector.broadcast %cst_330 : f32 to vector<8x128xf32>
    %811 = arith.addf %810, %809 : vector<8x128xf32>
    %812 = arith.divf %810, %811 : vector<8x128xf32>
    %813 = arith.mulf %806, %800 : vector<8x128xf32>
    %814 = arith.addf %797, %813 : vector<8x128xf32>
    %815 = math.tanh %814 : vector<8x128xf32>
    %cst_331 = arith.constant 1.000000e+00 : f32
    %816 = vector.broadcast %cst_331 : f32 to vector<8x128xf32>
    %817 = arith.subf %816, %812 : vector<8x128xf32>
    %818 = arith.mulf %817, %815 : vector<8x128xf32>
    %819 = arith.mulf %812, %718 : vector<8x128xf32>
    %820 = arith.addf %818, %819 : vector<8x128xf32>
    %821 = arith.index_cast %c7_i32 : i32 to index
    %c0_332 = arith.constant 0 : index
    %c0_333 = arith.constant 0 : index
    %822 = vector.load %arg15[%821, %c0_332, %c0_333] : memref<8x8x128xf32, #tpu.memory_space<vmem>>, vector<1x8x128xf32>
    %823 = vector.shape_cast %822 : vector<1x8x128xf32> to vector<8x128xf32>
    %824 = vector.shape_cast %820 : vector<8x128xf32> to vector<1x8x128xf32>
    tpu.vector_store %arg15[%821, %c0_332, %c0_333], %824 {strides = array<i32>} : memref<8x8x128xf32, #tpu.memory_space<vmem>>, vector<1x8x128xf32>,
    %c8_i32 = arith.constant 8 : i32
    %c0_334 = arith.constant 0 : index
    %c0_335 = arith.constant 0 : index
    %825 = vector.load %arg16[%c0_334, %c0_335] : memref<8x128xf32, #tpu.memory_space<vmem>>, vector<8x128xf32>
    tpu.vector_store %arg16[%c0_334, %c0_335], %820 {strides = array<i32>} : memref<8x128xf32, #tpu.memory_space<vmem>>, vector<8x128xf32>,
    return
  }
  func.func @transform_0(%arg0: i32, %arg1: i32) -> (i32, i32, i32) {
    %c0_i32 = arith.constant 0 : i32
    %c0_i32_0 = arith.constant 0 : i32
    return %arg1, %arg0, %c0_i32 : i32, i32, i32
  }
  func.func @transform_1(%arg0: i32, %arg1: i32) -> (i32, i32, i32) {
    %c0_i32 = arith.constant 0 : i32
    %c0_i32_0 = arith.constant 0 : i32
    return %arg1, %arg0, %c0_i32 : i32, i32, i32
  }
  func.func @transform_2(%arg0: i32, %arg1: i32) -> (i32, i32, i32) {
    %c0_i32 = arith.constant 0 : i32
    %c0_i32_0 = arith.constant 0 : i32
    return %arg1, %arg0, %c0_i32 : i32, i32, i32
  }
  func.func @transform_3(%arg0: i32, %arg1: i32) -> (i32, i32, i32) {
    %c0_i32 = arith.constant 0 : i32
    %c0_i32_0 = arith.constant 0 : i32
    %c0_i32_1 = arith.constant 0 : i32
    return %arg0, %c0_i32, %c0_i32_0 : i32, i32, i32
  }
  func.func @transform_4(%arg0: i32, %arg1: i32) -> (i32, i32, i32) {
    %c0_i32 = arith.constant 0 : i32
    %c0_i32_0 = arith.constant 0 : i32
    %c0_i32_1 = arith.constant 0 : i32
    return %arg0, %c0_i32, %c0_i32_0 : i32, i32, i32
  }
  func.func @transform_5(%arg0: i32, %arg1: i32) -> (i32, i32) {
    %c0_i32 = arith.constant 0 : i32
    %c0_i32_0 = arith.constant 0 : i32
    return %arg0, %c0_i32 : i32, i32
  }
  func.func @transform_6(%arg0: i32, %arg1: i32) -> (i32, i32) {
    %c0_i32 = arith.constant 0 : i32
    %c0_i32_0 = arith.constant 0 : i32
    %c0_i32_1 = arith.constant 0 : i32
    return %c0_i32, %c0_i32_0 : i32, i32
  }
  func.func @transform_7(%arg0: i32, %arg1: i32) -> (i32, i32) {
    %c0_i32 = arith.constant 0 : i32
    %c0_i32_0 = arith.constant 0 : i32
    %c0_i32_1 = arith.constant 0 : i32
    return %c0_i32, %c0_i32_0 : i32, i32
  }
  func.func @transform_8(%arg0: i32, %arg1: i32) -> (i32, i32) {
    %c0_i32 = arith.constant 0 : i32
    %c0_i32_0 = arith.constant 0 : i32
    %c0_i32_1 = arith.constant 0 : i32
    return %c0_i32, %c0_i32_0 : i32, i32
  }
  func.func @transform_9(%arg0: i32, %arg1: i32) -> (i32, i32) {
    %c0_i32 = arith.constant 0 : i32
    %c0_i32_0 = arith.constant 0 : i32
    %c0_i32_1 = arith.constant 0 : i32
    return %c0_i32, %c0_i32_0 : i32, i32
  }
  func.func @transform_10(%arg0: i32, %arg1: i32) -> (i32, i32) {
    %c0_i32 = arith.constant 0 : i32
    %c0_i32_0 = arith.constant 0 : i32
    %c0_i32_1 = arith.constant 0 : i32
    return %c0_i32, %c0_i32_0 : i32, i32
  }
  func.func @transform_11(%arg0: i32, %arg1: i32) -> (i32, i32) {
    %c0_i32 = arith.constant 0 : i32
    %c0_i32_0 = arith.constant 0 : i32
    %c0_i32_1 = arith.constant 0 : i32
    return %c0_i32, %c0_i32_0 : i32, i32
  }
  func.func @transform_12(%arg0: i32, %arg1: i32) -> (i32, i32) {
    %c0_i32 = arith.constant 0 : i32
    %c0_i32_0 = arith.constant 0 : i32
    %c0_i32_1 = arith.constant 0 : i32
    return %c0_i32, %c0_i32_0 : i32, i32
  }
  func.func @transform_13(%arg0: i32, %arg1: i32) -> (i32, i32, i32) {
    %c0_i32 = arith.constant 0 : i32
    %c0_i32_0 = arith.constant 0 : i32
    return %arg1, %arg0, %c0_i32 : i32, i32, i32
  }
}

</mosaic_0001>

<bundles_post_ra>
// kernel: pqmatcher_forward.1
= control target key start
LH: loop header
LB: loop body
LE: loop exit
PB: predicated region body
PF: predicated region fallthrough
CT: control target
= control target key end

     0   :  { %v14729_v24 = vmov 0.0|0.0   ;;  %vm418_vm0 = vcmask 1041409   ;;  %vm420_vm1 = vcmask 1042434   ;;  %vm422_vm2 = vcmask 1043459   ;;  %s20640_s6 = inlined_call_operand.vmem [shape: bf16[128,512], index: 6, kind: input, shape index: {}]   ;;  %s20641_s7 = inlined_call_operand.vmem [shape: f32[1,128], index: 7, kind: input, shape index: {}]   ;;  %s20642_s1 = inlined_call_operand.vmem [shape: f32[8,8,128], index: 1, kind: input, shape index: {}]   ;;  %s20643_s3 = inlined_call_operand.vmem [shape: bf16[8,8,128], index: 3, kind: input, shape index: {}]   ;;  %s20644_s5 = inlined_call_operand.vmem [shape: f32[8,8], index: 5, kind: input, shape index: {}]   ;;  %s20645_s4 = inlined_call_operand.vmem [shape: bf16[8,8,128], index: 4, kind: input, shape index: {}]   ;;  %s20646_s8 = inlined_call_operand.vmem [shape: bf16[128,256], index: 8, kind: input, shape index: {}]   ;;  %s20647_s10 = inlined_call_operand.vmem [shape: bf16[128,384], index: 10, kind: input, shape index: {}]   ;;  %s20648_s9 = inlined_call_operand.vmem [shape: bf16[128,384], index: 9, kind: input, shape index: {}]   ;;  %s20649_s2 = inlined_call_operand.vmem [shape: f32[8,8,256], index: 2, kind: input, shape index: {}]   ;;  %s20650_s0 = inlined_call_operand.vmem [shape: f32[8,8,128], index: 0, kind: input, shape index: {}]   ;;  %s20651_s12 = inlined_call_operand.vmem [shape: f32[1,384], index: 12, kind: input, shape index: {}]   ;;  %s20652_s11 = inlined_call_operand.vmem [shape: f32[1,384], index: 11, kind: input, shape index: {}]   ;;  %s20653_s13 = inlined_call_operand.vmem [shape: f32[8,8,128], index: 13, kind: output, shape index: {}]  }
   0x1   :  { %v10367_v0 = vld [vmem:[%s20640_s6 + $0xe0] sm:$0xf]  ;;  %v13518_v1 = vld [vmem:[%s20640_s6 + $0xec] sm:$0xf0]  ;;  %v14384_v28 = vld [vmem:[%s20643_s3 + $0x8] sm:$0xff]   ;;  %vm424_vm3 = vcmask 1044484  }
   0x2   :  { %v10351_v2 = vld [vmem:[%s20640_s6 + $0xc0] sm:$0xf]  ;;  %v10368_v3 = vor.u32 %v13518_v1, %v10367_v0  ;;  %v13514_v4 = vld [vmem:[%s20640_s6 + $0xcc] sm:$0xf0]  ;;  %v14262_v33 = vunpack.c.l.bf16 %v14384_v28  ;;  %v14263_v50 = vunpack.c.h.bf16 %v14384_v28  ;;  %v14386_v55 = vld [vmem:[%s20643_s3 + $0x18] sm:$0xff]   ;;  %vm426_vm4 = vcmask 1045509  }
   0x3   :  { %v10352_v5 = vor.u32 %v13514_v4, %v10351_v2  ;;  %v10335_v6 = vld [vmem:[%s20640_s6 + $0xa0] sm:$0xf]  ;;  %v13510_v7 = vld [vmem:[%s20640_s6 + $0xac] sm:$0xf0]  ;;  %v14270_v60 = vunpack.c.l.bf16 %v14386_v55  ;;  %v14271_v2 = vunpack.c.h.bf16 %v14386_v55  ;;  %vm428_vm5 = vcmask 1046534  }
   0x4   :  { %252 = vmatpush.bf16.msra.mxu0 %v10368_v3  ;;  %v10336_v8 = vor.u32 %v13510_v7, %v10335_v6  ;;  %v10319_v9 = vld [vmem:[%s20640_s6 + $0x80] sm:$0xf]  ;;  %v13506_v10 = vld [vmem:[%s20640_s6 + $0x8c] sm:$0xf0]  ;;  %vm430_vm6 = vcmask 1047559   ;;  %vm20656_vm8 = vcmask 64512  }
   0x5   :  { %v10320_v11 = vor.u32 %v13506_v10, %v10319_v9  ;;  %v10303_v12 = vld [vmem:[%s20640_s6 + $0x60] sm:$0xf]  ;;  %v13502_v13 = vld [vmem:[%s20640_s6 + $0x6c] sm:$0xf0]  ;;  %v10369_v55 = vld [vmem:[%s20640_s6 + $0xf0] sm:$0xf0] }
   0x6   :  { %v10304_v14 = vor.u32 %v13502_v13, %v10303_v12  ;;  %v10287_v15 = vld [vmem:[%s20640_s6 + $0x40] sm:$0xf]  ;;  %v13498_v16 = vld [vmem:[%s20640_s6 + $0x4c] sm:$0xf0]  ;;  %vm20655_vm9 = vcmask 1043456   ;;  %vm20654_vm10 = vcmask 1040384  }
   0x7   :  { %v10288_v17 = vor.u32 %v13498_v16, %v10287_v15  ;;  %v10271_v18 = vld [vmem:[%s20640_s6 + $0x20] sm:$0xf]  ;;  %v13494_v19 = vld [vmem:[%s20640_s6 + $0x2c] sm:$0xf0] }
   0x8   :  { %253 = vmatpush.bf16.msra.mxu0 %v10352_v5  ;;  %v10272_v20 = vor.u32 %v13494_v19, %v10271_v18  ;;  %v10255_v21 = vld [vmem:[%s20640_s6] sm:$0xf]  ;;  %v13490_v22 = vld [vmem:[%s20640_s6 + $0xc] sm:$0xf0]  ;;  %v408_v18 = vlaneseq }
   0x9   :  { %v10256_v23 = vor.u32 %v13490_v22, %v10255_v21  ;;  %v56_v25 = vld [vmem:[%s20642_s1] sm:$0xff]  ;;  %v14385_v27 = vld [vmem:[%s20643_s3 + $0x10] sm:$0xff]  }
   0xa   :  { %v14257_v26 = vld [vmem:[%s20643_s3] sm:$0xff]   ;;  %v14266_v32 = vunpack.c.l.bf16 %v14385_v27  ;;  %v14267_v45 = vunpack.c.h.bf16 %v14385_v27  ;;  %v14868_v21 = vand.u32 127, %v408_v18  ;;  %v13503_v18 = vld [vmem:[%s20640_s6 + $0x74] sm:$0xf0] }
   0xb   :  { %v14258_v31 = vunpack.c.l.bf16 %v14257_v26  ;;  %v14259_v38 = vunpack.c.h.bf16 %v14257_v26  ;;  %v14410_v54 = vld [vmem:[%s20641_s7] ss:$0 sm:$0xff] }
   0xc   :  { %254 = vmatpush.bf16.msra.mxu0 %v10336_v8 }
  0x10   :  { %255 = vmatpush.bf16.msra.mxu0 %v10320_v11 }
  0x14   :  { %256 = vmatpush.bf16.msra.mxu0 %v10304_v14 }
  0x18   :  { %257 = vmatpush.bf16.msra.mxu0 %v10288_v17 }
  0x1c   :  { %258 = vmatpush.bf16.msra.mxu0 %v10272_v20 }
  0x20   :  { %259 = vmatpush.bf16.msra.mxu0 %v10256_v23 }
  0x23   :  { %260 = vmatmul.bf16.vlgmr.msra.gmra.mxu0 %v14729_v24 }
  0xa0   :  { %v261_v29 = vpop.f32.mrf.mxu0 }
  0xa1   :  { %v315_v30 = vadd.f32 %v261_v29, %v56_v25 }
  0xa3   :  { %v340_v34 = vperm.slane %v315_v30, 0  ;;  %v336_v35 = vrot.slane %v315_v30, 4  ;;  %v334_v36 = vrot.slane %v315_v30, 2  ;;  %v333_v37 = vrot.slane %v315_v30, 1 }
  0xa4   :  { %v337_v39 = vrot.slane %v315_v30, 5  ;;  %v335_v40 = vrot.slane %v315_v30, 3  ;;  %v338_v53 = vrot.slane %v315_v30, 6  ;;  %v339_v58 = vrot.slane %v315_v30, 7 }
  0xa5   :  { %v356_v41 = vadd.f32 %v14258_v31, %v340_v34  ;;  %v344_v42 = vperm.slane %v336_v35, 0  ;;  %v342_v43 = vperm.slane %v334_v36, 0  ;;  %v341_v44 = vperm.slane %v333_v37, 0 }
  0xa6   :  { %v345_v48 = vperm.slane %v337_v39, 0  ;;  %v343_v51 = vperm.slane %v335_v40, 0  ;;  %v346_v61 = vperm.slane %v338_v53, 0  ;;  %v347_v3 = vperm.slane %v339_v58, 0 }
  0xa7   :  { %14418 = vtanh.f32 %v356_v41  ;;  %v360_v46 = vadd.f32 %v14266_v32, %v344_v42  ;;  %v358_v47 = vadd.f32 %v14262_v33, %v342_v43  ;;  %v357_v52 = vadd.f32 %v14259_v38, %v341_v44  ;;  %v14884_v38 = vld [vmem:[%s20644_s5] sm:$0xff] }
  0xa8   :  { %v263_v49 = vpop.f32.mrf.mxu0  ;;  %v361_v56 = vadd.f32 %v14267_v45, %v345_v48  ;;  %v359_v57 = vadd.f32 %v14263_v50, %v343_v51  ;;  %v362_v5 = vadd.f32 %v14270_v60, %v346_v61  ;;  %v363_v7 = vadd.f32 %v14271_v2, %v347_v3  ;;  %v13517_v48 = vld [vmem:[%s20640_s6 + $0xec] sm:$0xf]  ;;  %v10377_v50 = vld [vmem:[%s20640_s6 + $0xf8] sm:$0xf0]  ;;  %v10359_v51 = vld [vmem:[%s20640_s6 + $0xc8] sm:$0xf] }
  0xa9   :  { %14420 = vtanh.f32 %v360_v46  ;;  %vm51_vm7 = vcmp.gt.f32.partialorder %v14884_v38, 0.0  ;;  %v10375_v46 = vld [vmem:[%s20640_s6 + $0xe8] sm:$0xf]  ;;  %v10380_v53 = vor.u32 %v13517_v48, %v10377_v50  ;;  %v13509_v2 = vld [vmem:[%s20640_s6 + $0xac] sm:$0xf] }
  0xaa   :  { %14422 = vtanh.f32 %v358_v47  ;;  %v13519_v47 = vld [vmem:[%s20640_s6 + $0xf4] sm:$0xf0]  ;;  %v10343_v60 = vld [vmem:[%s20640_s6 + $0xa8] sm:$0xf]  ;;  %v10345_v3 = vld [vmem:[%s20640_s6 + $0xb8] sm:$0xf0] }
  0xab   :  { %14424 = vtanh.f32 %v357_v52  ;;  %v10376_v49 = vor.u32 %v13519_v47, %v10375_v46  ;;  %v13515_v52 = vld [vmem:[%s20640_s6 + $0xd4] sm:$0xf0]  ;;  %291 = vmatpush.bf16.msra.mxu3 %v10380_v53  ;;  %v13492_v46 = vld [vmem:[%s20640_s6 + $0x24] sm:$0xf]  ;;  %v10273_v47 = vld [vmem:[%s20640_s6 + $0x30] sm:$0xf0] }
  0xac   :  { %14426 = vtanh.f32 %v361_v56  ;;  %v13513_v56 = vld [vmem:[%s20640_s6 + $0xcc] sm:$0xf]  ;;  %v10263_v50 = vld [vmem:[%s20640_s6 + $0x8] sm:$0xf] }
  0xad   :  { %v14419_v59 = vpop.eup %14418  ;;  %14428 = vtanh.f32 %v359_v57  ;;  %278 = vmatpush.bf16.msra.mxu2 %v10376_v49  ;;  %v10360_v57 = vor.u32 %v13515_v52, %v10359_v51  ;;  %v13491_v51 = vld [vmem:[%s20640_s6 + $0x14] sm:$0xf0]  ;;  %v10276_v52 = vor.u32 %v13492_v46, %v10273_v47  ;;  %v13489_v53 = vld [vmem:[%s20640_s6 + $0xc] sm:$0xf] }
  0xae   :  { %v376_v62 = vmul.f32 %v14419_v59, %v14410_v54  ;;  %14430 = vtanh.f32 %v362_v5  ;;  %v10361_v59 = vld [vmem:[%s20640_s6 + $0xd8] sm:$0xf0]  ;;  %v10337_v5 = vld [vmem:[%s20640_s6 + $0xb0] sm:$0xf0]  ;;  %v9387_v38 = vld [vmem:[%s20645_s4 + $0xc] sm:$0xf] }
  0xaf   :  { %v14421_v63 = vpop.eup %14420  ;;  %14432 = vtanh.f32 %v363_v7  ;;  %v10364_v61 = vor.u32 %v13513_v56, %v10361_v59  ;;  %v10348_v7 = vor.u32 %v13509_v2, %v10345_v3  ;;  %v476_v2 = vld [vmem:[%s20645_s4 + $0xc] sm:$0xf] }
  0xb0   :  { %v14423_v0 = vpop.eup %14422  ;;  %384 = vadd.xlane.f32.xlu0 %v376_v62  ;;  %v380_v1 = vmul.f32 %v14421_v63, %v14410_v54  ;;  %v13511_v62 = vld [vmem:[%s20640_s6 + $0xb4] sm:$0xf0]  ;;  %v13512_v63 = vld [vmem:[%s20640_s6 + $0xc4] sm:$0xf] }
  0xb1   :  { %v378_v4 = vmul.f32 %v14423_v0, %v14410_v54  ;;  %v14425_v6 = vpop.eup %14424  ;;  %v10353_v0 = vld [vmem:[%s20640_s6 + $0xd0] sm:$0xf0]  ;;  %279 = vmatpush.bf16.msra.mxu2 %v10360_v57  ;;  %292 = vmatpush.bf16.msra.mxu3 %v10364_v61  ;;  %v10264_v57 = vor.u32 %v13491_v51, %v10263_v50 }
  0xb2   :  { %392 = vadd.xlane.f32.xlu2 %v380_v1  ;;  %v14427_v8 = vpop.eup %14426  ;;  %v377_v10 = vmul.f32 %v14425_v6, %v14410_v54  ;;  %v10356_v1 = vor.u32 %v13512_v63, %v10353_v0  ;;  %v10344_v6 = vor.u32 %v13511_v62, %v10343_v60  ;;  %v13488_v62 = vld [vmem:[%s20640_s6 + $0x4] sm:$0xf]  ;;  %v10257_v63 = vld [vmem:[%s20640_s6 + $0x10] sm:$0xf0] }
  0xb3   :  { %388 = vadd.xlane.f32.xlu1 %v378_v4  ;;  %v14429_v9 = vpop.eup %14428  ;;  %v381_v11 = vmul.f32 %v14427_v8, %v14410_v54  ;;  %v13508_v4 = vld [vmem:[%s20640_s6 + $0xa4] sm:$0xf]  ;;  %v10327_v8 = vld [vmem:[%s20640_s6 + $0x88] sm:$0xf]  ;;  %v10260_v0 = vor.u32 %v13488_v62, %v10257_v63  ;;  %v10453_v63 = vld [vmem:[%s20646_s8 + $0x78] sm:$0xf0] }
  0xb4   :  { %v379_v12 = vmul.f32 %v14429_v9, %v14410_v54  ;;  %v14431_v13 = vpop.eup %14430  ;;  %v13507_v9 = vld [vmem:[%s20640_s6 + $0x94] sm:$0xf0] }
  0xb5   :  { %v14433_v14 = vpop.eup %14432  ;;  %v382_v15 = vmul.f32 %v14431_v13, %v14410_v54  ;;  %v13504_v13 = vld [vmem:[%s20640_s6 + $0x84] sm:$0xf]  ;;  %280 = vmatpush.bf16.msra.mxu2 %v10344_v6  ;;  %293 = vmatpush.bf16.msra.mxu3 %v10348_v7 }
  0xb6   :  { %v383_v16 = vmul.f32 %v14433_v14, %v14410_v54  ;;  %v13516_v54 = vld [vmem:[%s20640_s6 + $0xe4] sm:$0xf]  ;;  %v10321_v14 = vld [vmem:[%s20640_s6 + $0x90] sm:$0xf0] }
  0xb7   :  { %v10372_v58 = vor.u32 %v13516_v54, %v10369_v55  ;;  %v10265_v54 = vld [vmem:[%s20640_s6 + $0x18] sm:$0xf0]  ;;  %v14730_v55 = vmov 0.0  }
  0xb8   :  { %386 = vadd.xlane.f32.xlu0 %v377_v10  ;;  %v10340_v10 = vor.u32 %v13508_v4, %v10337_v5  ;;  %v15038_v56 = vsel %vm51_vm7, 1.0, %v14730_v55  ;;  %v10268_v59 = vor.u32 %v13489_v53, %v10265_v54  ;;  %v551_v4 = vsel %vm20655_vm9, %v476_v2, 0  ;;  %v473_v5 = vld [vmem:[%s20645_s4] sm:$0xf]  ;;  %v13533_v2 = vld [vmem:[%s20646_s8 + $0x64] sm:$0xf0] }
  0xb9   :  { %265 = vmatpush.bf16.msra.mxu1 %v10372_v58  ;;  %v488_v6 = vsel %vm20655_vm9, %v473_v5, 0  ;;  %v10445_v5 = vld [vmem:[%s20646_s8 + $0x68] sm:$0xf0] }
  0xba   :  { %394 = vadd.xlane.f32.xlu2 %v381_v11  ;;  %v13505_v11 = vld [vmem:[%s20640_s6 + $0x8c] sm:$0xf]  ;;  %497 = vmatpush.bf16.msrb.mxu0 %v488_v6  ;;  %v10435_v6 = vld [vmem:[%s20646_s8 + $0x50] sm:$0xf] }
  0xbb   :  { %390 = vadd.xlane.f32.xlu1 %v379_v12  ;;  %v10329_v12 = vld [vmem:[%s20640_s6 + $0x98] sm:$0xf0] }
  0xbd   :  { %266 = vmatpush.bf16.msra.mxu1 %v10356_v1  ;;  %v475_v1 = vld [vmem:[%s20645_s4 + $0x8] sm:$0xf] }
  0xbe   :  { %v530_v3 = vsel %vm20655_vm9, %v475_v1, 0  ;;  %v10443_v1 = vld [vmem:[%s20646_s8 + $0x60] sm:$0xf] }
  0xc0   :  { %396 = vadd.xlane.f32.xlu0 %v382_v15  ;;  %v10328_v15 = vor.u32 %v13507_v9, %v10327_v8  ;;  %v479_v8 = vld [vmem:[%s20645_s4 + $0x18] sm:$0xf] }
  0xc1   :  { %267 = vmatpush.bf16.msra.mxu1 %v10340_v10  ;;  %v614_v9 = vsel %vm20655_vm9, %v479_v8, 0  ;;  %v480_v10 = vld [vmem:[%s20645_s4 + $0x1c] sm:$0xf]  ;;  %v13530_v8 = vld [vmem:[%s20646_s8 + $0x54] sm:$0xf] }
  0xc2   :  { %281 = vmatpush.bf16.msra.mxu2 %v10328_v15 }
  0xc3   :  { %398 = vadd.xlane.f32.xlu1 %v383_v16  ;;  %v10332_v16 = vor.u32 %v13505_v11, %v10329_v12  ;;  %v477_v11 = vld [vmem:[%s20645_s4 + $0x10] sm:$0xf]  ;;  %v478_v12 = vld [vmem:[%s20645_s4 + $0x14] sm:$0xf] }
  0xc4   :  { %v593_v15 = vsel %vm20655_vm9, %v478_v12, 0  ;;  %v10427_v12 = vld [vmem:[%s20646_s8 + $0x40] sm:$0xf] }
  0xc5   :  { %294 = vmatpush.bf16.msra.mxu3 %v10332_v16 }
 0x123   :  { %v385_v17 = vpop.xlane.xlu0 %384 }
 0x124   :  { %v410_v23 = vperm.slane %v385_v17, %v14868_v21  ;;  %v10311_v17 = vld [vmem:[%s20640_s6 + $0x68] sm:$0xf] }
 0x125   :  { %v393_v19 = vpop.xlane.xlu2 %392 }
 0x126   :  { %v389_v20 = vpop.xlane.xlu1 %388  ;;  %v414_v31 = vperm.slane %v393_v19, %v14868_v21  ;;  %v10324_v19 = vor.u32 %v13504_v13, %v10321_v14  ;;  %v635_v13 = vsel %vm20655_vm9, %v480_v10, 0  ;;  %v572_v14 = vsel %vm20655_vm9, %v477_v11, 0  ;;  %v10437_v10 = vld [vmem:[%s20646_s8 + $0x58] sm:$0xf0] }
 0x127   :  { %v412_v26 = vperm.slane %v389_v20, %v14868_v21  ;;  %v13501_v20 = vld [vmem:[%s20640_s6 + $0x6c] sm:$0xf]  ;;  %581 = vmatpush.bf16.msra.mxu0 %v572_v14  ;;  %v10440_v11 = vor.u32 %v13530_v8, %v10437_v10  ;;  %v13528_v14 = vld [vmem:[%s20646_s8 + $0x44] sm:$0xf] }
 0x128   :  { %268 = vmatpush.bf16.msra.mxu1 %v10324_v19 }
 0x12b   :  { %v387_v22 = vpop.xlane.xlu0 %386 }
 0x12c   :  { %v411_v25 = vperm.slane %v387_v22, %v14868_v21  ;;  %v10313_v22 = vld [vmem:[%s20640_s6 + $0x78] sm:$0xf0] }
 0x12d   :  { %v395_v32 = vpop.xlane.xlu2 %394 }
 0x12e   :  { %v419_v27 = vsel %vm418_vm0, %v411_v25, %v410_v23  ;;  %v391_v28 = vpop.xlane.xlu1 %390  ;;  %v415_v35 = vperm.slane %v395_v32, %v14868_v21  ;;  %v13500_v23 = vld [vmem:[%s20640_s6 + $0x64] sm:$0xf]  ;;  %v10305_v25 = vld [vmem:[%s20640_s6 + $0x70] sm:$0xf0]  ;;  %v13497_v32 = vld [vmem:[%s20640_s6 + $0x4c] sm:$0xf] }
 0x12f   :  { %v413_v29 = vperm.slane %v391_v28, %v14868_v21  ;;  %v421_v30 = vsel %vm420_vm1, %v412_v26, %v419_v27  ;;  %v10312_v26 = vor.u32 %v13503_v18, %v10311_v17  ;;  %v10316_v27 = vor.u32 %v13501_v20, %v10313_v22  ;;  %v10295_v28 = vld [vmem:[%s20640_s6 + $0x48] sm:$0xf] }
 0x131   :  { %v423_v33 = vsel %vm422_vm2, %v413_v29, %v421_v30  ;;  %v13499_v29 = vld [vmem:[%s20640_s6 + $0x54] sm:$0xf0]  ;;  %282 = vmatpush.bf16.msra.mxu2 %v10312_v26  ;;  %295 = vmatpush.bf16.msra.mxu3 %v10316_v27 }
 0x132   :  { %v425_v34 = vsel %vm424_vm3, %v414_v31, %v423_v33  ;;  %v10308_v31 = vor.u32 %v13500_v23, %v10305_v25  ;;  %v10297_v33 = vld [vmem:[%s20640_s6 + $0x58] sm:$0xf0] }
 0x133   :  { %v397_v36 = vpop.xlane.xlu0 %396  ;;  %v427_v39 = vsel %vm426_vm4, %v415_v35, %v425_v34  ;;  %v13496_v35 = vld [vmem:[%s20640_s6 + $0x44] sm:$0xf] }
 0x134   :  { %v416_v37 = vperm.slane %v397_v36, %v14868_v21  ;;  %v10289_v36 = vld [vmem:[%s20640_s6 + $0x50] sm:$0xf0]  ;;  %269 = vmatpush.bf16.msra.mxu1 %v10308_v31 }
 0x136   :  { %v399_v40 = vpop.xlane.xlu1 %398  ;;  %v429_v41 = vsel %vm428_vm5, %v416_v37, %v427_v39  ;;  %v10296_v37 = vor.u32 %v13499_v29, %v10295_v28 }
 0x137   :  { %v417_v42 = vperm.slane %v399_v40, %v14868_v21  ;;  %v10300_v40 = vor.u32 %v13497_v32, %v10297_v33 }
 0x138   :  { %283 = vmatpush.bf16.msra.mxu2 %v10296_v37 }
 0x139   :  { %v431_v43 = vsel %vm430_vm6, %v417_v42, %v429_v41  ;;  %v10279_v41 = vld [vmem:[%s20640_s6 + $0x28] sm:$0xf]  ;;  %v13495_v42 = vld [vmem:[%s20640_s6 + $0x34] sm:$0xf0]  ;;  %296 = vmatpush.bf16.msra.mxu3 %v10300_v40 }
 0x13a   :  { %v14893_v44 = vsel %vm51_vm7, %v431_v43, -1e+30  ;;  %v10292_v43 = vor.u32 %v13496_v35, %v10289_v36  ;;  %v10280_v48 = vor.u32 %v13495_v42, %v10279_v41 }
 0x13b   :  { %v435_v45 = vsel %vm20656_vm8, %v14893_v44, -inf }
 0x13c   :  { %436 = vmax.xlane.f32.xlu2 %v435_v45  ;;  %v10281_v45 = vld [vmem:[%s20640_s6 + $0x38] sm:$0xf0]  ;;  %270 = vmatpush.bf16.msra.mxu1 %v10292_v43 }
 0x13d   :  { %284 = vmatpush.bf16.msra.mxu2 %v10280_v48 }
 0x140   :  { %271 = vmatpush.bf16.msra.mxu1 %v10276_v52 }
 0x141   :  { %285 = vmatpush.bf16.msra.mxu2 %v10264_v57 }
 0x144   :  { %286 = vmatmul.bf16.vlgmr.msra.gmra.mxu2 %v14729_v24  ;;  %272 = vmatpush.bf16.msra.mxu1 %v10260_v0 }
 0x145   :  { %539 = vmatpush.bf16.msrb.mxu2 %v530_v3  ;;  %v13532_v3 = vld [vmem:[%s20646_s8 + $0x64] sm:$0xf] }
 0x147   :  { %273 = vmatmul.bf16.vlgmr.msra.gmra.mxu1 %v14729_v24 }
 0x149   :  { %623 = vmatpush.bf16.msra.mxu2 %v614_v9 }
 0x1af   :  { %v437_v30 = vpop.xlane.xlu2 %436 }
 0x1b0   :  { %v438_v34 = vsub.f32 %v14893_v44, %v437_v30  ;;  %v13493_v44 = vld [vmem:[%s20640_s6 + $0x2c] sm:$0xf] }
 0x1b1   :  { %v10284_v49 = vor.u32 %v13493_v44, %v10281_v45 }
 0x1b2   :  { %v439_v39 = vmul.f32 1.442695, %v438_v34 }
 0x1b3   :  { %297 = vmatpush.bf16.msra.mxu3 %v10284_v49 }
 0x1b4   :  { %14434 = vpow2.f32 %v439_v39 }
 0x1b7   :  { %298 = vmatpush.bf16.msra.mxu3 %v10268_v59  ;;  %v10451_v59 = vld [vmem:[%s20646_s8 + $0x70] sm:$0xf] }
 0x1ba   :  { %v14435_v58 = vpop.eup %14434  ;;  %299 = vmatmul.bf16.vlgmr.msra.gmra.mxu3 %v14729_v24  ;;  %v474_v24 = vld [vmem:[%s20645_s4 + $0x4] sm:$0xf] }
 0x1bb   :  { %v441_v60 = vmul.f32 %v14435_v58, %v15038_v56  ;;  %560 = vmatpush.bf16.msrb.mxu3 %v551_v4  ;;  %v509_v7 = vsel %vm20655_vm9, %v474_v24, 0  ;;  %v10444_v4 = vor.u32 %v13533_v2, %v10443_v1  ;;  %v10448_v24 = vor.u32 %v13532_v3, %v10445_v5  ;;  %v10521_v3 = vld [vmem:[%s20647_s10 + $0x78] sm:$0xf] }
 0x1bc   :  { %518 = vmatpush.bf16.msrb.mxu1 %v509_v7  ;;  %v13531_v7 = vld [vmem:[%s20646_s8 + $0x54] sm:$0xf0] }
 0x1bd   :  { %v442_v61 = vsel %vm20656_vm8, %v441_v60, 0.0  ;;  %v10436_v9 = vor.u32 %v13531_v7, %v10435_v6  ;;  %v13575_v6 = vld [vmem:[%s20647_s10 + $0x7c] sm:$0xf]  ;;  %v10523_v7 = vld [vmem:[%s20647_s10 + $0x84] sm:$0xf0] }
 0x1be   :  { %443 = vadd.xlane.f32.xlu0 %v442_v61  ;;  %v13534_v61 = vld [vmem:[%s20646_s8 + $0x74] sm:$0xf] }
 0x1bf   :  { %644 = vmatpush.bf16.msra.mxu3 %v635_v13  ;;  %v10456_v0 = vor.u32 %v13534_v61, %v10453_v63  ;;  %v13529_v13 = vld [vmem:[%s20646_s8 + $0x44] sm:$0xf0]  ;;  %v13578_v61 = vld [vmem:[%s20647_s10 + $0x94] sm:$0xf] }
 0x1c0   :  { %602 = vmatpush.bf16.msra.mxu1 %v593_v15  ;;  %v10428_v15 = vor.u32 %v13529_v13, %v10427_v12 }
 0x1c4   :  { %v15099_v57 = vpop.f32.mrf.mxu1 }
 0x1c7   :  { %v15095_v52 = vpop.f32.mrf.mxu2 }
 0x1cc   :  { %v276_v58 = vpop.f32.mrf.mxu1 }
 0x1cd   :  { %v10533_v58 = vld [vmem:[%s20647_s10 + $0x90] sm:$0xf] }
 0x1cf   :  { %v289_v54 = vpop.f32.mrf.mxu2 }
 0x231   :  { %v444_v16 = vpop.xlane.xlu0 %443 }
 0x232   :  { %v445_v17 = vadd.f32 1e-30, %v444_v16  ;;  %v10429_v16 = vld [vmem:[%s20646_s8 + $0x48] sm:$0xf0] }
 0x234   :  { %14436 = vrcp.f32 %v445_v17  ;;  %v10432_v17 = vor.u32 %v13528_v14, %v10429_v16  ;;  %v10526_v14 = vor.u32 %v13575_v6, %v10523_v7  ;;  %v13573_v6 = vld [vmem:[%s20647_s10 + $0x68] sm:$0xf0] }
 0x23a   :  { %v14437_v18 = vpop.eup %14436 }
 0x23b   :  { %v447_v19 = vmul.f32 %v14437_v18, %v441_v60  ;;  %v13535_v60 = vld [vmem:[%s20646_s8 + $0x74] sm:$0xf0]  ;;  %v10419_v18 = vld [vmem:[%s20646_s8 + $0x30] sm:$0xf] }
 0x23c   :  { %v10452_v62 = vor.u32 %v13535_v60, %v10451_v59  ;;  %v13579_v59 = vld [vmem:[%s20647_s10 + $0x98] sm:$0xf0] }
 0x23d   :  { %v448_v20 = vpack.c.bf16 %v447_v19, %v447_v19  ;;  %v15097_v53 = vpop.f32.mrf.mxu3  ;;  %v13527_v19 = vld [vmem:[%s20646_s8 + $0x34] sm:$0xf0]  ;;  %v10534_v63 = vor.u32 %v13579_v59, %v10533_v58 }
 0x23f   :  { %v450_v22 = vrot.slane %v448_v20, 3 }
 0x241   :  { %v454_v23 = vsel %vm20654_vm10, %v448_v20, %v450_v22  ;;  %v456_v25 = vsel %vm418_vm0, %v448_v20, %v450_v22  ;;  %v459_v36 = vsel %vm420_vm1, %v448_v20, %v450_v22  ;;  %v462_v39 = vsel %vm422_vm2, %v448_v20, %v450_v22  ;;  %v13526_v20 = vld [vmem:[%s20646_s8 + $0x34] sm:$0xf] }
 0x242   :  { %v10381_v26 = vpack.i.b16 %v454_v23, %v454_v23  ;;  %v466_v27 = vunpack.i.h.s16 %v454_v23  ;;  %v458_v28 = vrot.slane %v456_v25, 1  ;;  %v461_v40 = vrot.slane %v459_v36, 2  ;;  %v10421_v23 = vld [vmem:[%s20646_s8 + $0x38] sm:$0xf0] }
 0x243   :  { %v464_v41 = vrot.slane %v462_v39, 3  ;;  %v10420_v22 = vor.u32 %v13527_v19, %v10419_v18  ;;  %v10424_v25 = vor.u32 %v13526_v20, %v10421_v23 }
 0x244   :  { %v482_v29 = vperm.slane %v10381_v26, 0  ;;  %v503_v30 = vpack.i.b16 %v466_v27, %v466_v27  ;;  %v10384_v31 = vpack.i.b16 %v458_v28, %v458_v28  ;;  %v468_v32 = vunpack.i.h.s16 %v458_v28  ;;  %v10411_v26 = vld [vmem:[%s20646_s8 + $0x20] sm:$0xf]  ;;  %v13525_v27 = vld [vmem:[%s20646_s8 + $0x24] sm:$0xf0] }
 0x245   :  { %v470_v42 = vunpack.i.h.s16 %v461_v40  ;;  %v10387_v43 = vpack.i.b16 %v461_v40, %v461_v40  ;;  %v472_v44 = vunpack.i.h.s16 %v464_v41  ;;  %v10390_v46 = vpack.i.b16 %v464_v41, %v464_v41  ;;  %v302_v55 = vpop.f32.mrf.mxu3  ;;  %v13524_v28 = vld [vmem:[%s20646_s8 + $0x24] sm:$0xf]  ;;  %v10395_v40 = vld [vmem:[%s20646_s8] sm:$0xf]  ;;  %v13521_v41 = vld [vmem:[%s20646_s8 + $0x4] sm:$0xf0] }
 0x246   :  { %10382 = vmatmul.msk.bf16.vlgmr.msrb.gmra.mxu0 %vm20656_vm8, %v482_v29  ;;  %v504_v33 = vperm.slane %v503_v30, 0  ;;  %v525_v34 = vperm.slane %v10384_v31, 0  ;;  %v545_v35 = vpack.i.b16 %v468_v32, %v468_v32  ;;  %v10412_v29 = vor.u32 %v13525_v27, %v10411_v26  ;;  %v10413_v30 = vld [vmem:[%s20646_s8 + $0x28] sm:$0xf0]  ;;  %v10403_v32 = vld [vmem:[%s20646_s8 + $0x10] sm:$0xf] }
 0x247   :  { %v587_v45 = vpack.i.b16 %v470_v42, %v470_v42  ;;  %v567_v47 = vperm.slane %v10387_v43, 0  ;;  %v629_v48 = vpack.i.b16 %v472_v44, %v472_v44  ;;  %v609_v50 = vperm.slane %v10390_v46, 0  ;;  %786 = vmatpush.bf16.msrb.mxu0 %v10452_v62  ;;  %v13520_v42 = vld [vmem:[%s20646_s8 + $0x4] sm:$0xf]  ;;  %v10547_v55 = vld [vmem:[%s20647_s10 + $0xb4] sm:$0xf0] }
 0x248   :  { %10383 = vmatmul.msk.bf16.vlgmr.msrb.gmra.mxu1 %vm20656_vm8, %v504_v33  ;;  %10385 = vmatmul.msk.bf16.vlgmr.msrb.gmra.mxu2 %vm20656_vm8, %v525_v34  ;;  %v546_v37 = vperm.slane %v545_v35, 0  ;;  %v10416_v31 = vor.u32 %v13524_v28, %v10413_v30  ;;  %v13523_v33 = vld [vmem:[%s20646_s8 + $0x14] sm:$0xf0]  ;;  %v13522_v34 = vld [vmem:[%s20646_s8 + $0x14] sm:$0xf]  ;;  %v10396_v44 = vor.u32 %v13521_v41, %v10395_v40 }
 0x249   :  { %v588_v49 = vperm.slane %v587_v45, 0  ;;  %v630_v51 = vperm.slane %v629_v48, 0  ;;  %799 = vmatpush.bf16.msrb.mxu1 %v10456_v0  ;;  %v10404_v36 = vor.u32 %v13523_v33, %v10403_v32  ;;  %v10397_v45 = vld [vmem:[%s20646_s8 + $0x8] sm:$0xf0]  ;;  %v10545_v48 = vld [vmem:[%s20647_s10 + $0xa8] sm:$0xf] }
 0x24a   :  { %10386 = vmatmul.msk.bf16.vlgmr.msrb.gmra.mxu3 %vm20656_vm8, %v546_v37  ;;  %v10405_v37 = vld [vmem:[%s20646_s8 + $0x18] sm:$0xf0]  ;;  %v10535_v62 = vld [vmem:[%s20647_s10 + $0x9c] sm:$0xf0] }
 0x24b   :  { %787 = vmatpush.bf16.msrb.mxu0 %v10444_v4  ;;  %v10408_v39 = vor.u32 %v13522_v34, %v10405_v37  ;;  %v10538_v2 = vor.u32 %v13578_v61, %v10535_v62  ;;  %v13576_v4 = vld [vmem:[%s20647_s10 + $0x80] sm:$0xf0] }
 0x24c   :  { %v10522_v13 = vor.u32 %v13576_v4, %v10521_v3 }
 0x24d   :  { %800 = vmatpush.bf16.msrb.mxu1 %v10448_v24 }
 0x24f   :  { %788 = vmatpush.bf16.msrb.mxu0 %v10436_v9 }
 0x251   :  { %801 = vmatpush.bf16.msrb.mxu1 %v10440_v11 }
 0x253   :  { %789 = vmatpush.bf16.msrb.mxu0 %v10428_v15 }
 0x255   :  { %802 = vmatpush.bf16.msrb.mxu1 %v10432_v17 }
 0x256   :  { %10388 = vmatmul.msk.bf16.vlgmr.msra.gmra.mxu0 %vm20656_vm8, %v567_v47  ;;  %v10400_v47 = vor.u32 %v13520_v42, %v10397_v45 }
 0x257   :  { %790 = vmatpush.bf16.msrb.mxu0 %v10420_v22 }
 0x258   :  { %10389 = vmatmul.msk.bf16.vlgmr.msra.gmra.mxu1 %vm20656_vm8, %v588_v49  ;;  %10391 = vmatmul.msk.bf16.vlgmr.msra.gmra.mxu2 %vm20656_vm8, %v609_v50  ;;  %v13582_v49 = vld [vmem:[%s20647_s10 + $0xb0] sm:$0xf0]  ;;  %v13581_v50 = vld [vmem:[%s20647_s10 + $0xac] sm:$0xf] }
 0x259   :  { %803 = vmatpush.bf16.msrb.mxu1 %v10424_v25  ;;  %v10546_v54 = vor.u32 %v13582_v49, %v10545_v48  ;;  %v10550_v60 = vor.u32 %v13581_v50, %v10547_v55 }
 0x25a   :  { %10392 = vmatmul.msk.bf16.vlgmr.msra.gmra.mxu3 %vm20656_vm8, %v630_v51 }
 0x25b   :  { %791 = vmatpush.bf16.msrb.mxu0 %v10412_v29  ;;  %1071 = vmatpush.bf16.msrb.mxu2 %v10546_v54 }
 0x25c   :  { %1084 = vmatpush.bf16.msrb.mxu3 %v10550_v60 }
 0x25d   :  { %804 = vmatpush.bf16.msrb.mxu1 %v10416_v31 }
 0x25f   :  { %792 = vmatpush.bf16.msrb.mxu0 %v10404_v36  ;;  %1072 = vmatpush.bf16.msrb.mxu2 %v10534_v63 }
 0x260   :  { %1085 = vmatpush.bf16.msrb.mxu3 %v10538_v2 }
 0x261   :  { %805 = vmatpush.bf16.msrb.mxu1 %v10408_v39 }
 0x263   :  { %793 = vmatpush.bf16.msrb.mxu0 %v10396_v44  ;;  %1073 = vmatpush.bf16.msrb.mxu2 %v10522_v13  ;;  %v10641_v13 = vld [vmem:[%s20648_s9 + $0xa8] sm:$0xf] }
 0x264   :  { %1086 = vmatpush.bf16.msrb.mxu3 %v10526_v14  ;;  %v13558_v14 = vld [vmem:[%s20648_s9 + $0xb0] sm:$0xf0] }
 0x265   :  { %806 = vmatpush.bf16.msrb.mxu1 %v10400_v47 }
 0x2c3   :  { %v499_v35 = vpop.f32.mrf.mxu0 }
 0x2c4   :  { %v650_v18 = vpack.c.bf16 %v499_v35, %v499_v35 }
 0x2c5   :  { %v520_v43 = vpop.f32.mrf.mxu1 }
 0x2c6   :  { %v861_v46 = vrot.slane %v520_v43, 7  ;;  %v651_v5 = vpack.c.bf16 %v520_v43, %v520_v43  ;;  %v682_v28 = vunpack.c.l.b16 %v650_v18  ;;  %v13570_v18 = vld [vmem:[%s20647_s10 + $0x50] sm:$0xf0] }
 0x2c8   :  { %v862_v51 = vsel %vm418_vm0, %v861_v46, %v499_v35  ;;  %v683_v15 = vunpack.c.l.b16 %v651_v5 }
 0x2ca   :  { %v690_v23 = vrot.slane %v683_v15, 7 }
 0x2cb   :  { %v501_v0 = vpop.f32.mrf.mxu0  ;;  %v541_v1 = vpop.f32.mrf.mxu2 }
 0x2cc   :  { %v863_v24 = vrot.slane %v541_v1, 6  ;;  %v652_v8 = vpack.c.bf16 %v541_v1, %v541_v1  ;;  %v691_v35 = vsel %vm418_vm0, %v690_v23, %v682_v28  ;;  %v10541_v23 = vld [vmem:[%s20647_s10 + $0x98] sm:$0xf]  ;;  %v10629_v28 = vld [vmem:[%s20648_s9 + $0x90] sm:$0xf] }
 0x2cd   :  { %v522_v9 = vpop.f32.mrf.mxu1  ;;  %v562_v10 = vpop.f32.mrf.mxu3 }
 0x2ce   :  { %v864_v11 = vsel %vm420_vm1, %v863_v24, %v862_v51  ;;  %v865_v12 = vrot.slane %v562_v10, 5  ;;  %v653_v16 = vpack.c.bf16 %v562_v10, %v562_v10  ;;  %v684_v19 = vunpack.c.l.b16 %v652_v8  ;;  %v10509_v24 = vld [vmem:[%s20647_s10 + $0x60] sm:$0xf]  ;;  %v13572_v8 = vld [vmem:[%s20647_s10 + $0x64] sm:$0xf] }
 0x2cf   :  { %v10510_v7 = vor.u32 %v13573_v6, %v10509_v24  ;;  %v10511_v9 = vld [vmem:[%s20647_s10 + $0x6c] sm:$0xf0]  ;;  %v10593_v24 = vld [vmem:[%s20648_s9 + $0x48] sm:$0xf]  ;;  %v13546_v6 = vld [vmem:[%s20648_s9 + $0x50] sm:$0xf0] }
 0x2d0   :  { %v866_v17 = vsel %vm422_vm2, %v865_v12, %v864_v11  ;;  %v685_v25 = vunpack.c.l.b16 %v653_v16  ;;  %v692_v29 = vrot.slane %v684_v19, 6  ;;  %v10553_v10 = vld [vmem:[%s20647_s10 + $0xb0] sm:$0xf]  ;;  %v10514_v11 = vor.u32 %v13572_v8, %v10511_v9  ;;  %v13583_v12 = vld [vmem:[%s20647_s10 + $0xb8] sm:$0xf0] }
 0x2d1   :  { %1074 = vmatpush.bf16.msrb.mxu2 %v10510_v7  ;;  %v10554_v15 = vor.u32 %v13583_v12, %v10553_v10  ;;  %v10642_v16 = vor.u32 %v13558_v14, %v10641_v13  ;;  %v13569_v19 = vld [vmem:[%s20647_s10 + $0x4c] sm:$0xf]  ;;  %v10594_v8 = vor.u32 %v13546_v6, %v10593_v24  ;;  %v10643_v9 = vld [vmem:[%s20648_s9 + $0xb4] sm:$0xf0]  ;;  %v10649_v10 = vld [vmem:[%s20648_s9 + $0xb0] sm:$0xf] }
 0x2d2   :  { %v694_v37 = vrot.slane %v685_v25, 5  ;;  %v693_v40 = vsel %vm420_vm1, %v692_v29, %v691_v35  ;;  %1087 = vmatpush.bf16.msrb.mxu3 %v10514_v11  ;;  %v13580_v25 = vld [vmem:[%s20647_s10 + $0xa0] sm:$0xf0]  ;;  %v13555_v29 = vld [vmem:[%s20648_s9 + $0x98] sm:$0xf0] }
 0x2d3   :  { %v543_v20 = vpop.f32.mrf.mxu2  ;;  %v583_v22 = vpop.f32.mrf.mxu0  ;;  %1097 = vmatpush.bf16.msra.mxu0 %v10554_v15  ;;  %1238 = vmatpush.bf16.msra.mxu1 %v10642_v16  ;;  %v10529_v35 = vld [vmem:[%s20647_s10 + $0x80] sm:$0xf]  ;;  %v13557_v7 = vld [vmem:[%s20648_s9 + $0xac] sm:$0xf]  ;;  %v13559_v11 = vld [vmem:[%s20648_s9 + $0xb8] sm:$0xf0] }
 0x2d4   :  { %v654_v26 = vpack.c.bf16 %v583_v22, %v583_v22  ;;  %v867_v27 = vrot.slane %v583_v22, 4  ;;  %v695_v45 = vsel %vm422_vm2, %v694_v37, %v693_v40  ;;  %v10499_v22 = vld [vmem:[%s20647_s10 + $0x54] sm:$0xf0]  ;;  %v13577_v37 = vld [vmem:[%s20647_s10 + $0x88] sm:$0xf0]  ;;  %v10646_v12 = vor.u32 %v13557_v7, %v10643_v9 }
 0x2d5   :  { %v564_v30 = vpop.f32.mrf.mxu3  ;;  %v604_v31 = vpop.f32.mrf.mxu1  ;;  %v10530_v40 = vor.u32 %v13577_v37, %v10529_v35  ;;  %v10650_v13 = vor.u32 %v13559_v11, %v10649_v10  ;;  %v10493_v14 = vld [vmem:[%s20647_s10 + $0x38] sm:$0xf]  ;;  %v13568_v15 = vld [vmem:[%s20647_s10 + $0x40] sm:$0xf0]  ;;  %v10581_v16 = vld [vmem:[%s20648_s9 + $0x30] sm:$0xf] }
 0x2d6   :  { %v686_v32 = vunpack.c.l.b16 %v654_v26  ;;  %v868_v33 = vsel %vm424_vm3, %v867_v27, %v866_v17  ;;  %v655_v34 = vpack.c.bf16 %v604_v31, %v604_v31  ;;  %v869_v36 = vrot.slane %v604_v31, 3  ;;  %v10497_v17 = vld [vmem:[%s20647_s10 + $0x48] sm:$0xf]  ;;  %v10485_v31 = vld [vmem:[%s20647_s10 + $0x30] sm:$0xf] }
 0x2d7   :  { %v10498_v20 = vor.u32 %v13570_v18, %v10497_v17  ;;  %v10502_v26 = vor.u32 %v13569_v19, %v10499_v22  ;;  %v10542_v27 = vor.u32 %v13580_v25, %v10541_v23  ;;  %v10630_v30 = vor.u32 %v13555_v29, %v10629_v28  ;;  %v13543_v18 = vld [vmem:[%s20648_s9 + $0x38] sm:$0xf0]  ;;  %v13554_v19 = vld [vmem:[%s20648_s9 + $0x94] sm:$0xf]  ;;  %v10637_v25 = vld [vmem:[%s20648_s9 + $0x98] sm:$0xf] }
 0x2d8   :  { %v870_v39 = vsel %vm426_vm4, %v869_v36, %v868_v33  ;;  %v696_v41 = vrot.slane %v686_v32, 4  ;;  %v687_v42 = vunpack.c.l.b16 %v655_v34  ;;  %v13567_v32 = vld [vmem:[%s20647_s10 + $0x38] sm:$0xf0]  ;;  %v13566_v33 = vld [vmem:[%s20647_s10 + $0x34] sm:$0xf]  ;;  %v10494_v17 = vor.u32 %v13568_v15, %v10493_v14  ;;  %v57_v28 = vld [vmem:[%s20649_s2] sm:$0xff] }
 0x2d9   :  { %1075 = vmatpush.bf16.msrb.mxu2 %v10498_v20  ;;  %1088 = vmatpush.bf16.msrb.mxu3 %v10502_v26  ;;  %v10486_v34 = vor.u32 %v13567_v32, %v10485_v31  ;;  %v10487_v36 = vld [vmem:[%s20647_s10 + $0x3c] sm:$0xf0]  ;;  %v10582_v22 = vor.u32 %v13543_v18, %v10581_v16  ;;  %v13556_v26 = vld [vmem:[%s20648_s9 + $0xa0] sm:$0xf0]  ;;  %v58_v29 = vld [vmem:[%s20649_s2 + $0x8] sm:$0xff] }
 0x2da   :  { %v697_v48 = vsel %vm424_vm3, %v696_v41, %v695_v45  ;;  %v698_v49 = vrot.slane %v687_v42, 3  ;;  %1098 = vmatpush.bf16.msra.mxu0 %v10542_v27  ;;  %1239 = vmatpush.bf16.msra.mxu1 %v10630_v30  ;;  %v10617_v41 = vld [vmem:[%s20648_s9 + $0x78] sm:$0xf]  ;;  %v13552_v42 = vld [vmem:[%s20648_s9 + $0x80] sm:$0xf0]  ;;  %v10638_v30 = vor.u32 %v13556_v26, %v10637_v25 }
 0x2db   :  { %v585_v43 = vpop.f32.mrf.mxu0  ;;  %v625_v44 = vpop.f32.mrf.mxu2  ;;  %v13564_v45 = vld [vmem:[%s20647_s10 + $0x20] sm:$0xf0]  ;;  %v10631_v20 = vld [vmem:[%s20648_s9 + $0x9c] sm:$0xf0]  ;;  %v13565_v31 = vld [vmem:[%s20647_s10 + $0x28] sm:$0xf0] }
 0x2dc   :  { %v656_v46 = vpack.c.bf16 %v625_v44, %v625_v44  ;;  %v871_v47 = vrot.slane %v625_v44, 2  ;;  %v699_v63 = vsel %vm426_vm4, %v698_v49, %v697_v48  ;;  %v10618_v43 = vor.u32 %v13552_v42, %v10617_v41  ;;  %v10473_v44 = vld [vmem:[%s20647_s10 + $0x18] sm:$0xf]  ;;  %v10475_v48 = vld [vmem:[%s20647_s10 + $0x24] sm:$0xf0] }
 0x2dd   :  { %v606_v50 = vpop.f32.mrf.mxu1  ;;  %v646_v51 = vpop.f32.mrf.mxu3  ;;  %1076 = vmatpush.bf16.msrb.mxu2 %v10486_v34  ;;  %v10517_v49 = vld [vmem:[%s20647_s10 + $0x68] sm:$0xf]  ;;  %v10634_v23 = vor.u32 %v13554_v19, %v10631_v20  ;;  %v10481_v27 = vld [vmem:[%s20647_s10 + $0x20] sm:$0xf]  ;;  %v10569_v32 = vld [vmem:[%s20648_s9 + $0x18] sm:$0xf] }
 0x2de   :  { %v688_v54 = vunpack.c.l.b16 %v656_v46  ;;  %v872_v55 = vsel %vm428_vm5, %v871_v47, %v870_v39  ;;  %v657_v58 = vpack.c.bf16 %v646_v51, %v646_v51  ;;  %v873_v59 = vrot.slane %v646_v51, 1  ;;  %v13563_v46 = vld [vmem:[%s20647_s10 + $0x1c] sm:$0xf]  ;;  %1099 = vmatpush.bf16.msra.mxu0 %v10530_v40  ;;  %1240 = vmatpush.bf16.msra.mxu1 %v10618_v43  ;;  %v13574_v50 = vld [vmem:[%s20647_s10 + $0x70] sm:$0xf0] }
 0x2df   :  { %v10490_v39 = vor.u32 %v13566_v33, %v10487_v36  ;;  %v10474_v47 = vor.u32 %v13564_v45, %v10473_v44  ;;  %v10478_v51 = vor.u32 %v13563_v46, %v10475_v48  ;;  %v13540_v33 = vld [vmem:[%s20648_s9 + $0x20] sm:$0xf0]  ;;  %v13551_v34 = vld [vmem:[%s20648_s9 + $0x7c] sm:$0xf]  ;;  %v10619_v36 = vld [vmem:[%s20648_s9 + $0x84] sm:$0xf0]  ;;  %v10482_v37 = vor.u32 %v13565_v31, %v10481_v27 }
 0x2e0   :  { %v700_v60 = vrot.slane %v688_v54, 2  ;;  %v689_v61 = vunpack.c.l.b16 %v657_v58  ;;  %v15244_v62 = vsel %vm430_vm6, %v873_v59, %v872_v55  ;;  %v10518_v54 = vor.u32 %v13574_v50, %v10517_v49  ;;  %v10605_v55 = vld [vmem:[%s20648_s9 + $0x60] sm:$0xf]  ;;  %v13549_v58 = vld [vmem:[%s20648_s9 + $0x68] sm:$0xf0] }
 0x2e1   :  { %1089 = vmatpush.bf16.msrb.mxu3 %v10490_v39  ;;  %1077 = vmatpush.bf16.msrb.mxu2 %v10474_v47  ;;  %v10606_v59 = vor.u32 %v13549_v58, %v10605_v55  ;;  %v10625_v35 = vld [vmem:[%s20648_s9 + $0x80] sm:$0xf]  ;;  %v10570_v39 = vor.u32 %v13540_v33, %v10569_v32  ;;  %v13553_v40 = vld [vmem:[%s20648_s9 + $0x88] sm:$0xf0]  ;;  %v10469_v41 = vld [vmem:[%s20647_s10 + $0x8] sm:$0xf]  ;;  %v10622_v43 = vor.u32 %v13551_v34, %v10619_v36 }
 0x2e2   :  { %v701_v0 = vsel %vm428_vm5, %v700_v60, %v699_v63  ;;  %v702_v1 = vrot.slane %v689_v61, 1  ;;  %v10461_v60 = vld [vmem:[%s20647_s10] sm:$0xf]  ;;  %v13561_v61 = vld [vmem:[%s20647_s10 + $0x8] sm:$0xf0]  ;;  %1100 = vmatpush.bf16.msra.mxu0 %v10518_v54  ;;  %v10626_v44 = vor.u32 %v13553_v40, %v10625_v35 }
 0x2e3   :  { %v627_v2 = vpop.f32.mrf.mxu2  ;;  %v13560_v63 = vld [vmem:[%s20647_s10 + $0x4] sm:$0xf]  ;;  %1241 = vmatpush.bf16.msra.mxu1 %v10606_v59  ;;  %v13562_v42 = vld [vmem:[%s20647_s10 + $0x10] sm:$0xf0]  ;;  %v10557_v45 = vld [vmem:[%s20648_s9] sm:$0xf] }
 0x2e4   :  { %v703_v3 = vsel %vm430_vm6, %v702_v1, %v701_v0  ;;  %v10462_v0 = vor.u32 %v13561_v61, %v10461_v60  ;;  %v10463_v1 = vld [vmem:[%s20647_s10 + $0xc] sm:$0xf0]  ;;  %v13537_v46 = vld [vmem:[%s20648_s9 + $0x8] sm:$0xf0]  ;;  %v13548_v47 = vld [vmem:[%s20648_s9 + $0x64] sm:$0xf]  ;;  %v10470_v59 = vor.u32 %v13562_v42, %v10469_v41 }
 0x2e5   :  { %v648_v4 = vpop.f32.mrf.mxu3  ;;  %v704_v5 = vpack.c.b16 %v703_v3, %v703_v3  ;;  %1090 = vmatpush.bf16.msrb.mxu3 %v10478_v51  ;;  %v10505_v2 = vld [vmem:[%s20647_s10 + $0x50] sm:$0xf]  ;;  %v13571_v3 = vld [vmem:[%s20647_s10 + $0x58] sm:$0xf0]  ;;  %v10613_v51 = vld [vmem:[%s20648_s9 + $0x68] sm:$0xf]  ;;  %v10558_v60 = vor.u32 %v13537_v46, %v10557_v45 }
 0x2e6   :  { %v10466_v4 = vor.u32 %v13560_v63, %v10463_v1  ;;  %1078 = vmatpush.bf16.msrb.mxu2 %v10462_v0  ;;  %v10607_v50 = vld [vmem:[%s20648_s9 + $0x6c] sm:$0xf0]  ;;  %v13550_v54 = vld [vmem:[%s20648_s9 + $0x70] sm:$0xf0]  ;;  %v10583_v10 = vld [vmem:[%s20648_s9 + $0x3c] sm:$0xf0] }
 0x2e7   :  { %794 = vmatmul.bf16.vlgmr.msrb.gmra.mxu0 %v704_v5  ;;  %807 = vmatmul.bf16.vlgmr.msrb.gmra.mxu1 %v704_v5  ;;  %v10506_v5 = vor.u32 %v13571_v3, %v10505_v2  ;;  %v10610_v0 = vor.u32 %v13548_v47, %v10607_v50  ;;  %v10614_v1 = vor.u32 %v13550_v54, %v10613_v51  ;;  %v13545_v2 = vld [vmem:[%s20648_s9 + $0x4c] sm:$0xf]  ;;  %v10595_v3 = vld [vmem:[%s20648_s9 + $0x54] sm:$0xf0]  ;;  %v13542_v7 = vld [vmem:[%s20648_s9 + $0x34] sm:$0xf] }
 0x2e8   :  { %1242 = vmatpush.bf16.msra.mxu1 %v10594_v8  ;;  %v10598_v24 = vor.u32 %v13545_v2, %v10595_v3  ;;  %v10589_v11 = vld [vmem:[%s20648_s9 + $0x38] sm:$0xf]  ;;  %v10586_v14 = vor.u32 %v13542_v7, %v10583_v10  ;;  %v13539_v16 = vld [vmem:[%s20648_s9 + $0x1c] sm:$0xf]  ;;  %v10577_v20 = vld [vmem:[%s20648_s9 + $0x20] sm:$0xf] }
 0x2e9   :  { %1091 = vmatpush.bf16.msrb.mxu3 %v10466_v4  ;;  %1101 = vmatpush.bf16.msra.mxu0 %v10506_v5  ;;  %v10601_v4 = vld [vmem:[%s20648_s9 + $0x50] sm:$0xf]  ;;  %v13547_v5 = vld [vmem:[%s20648_s9 + $0x58] sm:$0xf0]  ;;  %v13536_v27 = vld [vmem:[%s20648_s9 + $0x4] sm:$0xf] }
 0x2ea   :  { %1251 = vmatpush.bf16.msra.mxu2 %v10646_v12  ;;  %v10602_v6 = vor.u32 %v13547_v5, %v10601_v4  ;;  %v13544_v12 = vld [vmem:[%s20648_s9 + $0x40] sm:$0xf0]  ;;  %v15516_v2 = vld [vmem:[%s20651_s12] sm:$0x7]  ;;  %v13614_v4 = vld [vmem:[%s20640_s6 + $0xec] sm:$0xf0] }
 0x2eb   :  { %v10590_v15 = vor.u32 %v13544_v12, %v10589_v11  ;;  %v10771_v3 = vld [vmem:[%s20640_s6 + $0xe0] sm:$0xf]  ;;  %v13612_v5 = vld [vmem:[%s20640_s6 + $0xe4] sm:$0xf]  ;;  %v10779_v7 = vld [vmem:[%s20640_s6 + $0xe8] sm:$0xf] }
 0x2ec   :  { %1243 = vmatpush.bf16.msra.mxu1 %v10582_v22  ;;  %v13541_v22 = vld [vmem:[%s20648_s9 + $0x28] sm:$0xf0] }
 0x2ed   :  { %1264 = vmatpush.bf16.msra.mxu3 %v10650_v13  ;;  %1102 = vmatpush.bf16.msra.mxu0 %v10494_v17  ;;  %v10571_v17 = vld [vmem:[%s20648_s9 + $0x24] sm:$0xf0]  ;;  %v10578_v26 = vor.u32 %v13541_v22, %v10577_v20  ;;  %v10755_v20 = vld [vmem:[%s20640_s6 + $0xc0] sm:$0xf]  ;;  %v13610_v22 = vld [vmem:[%s20640_s6 + $0xcc] sm:$0xf0] }
 0x2ee   :  { %1252 = vmatpush.bf16.msra.mxu2 %v10634_v23  ;;  %v10574_v25 = vor.u32 %v13539_v16, %v10571_v17 }
 0x2f0   :  { %1244 = vmatpush.bf16.msra.mxu1 %v10570_v39 }
 0x2f1   :  { %1265 = vmatpush.bf16.msra.mxu3 %v10638_v30  ;;  %1103 = vmatpush.bf16.msra.mxu0 %v10482_v37  ;;  %v13538_v30 = vld [vmem:[%s20648_s9 + $0x10] sm:$0xf0] }
 0x2f2   :  { %1253 = vmatpush.bf16.msra.mxu2 %v10622_v43 }
 0x2f4   :  { %1245 = vmatpush.bf16.msra.mxu1 %v10558_v60 }
 0x2f5   :  { %1266 = vmatpush.bf16.msra.mxu3 %v10626_v44  ;;  %1104 = vmatpush.bf16.msra.mxu0 %v10470_v59 }
 0x2f6   :  { %1254 = vmatpush.bf16.msra.mxu2 %v10610_v0 }
 0x2f9   :  { %1267 = vmatpush.bf16.msra.mxu3 %v10614_v1 }
 0x2fa   :  { %1255 = vmatpush.bf16.msra.mxu2 %v10598_v24  ;;  %v10772_v24 = vor.u32 %v13614_v4, %v10771_v3 }
 0x2fc   :  { %1536 = vmatpush.bf16.msrb.mxu0 %v10772_v24  ;;  %v10733_v24 = vld [vmem:[%s20640_s6 + $0x98] sm:$0xf0] }
 0x2fd   :  { %1268 = vmatpush.bf16.msra.mxu3 %v10602_v6  ;;  %v10773_v6 = vld [vmem:[%s20640_s6 + $0xf0] sm:$0xf0] }
 0x2fe   :  { %1256 = vmatpush.bf16.msra.mxu2 %v10586_v14  ;;  %v10776_v11 = vor.u32 %v13612_v5, %v10773_v6  ;;  %v10781_v14 = vld [vmem:[%s20640_s6 + $0xf8] sm:$0xf0]  ;;  %v13601_v5 = vld [vmem:[%s20640_s6 + $0x8c] sm:$0xf] }
 0x2ff   :  { %v10736_v6 = vor.u32 %v13601_v5, %v10733_v24  ;;  %v10661_v24 = vld [vmem:[%s20640_s6 + $0x10] sm:$0xf0] }
 0x300   :  { %1549 = vmatpush.bf16.msrb.mxu1 %v10776_v11  ;;  %v10709_v11 = vld [vmem:[%s20640_s6 + $0x70] sm:$0xf0] }
 0x301   :  { %1269 = vmatpush.bf16.msra.mxu3 %v10590_v15 }
 0x302   :  { %1257 = vmatpush.bf16.msra.mxu2 %v10574_v25  ;;  %v10756_v25 = vor.u32 %v13610_v22, %v10755_v20  ;;  %v13597_v20 = vld [vmem:[%s20640_s6 + $0x6c] sm:$0xf]  ;;  %v10717_v22 = vld [vmem:[%s20640_s6 + $0x78] sm:$0xf0] }
 0x304   :  { %1537 = vmatpush.bf16.msrb.mxu0 %v10756_v25 }
 0x305   :  { %1270 = vmatpush.bf16.msra.mxu3 %v10578_v26  ;;  %v10757_v26 = vld [vmem:[%s20640_s6 + $0xd0] sm:$0xf0] }
 0x364   :  { %v795_v48 = vpop.f32.mrf.mxu0  ;;  %v808_v49 = vpop.f32.mrf.mxu1 }
 0x365   :  { %v812_v55 = vadd.f32 %v795_v48, %v57_v28  ;;  %v813_v58 = vadd.f32 %v808_v49, %v58_v29  ;;  %v10559_v28 = vld [vmem:[%s20648_s9 + $0xc] sm:$0xf0]  ;;  %v10565_v29 = vld [vmem:[%s20648_s9 + $0x8] sm:$0xf]  ;;  %v55_v48 = vld [vmem:[%s20650_s0] sm:$0xff] }
 0x366   :  { %v10562_v31 = vor.u32 %v13536_v27, %v10559_v28  ;;  %v10566_v32 = vor.u32 %v13538_v30, %v10565_v29  ;;  %v10763_v27 = vld [vmem:[%s20640_s6 + $0xc8] sm:$0xf]  ;;  %v13611_v28 = vld [vmem:[%s20640_s6 + $0xd4] sm:$0xf0] }
 0x367   :  { %v10457_v61 = vmul.f32 -1.442695, %v812_v55  ;;  %v10458_v63 = vmul.f32 -1.442695, %v813_v58 }
 0x368   :  { %1258 = vmatpush.bf16.msra.mxu2 %v10562_v31  ;;  %1271 = vmatpush.bf16.msra.mxu3 %v10566_v32 }
 0x369   :  { %14438 = vpow2.f32 %v10457_v61 }
 0x36a   :  { %14440 = vpow2.f32 %v10458_v63 }
 0x36c   :  { %v797_v8 = vpop.f32.mrf.mxu0  ;;  %v810_v9 = vpop.f32.mrf.mxu1 }
 0x36d   :  { %v13615_v8 = vld [vmem:[%s20640_s6 + $0xf4] sm:$0xf0]  ;;  %v306_v9 = vperm.slane %v15516_v2, 0 }
 0x36e   :  { %v10780_v12 = vor.u32 %v13615_v8, %v10779_v7  ;;  %v10707_v7 = vld [vmem:[%s20640_s6 + $0x60] sm:$0xf]  ;;  %v13598_v8 = vld [vmem:[%s20640_s6 + $0x6c] sm:$0xf0] }
 0x36f   :  { %v14439_v13 = vpop.eup %14438  ;;  %v312_v29 = vadd.f32 %v306_v9, %v15099_v57  ;;  %v10739_v57 = vld [vmem:[%s20640_s6 + $0xa0] sm:$0xf]  ;;  %v13596_v9 = vld [vmem:[%s20640_s6 + $0x64] sm:$0xf] }
 0x370   :  { %v14441_v18 = vpop.eup %14440  ;;  %v820_v19 = vadd.f32 1.0, %v14439_v13  ;;  %v13613_v13 = vld [vmem:[%s20640_s6 + $0xec] sm:$0xf] }
 0x371   :  { %v821_v23 = vadd.f32 1.0, %v14441_v18  ;;  %v10784_v17 = vor.u32 %v13613_v13, %v10781_v14  ;;  %v13599_v13 = vld [vmem:[%s20640_s6 + $0x74] sm:$0xf0] }
 0x372   :  { %14442 = vrcp.f32 %v820_v19  ;;  %v833_v40 = vand.u32 2147483648, %v820_v19  ;;  %v831_v43 = vand.u32 2147483647, %v820_v19  ;;  %vm827_vm13 = vweird.f32 %v820_v19 }
 0x373   :  { %14444 = vrcp.f32 %v821_v23  ;;  %v848_v41 = vand.u32 2147483648, %v821_v23  ;;  %v846_v45 = vand.u32 2147483647, %v821_v23  ;;  %vm842_vm14 = vweird.f32 %v821_v23 }
 0x374   :  { %v834_v49 = vor.u32 1.1754944e-38, %v833_v40  ;;  %vm832_vm9 = vcmp.eq.f32.partialorder %v831_v43, 8.507059e+37  ;;  %v13604_v40 = vld [vmem:[%s20640_s6 + $0xa4] sm:$0xf]  ;;  %v10747_v43 = vld [vmem:[%s20640_s6 + $0xa8] sm:$0xf] }
 0x375   :  { %v849_v50 = vor.u32 1.1754944e-38, %v848_v41  ;;  %vm847_vm8 = vcmp.eq.f32.partialorder %v846_v45, 8.507059e+37 }
 0x378   :  { %v14443_v33 = vpop.eup %14442 }
 0x379   :  { %v14445_v34 = vpop.eup %14444  ;;  %v823_v36 = vmul.f32 %v14443_v33, %v820_v19  ;;  %vm828_vm11 = vweird.f32 %v14443_v33 }
 0x37a   :  { %v838_v35 = vmul.f32 %v14445_v34, %v821_v23  ;;  %vm843_vm12 = vweird.f32 %v14445_v34  ;;  %vm829_vm15 = vmor %vm827_vm13, %vm828_vm11  ;;  %v13608_v23 = vld [vmem:[%s20640_s6 + $0xc4] sm:$0xf] }
 0x37b   :  { %v824_v37 = vsub.f32 1.0, %v823_v36  ;;  %vm844_vm10 = vmor %vm842_vm14, %vm843_vm12  ;;  %v10760_v32 = vor.u32 %v13608_v23, %v10757_v26  ;;  %v10765_v36 = vld [vmem:[%s20640_s6 + $0xd8] sm:$0xf0] }
 0x37c   :  { %v839_v39 = vsub.f32 1.0, %v838_v35 }
 0x37d   :  { %v825_v42 = vmul.f32 %v14443_v33, %v824_v37  ;;  %1550 = vmatpush.bf16.msrb.mxu1 %v10760_v32 }
 0x37e   :  { %v840_v44 = vmul.f32 %v14445_v34, %v839_v39  ;;  %v13606_v39 = vld [vmem:[%s20640_s6 + $0xac] sm:$0xf0] }
 0x37f   :  { %v826_v46 = vadd.f32 %v14443_v33, %v825_v42  ;;  %v10740_v41 = vor.u32 %v13606_v39, %v10739_v57  ;;  %v10741_v42 = vld [vmem:[%s20640_s6 + $0xb0] sm:$0xf0]  ;;  %v13593_v57 = vld [vmem:[%s20640_s6 + $0x4c] sm:$0xf] }
 0x380   :  { %v841_v47 = vadd.f32 %v14445_v34, %v840_v44  ;;  %v13607_v44 = vld [vmem:[%s20640_s6 + $0xb4] sm:$0xf0] }
 0x381   :  { %v830_v51 = vsel %vm829_vm15, %v14443_v33, %v826_v46  ;;  %v10764_v33 = vor.u32 %v13611_v28, %v10763_v27  ;;  %v10744_v46 = vor.u32 %v13604_v40, %v10741_v42  ;;  %1538 = vmatpush.bf16.msrb.mxu0 %v10740_v41  ;;  %v10720_v27 = vor.u32 %v13597_v20, %v10717_v22  ;;  %v10675_v42 = vld [vmem:[%s20640_s6 + $0x20] sm:$0xf] }
 0x382   :  { %v845_v54 = vsel %vm844_vm10, %v14445_v34, %v841_v47  ;;  %v835_v55 = vsel %vm832_vm9, %v834_v49, %v830_v51  ;;  %v13609_v34 = vld [vmem:[%s20640_s6 + $0xcc] sm:$0xf]  ;;  %v10748_v47 = vor.u32 %v13607_v44, %v10747_v43  ;;  %v10749_v49 = vld [vmem:[%s20640_s6 + $0xb8] sm:$0xf0]  ;;  %v13590_v43 = vld [vmem:[%s20640_s6 + $0x2c] sm:$0xf0] }
 0x383   :  { %v850_v58 = vsel %vm847_vm8, %v849_v50, %v845_v54  ;;  %v852_v59 = vmul.f32 %v835_v55, %v55_v48  ;;  %v10768_v35 = vor.u32 %v13609_v34, %v10765_v36  ;;  %v13605_v48 = vld [vmem:[%s20640_s6 + $0xac] sm:$0xf]  ;;  %1551 = vmatpush.bf16.msrb.mxu1 %v10744_v46  ;;  %v10723_v55 = vld [vmem:[%s20640_s6 + $0x80] sm:$0xf]  ;;  %v13588_v44 = vld [vmem:[%s20640_s6 + $0x24] sm:$0xf] }
 0x384   :  { %v876_v60 = vmul.f32 %v15244_v62, %v850_v58  ;;  %v15521_v62 = vld [vmem:[%s20652_s11] sm:$0x7]  ;;  %v10752_v54 = vor.u32 %v13605_v48, %v10749_v49  ;;  %v13602_v58 = vld [vmem:[%s20640_s6 + $0x8c] sm:$0xf0]  ;;  %v10677_v46 = vld [vmem:[%s20640_s6 + $0x30] sm:$0xf0] }
 0x385   :  { %v877_v61 = vpack.c.bf16 %v852_v59, %v852_v59  ;;  %v1279_v10 = vperm.slane %v15521_v62, 0  ;;  %v13600_v59 = vld [vmem:[%s20640_s6 + $0x84] sm:$0xf]  ;;  %v13591_v48 = vld [vmem:[%s20640_s6 + $0x34] sm:$0xf0] }
 0x386   :  { %v910_v63 = vpack.c.bf16 %v876_v60, %v876_v60  ;;  %v10724_v60 = vor.u32 %v13602_v58, %v10723_v55  ;;  %v10685_v55 = vld [vmem:[%s20640_s6 + $0x38] sm:$0xf0] }
 0x387   :  { %1246 = vmatmul.bf16.vlgmr.msra.gmra.mxu1 %v877_v61 }
 0x388   :  { %1079 = vmatmul.bf16.vlgmr.msrb.gmra.mxu2 %v910_v63  ;;  %1092 = vmatmul.bf16.vlgmr.msrb.gmra.mxu3 %v910_v63 }
 0x389   :  { %1105 = vmatmul.bf16.vlgmr.msra.gmra.mxu0 %v910_v63  ;;  %1562 = vmatpush.bf16.msrb.mxu2 %v10780_v12  ;;  %v10731_v63 = vld [vmem:[%s20640_s6 + $0x88] sm:$0xf] }
 0x38a   :  { %1575 = vmatpush.bf16.msrb.mxu3 %v10784_v17  ;;  %1539 = vmatpush.bf16.msrb.mxu0 %v10724_v60  ;;  %v10715_v12 = vld [vmem:[%s20640_s6 + $0x68] sm:$0xf]  ;;  %v1280_v17 = vperm.slane %v15521_v62, 1 }
 0x38d   :  { %1563 = vmatpush.bf16.msrb.mxu2 %v10764_v33 }
 0x38e   :  { %1576 = vmatpush.bf16.msrb.mxu3 %v10768_v35  ;;  %v10699_v35 = vld [vmem:[%s20640_s6 + $0x48] sm:$0xf] }
 0x391   :  { %1564 = vmatpush.bf16.msrb.mxu2 %v10748_v47  ;;  %v10683_v47 = vld [vmem:[%s20640_s6 + $0x28] sm:$0xf] }
 0x392   :  { %1577 = vmatpush.bf16.msrb.mxu3 %v10752_v54  ;;  %v13589_v54 = vld [vmem:[%s20640_s6 + $0x2c] sm:$0xf] }
 0x396   :  { %1578 = vmatpush.bf16.msrb.mxu3 %v10736_v6  ;;  %v10667_v6 = vld [vmem:[%s20640_s6 + $0x8] sm:$0xf] }
 0x398   :  { %1259 = vmatmul.bf16.vlgmr.msra.gmra.mxu2 %v877_v61  ;;  %1272 = vmatmul.bf16.vlgmr.msra.gmra.mxu3 %v877_v61  ;;  %v10725_v61 = vld [vmem:[%s20640_s6 + $0x90] sm:$0xf0] }
 0x399   :  { %v10728_v3 = vor.u32 %v13600_v59, %v10725_v61  ;;  %v10688_v61 = vor.u32 %v13589_v54, %v10685_v55 }
 0x39a   :  { %1579 = vmatpush.bf16.msrb.mxu3 %v10720_v27 }
 0x39b   :  { %1552 = vmatpush.bf16.msrb.mxu1 %v10728_v3  ;;  %v13584_v3 = vld [vmem:[%s20640_s6 + $0x4] sm:$0xf] }
 0x404   :  { %v1247_v0 = vpop.f32.mrf.mxu1 }
 0x406   :  { %v15511_v1 = vpop.f32.mrf.mxu0 }
 0x40b   :  { %v1080_v15 = vpop.f32.mrf.mxu2  ;;  %v15549_v16 = vpop.f32.mrf.mxu3 }
 0x40c   :  { %v1248_v18 = vadd.f32 %v1247_v0, %v1080_v15  ;;  %v1249_v19 = vpop.f32.mrf.mxu1  ;;  %v13603_v0 = vld [vmem:[%s20640_s6 + $0x94] sm:$0xf0]  ;;  %v307_v15 = vperm.slane %v15516_v2, 1 }
 0x40d   :  { %v10732_v4 = vor.u32 %v13603_v0, %v10731_v63  ;;  %v10716_v19 = vor.u32 %v13599_v13, %v10715_v12  ;;  %v10659_v63 = vld [vmem:[%s20640_s6] sm:$0xf]  ;;  %v13586_v0 = vld [vmem:[%s20640_s6 + $0xc] sm:$0xf0] }
 0x40e   :  { %v1285_v30 = vadd.f32 %v1279_v10, %v1248_v18  ;;  %v1108_v31 = vpop.f32.mrf.mxu0  ;;  %v10708_v10 = vor.u32 %v13598_v8, %v10707_v7  ;;  %v10712_v18 = vor.u32 %v13596_v9, %v10709_v11  ;;  %v313_v32 = vadd.f32 %v307_v15, %v15095_v52  ;;  %v10701_v52 = vld [vmem:[%s20640_s6 + $0x58] sm:$0xf0]  ;;  %v13587_v7 = vld [vmem:[%s20640_s6 + $0x14] sm:$0xf0] }
 0x40f   :  { %1565 = vmatpush.bf16.msrb.mxu2 %v10732_v4  ;;  %v13592_v31 = vld [vmem:[%s20640_s6 + $0x44] sm:$0xf]  ;;  %v10704_v41 = vor.u32 %v13593_v57, %v10701_v52  ;;  %v10660_v5 = vor.u32 %v13586_v0, %v10659_v63  ;;  %v10664_v8 = vor.u32 %v13584_v3, %v10661_v24  ;;  %v10668_v9 = vor.u32 %v13587_v7, %v10667_v6  ;;  %v10669_v11 = vld [vmem:[%s20640_s6 + $0x18] sm:$0xf0] }
 0x410   :  { %v1288_v37 = vadd.f32 %v1285_v30, %v312_v29  ;;  %1540 = vmatpush.bf16.msrb.mxu0 %v10708_v10  ;;  %1553 = vmatpush.bf16.msrb.mxu1 %v10712_v18  ;;  %v10691_v29 = vld [vmem:[%s20640_s6 + $0x40] sm:$0xf]  ;;  %v13594_v30 = vld [vmem:[%s20640_s6 + $0x4c] sm:$0xf0]  ;;  %v13585_v10 = vld [vmem:[%s20640_s6 + $0xc] sm:$0xf] }
 0x411   :  { %v10692_v34 = vor.u32 %v13594_v30, %v10691_v29  ;;  %1580 = vmatpush.bf16.msrb.mxu3 %v10704_v41  ;;  %v10672_v13 = vor.u32 %v13585_v10, %v10669_v11  ;;  %v308_v15 = vperm.slane %v15516_v2, 2 }
 0x412   :  { %v10651_v45 = vmul.f32 -1.442695, %v1288_v37  ;;  %v13595_v37 = vld [vmem:[%s20640_s6 + $0x54] sm:$0xf0] }
 0x413   :  { %v1082_v50 = vpop.f32.mrf.mxu2  ;;  %v1095_v51 = vpop.f32.mrf.mxu3  ;;  %1566 = vmatpush.bf16.msrb.mxu2 %v10716_v19  ;;  %v10700_v39 = vor.u32 %v13595_v37, %v10699_v35  ;;  %v314_v27 = vadd.f32 %v308_v15, %v15097_v53 }
 0x414   :  { %14446 = vpow2.f32 %v10651_v45  ;;  %1541 = vmatpush.bf16.msrb.mxu0 %v10692_v34  ;;  %v10676_v45 = vor.u32 %v13590_v43, %v10675_v42  ;;  %v10680_v50 = vor.u32 %v13588_v44, %v10677_v46  ;;  %v10684_v51 = vor.u32 %v13591_v48, %v10683_v47  ;;  %v10654_v43 = vld [vmem:[%s20642_s1 + $0x8] sm:$0xff]  ;;  %v14273_v44 = vld [vmem:[%s20643_s3] sm:$0xff]  }
 0x415   :  { %1581 = vmatpush.bf16.msrb.mxu3 %v10688_v61 }
 0x417   :  { %1567 = vmatpush.bf16.msrb.mxu2 %v10700_v39 }
 0x418   :  { %1542 = vmatpush.bf16.msrb.mxu0 %v10676_v45  ;;  %v14387_v45 = vld [vmem:[%s20643_s3 + $0x8] sm:$0xff]  }
 0x419   :  { %1582 = vmatpush.bf16.msrb.mxu3 %v10672_v13  ;;  %v14279_v61 = vunpack.c.h.bf16 %v14387_v45 }
 0x41a   :  { %v14447_v14 = vpop.eup %14446 }
 0x41b   :  { %v15650_v23 = vadd.f32 1.0, %v14447_v14  ;;  %v1260_v25 = vpop.f32.mrf.mxu2  ;;  %v15652_v26 = vpop.f32.mrf.mxu3  ;;  %1568 = vmatpush.bf16.msrb.mxu2 %v10684_v51  ;;  %v14275_v51 = vunpack.c.h.bf16 %v14273_v44 }
 0x41c   :  { %v1261_v28 = vadd.f32 %v1260_v25, %v15549_v16  ;;  %v10693_v16 = vld [vmem:[%s20640_s6 + $0x50] sm:$0xf0]  ;;  %1543 = vmatpush.bf16.msrb.mxu0 %v10660_v5  ;;  %v1274_v30 = vadd.f32 %v15652_v26, %v15511_v1 }
 0x41d   :  { %14448 = vrcp.f32 %v15650_v23  ;;  %v10696_v36 = vor.u32 %v13592_v31, %v10693_v16  ;;  %v1304_v14 = vand.u32 2147483648, %v15650_v23  ;;  %v1302_v18 = vand.u32 2147483647, %v15650_v23 }
 0x41e   :  { %v1286_v33 = vadd.f32 %v1280_v17, %v1261_v28  ;;  %vm1298_vm9 = vweird.f32 %v15650_v23  ;;  %v1281_v31 = vperm.slane %v15521_v62, 2 }
 0x41f   :  { %1554 = vmatpush.bf16.msrb.mxu1 %v10696_v36  ;;  %1569 = vmatpush.bf16.msrb.mxu2 %v10668_v9  ;;  %v1305_v25 = vor.u32 1.1754944e-38, %v1304_v14  ;;  %vm1303_vm11 = vcmp.eq.f32.partialorder %v1302_v18, 8.507059e+37 }
 0x420   :  { %v1308_v40 = vadd.f32 %v1286_v33, %v313_v32  ;;  %v1287_v32 = vadd.f32 %v1281_v31, %v1274_v30 }
 0x422   :  { %v10652_v49 = vmul.f32 -1.442695, %v1308_v40 }
 0x423   :  { %v14449_v58 = vpop.eup %14448  ;;  %v1262_v59 = vpop.f32.mrf.mxu2  ;;  %1555 = vmatpush.bf16.msrb.mxu1 %v10680_v50  ;;  %v14278_v50 = vunpack.c.l.bf16 %v14387_v45 }
 0x424   :  { %v1275_v60 = vpop.f32.mrf.mxu3  ;;  %14450 = vpow2.f32 %v10652_v49  ;;  %v1294_v4 = vmul.f32 %v14449_v58, %v15650_v23  ;;  %vm1299_vm8 = vweird.f32 %v14449_v58  ;;  %v14274_v49 = vunpack.c.l.bf16 %v14273_v44 }
 0x425   :  { %vm1300_vm10 = vmor %vm1298_vm9, %vm1299_vm8  ;;  %v14388_v60 = vld [vmem:[%s20643_s3 + $0x10] sm:$0xff]   ;;  %vm20657_vm8 = vcmask 64512  }
 0x426   :  { %v1295_v12 = vsub.f32 1.0, %v1294_v4  ;;  %v14283_v6 = vunpack.c.h.bf16 %v14388_v60  ;;  %v14282_v14 = vunpack.c.l.bf16 %v14388_v60  ;;  %vm20658_vm9 = vmmov %vm20657_vm8 }
 0x427   :  { %1556 = vmatpush.bf16.msrb.mxu1 %v10664_v8 }
 0x428   :  { %v1296_v17 = vmul.f32 %v14449_v58, %v1295_v12 }
 0x42a   :  { %v14451_v19 = vpop.eup %14450  ;;  %v1297_v20 = vadd.f32 %v14449_v58, %v1296_v17 }
 0x42b   :  { %v1312_v22 = vadd.f32 1.0, %v14451_v19  ;;  %v14411_v19 = vld [vmem:[%s20641_s7] ss:$0 sm:$0xff] }
 0x42c   :  { %v1301_v28 = vsel %vm1300_vm10, %v14449_v58, %v1297_v20  ;;  %v14389_v20 = vld [vmem:[%s20643_s3 + $0x18] sm:$0xff]   ;;  %vm20659_vm10 = vcmask 1043456  }
 0x42d   :  { %14452 = vrcp.f32 %v1312_v22  ;;  %v1306_v2 = vsel %vm1303_vm11, %v1305_v25, %v1301_v28  ;;  %v1324_v36 = vand.u32 2147483648, %v1312_v22  ;;  %v1322_v37 = vand.u32 2147483647, %v1312_v22  ;;  %vm20660_vm11 = vmmov %vm20659_vm10 }
 0x42e   :  { %v1328_v29 = vmul.f32 %v1306_v2, %v314_v27  ;;  %vm1318_vm13 = vweird.f32 %v1312_v22  ;;  %v14286_v2 = vunpack.c.l.bf16 %v14389_v20 }
 0x42f   :  { %v1325_v57 = vor.u32 1.1754944e-38, %v1324_v36  ;;  %vm1323_vm15 = vcmp.eq.f32.partialorder %v1322_v37, 8.507059e+37 }
 0x430   :  { %v1329_v23 = vadd.f32 %v1328_v29, %v1287_v32 }
 0x432   :  { %14454 = vtanh.f32 %v1329_v23 }
 0x433   :  { %v14453_v16 = vpop.eup %14452 }
 0x434   :  { %v1314_v33 = vmul.f32 %v14453_v16, %v1312_v22  ;;  %vm1319_vm12 = vweird.f32 %v14453_v16 }
 0x435   :  { %vm1320_vm14 = vmor %vm1318_vm13, %vm1319_vm12 }
 0x436   :  { %v1315_v34 = vsub.f32 1.0, %v1314_v33  ;;  %vm20661_vm12 = vmmov %vm20659_vm10 }
 0x437   :  { %vm20662_vm13 = vmmov %vm20659_vm10 }
 0x438   :  { %v1316_v35 = vmul.f32 %v14453_v16, %v1315_v34  ;;  %v14455_v26 = vpop.eup %14454  ;;  %v14287_v34 = vunpack.c.h.bf16 %v14389_v20 }
 0x43a   :  { %v1317_v53 = vadd.f32 %v14453_v16, %v1316_v35 }
 0x43c   :  { %v1321_v39 = vsel %vm1320_vm14, %v14453_v16, %v1317_v53  ;;  %vm20663_vm14 = vmmov %vm20659_vm10 }
 0x43d   :  { %v1326_v52 = vsel %vm1323_vm15, %v1325_v57, %v1321_v39  ;;  %vm20664_vm15 = vmmov %vm20659_vm10 }
 0x43e   :  { %v1331_v1 = vsub.f32 1.0, %v1326_v52  ;;  %v1333_v40 = vmul.f32 0.0, %v1326_v52 }
 0x440   :  { %v1332_v62 = vmul.f32 %v14455_v26, %v1331_v1 }
 0x442   :  { %v1334_v41 = vadd.f32 %v1333_v40, %v1332_v62 }
 0x444   :  { %1335 = vst [vmem:[%s20653_s13] sm:$0xff] %v1334_v41  ;;  %v1343_v42 = vpack.c.bf16 %v1334_v41, %v1334_v41 }
 0x446   :  { %1544 = vmatmul.bf16.vlgmr.msrb.gmra.mxu0 %v1343_v42  ;;  %1557 = vmatmul.bf16.vlgmr.msrb.gmra.mxu1 %v1343_v42 }
 0x447   :  { %1570 = vmatmul.bf16.vlgmr.msrb.gmra.mxu2 %v1343_v42  ;;  %1583 = vmatmul.bf16.vlgmr.msrb.gmra.mxu3 %v1343_v42 }
 0x4c3   :  { %v1545_v46 = vpop.f32.mrf.mxu0  ;;  %v15750_v47 = vpop.f32.mrf.mxu1 }
 0x4c4   :  { %v1599_v48 = vadd.f32 %v10654_v43, %v1545_v46 }
 0x4c6   :  { %v1624_v54 = vperm.slane %v1599_v48, 0  ;;  %v1618_v55 = vrot.slane %v1599_v48, 2  ;;  %v1617_v58 = vrot.slane %v1599_v48, 1  ;;  %v1619_v59 = vrot.slane %v1599_v48, 3 }
 0x4c7   :  { %v1621_v63 = vrot.slane %v1599_v48, 5  ;;  %v1620_v0 = vrot.slane %v1599_v48, 4  ;;  %v1622_v18 = vrot.slane %v1599_v48, 6  ;;  %v1623_v27 = vrot.slane %v1599_v48, 7 }
 0x4c8   :  { %v1640_v3 = vadd.f32 %v14274_v49, %v1624_v54  ;;  %v1626_v4 = vperm.slane %v1618_v55, 0  ;;  %v1625_v5 = vperm.slane %v1617_v58, 0  ;;  %v1627_v24 = vperm.slane %v1619_v59, 0 }
 0x4c9   :  { %v1629_v11 = vperm.slane %v1621_v63, 0  ;;  %v1628_v15 = vperm.slane %v1620_v0, 0  ;;  %v1630_v29 = vperm.slane %v1622_v18, 0  ;;  %v1631_v36 = vperm.slane %v1623_v27, 0  ;;  %v1746_v27 = vld [vmem:[%s20645_s4] sm:$0xf] }
 0x4ca   :  { %v15755_v7 = vpop.f32.mrf.mxu2  ;;  %v15757_v8 = vpop.f32.mrf.mxu3  ;;  %14456 = vtanh.f32 %v1640_v3  ;;  %v1642_v9 = vadd.f32 %v14278_v50, %v1626_v4  ;;  %v1641_v10 = vadd.f32 %v14275_v51, %v1625_v5  ;;  %v1643_v17 = vadd.f32 %v14279_v61, %v1627_v24 }
 0x4cb   :  { %v1547_v12 = vpop.f32.mrf.mxu0  ;;  %v1560_v13 = vpop.f32.mrf.mxu1  ;;  %v1645_v22 = vadd.f32 %v14283_v6, %v1629_v11  ;;  %v1644_v25 = vadd.f32 %v14282_v14, %v1628_v15  ;;  %v1646_v37 = vadd.f32 %v14286_v2, %v1630_v29  ;;  %v1647_v57 = vadd.f32 %v14287_v34, %v1631_v36  ;;  %v1751_v34 = vld [vmem:[%s20645_s4 + $0x14] sm:$0xf] }
 0x4cc   :  { %14458 = vtanh.f32 %v1642_v9  ;;  %v1760_v29 = vsel %vm20661_vm12, %v1746_v27, 0 }
 0x4cd   :  { %14460 = vtanh.f32 %v1641_v10  ;;  %1769 = vmatpush.bf16.msra.mxu0 %v1760_v29  ;;  %v13626_v29 = vld [vmem:[%s20646_s8 + $0x54] sm:$0xf] }
 0x4ce   :  { %14462 = vtanh.f32 %v1643_v17 }
 0x4cf   :  { %14464 = vtanh.f32 %v1645_v22  ;;  %v1748_v22 = vld [vmem:[%s20645_s4 + $0x8] sm:$0xf] }
 0x4d0   :  { %v14457_v28 = vpop.eup %14456  ;;  %14466 = vtanh.f32 %v1644_v25  ;;  %v1749_v25 = vld [vmem:[%s20645_s4 + $0xc] sm:$0xf] }
 0x4d1   :  { %v1660_v30 = vmul.f32 %v14457_v28, %v14411_v19  ;;  %14468 = vtanh.f32 %v1646_v37  ;;  %v1802_v28 = vsel %vm20659_vm10, %v1748_v22, 0  ;;  %v1823_v2 = vsel %vm20660_vm11, %v1749_v25, 0  ;;  %v10849_v25 = vld [vmem:[%s20646_s8 + $0x68] sm:$0xf0] }
 0x4d2   :  { %v14459_v31 = vpop.eup %14458  ;;  %v1573_v16 = vpop.f32.mrf.mxu2  ;;  %14470 = vtanh.f32 %v1647_v57  ;;  %1811 = vmatpush.bf16.msra.mxu2 %v1802_v28  ;;  %1832 = vmatpush.bf16.msra.mxu3 %v1823_v2  ;;  %vm20668_vm11 = vcmask 64512   ;;  %v10839_v28 = vld [vmem:[%s20646_s8 + $0x50] sm:$0xf]  ;;  %v13627_v2 = vld [vmem:[%s20646_s8 + $0x54] sm:$0xf0] }
 0x4d3   :  { %v1586_v32 = vpop.f32.mrf.mxu3  ;;  %v14461_v33 = vpop.eup %14460  ;;  %1668 = vadd.xlane.f32.xlu1 %v1660_v30  ;;  %v1662_v23 = vmul.f32 %v14459_v31, %v14411_v19  ;;  %v1747_v30 = vld [vmem:[%s20645_s4 + $0x4] sm:$0xf]  ;;  %v1752_v16 = vld [vmem:[%s20645_s4 + $0x18] sm:$0xf]  ;;  %vm20669_vm12 = vmmov %vm20668_vm11 }
 0x4d4   :  { %v1661_v35 = vmul.f32 %v14461_v33, %v14411_v19  ;;  %v14463_v53 = vpop.eup %14462  ;;  %v1781_v31 = vsel %vm20662_vm13, %v1747_v30, 0  ;;  %v1886_v32 = vsel %vm20663_vm14, %v1752_v16, 0  ;;  %v1753_v33 = vld [vmem:[%s20645_s4 + $0x1c] sm:$0xf]  ;;  %vm20670_vm13 = vmmov %vm20668_vm11  ;;  %v10840_v30 = vor.u32 %v13627_v2, %v10839_v28  ;;  %v10927_v2 = vld [vmem:[%s20647_s10 + $0x84] sm:$0xf0] }
 0x4d5   :  { %1672 = vadd.xlane.f32.xlu0 %v1662_v23  ;;  %v14465_v39 = vpop.eup %14464  ;;  %v1663_v1 = vmul.f32 %v14463_v53, %v14411_v19  ;;  %1790 = vmatpush.bf16.msra.mxu1 %v1781_v31  ;;  %v1750_v23 = vld [vmem:[%s20645_s4 + $0x10] sm:$0xf]  ;;  %v1907_v36 = vsel %vm20664_vm15, %v1753_v33, 0  ;;  %vm20671_vm14 = vmmov %vm20668_vm11  ;;  %v10841_v31 = vld [vmem:[%s20646_s8 + $0x58] sm:$0xf0] }
 0x4d6   :  { %1670 = vadd.xlane.f32.xlu2 %v1661_v35  ;;  %v14467_v52 = vpop.eup %14466  ;;  %v1665_v26 = vmul.f32 %v14465_v39, %v14411_v19  ;;  %1895 = vmatpush.bf16.msrb.mxu2 %v1886_v32  ;;  %vm20672_vm15 = vmmov %vm20668_vm11  ;;  %v10844_v16 = vor.u32 %v13626_v29, %v10841_v31  ;;  %v10831_v32 = vld [vmem:[%s20646_s8 + $0x40] sm:$0xf]  ;;  %v13625_v33 = vld [vmem:[%s20646_s8 + $0x44] sm:$0xf0] }
 0x4d7   :  { %v1664_v62 = vmul.f32 %v14467_v52, %v14411_v19  ;;  %v14469_v40 = vpop.eup %14468  ;;  %1916 = vmatpush.bf16.msrb.mxu3 %v1907_v36  ;;  %v10833_v36 = vld [vmem:[%s20646_s8 + $0x48] sm:$0xf0]  ;;  %v13671_v28 = vld [vmem:[%s20647_s10 + $0x7c] sm:$0xf] }
 0x4d8   :  { %v14471_v41 = vpop.eup %14470  ;;  %v1666_v42 = vmul.f32 %v14469_v40, %v14411_v19 }
 0x4d9   :  { %v1667_v43 = vmul.f32 %v14471_v41, %v14411_v19 }
 0x4db   :  { %1674 = vadd.xlane.f32.xlu1 %v1663_v1 }
 0x4dd   :  { %1678 = vadd.xlane.f32.xlu0 %v1665_v26 }
 0x4de   :  { %1676 = vadd.xlane.f32.xlu2 %v1664_v62 }
 0x4e3   :  { %1680 = vadd.xlane.f32.xlu1 %v1666_v42 }
 0x4e6   :  { %1682 = vadd.xlane.f32.xlu2 %v1667_v43 }
 0x546   :  { %v1669_v44 = vpop.xlane.xlu1 %1668 }
 0x547   :  { %v1692_v49 = vperm.slane %v1669_v44, %v14868_v21 }
 0x548   :  { %v1673_v45 = vpop.xlane.xlu0 %1672 }
 0x549   :  { %v1671_v46 = vpop.xlane.xlu2 %1670  ;;  %v1694_v50 = vperm.slane %v1673_v45, %v14868_v21 }
 0x54a   :  { %v1693_v48 = vperm.slane %v1671_v46, %v14868_v21 }
 0x54c   :  { %v1700_v51 = vsel %vm418_vm0, %v1693_v48, %v1692_v49 }
 0x54d   :  { %v1701_v58 = vsel %vm420_vm1, %v1694_v50, %v1700_v51 }
 0x54e   :  { %v1675_v54 = vpop.xlane.xlu1 %1674 }
 0x54f   :  { %v1695_v55 = vperm.slane %v1675_v54, %v14868_v21 }
 0x550   :  { %v1679_v59 = vpop.xlane.xlu0 %1678 }
 0x551   :  { %v1677_v60 = vpop.xlane.xlu2 %1676  ;;  %v1702_v61 = vsel %vm422_vm2, %v1695_v55, %v1701_v58  ;;  %v1697_v0 = vperm.slane %v1679_v59, %v14868_v21 }
 0x552   :  { %v1696_v63 = vperm.slane %v1677_v60, %v14868_v21 }
 0x554   :  { %v1703_v3 = vsel %vm424_vm3, %v1696_v63, %v1702_v61 }
 0x555   :  { %v1704_v24 = vsel %vm426_vm4, %v1697_v0, %v1703_v3 }
 0x556   :  { %v1681_v4 = vpop.xlane.xlu1 %1680 }
 0x557   :  { %v1698_v5 = vperm.slane %v1681_v4, %v14868_v21 }
 0x559   :  { %v1683_v6 = vpop.xlane.xlu2 %1682  ;;  %v1705_v9 = vsel %vm428_vm5, %v1698_v5, %v1704_v24 }
 0x55a   :  { %v1699_v10 = vperm.slane %v1683_v6, %v14868_v21 }
 0x55c   :  { %v1706_v11 = vsel %vm430_vm6, %v1699_v10, %v1705_v9 }
 0x55d   :  { %v1708_v12 = vsel %vm51_vm7, %v1706_v11, -1e+30  ;;  %v10855_v11 = vld [vmem:[%s20646_s8 + $0x70] sm:$0xf] }
 0x55e   :  { %v1709_v13 = vsel %vm20657_vm8, %v1708_v12, -inf  ;;  %vm20665_vm8 = vmmov %vm20659_vm10  ;;  %vm20667_vm10 = vcmask 1040384  }
 0x55f   :  { %1710 = vmax.xlane.f32.xlu0 %v1709_v13  ;;  %v1844_v35 = vsel %vm20665_vm8, %v1750_v23, 0  ;;  %v13630_v13 = vld [vmem:[%s20646_s8 + $0x74] sm:$0xf]  ;;  %v13624_v23 = vld [vmem:[%s20646_s8 + $0x44] sm:$0xf] }
 0x560   :  { %1853 = vmatpush.bf16.msrb.mxu0 %v1844_v35  ;;  %v10836_v35 = vor.u32 %v13624_v23, %v10833_v36  ;;  %v10930_v23 = vor.u32 %v13671_v28, %v10927_v2  ;;  %v13669_v28 = vld [vmem:[%s20647_s10 + $0x68] sm:$0xf0] }
 0x5d2   :  { %v1711_v14 = vpop.xlane.xlu0 %1710 }
 0x5d3   :  { %v1712_v15 = vsub.f32 %v1708_v12, %v1711_v14  ;;  %v13631_v12 = vld [vmem:[%s20646_s8 + $0x74] sm:$0xf0] }
 0x5d4   :  { %v10856_v14 = vor.u32 %v13631_v12, %v10855_v11  ;;  %v13675_v11 = vld [vmem:[%s20647_s10 + $0x98] sm:$0xf0] }
 0x5d5   :  { %v1713_v17 = vmul.f32 1.442695, %v1712_v15  ;;  %v10857_v15 = vld [vmem:[%s20646_s8 + $0x78] sm:$0xf0] }
 0x5d7   :  { %14472 = vpow2.f32 %v1713_v17  ;;  %v10860_v17 = vor.u32 %v13630_v13, %v10857_v15  ;;  %v13674_v13 = vld [vmem:[%s20647_s10 + $0x94] sm:$0xf] }
 0x5dd   :  { %v14473_v18 = vpop.eup %14472 }
 0x5de   :  { %v1715_v19 = vmul.f32 %v14473_v18, %v15038_v56  ;;  %v10847_v18 = vld [vmem:[%s20646_s8 + $0x60] sm:$0xf] }
 0x5e0   :  { %v1716_v20 = vsel %vm20658_vm9, %v1715_v19, 0.0  ;;  %vm20666_vm9 = vmmov %vm20665_vm8 }
 0x5e1   :  { %1717 = vadd.xlane.f32.xlu1 %v1716_v20  ;;  %v1865_v37 = vsel %vm20666_vm9, %v1751_v34, 0  ;;  %vm20673_vm8 = vmmov %vm20668_vm11  ;;  %v13628_v20 = vld [vmem:[%s20646_s8 + $0x64] sm:$0xf]  ;;  %v10832_v34 = vor.u32 %v13625_v33, %v10831_v32 }
 0x5e2   :  { %1874 = vmatpush.bf16.msrb.mxu1 %v1865_v37  ;;  %vm20674_vm9 = vmmov %vm20673_vm8  ;;  %v10852_v27 = vor.u32 %v13628_v20, %v10849_v25  ;;  %v10823_v37 = vld [vmem:[%s20646_s8 + $0x30] sm:$0xf]  ;;  %v10925_v20 = vld [vmem:[%s20647_s10 + $0x78] sm:$0xf] }
 0x654   :  { %v1718_v53 = vpop.xlane.xlu1 %1717 }
 0x655   :  { %v1719_v57 = vadd.f32 1e-30, %v1718_v53  ;;  %v13623_v53 = vld [vmem:[%s20646_s8 + $0x34] sm:$0xf0] }
 0x657   :  { %14474 = vrcp.f32 %v1719_v57  ;;  %v13622_v57 = vld [vmem:[%s20646_s8 + $0x34] sm:$0xf] }
 0x65d   :  { %v14475_v39 = vpop.eup %14474 }
 0x65e   :  { %v1721_v52 = vmul.f32 %v14475_v39, %v1715_v19  ;;  %v13629_v19 = vld [vmem:[%s20646_s8 + $0x64] sm:$0xf0]  ;;  %v10824_v39 = vor.u32 %v13623_v53, %v10823_v37 }
 0x65f   :  { %v10848_v22 = vor.u32 %v13629_v19, %v10847_v18 }
 0x660   :  { %v1722_v1 = vpack.c.bf16 %v1721_v52, %v1721_v52  ;;  %v10825_v52 = vld [vmem:[%s20646_s8 + $0x38] sm:$0xf0] }
 0x662   :  { %v1724_v26 = vrot.slane %v1722_v1, 3 }
 0x664   :  { %v1727_v62 = vsel %vm20667_vm10, %v1722_v1, %v1724_v26  ;;  %v1729_v40 = vsel %vm418_vm0, %v1722_v1, %v1724_v26  ;;  %v1732_v54 = vsel %vm420_vm1, %v1722_v1, %v1724_v26  ;;  %v1735_v58 = vsel %vm422_vm2, %v1722_v1, %v1724_v26  ;;  %vm20675_vm10 = vmmov %vm20673_vm8  ;;  %v10815_v26 = vld [vmem:[%s20646_s8 + $0x20] sm:$0xf] }
 0x665   :  { %v10785_v41 = vpack.i.b16 %v1727_v62, %v1727_v62  ;;  %v1739_v42 = vunpack.i.h.s16 %v1727_v62  ;;  %v1731_v43 = vrot.slane %v1729_v40, 1  ;;  %v1734_v59 = vrot.slane %v1732_v54, 2  ;;  %v13621_v62 = vld [vmem:[%s20646_s8 + $0x24] sm:$0xf0]  ;;  %v13620_v40 = vld [vmem:[%s20646_s8 + $0x24] sm:$0xf] }
 0x666   :  { %v1737_v60 = vrot.slane %v1735_v58, 3  ;;  %v10828_v1 = vor.u32 %v13622_v57, %v10825_v52  ;;  %v10799_v54 = vld [vmem:[%s20646_s8] sm:$0xf]  ;;  %v13616_v58 = vld [vmem:[%s20646_s8 + $0x4] sm:$0xf] }
 0x667   :  { %v1755_v44 = vperm.slane %v10785_v41, 0  ;;  %v1775_v45 = vpack.i.b16 %v1739_v42, %v1739_v42  ;;  %v10788_v46 = vpack.i.b16 %v1731_v43, %v1731_v43  ;;  %v1741_v48 = vunpack.i.h.s16 %v1731_v43  ;;  %v10817_v42 = vld [vmem:[%s20646_s8 + $0x28] sm:$0xf0] }
 0x668   :  { %v1743_v61 = vunpack.i.h.s16 %v1734_v59  ;;  %v10791_v63 = vpack.i.b16 %v1734_v59, %v1734_v59  ;;  %v1745_v0 = vunpack.i.h.s16 %v1737_v60  ;;  %v10794_v4 = vpack.i.b16 %v1737_v60, %v1737_v60 }
 0x669   :  { %10786 = vmatmul.msk.bf16.vlgmr.msra.gmra.mxu0 %vm20668_vm11, %v1755_v44  ;;  %v1776_v49 = vperm.slane %v1775_v45, 0  ;;  %v1797_v50 = vperm.slane %v10788_v46, 0  ;;  %v1817_v51 = vpack.i.b16 %v1741_v48, %v1741_v48  ;;  %v10816_v41 = vor.u32 %v13621_v62, %v10815_v26  ;;  %v10807_v44 = vld [vmem:[%s20646_s8 + $0x10] sm:$0xf]  ;;  %v13619_v45 = vld [vmem:[%s20646_s8 + $0x14] sm:$0xf0] }
 0x66a   :  { %v1859_v3 = vpack.i.b16 %v1743_v61, %v1743_v61  ;;  %v1839_v5 = vperm.slane %v10791_v63, 0  ;;  %v1901_v24 = vpack.i.b16 %v1745_v0, %v1745_v0  ;;  %v1881_v9 = vperm.slane %v10794_v4, 0  ;;  %2058 = vmatpush.bf16.msra.mxu0 %v10856_v14  ;;  %v13618_v46 = vld [vmem:[%s20646_s8 + $0x14] sm:$0xf]  ;;  %v10801_v61 = vld [vmem:[%s20646_s8 + $0x8] sm:$0xf0] }
 0x66b   :  { %10787 = vmatmul.msk.bf16.vlgmr.msra.gmra.mxu1 %vm20669_vm12, %v1776_v49  ;;  %10789 = vmatmul.msk.bf16.vlgmr.msra.gmra.mxu2 %vm20670_vm13, %v1797_v50  ;;  %v1818_v55 = vperm.slane %v1817_v51, 0  ;;  %v10820_v43 = vor.u32 %v13620_v40, %v10817_v42  ;;  %v10808_v49 = vor.u32 %v13619_v45, %v10807_v44  ;;  %v10809_v50 = vld [vmem:[%s20646_s8 + $0x18] sm:$0xf0]  ;;  %v10804_v0 = vor.u32 %v13616_v58, %v10801_v61  ;;  %v13678_v4 = vld [vmem:[%s20647_s10 + $0xb0] sm:$0xf0] }
 0x66c   :  { %v1860_v6 = vperm.slane %v1859_v3, 0  ;;  %v1902_v10 = vperm.slane %v1901_v24, 0  ;;  %2071 = vmatpush.bf16.msra.mxu1 %v10860_v17  ;;  %v10812_v51 = vor.u32 %v13618_v46, %v10809_v50  ;;  %v10949_v3 = vld [vmem:[%s20647_s10 + $0xa8] sm:$0xf]  ;;  %v10939_v14 = vld [vmem:[%s20647_s10 + $0x9c] sm:$0xf0] }
 0x66d   :  { %10790 = vmatmul.msk.bf16.vlgmr.msra.gmra.mxu3 %vm20671_vm14, %v1818_v55  ;;  %v13617_v55 = vld [vmem:[%s20646_s8 + $0x4] sm:$0xf0]  ;;  %v10942_v19 = vor.u32 %v13674_v13, %v10939_v14 }
 0x66e   :  { %2059 = vmatpush.bf16.msra.mxu0 %v10848_v22  ;;  %v10800_v60 = vor.u32 %v13617_v55, %v10799_v54  ;;  %v13672_v22 = vld [vmem:[%s20647_s10 + $0x80] sm:$0xf0] }
 0x66f   :  { %v10926_v33 = vor.u32 %v13672_v22, %v10925_v20 }
 0x670   :  { %2072 = vmatpush.bf16.msra.mxu1 %v10852_v27 }
 0x672   :  { %2060 = vmatpush.bf16.msra.mxu0 %v10840_v30 }
 0x674   :  { %2073 = vmatpush.bf16.msra.mxu1 %v10844_v16 }
 0x676   :  { %2061 = vmatpush.bf16.msra.mxu0 %v10832_v34 }
 0x678   :  { %2074 = vmatpush.bf16.msra.mxu1 %v10836_v35 }
 0x679   :  { %10792 = vmatmul.msk.bf16.vlgmr.msrb.gmra.mxu0 %vm20672_vm15, %v1839_v5  ;;  %v13677_v5 = vld [vmem:[%s20647_s10 + $0xac] sm:$0xf] }
 0x67a   :  { %2062 = vmatpush.bf16.msra.mxu0 %v10824_v39 }
 0x67b   :  { %10793 = vmatmul.msk.bf16.vlgmr.msrb.gmra.mxu1 %vm20673_vm8, %v1860_v6  ;;  %10795 = vmatmul.msk.bf16.vlgmr.msrb.gmra.mxu2 %vm20674_vm9, %v1881_v9  ;;  %v10950_v6 = vor.u32 %v13678_v4, %v10949_v3  ;;  %v10951_v9 = vld [vmem:[%s20647_s10 + $0xb4] sm:$0xf0] }
 0x67c   :  { %2075 = vmatpush.bf16.msra.mxu1 %v10828_v1  ;;  %v10954_v12 = vor.u32 %v13677_v5, %v10951_v9 }
 0x67d   :  { %10796 = vmatmul.msk.bf16.vlgmr.msrb.gmra.mxu3 %vm20675_vm10, %v1902_v10  ;;  %v10937_v10 = vld [vmem:[%s20647_s10 + $0x90] sm:$0xf]  ;;  %2343 = vmatpush.bf16.msra.mxu2 %v10950_v6 }
 0x67e   :  { %2063 = vmatpush.bf16.msra.mxu0 %v10816_v41  ;;  %v10938_v15 = vor.u32 %v13675_v11, %v10937_v10  ;;  %2356 = vmatpush.bf16.msra.mxu3 %v10954_v12 }
 0x680   :  { %2076 = vmatpush.bf16.msra.mxu1 %v10820_v43 }
 0x681   :  { %2344 = vmatpush.bf16.msra.mxu2 %v10938_v15 }
 0x682   :  { %2064 = vmatpush.bf16.msra.mxu0 %v10808_v49  ;;  %2357 = vmatpush.bf16.msra.mxu3 %v10942_v19 }
 0x684   :  { %2077 = vmatpush.bf16.msra.mxu1 %v10812_v51 }
 0x685   :  { %2345 = vmatpush.bf16.msra.mxu2 %v10926_v33  ;;  %v11045_v33 = vld [vmem:[%s20648_s9 + $0xa8] sm:$0xf] }
 0x686   :  { %2065 = vmatpush.bf16.msra.mxu0 %v10800_v60  ;;  %2358 = vmatpush.bf16.msra.mxu3 %v10930_v23  ;;  %v13654_v23 = vld [vmem:[%s20648_s9 + $0xb0] sm:$0xf0] }
 0x688   :  { %2078 = vmatpush.bf16.msra.mxu1 %v10804_v0 }
 0x6e6   :  { %v1771_v48 = vpop.f32.mrf.mxu0 }
 0x6e7   :  { %v1922_v37 = vpack.c.bf16 %v1771_v48, %v1771_v48 }
 0x6e8   :  { %v1792_v59 = vpop.f32.mrf.mxu1 }
 0x6e9   :  { %v2133_v63 = vrot.slane %v1792_v59, 7  ;;  %v1923_v25 = vpack.c.bf16 %v1792_v59, %v1792_v59  ;;  %v1954_v40 = vunpack.c.l.b16 %v1922_v37  ;;  %v13666_v37 = vld [vmem:[%s20647_s10 + $0x50] sm:$0xf0] }
 0x6eb   :  { %v2134_v24 = vsel %vm418_vm0, %v2133_v63, %v1771_v48  ;;  %v1955_v34 = vunpack.c.l.b16 %v1923_v25 }
 0x6ed   :  { %v1962_v52 = vrot.slane %v1955_v34, 7 }
 0x6ee   :  { %v1773_v17 = vpop.f32.mrf.mxu0  ;;  %v1813_v18 = vpop.f32.mrf.mxu2 }
 0x6ef   :  { %v2135_v27 = vrot.slane %v1813_v18, 6  ;;  %v1924_v29 = vpack.c.bf16 %v1813_v18, %v1813_v18  ;;  %v1963_v48 = vsel %vm418_vm0, %v1962_v52, %v1954_v40  ;;  %v10945_v52 = vld [vmem:[%s20647_s10 + $0x98] sm:$0xf]  ;;  %v11033_v40 = vld [vmem:[%s20648_s9 + $0x90] sm:$0xf] }
 0x6f0   :  { %v1794_v30 = vpop.f32.mrf.mxu1  ;;  %v1834_v31 = vpop.f32.mrf.mxu3 }
 0x6f1   :  { %v2136_v16 = vsel %vm420_vm1, %v2135_v27, %v2134_v24  ;;  %v2137_v32 = vrot.slane %v1834_v31, 5  ;;  %v1925_v36 = vpack.c.bf16 %v1834_v31, %v1834_v31  ;;  %v1956_v53 = vunpack.c.l.b16 %v1924_v29  ;;  %v10913_v27 = vld [vmem:[%s20647_s10 + $0x60] sm:$0xf]  ;;  %v13668_v29 = vld [vmem:[%s20647_s10 + $0x64] sm:$0xf] }
 0x6f2   :  { %v10914_v2 = vor.u32 %v13669_v28, %v10913_v27  ;;  %v10915_v30 = vld [vmem:[%s20647_s10 + $0x6c] sm:$0xf0]  ;;  %v10997_v27 = vld [vmem:[%s20648_s9 + $0x48] sm:$0xf]  ;;  %v13642_v28 = vld [vmem:[%s20648_s9 + $0x50] sm:$0xf0] }
 0x6f3   :  { %v2138_v35 = vsel %vm422_vm2, %v2137_v32, %v2136_v16  ;;  %v1957_v1 = vunpack.c.l.b16 %v1925_v36  ;;  %v1964_v41 = vrot.slane %v1956_v53, 6  ;;  %v10957_v31 = vld [vmem:[%s20647_s10 + $0xb0] sm:$0xf]  ;;  %v10918_v16 = vor.u32 %v13668_v29, %v10915_v30  ;;  %v13679_v32 = vld [vmem:[%s20647_s10 + $0xb8] sm:$0xf0] }
 0x6f4   :  { %2346 = vmatpush.bf16.msra.mxu2 %v10914_v2  ;;  %v10958_v34 = vor.u32 %v13679_v32, %v10957_v31  ;;  %v11046_v36 = vor.u32 %v13654_v23, %v11045_v33  ;;  %v13665_v53 = vld [vmem:[%s20647_s10 + $0x4c] sm:$0xf]  ;;  %v10998_v29 = vor.u32 %v13642_v28, %v10997_v27  ;;  %v11047_v30 = vld [vmem:[%s20648_s9 + $0xb4] sm:$0xf0]  ;;  %v11053_v31 = vld [vmem:[%s20648_s9 + $0xb0] sm:$0xf] }
 0x6f5   :  { %v1966_v50 = vrot.slane %v1957_v1, 5  ;;  %v1965_v54 = vsel %vm420_vm1, %v1964_v41, %v1963_v48  ;;  %2359 = vmatpush.bf16.msra.mxu3 %v10918_v16  ;;  %v13676_v1 = vld [vmem:[%s20647_s10 + $0xa0] sm:$0xf0]  ;;  %v13651_v41 = vld [vmem:[%s20648_s9 + $0x98] sm:$0xf0] }
 0x6f6   :  { %v1815_v57 = vpop.f32.mrf.mxu2  ;;  %v1855_v39 = vpop.f32.mrf.mxu0  ;;  %2369 = vmatpush.bf16.msrb.mxu0 %v10958_v34  ;;  %2510 = vmatpush.bf16.msrb.mxu1 %v11046_v36  ;;  %v10933_v48 = vld [vmem:[%s20647_s10 + $0x80] sm:$0xf]  ;;  %v13653_v2 = vld [vmem:[%s20648_s9 + $0xac] sm:$0xf]  ;;  %v13655_v16 = vld [vmem:[%s20648_s9 + $0xb8] sm:$0xf0] }
 0x6f7   :  { %v1926_v26 = vpack.c.bf16 %v1855_v39, %v1855_v39  ;;  %v2139_v62 = vrot.slane %v1855_v39, 4  ;;  %v1967_v61 = vsel %vm422_vm2, %v1966_v50, %v1965_v54  ;;  %v10903_v39 = vld [vmem:[%s20647_s10 + $0x54] sm:$0xf0]  ;;  %v13673_v50 = vld [vmem:[%s20647_s10 + $0x88] sm:$0xf0]  ;;  %v11050_v32 = vor.u32 %v13653_v2, %v11047_v30 }
 0x6f8   :  { %v1836_v42 = vpop.f32.mrf.mxu3  ;;  %v1876_v43 = vpop.f32.mrf.mxu1  ;;  %v10934_v54 = vor.u32 %v13673_v50, %v10933_v48  ;;  %v11054_v33 = vor.u32 %v13655_v16, %v11053_v31  ;;  %v10897_v23 = vld [vmem:[%s20647_s10 + $0x38] sm:$0xf]  ;;  %v13664_v34 = vld [vmem:[%s20647_s10 + $0x40] sm:$0xf0]  ;;  %v10985_v36 = vld [vmem:[%s20648_s9 + $0x30] sm:$0xf] }
 0x6f9   :  { %v1958_v44 = vunpack.c.l.b16 %v1926_v26  ;;  %v2140_v45 = vsel %vm424_vm3, %v2139_v62, %v2138_v35  ;;  %v1927_v46 = vpack.c.bf16 %v1876_v43, %v1876_v43  ;;  %v2141_v49 = vrot.slane %v1876_v43, 3  ;;  %v10901_v35 = vld [vmem:[%s20647_s10 + $0x48] sm:$0xf]  ;;  %v10889_v43 = vld [vmem:[%s20647_s10 + $0x30] sm:$0xf] }
 0x6fa   :  { %v10902_v57 = vor.u32 %v13666_v37, %v10901_v35  ;;  %v10906_v26 = vor.u32 %v13665_v53, %v10903_v39  ;;  %v10946_v62 = vor.u32 %v13676_v1, %v10945_v52  ;;  %v11034_v42 = vor.u32 %v13651_v41, %v11033_v40  ;;  %v13639_v37 = vld [vmem:[%s20648_s9 + $0x38] sm:$0xf0]  ;;  %v13650_v53 = vld [vmem:[%s20648_s9 + $0x94] sm:$0xf]  ;;  %v11041_v1 = vld [vmem:[%s20648_s9 + $0x98] sm:$0xf] }
 0x6fb   :  { %v2142_v51 = vsel %vm426_vm4, %v2141_v49, %v2140_v45  ;;  %v1968_v55 = vrot.slane %v1958_v44, 4  ;;  %v1959_v58 = vunpack.c.l.b16 %v1927_v46  ;;  %v13663_v44 = vld [vmem:[%s20647_s10 + $0x38] sm:$0xf0]  ;;  %v13662_v45 = vld [vmem:[%s20647_s10 + $0x34] sm:$0xf]  ;;  %v10898_v35 = vor.u32 %v13664_v34, %v10897_v23 }
 0x6fc   :  { %2347 = vmatpush.bf16.msra.mxu2 %v10902_v57  ;;  %2360 = vmatpush.bf16.msra.mxu3 %v10906_v26  ;;  %v10890_v46 = vor.u32 %v13663_v44, %v10889_v43  ;;  %v10891_v49 = vld [vmem:[%s20647_s10 + $0x3c] sm:$0xf0]  ;;  %v10986_v39 = vor.u32 %v13639_v37, %v10985_v36  ;;  %v13652_v26 = vld [vmem:[%s20648_s9 + $0xa0] sm:$0xf0]  ;;  %v10655_v40 = vld [vmem:[%s20649_s2 + $0x10] sm:$0xff] }
 0x6fd   :  { %v1969_v3 = vsel %vm424_vm3, %v1968_v55, %v1967_v61  ;;  %v1970_v4 = vrot.slane %v1959_v58, 3  ;;  %2370 = vmatpush.bf16.msrb.mxu0 %v10946_v62  ;;  %2511 = vmatpush.bf16.msrb.mxu1 %v11034_v42  ;;  %v11021_v55 = vld [vmem:[%s20648_s9 + $0x78] sm:$0xf]  ;;  %v13648_v58 = vld [vmem:[%s20648_s9 + $0x80] sm:$0xf0]  ;;  %v11042_v42 = vor.u32 %v13652_v26, %v11041_v1 }
 0x6fe   :  { %v1857_v59 = vpop.f32.mrf.mxu0  ;;  %v1897_v60 = vpop.f32.mrf.mxu2  ;;  %v13660_v61 = vld [vmem:[%s20647_s10 + $0x20] sm:$0xf0]  ;;  %v11035_v57 = vld [vmem:[%s20648_s9 + $0x9c] sm:$0xf0]  ;;  %v10656_v41 = vld [vmem:[%s20649_s2 + $0x18] sm:$0xff] }
 0x6ff   :  { %v1928_v63 = vpack.c.bf16 %v1897_v60, %v1897_v60  ;;  %v2143_v0 = vrot.slane %v1897_v60, 2  ;;  %v1971_v15 = vsel %vm426_vm4, %v1970_v4, %v1969_v3  ;;  %v11022_v59 = vor.u32 %v13648_v58, %v11021_v55  ;;  %v10877_v60 = vld [vmem:[%s20647_s10 + $0x18] sm:$0xf]  ;;  %v10879_v3 = vld [vmem:[%s20647_s10 + $0x24] sm:$0xf0] }
 0x700   :  { %v1878_v5 = vpop.f32.mrf.mxu1  ;;  %v1918_v24 = vpop.f32.mrf.mxu3  ;;  %2348 = vmatpush.bf16.msra.mxu2 %v10890_v46  ;;  %v10921_v4 = vld [vmem:[%s20647_s10 + $0x68] sm:$0xf]  ;;  %v11038_v52 = vor.u32 %v13650_v53, %v11035_v57  ;;  %v10885_v62 = vld [vmem:[%s20647_s10 + $0x20] sm:$0xf]  ;;  %v13661_v43 = vld [vmem:[%s20647_s10 + $0x28] sm:$0xf0] }
 0x701   :  { %v1960_v6 = vunpack.c.l.b16 %v1928_v63  ;;  %v2144_v9 = vsel %vm428_vm5, %v2143_v0, %v2142_v51  ;;  %v1929_v10 = vpack.c.bf16 %v1918_v24, %v1918_v24  ;;  %v2145_v11 = vrot.slane %v1918_v24, 1  ;;  %v13659_v63 = vld [vmem:[%s20647_s10 + $0x1c] sm:$0xf]  ;;  %2371 = vmatpush.bf16.msrb.mxu0 %v10934_v54  ;;  %2512 = vmatpush.bf16.msrb.mxu1 %v11022_v59  ;;  %v13670_v5 = vld [vmem:[%s20647_s10 + $0x70] sm:$0xf0] }
 0x702   :  { %v10894_v51 = vor.u32 %v13662_v45, %v10891_v49  ;;  %v10878_v0 = vor.u32 %v13660_v61, %v10877_v60  ;;  %v10882_v24 = vor.u32 %v13659_v63, %v10879_v3  ;;  %v10973_v44 = vld [vmem:[%s20648_s9 + $0x18] sm:$0xf]  ;;  %v13636_v45 = vld [vmem:[%s20648_s9 + $0x20] sm:$0xf0]  ;;  %v13647_v46 = vld [vmem:[%s20648_s9 + $0x7c] sm:$0xf]  ;;  %v10886_v50 = vor.u32 %v13661_v43, %v10885_v62 }
 0x703   :  { %v1972_v12 = vrot.slane %v1960_v6, 2  ;;  %v1961_v13 = vunpack.c.l.b16 %v1929_v10  ;;  %v15972_v14 = vsel %vm430_vm6, %v2145_v11, %v2144_v9  ;;  %v10922_v6 = vor.u32 %v13670_v5, %v10921_v4  ;;  %v11009_v9 = vld [vmem:[%s20648_s9 + $0x60] sm:$0xf]  ;;  %v13645_v10 = vld [vmem:[%s20648_s9 + $0x68] sm:$0xf0] }
 0x704   :  { %2361 = vmatpush.bf16.msra.mxu3 %v10894_v51  ;;  %2349 = vmatpush.bf16.msra.mxu2 %v10878_v0  ;;  %v11010_v11 = vor.u32 %v13645_v10, %v11009_v9  ;;  %v11023_v49 = vld [vmem:[%s20648_s9 + $0x84] sm:$0xf0]  ;;  %v11029_v48 = vld [vmem:[%s20648_s9 + $0x80] sm:$0xf]  ;;  %v10974_v51 = vor.u32 %v13636_v45, %v10973_v44  ;;  %v13649_v54 = vld [vmem:[%s20648_s9 + $0x88] sm:$0xf0] }
 0x705   :  { %v1973_v17 = vsel %vm428_vm5, %v1972_v12, %v1971_v15  ;;  %v1974_v18 = vrot.slane %v1961_v13, 1  ;;  %v10865_v12 = vld [vmem:[%s20647_s10] sm:$0xf]  ;;  %v13657_v13 = vld [vmem:[%s20647_s10 + $0x8] sm:$0xf0]  ;;  %2372 = vmatpush.bf16.msrb.mxu0 %v10922_v6  ;;  %v11026_v59 = vor.u32 %v13647_v46, %v11023_v49  ;;  %v11030_v60 = vor.u32 %v13649_v54, %v11029_v48 }
 0x706   :  { %v1899_v19 = vpop.f32.mrf.mxu2  ;;  %v13656_v15 = vld [vmem:[%s20647_s10 + $0x4] sm:$0xf]  ;;  %2513 = vmatpush.bf16.msrb.mxu1 %v11010_v11  ;;  %v10873_v55 = vld [vmem:[%s20647_s10 + $0x8] sm:$0xf]  ;;  %v13658_v58 = vld [vmem:[%s20647_s10 + $0x10] sm:$0xf0] }
 0x707   :  { %v1975_v20 = vsel %vm430_vm6, %v1974_v18, %v1973_v17  ;;  %v10866_v17 = vor.u32 %v13657_v13, %v10865_v12  ;;  %v10867_v18 = vld [vmem:[%s20647_s10 + $0xc] sm:$0xf0]  ;;  %v10961_v61 = vld [vmem:[%s20648_s9] sm:$0xf]  ;;  %v13633_v63 = vld [vmem:[%s20648_s9 + $0x8] sm:$0xf0]  ;;  %v10874_v11 = vor.u32 %v13658_v58, %v10873_v55 }
 0x708   :  { %v1920_v22 = vpop.f32.mrf.mxu3  ;;  %v1976_v25 = vpack.c.b16 %v1975_v20, %v1975_v20  ;;  %2362 = vmatpush.bf16.msra.mxu3 %v10882_v24  ;;  %v10909_v19 = vld [vmem:[%s20647_s10 + $0x50] sm:$0xf]  ;;  %v13667_v20 = vld [vmem:[%s20647_s10 + $0x58] sm:$0xf0]  ;;  %v13644_v0 = vld [vmem:[%s20648_s9 + $0x64] sm:$0xf]  ;;  %v10962_v12 = vor.u32 %v13633_v63, %v10961_v61 }
 0x709   :  { %v10870_v22 = vor.u32 %v13656_v15, %v10867_v18  ;;  %2350 = vmatpush.bf16.msra.mxu2 %v10866_v17  ;;  %v11011_v5 = vld [vmem:[%s20648_s9 + $0x6c] sm:$0xf0]  ;;  %v11017_v24 = vld [vmem:[%s20648_s9 + $0x68] sm:$0xf]  ;;  %v13646_v6 = vld [vmem:[%s20648_s9 + $0x70] sm:$0xf0] }
 0x70a   :  { %2066 = vmatmul.bf16.vlgmr.msra.gmra.mxu0 %v1976_v25  ;;  %2079 = vmatmul.bf16.vlgmr.msra.gmra.mxu1 %v1976_v25  ;;  %v10910_v25 = vor.u32 %v13667_v20, %v10909_v19  ;;  %v11014_v17 = vor.u32 %v13644_v0, %v11011_v5  ;;  %v11018_v18 = vor.u32 %v13646_v6, %v11017_v24  ;;  %v13641_v19 = vld [vmem:[%s20648_s9 + $0x4c] sm:$0xf]  ;;  %v10999_v20 = vld [vmem:[%s20648_s9 + $0x54] sm:$0xf0]  ;;  %v13638_v2 = vld [vmem:[%s20648_s9 + $0x34] sm:$0xf] }
 0x70b   :  { %2514 = vmatpush.bf16.msrb.mxu1 %v10998_v29  ;;  %v11002_v27 = vor.u32 %v13641_v19, %v10999_v20  ;;  %v10987_v31 = vld [vmem:[%s20648_s9 + $0x3c] sm:$0xf0]  ;;  %v10993_v16 = vld [vmem:[%s20648_s9 + $0x38] sm:$0xf]  ;;  %v13635_v36 = vld [vmem:[%s20648_s9 + $0x1c] sm:$0xf] }
 0x70c   :  { %2363 = vmatpush.bf16.msra.mxu3 %v10870_v22  ;;  %2373 = vmatpush.bf16.msrb.mxu0 %v10910_v25  ;;  %v11005_v22 = vld [vmem:[%s20648_s9 + $0x50] sm:$0xf]  ;;  %v13643_v25 = vld [vmem:[%s20648_s9 + $0x58] sm:$0xf0]  ;;  %v10990_v23 = vor.u32 %v13638_v2, %v10987_v31  ;;  %v10981_v57 = vld [vmem:[%s20648_s9 + $0x20] sm:$0xf] }
 0x70d   :  { %2523 = vmatpush.bf16.msrb.mxu2 %v11050_v32  ;;  %v11006_v28 = vor.u32 %v13643_v25, %v11005_v22  ;;  %v13640_v32 = vld [vmem:[%s20648_s9 + $0x40] sm:$0xf0]  ;;  %v16244_v19 = vld [vmem:[%s20651_s12] sm:$0x7]  ;;  %v13710_v22 = vld [vmem:[%s20640_s6 + $0xec] sm:$0xf0] }
 0x70e   :  { %v10994_v34 = vor.u32 %v13640_v32, %v10993_v16  ;;  %v13632_v62 = vld [vmem:[%s20648_s9 + $0x4] sm:$0xf]  ;;  %v11176_v20 = vld [vmem:[%s20640_s6 + $0xe0] sm:$0xf]  ;;  %v11184_v2 = vld [vmem:[%s20640_s6 + $0xe8] sm:$0xf] }
 0x70f   :  { %2515 = vmatpush.bf16.msrb.mxu1 %v10986_v39  ;;  %v13637_v39 = vld [vmem:[%s20648_s9 + $0x28] sm:$0xf0]  ;;  %v13708_v25 = vld [vmem:[%s20640_s6 + $0xe4] sm:$0xf] }
 0x710   :  { %2536 = vmatpush.bf16.msrb.mxu3 %v11054_v33  ;;  %2374 = vmatpush.bf16.msrb.mxu0 %v10898_v35  ;;  %v10975_v35 = vld [vmem:[%s20648_s9 + $0x24] sm:$0xf0]  ;;  %v10982_v26 = vor.u32 %v13637_v39, %v10981_v57  ;;  %v11160_v57 = vld [vmem:[%s20640_s6 + $0xc0] sm:$0xf]  ;;  %v13706_v39 = vld [vmem:[%s20640_s6 + $0xcc] sm:$0xf0] }
 0x711   :  { %2524 = vmatpush.bf16.msrb.mxu2 %v11038_v52  ;;  %v10978_v1 = vor.u32 %v13635_v36, %v10975_v35 }
 0x713   :  { %2516 = vmatpush.bf16.msrb.mxu1 %v10974_v51 }
 0x714   :  { %2537 = vmatpush.bf16.msrb.mxu3 %v11042_v42  ;;  %2375 = vmatpush.bf16.msrb.mxu0 %v10886_v50  ;;  %v13634_v42 = vld [vmem:[%s20648_s9 + $0x10] sm:$0xf0] }
 0x715   :  { %2525 = vmatpush.bf16.msrb.mxu2 %v11026_v59 }
 0x717   :  { %2517 = vmatpush.bf16.msrb.mxu1 %v10962_v12 }
 0x718   :  { %2538 = vmatpush.bf16.msrb.mxu3 %v11030_v60  ;;  %2376 = vmatpush.bf16.msrb.mxu0 %v10874_v11 }
 0x719   :  { %2526 = vmatpush.bf16.msrb.mxu2 %v11014_v17 }
 0x71c   :  { %2539 = vmatpush.bf16.msrb.mxu3 %v11018_v18 }
 0x71d   :  { %2527 = vmatpush.bf16.msrb.mxu2 %v11002_v27  ;;  %v11177_v27 = vor.u32 %v13710_v22, %v11176_v20 }
 0x71f   :  { %2809 = vmatpush.bf16.msra.mxu0 %v11177_v27  ;;  %v11138_v27 = vld [vmem:[%s20640_s6 + $0x98] sm:$0xf0] }
 0x720   :  { %2540 = vmatpush.bf16.msrb.mxu3 %v11006_v28  ;;  %v11178_v28 = vld [vmem:[%s20640_s6 + $0xf0] sm:$0xf0] }
 0x721   :  { %2528 = vmatpush.bf16.msrb.mxu2 %v10990_v23  ;;  %v11181_v16 = vor.u32 %v13708_v25, %v11178_v28  ;;  %v11186_v23 = vld [vmem:[%s20640_s6 + $0xf8] sm:$0xf0]  ;;  %v13697_v25 = vld [vmem:[%s20640_s6 + $0x8c] sm:$0xf] }
 0x722   :  { %v11141_v28 = vor.u32 %v13697_v25, %v11138_v27  ;;  %v11066_v27 = vld [vmem:[%s20640_s6 + $0x10] sm:$0xf0] }
 0x723   :  { %2822 = vmatpush.bf16.msra.mxu1 %v11181_v16  ;;  %v11114_v16 = vld [vmem:[%s20640_s6 + $0x70] sm:$0xf0] }
 0x724   :  { %2541 = vmatpush.bf16.msrb.mxu3 %v10994_v34 }
 0x725   :  { %2529 = vmatpush.bf16.msrb.mxu2 %v10978_v1  ;;  %v11161_v1 = vor.u32 %v13706_v39, %v11160_v57  ;;  %v13693_v57 = vld [vmem:[%s20640_s6 + $0x6c] sm:$0xf]  ;;  %v11122_v39 = vld [vmem:[%s20640_s6 + $0x78] sm:$0xf0] }
 0x727   :  { %2810 = vmatpush.bf16.msra.mxu0 %v11161_v1 }
 0x728   :  { %2542 = vmatpush.bf16.msrb.mxu3 %v10982_v26  ;;  %v11162_v26 = vld [vmem:[%s20640_s6 + $0xd0] sm:$0xf0] }
 0x787   :  { %v2067_v3 = vpop.f32.mrf.mxu0  ;;  %v2080_v4 = vpop.f32.mrf.mxu1 }
 0x788   :  { %v2084_v9 = vadd.f32 %v10655_v40, %v2067_v3  ;;  %v2085_v10 = vadd.f32 %v10656_v41, %v2080_v4  ;;  %v10963_v40 = vld [vmem:[%s20648_s9 + $0xc] sm:$0xf0]  ;;  %v10969_v41 = vld [vmem:[%s20648_s9 + $0x8] sm:$0xf] }
 0x789   :  { %v10966_v43 = vor.u32 %v13632_v62, %v10963_v40  ;;  %v10970_v44 = vor.u32 %v13634_v42, %v10969_v41  ;;  %v10653_v3 = vld [vmem:[%s20650_s0 + $0x8] sm:$0xff]  ;;  %v13707_v40 = vld [vmem:[%s20640_s6 + $0xd4] sm:$0xf0] }
 0x78a   :  { %v10861_v13 = vmul.f32 -1.442695, %v2084_v9  ;;  %v10862_v15 = vmul.f32 -1.442695, %v2085_v10  ;;  %v11168_v62 = vld [vmem:[%s20640_s6 + $0xc8] sm:$0xf] }
 0x78b   :  { %2530 = vmatpush.bf16.msrb.mxu2 %v10966_v43  ;;  %2543 = vmatpush.bf16.msrb.mxu3 %v10970_v44 }
 0x78c   :  { %14476 = vpow2.f32 %v10861_v13 }
 0x78d   :  { %14478 = vpow2.f32 %v10862_v15 }
 0x78f   :  { %v2069_v29 = vpop.f32.mrf.mxu0  ;;  %v2082_v30 = vpop.f32.mrf.mxu1 }
 0x790   :  { %v13711_v29 = vld [vmem:[%s20640_s6 + $0xf4] sm:$0xf0]  ;;  %v1590_v30 = vperm.slane %v16244_v19, 0 }
 0x791   :  { %v11185_v32 = vor.u32 %v13711_v29, %v11184_v2  ;;  %v11112_v2 = vld [vmem:[%s20640_s6 + $0x60] sm:$0xf]  ;;  %v13694_v29 = vld [vmem:[%s20640_s6 + $0x6c] sm:$0xf0] }
 0x792   :  { %v14477_v33 = vpop.eup %14476  ;;  %v1596_v41 = vadd.f32 %v1590_v30, %v15750_v47  ;;  %v11144_v47 = vld [vmem:[%s20640_s6 + $0xa0] sm:$0xf]  ;;  %v13692_v30 = vld [vmem:[%s20640_s6 + $0x64] sm:$0xf] }
 0x793   :  { %v14479_v37 = vpop.eup %14478  ;;  %v2092_v53 = vadd.f32 1.0, %v14477_v33  ;;  %v13709_v33 = vld [vmem:[%s20640_s6 + $0xec] sm:$0xf] }
 0x794   :  { %v2093_v52 = vadd.f32 1.0, %v14479_v37  ;;  %v11189_v35 = vor.u32 %v13709_v33, %v11186_v23  ;;  %v13695_v33 = vld [vmem:[%s20640_s6 + $0x74] sm:$0xf0] }
 0x795   :  { %14480 = vrcp.f32 %v2092_v53  ;;  %v2105_v54 = vand.u32 2147483648, %v2092_v53  ;;  %v2103_v59 = vand.u32 2147483647, %v2092_v53  ;;  %vm2099_vm13 = vweird.f32 %v2092_v53 }
 0x796   :  { %14482 = vrcp.f32 %v2093_v52  ;;  %v2120_v55 = vand.u32 2147483648, %v2093_v52  ;;  %v2118_v61 = vand.u32 2147483647, %v2093_v52  ;;  %vm2114_vm14 = vweird.f32 %v2093_v52 }
 0x797   :  { %v2106_v4 = vor.u32 1.1754944e-38, %v2105_v54  ;;  %vm2104_vm9 = vcmp.eq.f32.partialorder %v2103_v59, 8.507059e+37  ;;  %v13700_v54 = vld [vmem:[%s20640_s6 + $0xa4] sm:$0xf]  ;;  %v11152_v59 = vld [vmem:[%s20640_s6 + $0xa8] sm:$0xf] }
 0x798   :  { %v2121_v5 = vor.u32 1.1754944e-38, %v2120_v55  ;;  %vm2119_vm10 = vcmp.eq.f32.partialorder %v2118_v61, 8.507059e+37 }
 0x79b   :  { %v14481_v45 = vpop.eup %14480 }
 0x79c   :  { %v14483_v46 = vpop.eup %14482  ;;  %v2095_v49 = vmul.f32 %v14481_v45, %v2092_v53  ;;  %vm2100_vm11 = vweird.f32 %v14481_v45 }
 0x79d   :  { %v2110_v48 = vmul.f32 %v14483_v46, %v2093_v52  ;;  %vm2115_vm12 = vweird.f32 %v14483_v46  ;;  %vm2101_vm15 = vmor %vm2099_vm13, %vm2100_vm11  ;;  %v13704_v52 = vld [vmem:[%s20640_s6 + $0xc4] sm:$0xf] }
 0x79e   :  { %v2096_v50 = vsub.f32 1.0, %v2095_v49  ;;  %vm2116_vm8 = vmor %vm2114_vm14, %vm2115_vm12  ;;  %v11165_v44 = vor.u32 %v13704_v52, %v11162_v26  ;;  %v11170_v49 = vld [vmem:[%s20640_s6 + $0xd8] sm:$0xf0] }
 0x79f   :  { %v2111_v51 = vsub.f32 1.0, %v2110_v48 }
 0x7a0   :  { %v2097_v58 = vmul.f32 %v14481_v45, %v2096_v50  ;;  %2823 = vmatpush.bf16.msra.mxu1 %v11165_v44 }
 0x7a1   :  { %v2112_v60 = vmul.f32 %v14483_v46, %v2111_v51  ;;  %v13702_v51 = vld [vmem:[%s20640_s6 + $0xac] sm:$0xf0] }
 0x7a2   :  { %v2098_v63 = vadd.f32 %v14481_v45, %v2097_v58  ;;  %v11145_v55 = vor.u32 %v13702_v51, %v11144_v47  ;;  %v11146_v58 = vld [vmem:[%s20640_s6 + $0xb0] sm:$0xf0]  ;;  %v13689_v47 = vld [vmem:[%s20640_s6 + $0x4c] sm:$0xf] }
 0x7a3   :  { %v2113_v0 = vadd.f32 %v14483_v46, %v2112_v60  ;;  %v13703_v60 = vld [vmem:[%s20640_s6 + $0xb4] sm:$0xf0] }
 0x7a4   :  { %v2102_v24 = vsel %vm2101_vm15, %v14481_v45, %v2098_v63  ;;  %v11169_v45 = vor.u32 %v13707_v40, %v11168_v62  ;;  %v11149_v63 = vor.u32 %v13700_v54, %v11146_v58  ;;  %2811 = vmatpush.bf16.msra.mxu0 %v11145_v55  ;;  %v11125_v62 = vor.u32 %v13693_v57, %v11122_v39  ;;  %v11080_v58 = vld [vmem:[%s20640_s6 + $0x20] sm:$0xf] }
 0x7a5   :  { %v2117_v6 = vsel %vm2116_vm8, %v14483_v46, %v2113_v0  ;;  %v2107_v9 = vsel %vm2104_vm9, %v2106_v4, %v2102_v24  ;;  %v13705_v46 = vld [vmem:[%s20640_s6 + $0xcc] sm:$0xf]  ;;  %v11153_v0 = vor.u32 %v13703_v60, %v11152_v59  ;;  %v11154_v4 = vld [vmem:[%s20640_s6 + $0xb8] sm:$0xf0]  ;;  %v13686_v59 = vld [vmem:[%s20640_s6 + $0x2c] sm:$0xf0] }
 0x7a6   :  { %v2122_v10 = vsel %vm2119_vm10, %v2121_v5, %v2117_v6  ;;  %v2124_v11 = vmul.f32 %v10653_v3, %v2107_v9  ;;  %v11173_v48 = vor.u32 %v13705_v46, %v11170_v49  ;;  %v13701_v3 = vld [vmem:[%s20640_s6 + $0xac] sm:$0xf]  ;;  %2824 = vmatpush.bf16.msra.mxu1 %v11149_v63  ;;  %v11128_v9 = vld [vmem:[%s20640_s6 + $0x80] sm:$0xf]  ;;  %v13684_v60 = vld [vmem:[%s20640_s6 + $0x24] sm:$0xf] }
 0x7a7   :  { %v2148_v12 = vmul.f32 %v15972_v14, %v2122_v10  ;;  %v16249_v14 = vld [vmem:[%s20652_s11] sm:$0x7]  ;;  %v11157_v6 = vor.u32 %v13701_v3, %v11154_v4  ;;  %v13698_v10 = vld [vmem:[%s20640_s6 + $0x8c] sm:$0xf0]  ;;  %v11082_v63 = vld [vmem:[%s20640_s6 + $0x30] sm:$0xf0] }
 0x7a8   :  { %v2149_v13 = vpack.c.bf16 %v2124_v11, %v2124_v11  ;;  %v2551_v31 = vperm.slane %v16249_v14, 0  ;;  %v13696_v11 = vld [vmem:[%s20640_s6 + $0x84] sm:$0xf]  ;;  %v13687_v3 = vld [vmem:[%s20640_s6 + $0x34] sm:$0xf0] }
 0x7a9   :  { %v2182_v15 = vpack.c.bf16 %v2148_v12, %v2148_v12  ;;  %v11129_v12 = vor.u32 %v13698_v10, %v11128_v9  ;;  %v11090_v9 = vld [vmem:[%s20640_s6 + $0x38] sm:$0xf0] }
 0x7aa   :  { %2518 = vmatmul.bf16.vlgmr.msrb.gmra.mxu1 %v2149_v13 }
 0x7ab   :  { %2351 = vmatmul.bf16.vlgmr.msra.gmra.mxu2 %v2182_v15  ;;  %2364 = vmatmul.bf16.vlgmr.msra.gmra.mxu3 %v2182_v15 }
 0x7ac   :  { %2377 = vmatmul.bf16.vlgmr.msrb.gmra.mxu0 %v2182_v15  ;;  %2835 = vmatpush.bf16.msra.mxu2 %v11185_v32  ;;  %v11136_v15 = vld [vmem:[%s20640_s6 + $0x88] sm:$0xf] }
 0x7ad   :  { %2848 = vmatpush.bf16.msra.mxu3 %v11189_v35  ;;  %2812 = vmatpush.bf16.msra.mxu0 %v11129_v12  ;;  %v11120_v32 = vld [vmem:[%s20640_s6 + $0x68] sm:$0xf]  ;;  %v2552_v35 = vperm.slane %v16249_v14, 1 }
 0x7b0   :  { %2836 = vmatpush.bf16.msra.mxu2 %v11169_v45 }
 0x7b1   :  { %2849 = vmatpush.bf16.msra.mxu3 %v11173_v48  ;;  %v11104_v48 = vld [vmem:[%s20640_s6 + $0x48] sm:$0xf] }
 0x7b4   :  { %2837 = vmatpush.bf16.msra.mxu2 %v11153_v0  ;;  %v11088_v0 = vld [vmem:[%s20640_s6 + $0x28] sm:$0xf] }
 0x7b5   :  { %2850 = vmatpush.bf16.msra.mxu3 %v11157_v6  ;;  %v13685_v6 = vld [vmem:[%s20640_s6 + $0x2c] sm:$0xf] }
 0x7b9   :  { %2851 = vmatpush.bf16.msra.mxu3 %v11141_v28  ;;  %v11072_v28 = vld [vmem:[%s20640_s6 + $0x8] sm:$0xf] }
 0x7bb   :  { %2531 = vmatmul.bf16.vlgmr.msrb.gmra.mxu2 %v2149_v13  ;;  %2544 = vmatmul.bf16.vlgmr.msrb.gmra.mxu3 %v2149_v13  ;;  %v11130_v13 = vld [vmem:[%s20640_s6 + $0x90] sm:$0xf0] }
 0x7bc   :  { %v11133_v20 = vor.u32 %v13696_v11, %v11130_v13  ;;  %v11093_v13 = vor.u32 %v13685_v6, %v11090_v9 }
 0x7bd   :  { %2852 = vmatpush.bf16.msra.mxu3 %v11125_v62 }
 0x7be   :  { %2825 = vmatpush.bf16.msra.mxu1 %v11133_v20  ;;  %v13680_v20 = vld [vmem:[%s20640_s6 + $0x4] sm:$0xf] }
 0x827   :  { %v2519_v17 = vpop.f32.mrf.mxu1 }
 0x829   :  { %v16239_v18 = vpop.f32.mrf.mxu0 }
 0x82e   :  { %v2352_v34 = vpop.f32.mrf.mxu2  ;;  %v16277_v36 = vpop.f32.mrf.mxu3 }
 0x82f   :  { %v2520_v37 = vadd.f32 %v2519_v17, %v2352_v34  ;;  %v2521_v53 = vpop.f32.mrf.mxu1  ;;  %v13699_v17 = vld [vmem:[%s20640_s6 + $0x94] sm:$0xf0]  ;;  %v1591_v34 = vperm.slane %v16244_v19, 1 }
 0x830   :  { %v11137_v22 = vor.u32 %v13699_v17, %v11136_v15  ;;  %v11121_v53 = vor.u32 %v13695_v33, %v11120_v32  ;;  %v11064_v15 = vld [vmem:[%s20640_s6] sm:$0xf]  ;;  %v13682_v17 = vld [vmem:[%s20640_s6 + $0xc] sm:$0xf0] }
 0x831   :  { %v2557_v42 = vadd.f32 %v2551_v31, %v2520_v37  ;;  %v2380_v43 = vpop.f32.mrf.mxu0  ;;  %v11113_v31 = vor.u32 %v13694_v29, %v11112_v2  ;;  %v11117_v37 = vor.u32 %v13692_v30, %v11114_v16  ;;  %v1597_v44 = vadd.f32 %v1591_v34, %v15755_v7  ;;  %v11106_v7 = vld [vmem:[%s20640_s6 + $0x58] sm:$0xf0]  ;;  %v13683_v2 = vld [vmem:[%s20640_s6 + $0x14] sm:$0xf0] }
 0x832   :  { %2838 = vmatpush.bf16.msra.mxu2 %v11137_v22  ;;  %v13688_v43 = vld [vmem:[%s20640_s6 + $0x44] sm:$0xf]  ;;  %v11109_v55 = vor.u32 %v13689_v47, %v11106_v7  ;;  %v11065_v25 = vor.u32 %v13682_v17, %v11064_v15  ;;  %v11069_v29 = vor.u32 %v13680_v20, %v11066_v27  ;;  %v11073_v30 = vor.u32 %v13683_v2, %v11072_v28  ;;  %v11074_v16 = vld [vmem:[%s20640_s6 + $0x18] sm:$0xf0] }
 0x833   :  { %v2560_v50 = vadd.f32 %v2557_v42, %v1596_v41  ;;  %2813 = vmatpush.bf16.msra.mxu0 %v11113_v31  ;;  %2826 = vmatpush.bf16.msra.mxu1 %v11117_v37  ;;  %v11096_v41 = vld [vmem:[%s20640_s6 + $0x40] sm:$0xf]  ;;  %v13690_v42 = vld [vmem:[%s20640_s6 + $0x4c] sm:$0xf0]  ;;  %v13681_v31 = vld [vmem:[%s20640_s6 + $0xc] sm:$0xf] }
 0x834   :  { %v11097_v46 = vor.u32 %v13690_v42, %v11096_v41  ;;  %2853 = vmatpush.bf16.msra.mxu3 %v11109_v55  ;;  %v11077_v33 = vor.u32 %v13681_v31, %v11074_v16  ;;  %v1592_v34 = vperm.slane %v16244_v19, 2 }
 0x835   :  { %v11055_v61 = vmul.f32 -1.442695, %v2560_v50  ;;  %v13691_v50 = vld [vmem:[%s20640_s6 + $0x54] sm:$0xf0] }
 0x836   :  { %v2354_v5 = vpop.f32.mrf.mxu2  ;;  %v2367_v24 = vpop.f32.mrf.mxu3  ;;  %2839 = vmatpush.bf16.msra.mxu2 %v11121_v53  ;;  %v11105_v51 = vor.u32 %v13691_v50, %v11104_v48  ;;  %v1598_v62 = vadd.f32 %v1592_v34, %v15757_v8 }
 0x837   :  { %14484 = vpow2.f32 %v11055_v61  ;;  %2814 = vmatpush.bf16.msra.mxu0 %v11097_v46  ;;  %v11081_v61 = vor.u32 %v13686_v59, %v11080_v58  ;;  %v11085_v5 = vor.u32 %v13684_v60, %v11082_v63  ;;  %v11089_v24 = vor.u32 %v13687_v3, %v11088_v0  ;;  %v11059_v60 = vld [vmem:[%s20642_s1 + $0x10] sm:$0xff]  ;;  %v14390_v63 = vld [vmem:[%s20643_s3 + $0x8] sm:$0xff]  }
 0x838   :  { %2854 = vmatpush.bf16.msra.mxu3 %v11093_v13  ;;  %v14391_v13 = vld [vmem:[%s20643_s3 + $0x10] sm:$0xff]   ;;  %v14295_v15 = vunpack.c.h.bf16 %v14390_v63 }
 0x839   :  { %v14299_v2 = vunpack.c.h.bf16 %v14391_v13  ;;  %v14298_v34 = vunpack.c.l.bf16 %v14391_v13 }
 0x83a   :  { %2840 = vmatpush.bf16.msra.mxu2 %v11105_v51 }
 0x83b   :  { %2815 = vmatpush.bf16.msra.mxu0 %v11081_v61  ;;  %v14289_v61 = vld [vmem:[%s20643_s3] sm:$0xff]  }
 0x83c   :  { %2855 = vmatpush.bf16.msra.mxu3 %v11077_v33  ;;  %v14291_v6 = vunpack.c.h.bf16 %v14289_v61 }
 0x83d   :  { %v14485_v23 = vpop.eup %14484 }
 0x83e   :  { %v16378_v52 = vadd.f32 1.0, %v14485_v23  ;;  %v2532_v1 = vpop.f32.mrf.mxu2  ;;  %v16380_v26 = vpop.f32.mrf.mxu3  ;;  %2841 = vmatpush.bf16.msra.mxu2 %v11089_v24  ;;  %v14294_v24 = vunpack.c.l.bf16 %v14390_v63 }
 0x83f   :  { %v2533_v40 = vadd.f32 %v2532_v1, %v16277_v36  ;;  %v11098_v36 = vld [vmem:[%s20640_s6 + $0x50] sm:$0xf0]  ;;  %2816 = vmatpush.bf16.msra.mxu0 %v11065_v25  ;;  %v2546_v42 = vadd.f32 %v16380_v26, %v16239_v18 }
 0x840   :  { %14486 = vrcp.f32 %v16378_v52  ;;  %v11101_v49 = vor.u32 %v13688_v43, %v11098_v36  ;;  %v2576_v23 = vand.u32 2147483648, %v16378_v52  ;;  %v2574_v37 = vand.u32 2147483647, %v16378_v52 }
 0x841   :  { %v2558_v45 = vadd.f32 %v2552_v35, %v2533_v40  ;;  %vm2570_vm12 = vweird.f32 %v16378_v52  ;;  %v2553_v43 = vperm.slane %v16249_v14, 2 }
 0x842   :  { %2827 = vmatpush.bf16.msra.mxu1 %v11101_v49  ;;  %2842 = vmatpush.bf16.msra.mxu2 %v11073_v30  ;;  %v2577_v1 = vor.u32 1.1754944e-38, %v2576_v23  ;;  %vm2575_vm14 = vcmp.eq.f32.partialorder %v2574_v37, 8.507059e+37 }
 0x843   :  { %v2580_v54 = vadd.f32 %v2558_v45, %v1597_v44  ;;  %v2559_v44 = vadd.f32 %v2553_v43, %v2546_v42 }
 0x845   :  { %v11056_v4 = vmul.f32 -1.442695, %v2580_v54  ;;  %v14722_v54 = vld [vmem:[%s20653_s13] sm:$0xff] }
 0x846   :  { %v14487_v10 = vpop.eup %14486  ;;  %v2534_v11 = vpop.f32.mrf.mxu2  ;;  %2828 = vmatpush.bf16.msra.mxu1 %v11085_v5  ;;  %v14290_v5 = vunpack.c.l.bf16 %v14289_v61 }
 0x847   :  { %v2547_v12 = vpop.f32.mrf.mxu3  ;;  %14488 = vpow2.f32 %v11056_v4  ;;  %v2566_v22 = vmul.f32 %v14487_v10, %v16378_v52  ;;  %vm2571_vm11 = vweird.f32 %v14487_v10 }
 0x848   :  { %vm2572_vm13 = vmor %vm2570_vm12, %vm2571_vm11  ;;  %vm20676_vm11 = vcmask 64512  }
 0x849   :  { %v2567_v32 = vsub.f32 1.0, %v2566_v22  ;;  %vm20677_vm12 = vmmov %vm20676_vm11 }
 0x84a   :  { %2829 = vmatpush.bf16.msra.mxu1 %v11069_v29 }
 0x84b   :  { %v2568_v35 = vmul.f32 %v14487_v10, %v2567_v32 }
 0x84d   :  { %v14489_v53 = vpop.eup %14488  ;;  %v2569_v57 = vadd.f32 %v14487_v10, %v2568_v35 }
 0x84e   :  { %v2584_v39 = vadd.f32 1.0, %v14489_v53 }
 0x84f   :  { %v2573_v40 = vsel %vm2572_vm13, %v14487_v10, %v2569_v57  ;;  %v14412_v57 = vld [vmem:[%s20641_s7] ss:$0 sm:$0xff]  ;;  %vm20678_vm13 = vcmask 1043456  }
 0x850   :  { %14490 = vrcp.f32 %v2584_v39  ;;  %v2578_v19 = vsel %vm2575_vm14, %v2577_v1, %v2573_v40  ;;  %v2596_v49 = vand.u32 2147483648, %v2584_v39  ;;  %v2594_v50 = vand.u32 2147483647, %v2584_v39  ;;  %vm20679_vm14 = vmmov %vm20678_vm13 }
 0x851   :  { %v2600_v41 = vmul.f32 %v2578_v19, %v1598_v62  ;;  %vm2590_vm8 = vweird.f32 %v2584_v39 }
 0x852   :  { %v2597_v47 = vor.u32 1.1754944e-38, %v2596_v49  ;;  %vm2595_vm10 = vcmp.eq.f32.partialorder %v2594_v50, 8.507059e+37 }
 0x853   :  { %v2601_v52 = vadd.f32 %v2600_v41, %v2559_v44 }
 0x855   :  { %14492 = vtanh.f32 %v2601_v52 }
 0x856   :  { %v14491_v36 = vpop.eup %14490 }
 0x857   :  { %v2586_v45 = vmul.f32 %v14491_v36, %v2584_v39  ;;  %vm2591_vm15 = vweird.f32 %v14491_v36  ;;  %v14392_v39 = vld [vmem:[%s20643_s3 + $0x18] sm:$0xff]  }
 0x858   :  { %vm2592_vm9 = vmor %vm2590_vm8, %vm2591_vm15  ;;  %v14302_v41 = vunpack.c.l.bf16 %v14392_v39  ;;  %v14303_v49 = vunpack.c.h.bf16 %v14392_v39 }
 0x859   :  { %v2587_v46 = vsub.f32 1.0, %v2586_v45  ;;  %vm20680_vm15 = vmmov %vm20678_vm13 }
 0x85a   :  { %vm20681_vm8 = vmmov %vm20678_vm13 }
 0x85b   :  { %v2588_v48 = vmul.f32 %v14491_v36, %v2587_v46  ;;  %v14493_v26 = vpop.eup %14492 }
 0x85d   :  { %v2589_v8 = vadd.f32 %v14491_v36, %v2588_v48 }
 0x85f   :  { %v2593_v51 = vsel %vm2592_vm9, %v14491_v36, %v2589_v8  ;;  %vm20682_vm9 = vmmov %vm20681_vm8 }
 0x860   :  { %v2598_v7 = vsel %vm2595_vm10, %v2597_v47, %v2593_v51  ;;  %vm20683_vm10 = vmmov %vm20681_vm8 }
 0x861   :  { %v2603_v18 = vsub.f32 1.0, %v2598_v7  ;;  %v2605_v55 = vmul.f32 %v14722_v54, %v2598_v7 }
 0x863   :  { %v2604_v14 = vmul.f32 %v14493_v26, %v2603_v18 }
 0x865   :  { %v2606_v58 = vadd.f32 %v2605_v55, %v2604_v14 }
 0x867   :  { %11057 = vst [vmem:[%s20653_s13 + $0x8] sm:$0xff] %v2606_v58  ;;  %v2616_v59 = vpack.c.bf16 %v2606_v58, %v2606_v58 }
 0x869   :  { %2817 = vmatmul.bf16.vlgmr.msra.gmra.mxu0 %v2616_v59  ;;  %2830 = vmatmul.bf16.vlgmr.msra.gmra.mxu1 %v2616_v59 }
 0x86a   :  { %2843 = vmatmul.bf16.vlgmr.msra.gmra.mxu2 %v2616_v59  ;;  %2856 = vmatmul.bf16.vlgmr.msra.gmra.mxu3 %v2616_v59 }
 0x8e6   :  { %v2818_v0 = vpop.f32.mrf.mxu0  ;;  %v16481_v3 = vpop.f32.mrf.mxu1 }
 0x8e7   :  { %v2872_v4 = vadd.f32 %v11059_v60, %v2818_v0 }
 0x8e9   :  { %v2897_v9 = vperm.slane %v2872_v4, 0  ;;  %v2891_v10 = vrot.slane %v2872_v4, 2  ;;  %v2890_v11 = vrot.slane %v2872_v4, 1  ;;  %v2892_v12 = vrot.slane %v2872_v4, 3 }
 0x8ea   :  { %v2894_v17 = vrot.slane %v2872_v4, 5  ;;  %v2893_v20 = vrot.slane %v2872_v4, 4  ;;  %v2895_v53 = vrot.slane %v2872_v4, 6  ;;  %v2896_v40 = vrot.slane %v2872_v4, 7 }
 0x8eb   :  { %v2913_v22 = vadd.f32 %v14290_v5, %v2897_v9  ;;  %v2899_v25 = vperm.slane %v2891_v10, 0  ;;  %v2898_v27 = vperm.slane %v2890_v11, 0  ;;  %v2900_v28 = vperm.slane %v2892_v12, 0 }
 0x8ec   :  { %v2902_v32 = vperm.slane %v2894_v17, 0  ;;  %v2901_v35 = vperm.slane %v2893_v20, 0  ;;  %v2903_v42 = vperm.slane %v2895_v53, 0  ;;  %v2904_v48 = vperm.slane %v2896_v40, 0  ;;  %v3019_v40 = vld [vmem:[%s20645_s4] sm:$0xf] }
 0x8ed   :  { %v16486_v29 = vpop.f32.mrf.mxu2  ;;  %v16488_v30 = vpop.f32.mrf.mxu3  ;;  %14494 = vtanh.f32 %v2913_v22  ;;  %v2915_v31 = vadd.f32 %v14294_v24, %v2899_v25  ;;  %v2914_v16 = vadd.f32 %v14291_v6, %v2898_v27  ;;  %v2916_v37 = vadd.f32 %v14295_v15, %v2900_v28 }
 0x8ee   :  { %v2820_v33 = vpop.f32.mrf.mxu0  ;;  %v2833_v23 = vpop.f32.mrf.mxu1  ;;  %v2918_v1 = vadd.f32 %v14299_v2, %v2902_v32  ;;  %v2917_v62 = vadd.f32 %v14298_v34, %v2901_v35  ;;  %v2919_v8 = vadd.f32 %v14302_v41, %v2903_v42  ;;  %v2920_v51 = vadd.f32 %v14303_v49, %v2904_v48  ;;  %v3024_v49 = vld [vmem:[%s20645_s4 + $0x14] sm:$0xf] }
 0x8ef   :  { %14496 = vtanh.f32 %v2915_v31  ;;  %v3033_v42 = vsel %vm20680_vm15, %v3019_v40, 0 }
 0x8f0   :  { %14498 = vtanh.f32 %v2914_v16  ;;  %3042 = vmatpush.bf16.msrb.mxu0 %v3033_v42  ;;  %v13722_v42 = vld [vmem:[%s20646_s8 + $0x54] sm:$0xf] }
 0x8f1   :  { %14500 = vtanh.f32 %v2916_v37 }
 0x8f2   :  { %14502 = vtanh.f32 %v2918_v1  ;;  %v3021_v1 = vld [vmem:[%s20645_s4 + $0x8] sm:$0xf] }
 0x8f3   :  { %v14495_v19 = vpop.eup %14494  ;;  %14504 = vtanh.f32 %v2917_v62  ;;  %v3022_v62 = vld [vmem:[%s20645_s4 + $0xc] sm:$0xf] }
 0x8f4   :  { %v2933_v43 = vmul.f32 %v14495_v19, %v14412_v57  ;;  %14506 = vtanh.f32 %v2919_v8  ;;  %v3075_v19 = vsel %vm20678_vm13, %v3021_v1, 0  ;;  %v3096_v41 = vsel %vm20679_vm14, %v3022_v62, 0  ;;  %v11254_v62 = vld [vmem:[%s20646_s8 + $0x68] sm:$0xf0] }
 0x8f5   :  { %v14497_v36 = vpop.eup %14496  ;;  %v2846_v44 = vpop.f32.mrf.mxu2  ;;  %14508 = vtanh.f32 %v2920_v51  ;;  %3084 = vmatpush.bf16.msrb.mxu2 %v3075_v19  ;;  %3105 = vmatpush.bf16.msrb.mxu3 %v3096_v41  ;;  %vm20686_vm13 = vcmask 1040384   ;;  %vm20687_vm14 = vcmask 64512   ;;  %v11244_v19 = vld [vmem:[%s20646_s8 + $0x50] sm:$0xf]  ;;  %v13723_v41 = vld [vmem:[%s20646_s8 + $0x54] sm:$0xf0] }
 0x8f6   :  { %v2859_v45 = vpop.f32.mrf.mxu3  ;;  %v14499_v52 = vpop.eup %14498  ;;  %2941 = vadd.xlane.f32.xlu2 %v2933_v43  ;;  %v2935_v46 = vmul.f32 %v14497_v36, %v14412_v57  ;;  %v3020_v43 = vld [vmem:[%s20645_s4 + $0x4] sm:$0xf]  ;;  %v3025_v44 = vld [vmem:[%s20645_s4 + $0x18] sm:$0xf]  ;;  %vm20688_vm15 = vmmov %vm20687_vm14 }
 0x8f7   :  { %v2934_v50 = vmul.f32 %v14499_v52, %v14412_v57  ;;  %v14501_v47 = vpop.eup %14500  ;;  %v3054_v36 = vsel %vm20681_vm8, %v3020_v43, 0  ;;  %v3159_v45 = vsel %vm20682_vm9, %v3025_v44, 0  ;;  %v3026_v52 = vld [vmem:[%s20645_s4 + $0x1c] sm:$0xf]  ;;  %v11245_v43 = vor.u32 %v13723_v41, %v11244_v19  ;;  %v11332_v41 = vld [vmem:[%s20647_s10 + $0x84] sm:$0xf0] }
 0x8f8   :  { %2945 = vadd.xlane.f32.xlu1 %v2935_v46  ;;  %v14503_v7 = vpop.eup %14502  ;;  %v2936_v26 = vmul.f32 %v14501_v47, %v14412_v57  ;;  %3063 = vmatpush.bf16.msrb.mxu1 %v3054_v36  ;;  %v3023_v46 = vld [vmem:[%s20645_s4 + $0x10] sm:$0xf]  ;;  %v3180_v48 = vsel %vm20683_vm10, %v3026_v52, 0  ;;  %v11246_v36 = vld [vmem:[%s20646_s8 + $0x58] sm:$0xf0] }
 0x8f9   :  { %2943 = vadd.xlane.f32.xlu0 %v2934_v50  ;;  %v14505_v18 = vpop.eup %14504  ;;  %v2938_v14 = vmul.f32 %v14503_v7, %v14412_v57  ;;  %3168 = vmatpush.bf16.msra.mxu2 %v3159_v45  ;;  %v11249_v44 = vor.u32 %v13722_v42, %v11246_v36  ;;  %v11236_v45 = vld [vmem:[%s20646_s8 + $0x40] sm:$0xf]  ;;  %v13721_v52 = vld [vmem:[%s20646_s8 + $0x44] sm:$0xf0]  ;;  %v13767_v19 = vld [vmem:[%s20647_s10 + $0x7c] sm:$0xf] }
 0x8fa   :  { %v2937_v54 = vmul.f32 %v14505_v18, %v14412_v57  ;;  %v14507_v55 = vpop.eup %14506  ;;  %3189 = vmatpush.bf16.msra.mxu3 %v3180_v48  ;;  %v11238_v48 = vld [vmem:[%s20646_s8 + $0x48] sm:$0xf0] }
 0x8fb   :  { %v14509_v58 = vpop.eup %14508  ;;  %v2939_v59 = vmul.f32 %v14507_v55, %v14412_v57 }
 0x8fc   :  { %v2940_v60 = vmul.f32 %v14509_v58, %v14412_v57 }
 0x8fe   :  { %2947 = vadd.xlane.f32.xlu2 %v2936_v26 }
 0x900   :  { %2951 = vadd.xlane.f32.xlu1 %v2938_v14 }
 0x901   :  { %2949 = vadd.xlane.f32.xlu0 %v2937_v54 }
 0x906   :  { %2953 = vadd.xlane.f32.xlu2 %v2939_v59 }
 0x909   :  { %2955 = vadd.xlane.f32.xlu0 %v2940_v60 }
 0x969   :  { %v2942_v61 = vpop.xlane.xlu2 %2941 }
 0x96a   :  { %v2965_v5 = vperm.slane %v2942_v61, %v14868_v21 }
 0x96b   :  { %v2946_v63 = vpop.xlane.xlu1 %2945 }
 0x96c   :  { %v2944_v0 = vpop.xlane.xlu0 %2943  ;;  %v2967_v24 = vperm.slane %v2946_v63, %v14868_v21 }
 0x96d   :  { %v2966_v4 = vperm.slane %v2944_v0, %v14868_v21 }
 0x96f   :  { %v2973_v6 = vsel %vm418_vm0, %v2966_v4, %v2965_v5 }
 0x970   :  { %v2974_v11 = vsel %vm420_vm1, %v2967_v24, %v2973_v6 }
 0x971   :  { %v2948_v9 = vpop.xlane.xlu2 %2947 }
 0x972   :  { %v2968_v10 = vperm.slane %v2948_v9, %v14868_v21 }
 0x973   :  { %v2952_v12 = vpop.xlane.xlu1 %2951 }
 0x974   :  { %v2950_v13 = vpop.xlane.xlu0 %2949  ;;  %v2975_v15 = vsel %vm422_vm2, %v2968_v10, %v2974_v11  ;;  %v2970_v20 = vperm.slane %v2952_v12, %v14868_v21 }
 0x975   :  { %v2969_v17 = vperm.slane %v2950_v13, %v14868_v21 }
 0x977   :  { %v2976_v22 = vsel %vm424_vm3, %v2969_v17, %v2975_v15 }
 0x978   :  { %v2977_v28 = vsel %vm426_vm4, %v2970_v20, %v2976_v22 }
 0x979   :  { %v2954_v25 = vpop.xlane.xlu2 %2953 }
 0x97a   :  { %v2971_v27 = vperm.slane %v2954_v25, %v14868_v21 }
 0x97c   :  { %v2956_v2 = vpop.xlane.xlu0 %2955  ;;  %v2978_v31 = vsel %vm428_vm5, %v2971_v27, %v2977_v28 }
 0x97d   :  { %v2972_v16 = vperm.slane %v2956_v2, %v14868_v21 }
 0x97f   :  { %v2979_v32 = vsel %vm430_vm6, %v2972_v16, %v2978_v31 }
 0x980   :  { %v2981_v33 = vsel %vm51_vm7, %v2979_v32, -1e+30  ;;  %v11260_v32 = vld [vmem:[%s20646_s8 + $0x70] sm:$0xf] }
 0x981   :  { %v2982_v23 = vsel %vm20676_vm11, %v2981_v33, -inf  ;;  %vm20684_vm11 = vmmov %vm20681_vm8 }
 0x982   :  { %2983 = vmax.xlane.f32.xlu1 %v2982_v23  ;;  %v3117_v50 = vsel %vm20684_vm11, %v3023_v46, 0  ;;  %v13726_v23 = vld [vmem:[%s20646_s8 + $0x74] sm:$0xf]  ;;  %v13720_v46 = vld [vmem:[%s20646_s8 + $0x44] sm:$0xf] }
 0x983   :  { %3126 = vmatpush.bf16.msra.mxu0 %v3117_v50  ;;  %v11241_v50 = vor.u32 %v13720_v46, %v11238_v48  ;;  %v11335_v46 = vor.u32 %v13767_v19, %v11332_v41  ;;  %v13765_v19 = vld [vmem:[%s20647_s10 + $0x68] sm:$0xf0] }
 0x9f5   :  { %v2984_v34 = vpop.xlane.xlu1 %2983 }
 0x9f6   :  { %v2985_v35 = vsub.f32 %v2981_v33, %v2984_v34  ;;  %v13727_v33 = vld [vmem:[%s20646_s8 + $0x74] sm:$0xf0] }
 0x9f7   :  { %v11261_v34 = vor.u32 %v13727_v33, %v11260_v32  ;;  %v13771_v32 = vld [vmem:[%s20647_s10 + $0x98] sm:$0xf0] }
 0x9f8   :  { %v2986_v37 = vmul.f32 1.442695, %v2985_v35  ;;  %v11262_v35 = vld [vmem:[%s20646_s8 + $0x78] sm:$0xf0] }
 0x9fa   :  { %14510 = vpow2.f32 %v2986_v37  ;;  %v11265_v37 = vor.u32 %v13726_v23, %v11262_v35  ;;  %v13770_v23 = vld [vmem:[%s20647_s10 + $0x94] sm:$0xf] }
 0xa00   :  { %v14511_v53 = vpop.eup %14510 }
 0xa01   :  { %v2988_v57 = vmul.f32 %v14511_v53, %v15038_v56  ;;  %v11252_v53 = vld [vmem:[%s20646_s8 + $0x60] sm:$0xf] }
 0xa03   :  { %v2989_v39 = vsel %vm20677_vm12, %v2988_v57, 0.0  ;;  %vm20685_vm12 = vmmov %vm20681_vm8 }
 0xa04   :  { %2990 = vadd.xlane.f32.xlu2 %v2989_v39  ;;  %v3138_v8 = vsel %vm20685_vm12, %v3024_v49, 0  ;;  %vm20689_vm8 = vmmov %vm20687_vm14  ;;  %v13724_v39 = vld [vmem:[%s20646_s8 + $0x64] sm:$0xf]  ;;  %v11237_v49 = vor.u32 %v13721_v52, %v11236_v45 }
 0xa05   :  { %3147 = vmatpush.bf16.msra.mxu1 %v3138_v8  ;;  %vm20690_vm9 = vmmov %vm20689_vm8  ;;  %v11257_v40 = vor.u32 %v13724_v39, %v11254_v62  ;;  %v11228_v8 = vld [vmem:[%s20646_s8 + $0x30] sm:$0xf]  ;;  %v11330_v39 = vld [vmem:[%s20647_s10 + $0x78] sm:$0xf] }
 0xa06   :  { %vm20691_vm10 = vmmov %vm20689_vm8 }
 0xa07   :  { %vm20692_vm11 = vmmov %vm20689_vm8 }
 0xa08   :  { %vm20693_vm12 = vmmov %vm20689_vm8 }
 0xa77   :  { %v2991_v47 = vpop.xlane.xlu2 %2990 }
 0xa78   :  { %v2992_v51 = vadd.f32 1e-30, %v2991_v47  ;;  %v13719_v47 = vld [vmem:[%s20646_s8 + $0x34] sm:$0xf0] }
 0xa7a   :  { %14512 = vrcp.f32 %v2992_v51  ;;  %v13718_v51 = vld [vmem:[%s20646_s8 + $0x34] sm:$0xf] }
 0xa80   :  { %v14513_v7 = vpop.eup %14512 }
 0xa81   :  { %v2994_v18 = vmul.f32 %v14513_v7, %v2988_v57  ;;  %v13725_v57 = vld [vmem:[%s20646_s8 + $0x64] sm:$0xf0]  ;;  %v11229_v7 = vor.u32 %v13719_v47, %v11228_v8 }
 0xa82   :  { %v11253_v1 = vor.u32 %v13725_v57, %v11252_v53 }
 0xa83   :  { %v2995_v26 = vpack.c.bf16 %v2994_v18, %v2994_v18  ;;  %v11230_v18 = vld [vmem:[%s20646_s8 + $0x38] sm:$0xf0] }
 0xa85   :  { %v2997_v14 = vrot.slane %v2995_v26, 3 }
 0xa87   :  { %v3000_v54 = vsel %vm20686_vm13, %v2995_v26, %v2997_v14  ;;  %v3002_v55 = vsel %vm418_vm0, %v2995_v26, %v2997_v14  ;;  %v3005_v9 = vsel %vm420_vm1, %v2995_v26, %v2997_v14  ;;  %v3008_v11 = vsel %vm422_vm2, %v2995_v26, %v2997_v14  ;;  %vm20694_vm13 = vmmov %vm20689_vm8  ;;  %v11220_v14 = vld [vmem:[%s20646_s8 + $0x20] sm:$0xf] }
 0xa88   :  { %v11190_v58 = vpack.i.b16 %v3000_v54, %v3000_v54  ;;  %v3012_v59 = vunpack.i.h.s16 %v3000_v54  ;;  %v3004_v60 = vrot.slane %v3002_v55, 1  ;;  %v3007_v12 = vrot.slane %v3005_v9, 2  ;;  %v13717_v54 = vld [vmem:[%s20646_s8 + $0x24] sm:$0xf0]  ;;  %v13716_v55 = vld [vmem:[%s20646_s8 + $0x24] sm:$0xf] }
 0xa89   :  { %v3010_v13 = vrot.slane %v3008_v11, 3  ;;  %v11233_v26 = vor.u32 %v13718_v51, %v11230_v18  ;;  %v13713_v11 = vld [vmem:[%s20646_s8 + $0x4] sm:$0xf0] }
 0xa8a   :  { %v3028_v61 = vperm.slane %v11190_v58, 0  ;;  %v3048_v63 = vpack.i.b16 %v3012_v59, %v3012_v59  ;;  %v11193_v0 = vpack.i.b16 %v3004_v60, %v3004_v60  ;;  %v3014_v4 = vunpack.i.h.s16 %v3004_v60  ;;  %v11222_v59 = vld [vmem:[%s20646_s8 + $0x28] sm:$0xf0] }
 0xa8b   :  { %v3016_v15 = vunpack.i.h.s16 %v3007_v12  ;;  %v11196_v17 = vpack.i.b16 %v3007_v12, %v3007_v12  ;;  %v3018_v20 = vunpack.i.h.s16 %v3010_v13  ;;  %v11199_v25 = vpack.i.b16 %v3010_v13, %v3010_v13  ;;  %v13712_v12 = vld [vmem:[%s20646_s8 + $0x4] sm:$0xf] }
 0xa8c   :  { %11191 = vmatmul.msk.bf16.vlgmr.msrb.gmra.mxu0 %vm20687_vm14, %v3028_v61  ;;  %v3049_v5 = vperm.slane %v3048_v63, 0  ;;  %v3070_v24 = vperm.slane %v11193_v0, 0  ;;  %v3090_v6 = vpack.i.b16 %v3014_v4, %v3014_v4  ;;  %v11221_v58 = vor.u32 %v13717_v54, %v11220_v14  ;;  %v11212_v61 = vld [vmem:[%s20646_s8 + $0x10] sm:$0xf]  ;;  %v13715_v63 = vld [vmem:[%s20646_s8 + $0x14] sm:$0xf0] }
 0xa8d   :  { %v3132_v22 = vpack.i.b16 %v3016_v15, %v3016_v15  ;;  %v3112_v27 = vperm.slane %v11196_v17, 0  ;;  %v3174_v28 = vpack.i.b16 %v3018_v20, %v3018_v20  ;;  %v3154_v31 = vperm.slane %v11199_v25, 0  ;;  %3331 = vmatpush.bf16.msrb.mxu0 %v11261_v34  ;;  %v13714_v0 = vld [vmem:[%s20646_s8 + $0x14] sm:$0xf]  ;;  %v11206_v17 = vld [vmem:[%s20646_s8 + $0x8] sm:$0xf0] }
 0xa8e   :  { %11192 = vmatmul.msk.bf16.vlgmr.msrb.gmra.mxu1 %vm20688_vm15, %v3049_v5  ;;  %11194 = vmatmul.msk.bf16.vlgmr.msrb.gmra.mxu2 %vm20689_vm8, %v3070_v24  ;;  %v3091_v10 = vperm.slane %v3090_v6, 0  ;;  %v11225_v60 = vor.u32 %v13716_v55, %v11222_v59  ;;  %v11213_v5 = vor.u32 %v13715_v63, %v11212_v61  ;;  %v11214_v24 = vld [vmem:[%s20646_s8 + $0x18] sm:$0xf0]  ;;  %v11209_v20 = vor.u32 %v13712_v12, %v11206_v17  ;;  %v13774_v25 = vld [vmem:[%s20647_s10 + $0xb0] sm:$0xf0] }
 0xa8f   :  { %v3133_v2 = vperm.slane %v3132_v22, 0  ;;  %v3175_v16 = vperm.slane %v3174_v28, 0  ;;  %3344 = vmatpush.bf16.msrb.mxu1 %v11265_v37  ;;  %v11217_v6 = vor.u32 %v13714_v0, %v11214_v24  ;;  %v11354_v22 = vld [vmem:[%s20647_s10 + $0xa8] sm:$0xf]  ;;  %v11344_v34 = vld [vmem:[%s20647_s10 + $0x9c] sm:$0xf0] }
 0xa90   :  { %11195 = vmatmul.msk.bf16.vlgmr.msrb.gmra.mxu3 %vm20690_vm9, %v3091_v10  ;;  %v11204_v10 = vld [vmem:[%s20646_s8] sm:$0xf]  ;;  %v11347_v57 = vor.u32 %v13770_v23, %v11344_v34 }
 0xa91   :  { %3332 = vmatpush.bf16.msrb.mxu0 %v11253_v1  ;;  %v11205_v15 = vor.u32 %v13713_v11, %v11204_v10  ;;  %v13768_v1 = vld [vmem:[%s20647_s10 + $0x80] sm:$0xf0] }
 0xa92   :  { %v11331_v52 = vor.u32 %v13768_v1, %v11330_v39 }
 0xa93   :  { %3345 = vmatpush.bf16.msrb.mxu1 %v11257_v40 }
 0xa95   :  { %3333 = vmatpush.bf16.msrb.mxu0 %v11245_v43 }
 0xa97   :  { %3346 = vmatpush.bf16.msrb.mxu1 %v11249_v44 }
 0xa99   :  { %3334 = vmatpush.bf16.msrb.mxu0 %v11237_v49 }
 0xa9b   :  { %3347 = vmatpush.bf16.msrb.mxu1 %v11241_v50 }
 0xa9c   :  { %11197 = vmatmul.msk.bf16.vlgmr.msra.gmra.mxu0 %vm20691_vm10, %v3112_v27  ;;  %v13773_v27 = vld [vmem:[%s20647_s10 + $0xac] sm:$0xf] }
 0xa9d   :  { %3335 = vmatpush.bf16.msrb.mxu0 %v11229_v7 }
 0xa9e   :  { %11198 = vmatmul.msk.bf16.vlgmr.msra.gmra.mxu1 %vm20692_vm11, %v3133_v2  ;;  %11200 = vmatmul.msk.bf16.vlgmr.msra.gmra.mxu2 %vm20693_vm12, %v3154_v31  ;;  %v11355_v2 = vor.u32 %v13774_v25, %v11354_v22  ;;  %v11356_v31 = vld [vmem:[%s20647_s10 + $0xb4] sm:$0xf0] }
 0xa9f   :  { %3348 = vmatpush.bf16.msrb.mxu1 %v11233_v26  ;;  %v11359_v33 = vor.u32 %v13773_v27, %v11356_v31 }
 0xaa0   :  { %11201 = vmatmul.msk.bf16.vlgmr.msra.gmra.mxu3 %vm20694_vm13, %v3175_v16  ;;  %v11342_v16 = vld [vmem:[%s20647_s10 + $0x90] sm:$0xf]  ;;  %3616 = vmatpush.bf16.msrb.mxu2 %v11355_v2 }
 0xaa1   :  { %3336 = vmatpush.bf16.msrb.mxu0 %v11221_v58  ;;  %v11343_v35 = vor.u32 %v13771_v32, %v11342_v16  ;;  %3629 = vmatpush.bf16.msrb.mxu3 %v11359_v33 }
 0xaa3   :  { %3349 = vmatpush.bf16.msrb.mxu1 %v11225_v60 }
 0xaa4   :  { %3617 = vmatpush.bf16.msrb.mxu2 %v11343_v35 }
 0xaa5   :  { %3337 = vmatpush.bf16.msrb.mxu0 %v11213_v5  ;;  %3630 = vmatpush.bf16.msrb.mxu3 %v11347_v57 }
 0xaa7   :  { %3350 = vmatpush.bf16.msrb.mxu1 %v11217_v6 }
 0xaa8   :  { %3618 = vmatpush.bf16.msrb.mxu2 %v11331_v52  ;;  %v11450_v52 = vld [vmem:[%s20648_s9 + $0xa8] sm:$0xf] }
 0xaa9   :  { %3338 = vmatpush.bf16.msrb.mxu0 %v11205_v15  ;;  %3631 = vmatpush.bf16.msrb.mxu3 %v11335_v46  ;;  %v13750_v46 = vld [vmem:[%s20648_s9 + $0xb0] sm:$0xf0] }
 0xaab   :  { %3351 = vmatpush.bf16.msrb.mxu1 %v11209_v20 }
 0xb09   :  { %v3044_v4 = vpop.f32.mrf.mxu0 }
 0xb0a   :  { %v3195_v8 = vpack.c.bf16 %v3044_v4, %v3044_v4 }
 0xb0b   :  { %v3065_v9 = vpop.f32.mrf.mxu1 }
 0xb0c   :  { %v3406_v13 = vrot.slane %v3065_v9, 7  ;;  %v3196_v62 = vpack.c.bf16 %v3065_v9, %v3065_v9  ;;  %v3227_v55 = vunpack.c.l.b16 %v3195_v8  ;;  %v13762_v8 = vld [vmem:[%s20647_s10 + $0x50] sm:$0xf0] }
 0xb0e   :  { %v3407_v28 = vsel %vm418_vm0, %v3406_v13, %v3044_v4  ;;  %v3228_v49 = vunpack.c.l.b16 %v3196_v62 }
 0xb10   :  { %v3235_v18 = vrot.slane %v3228_v49, 7 }
 0xb11   :  { %v3046_v37 = vpop.f32.mrf.mxu0  ;;  %v3086_v53 = vpop.f32.mrf.mxu2 }
 0xb12   :  { %v3408_v40 = vrot.slane %v3086_v53, 6  ;;  %v3197_v42 = vpack.c.bf16 %v3086_v53, %v3086_v53  ;;  %v3236_v4 = vsel %vm418_vm0, %v3235_v18, %v3227_v55  ;;  %v11350_v18 = vld [vmem:[%s20647_s10 + $0x98] sm:$0xf]  ;;  %v11438_v55 = vld [vmem:[%s20648_s9 + $0x90] sm:$0xf] }
 0xb13   :  { %v3067_v43 = vpop.f32.mrf.mxu1  ;;  %v3107_v36 = vpop.f32.mrf.mxu3 }
 0xb14   :  { %v3409_v44 = vsel %vm420_vm1, %v3408_v40, %v3407_v28  ;;  %v3410_v45 = vrot.slane %v3107_v36, 5  ;;  %v3198_v48 = vpack.c.bf16 %v3107_v36, %v3107_v36  ;;  %v3229_v47 = vunpack.c.l.b16 %v3197_v42  ;;  %v11318_v40 = vld [vmem:[%s20647_s10 + $0x60] sm:$0xf]  ;;  %v13764_v42 = vld [vmem:[%s20647_s10 + $0x64] sm:$0xf] }
 0xb15   :  { %v11319_v41 = vor.u32 %v13765_v19, %v11318_v40  ;;  %v11320_v43 = vld [vmem:[%s20647_s10 + $0x6c] sm:$0xf0]  ;;  %v11402_v40 = vld [vmem:[%s20648_s9 + $0x48] sm:$0xf]  ;;  %v13738_v19 = vld [vmem:[%s20648_s9 + $0x50] sm:$0xf0] }
 0xb16   :  { %v3411_v50 = vsel %vm422_vm2, %v3410_v45, %v3409_v44  ;;  %v3230_v26 = vunpack.c.l.b16 %v3198_v48  ;;  %v3237_v58 = vrot.slane %v3229_v47, 6  ;;  %v11362_v36 = vld [vmem:[%s20647_s10 + $0xb0] sm:$0xf]  ;;  %v11323_v44 = vor.u32 %v13764_v42, %v11320_v43  ;;  %v13775_v45 = vld [vmem:[%s20647_s10 + $0xb8] sm:$0xf0] }
 0xb17   :  { %3619 = vmatpush.bf16.msrb.mxu2 %v11319_v41  ;;  %v11363_v49 = vor.u32 %v13775_v45, %v11362_v36  ;;  %v11451_v48 = vor.u32 %v13750_v46, %v11450_v52  ;;  %v13761_v47 = vld [vmem:[%s20647_s10 + $0x4c] sm:$0xf]  ;;  %v11403_v42 = vor.u32 %v13738_v19, %v11402_v40  ;;  %v11452_v43 = vld [vmem:[%s20648_s9 + $0xb4] sm:$0xf0]  ;;  %v11458_v36 = vld [vmem:[%s20648_s9 + $0xb0] sm:$0xf] }
 0xb18   :  { %v3239_v24 = vrot.slane %v3230_v26, 5  ;;  %v3238_v9 = vsel %vm420_vm1, %v3237_v58, %v3236_v4  ;;  %3632 = vmatpush.bf16.msrb.mxu3 %v11323_v44  ;;  %v13772_v26 = vld [vmem:[%s20647_s10 + $0xa0] sm:$0xf0]  ;;  %v13747_v58 = vld [vmem:[%s20648_s9 + $0x98] sm:$0xf0] }
 0xb19   :  { %v3088_v51 = vpop.f32.mrf.mxu2  ;;  %v3128_v7 = vpop.f32.mrf.mxu0  ;;  %3642 = vmatpush.bf16.msra.mxu0 %v11363_v49  ;;  %3783 = vmatpush.bf16.msra.mxu1 %v11451_v48  ;;  %v11338_v4 = vld [vmem:[%s20647_s10 + $0x80] sm:$0xf]  ;;  %v13749_v41 = vld [vmem:[%s20648_s9 + $0xac] sm:$0xf]  ;;  %v13751_v44 = vld [vmem:[%s20648_s9 + $0xb8] sm:$0xf0] }
 0xb1a   :  { %v3199_v14 = vpack.c.bf16 %v3128_v7, %v3128_v7  ;;  %v3412_v54 = vrot.slane %v3128_v7, 4  ;;  %v3240_v15 = vsel %vm422_vm2, %v3239_v24, %v3238_v9  ;;  %v11308_v7 = vld [vmem:[%s20647_s10 + $0x54] sm:$0xf0]  ;;  %v13769_v24 = vld [vmem:[%s20647_s10 + $0x88] sm:$0xf0]  ;;  %v11455_v45 = vor.u32 %v13749_v41, %v11452_v43 }
 0xb1b   :  { %v3109_v59 = vpop.f32.mrf.mxu3  ;;  %v3149_v60 = vpop.f32.mrf.mxu1  ;;  %v11339_v9 = vor.u32 %v13769_v24, %v11338_v4  ;;  %v11459_v52 = vor.u32 %v13751_v44, %v11458_v36  ;;  %v11302_v46 = vld [vmem:[%s20647_s10 + $0x38] sm:$0xf]  ;;  %v13760_v49 = vld [vmem:[%s20647_s10 + $0x40] sm:$0xf0]  ;;  %v11390_v48 = vld [vmem:[%s20648_s9 + $0x30] sm:$0xf] }
 0xb1c   :  { %v3231_v61 = vunpack.c.l.b16 %v3199_v14  ;;  %v3413_v63 = vsel %vm424_vm3, %v3412_v54, %v3411_v50  ;;  %v3200_v0 = vpack.c.bf16 %v3149_v60, %v3149_v60  ;;  %v3414_v5 = vrot.slane %v3149_v60, 3  ;;  %v11306_v50 = vld [vmem:[%s20647_s10 + $0x48] sm:$0xf]  ;;  %v11294_v60 = vld [vmem:[%s20647_s10 + $0x30] sm:$0xf] }
 0xb1d   :  { %v11307_v51 = vor.u32 %v13762_v8, %v11306_v50  ;;  %v11311_v14 = vor.u32 %v13761_v47, %v11308_v7  ;;  %v11351_v54 = vor.u32 %v13772_v26, %v11350_v18  ;;  %v11439_v59 = vor.u32 %v13747_v58, %v11438_v55  ;;  %v13735_v8 = vld [vmem:[%s20648_s9 + $0x38] sm:$0xf0]  ;;  %v13746_v47 = vld [vmem:[%s20648_s9 + $0x94] sm:$0xf]  ;;  %v11060_v7 = vld [vmem:[%s20649_s2 + $0x20] sm:$0xff] }
 0xb1e   :  { %v3415_v6 = vsel %vm426_vm4, %v3414_v5, %v3413_v63  ;;  %v3241_v10 = vrot.slane %v3231_v61, 4  ;;  %v3232_v11 = vunpack.c.l.b16 %v3200_v0  ;;  %v13759_v61 = vld [vmem:[%s20647_s10 + $0x38] sm:$0xf0]  ;;  %v13758_v63 = vld [vmem:[%s20647_s10 + $0x34] sm:$0xf]  ;;  %v11303_v50 = vor.u32 %v13760_v49, %v11302_v46  ;;  %v11061_v18 = vld [vmem:[%s20649_s2 + $0x28] sm:$0xff] }
 0xb1f   :  { %3620 = vmatpush.bf16.msrb.mxu2 %v11307_v51  ;;  %3633 = vmatpush.bf16.msrb.mxu3 %v11311_v14  ;;  %v11295_v0 = vor.u32 %v13759_v61, %v11294_v60  ;;  %v11296_v5 = vld [vmem:[%s20647_s10 + $0x3c] sm:$0xf0]  ;;  %v11391_v26 = vor.u32 %v13735_v8, %v11390_v48  ;;  %v13748_v55 = vld [vmem:[%s20648_s9 + $0xa0] sm:$0xf0]  ;;  %v13757_v60 = vld [vmem:[%s20647_s10 + $0x28] sm:$0xf0] }
 0xb20   :  { %v3242_v22 = vsel %vm424_vm3, %v3241_v10, %v3240_v15  ;;  %v3243_v25 = vrot.slane %v3232_v11, 3  ;;  %3643 = vmatpush.bf16.msra.mxu0 %v11351_v54  ;;  %3784 = vmatpush.bf16.msra.mxu1 %v11439_v59  ;;  %v11426_v10 = vld [vmem:[%s20648_s9 + $0x78] sm:$0xf]  ;;  %v13744_v11 = vld [vmem:[%s20648_s9 + $0x80] sm:$0xf0] }
 0xb21   :  { %v3130_v12 = vpop.f32.mrf.mxu0  ;;  %v3170_v13 = vpop.f32.mrf.mxu2  ;;  %v13756_v15 = vld [vmem:[%s20647_s10 + $0x20] sm:$0xf0]  ;;  %v11440_v51 = vld [vmem:[%s20648_s9 + $0x9c] sm:$0xf0]  ;;  %v11446_v54 = vld [vmem:[%s20648_s9 + $0x98] sm:$0xf] }
 0xb22   :  { %v3201_v17 = vpack.c.bf16 %v3170_v13, %v3170_v13  ;;  %v3416_v20 = vrot.slane %v3170_v13, 2  ;;  %v3244_v35 = vsel %vm426_vm4, %v3243_v25, %v3242_v22  ;;  %v11427_v12 = vor.u32 %v13744_v11, %v11426_v10  ;;  %v11282_v13 = vld [vmem:[%s20647_s10 + $0x18] sm:$0xf]  ;;  %v11284_v22 = vld [vmem:[%s20647_s10 + $0x24] sm:$0xf0] }
 0xb23   :  { %v3151_v27 = vpop.f32.mrf.mxu1  ;;  %v3191_v28 = vpop.f32.mrf.mxu3  ;;  %3621 = vmatpush.bf16.msrb.mxu2 %v11295_v0  ;;  %v11326_v25 = vld [vmem:[%s20647_s10 + $0x68] sm:$0xf]  ;;  %v11443_v14 = vor.u32 %v13746_v47, %v11440_v51  ;;  %v11290_v58 = vld [vmem:[%s20647_s10 + $0x20] sm:$0xf]  ;;  %v11447_v59 = vor.u32 %v13748_v55, %v11446_v54  ;;  %v11378_v61 = vld [vmem:[%s20648_s9 + $0x18] sm:$0xf] }
 0xb24   :  { %v3233_v2 = vunpack.c.l.b16 %v3201_v17  ;;  %v3417_v31 = vsel %vm428_vm5, %v3416_v20, %v3415_v6  ;;  %v3202_v16 = vpack.c.bf16 %v3191_v28, %v3191_v28  ;;  %v3418_v32 = vrot.slane %v3191_v28, 1  ;;  %v13755_v17 = vld [vmem:[%s20647_s10 + $0x1c] sm:$0xf]  ;;  %3644 = vmatpush.bf16.msra.mxu0 %v11339_v9  ;;  %3785 = vmatpush.bf16.msra.mxu1 %v11427_v12  ;;  %v13766_v27 = vld [vmem:[%s20647_s10 + $0x70] sm:$0xf0] }
 0xb25   :  { %v11299_v6 = vor.u32 %v13758_v63, %v11296_v5  ;;  %v11283_v20 = vor.u32 %v13756_v15, %v11282_v13  ;;  %v11287_v28 = vor.u32 %v13755_v17, %v11284_v22  ;;  %v13732_v63 = vld [vmem:[%s20648_s9 + $0x20] sm:$0xf0]  ;;  %v11291_v0 = vor.u32 %v13757_v60, %v11290_v58  ;;  %v13743_v4 = vld [vmem:[%s20648_s9 + $0x7c] sm:$0xf]  ;;  %v11428_v24 = vld [vmem:[%s20648_s9 + $0x84] sm:$0xf0] }
 0xb26   :  { %v3245_v33 = vrot.slane %v3233_v2, 2  ;;  %v3234_v23 = vunpack.c.l.b16 %v3202_v16  ;;  %v16703_v34 = vsel %vm430_vm6, %v3418_v32, %v3417_v31  ;;  %v11327_v2 = vor.u32 %v13766_v27, %v11326_v25  ;;  %v11414_v31 = vld [vmem:[%s20648_s9 + $0x60] sm:$0xf]  ;;  %v13741_v16 = vld [vmem:[%s20648_s9 + $0x68] sm:$0xf0] }
 0xb27   :  { %3634 = vmatpush.bf16.msrb.mxu3 %v11299_v6  ;;  %3622 = vmatpush.bf16.msrb.mxu2 %v11283_v20  ;;  %v11415_v32 = vor.u32 %v13741_v16, %v11414_v31  ;;  %v11379_v5 = vor.u32 %v13732_v63, %v11378_v61  ;;  %v11434_v6 = vld [vmem:[%s20648_s9 + $0x80] sm:$0xf]  ;;  %v11431_v9 = vor.u32 %v13743_v4, %v11428_v24  ;;  %v13745_v10 = vld [vmem:[%s20648_s9 + $0x88] sm:$0xf0]  ;;  %v11278_v11 = vld [vmem:[%s20647_s10 + $0x8] sm:$0xf] }
 0xb28   :  { %v3246_v37 = vsel %vm428_vm5, %v3245_v33, %v3244_v35  ;;  %v3247_v53 = vrot.slane %v3234_v23, 1  ;;  %v11270_v33 = vld [vmem:[%s20647_s10] sm:$0xf]  ;;  %v13753_v23 = vld [vmem:[%s20647_s10 + $0x8] sm:$0xf0]  ;;  %3645 = vmatpush.bf16.msra.mxu0 %v11327_v2  ;;  %v11435_v17 = vor.u32 %v13745_v10, %v11434_v6 }
 0xb29   :  { %v3172_v57 = vpop.f32.mrf.mxu2  ;;  %v13752_v35 = vld [vmem:[%s20647_s10 + $0x4] sm:$0xf]  ;;  %3786 = vmatpush.bf16.msra.mxu1 %v11415_v32  ;;  %v13754_v12 = vld [vmem:[%s20647_s10 + $0x10] sm:$0xf0]  ;;  %v11366_v20 = vld [vmem:[%s20648_s9] sm:$0xf] }
 0xb2a   :  { %v3248_v39 = vsel %vm430_vm6, %v3247_v53, %v3246_v37  ;;  %v11271_v37 = vor.u32 %v13753_v23, %v11270_v33  ;;  %v11272_v53 = vld [vmem:[%s20647_s10 + $0xc] sm:$0xf0]  ;;  %v13729_v22 = vld [vmem:[%s20648_s9 + $0x8] sm:$0xf0]  ;;  %v13740_v25 = vld [vmem:[%s20648_s9 + $0x64] sm:$0xf]  ;;  %v11279_v32 = vor.u32 %v13754_v12, %v11278_v11 }
 0xb2b   :  { %v3249_v1 = vpack.c.b16 %v3248_v39, %v3248_v39  ;;  %v3193_v62 = vpop.f32.mrf.mxu3  ;;  %3635 = vmatpush.bf16.msrb.mxu3 %v11287_v28  ;;  %v11314_v57 = vld [vmem:[%s20647_s10 + $0x50] sm:$0xf]  ;;  %v13763_v39 = vld [vmem:[%s20647_s10 + $0x58] sm:$0xf0]  ;;  %v11422_v31 = vld [vmem:[%s20648_s9 + $0x68] sm:$0xf]  ;;  %v11367_v33 = vor.u32 %v13729_v22, %v11366_v20 }
 0xb2c   :  { %v11315_v62 = vor.u32 %v13763_v39, %v11314_v57  ;;  %3623 = vmatpush.bf16.msrb.mxu2 %v11271_v37  ;;  %v11416_v2 = vld [vmem:[%s20648_s9 + $0x6c] sm:$0xf0]  ;;  %v13742_v16 = vld [vmem:[%s20648_s9 + $0x70] sm:$0xf0]  ;;  %v13737_v57 = vld [vmem:[%s20648_s9 + $0x4c] sm:$0xf] }
 0xb2d   :  { %3339 = vmatmul.bf16.vlgmr.msrb.gmra.mxu0 %v3249_v1  ;;  %3352 = vmatmul.bf16.vlgmr.msrb.gmra.mxu1 %v3249_v1  ;;  %v11275_v1 = vor.u32 %v13752_v35, %v11272_v53  ;;  %v11419_v37 = vor.u32 %v13740_v25, %v11416_v2  ;;  %v11423_v53 = vor.u32 %v13742_v16, %v11422_v31  ;;  %v11404_v39 = vld [vmem:[%s20648_s9 + $0x54] sm:$0xf0]  ;;  %v13734_v41 = vld [vmem:[%s20648_s9 + $0x34] sm:$0xf]  ;;  %v11392_v36 = vld [vmem:[%s20648_s9 + $0x3c] sm:$0xf0] }
 0xb2e   :  { %3646 = vmatpush.bf16.msra.mxu0 %v11315_v62  ;;  %3787 = vmatpush.bf16.msra.mxu1 %v11403_v42  ;;  %v13739_v62 = vld [vmem:[%s20648_s9 + $0x58] sm:$0xf0]  ;;  %v11407_v40 = vor.u32 %v13737_v57, %v11404_v39  ;;  %v11398_v44 = vld [vmem:[%s20648_s9 + $0x38] sm:$0xf]  ;;  %v11395_v46 = vor.u32 %v13734_v41, %v11392_v36  ;;  %v11386_v51 = vld [vmem:[%s20648_s9 + $0x20] sm:$0xf] }
 0xb2f   :  { %3636 = vmatpush.bf16.msrb.mxu3 %v11275_v1  ;;  %v11410_v1 = vld [vmem:[%s20648_s9 + $0x50] sm:$0xf]  ;;  %v13731_v48 = vld [vmem:[%s20648_s9 + $0x1c] sm:$0xf]  ;;  %v13728_v54 = vld [vmem:[%s20648_s9 + $0x4] sm:$0xf] }
 0xb30   :  { %3796 = vmatpush.bf16.msra.mxu2 %v11455_v45  ;;  %v11411_v19 = vor.u32 %v13739_v62, %v11410_v1  ;;  %v13736_v45 = vld [vmem:[%s20648_s9 + $0x40] sm:$0xf0]  ;;  %v11368_v55 = vld [vmem:[%s20648_s9 + $0xc] sm:$0xf0]  ;;  %v11374_v58 = vld [vmem:[%s20648_s9 + $0x8] sm:$0xf] }
 0xb31   :  { %v11399_v49 = vor.u32 %v13736_v45, %v11398_v44  ;;  %v11371_v60 = vor.u32 %v13728_v54, %v11368_v55  ;;  %v11058_v25 = vld [vmem:[%s20650_s0 + $0x10] sm:$0xff]  ;;  %v16975_v57 = vld [vmem:[%s20651_s12] sm:$0x7]  ;;  %v13804_v62 = vld [vmem:[%s20640_s6 + $0xe4] sm:$0xf] }
 0xb32   :  { %3647 = vmatpush.bf16.msra.mxu0 %v11303_v50  ;;  %3788 = vmatpush.bf16.msra.mxu1 %v11391_v26  ;;  %v11380_v50 = vld [vmem:[%s20648_s9 + $0x24] sm:$0xf0]  ;;  %v11581_v39 = vld [vmem:[%s20640_s6 + $0xe0] sm:$0xf]  ;;  %v13806_v1 = vld [vmem:[%s20640_s6 + $0xec] sm:$0xf0] }
 0xb33   :  { %3809 = vmatpush.bf16.msra.mxu3 %v11459_v52  ;;  %v11383_v26 = vor.u32 %v13731_v48, %v11380_v50  ;;  %v11589_v41 = vld [vmem:[%s20640_s6 + $0xe8] sm:$0xf]  ;;  %v13803_v55 = vld [vmem:[%s20640_s6 + $0xd4] sm:$0xf0] }
 0xb34   :  { %3797 = vmatpush.bf16.msra.mxu2 %v11443_v14  ;;  %v11573_v54 = vld [vmem:[%s20640_s6 + $0xc8] sm:$0xf] }
 0xb36   :  { %3648 = vmatpush.bf16.msra.mxu0 %v11291_v0  ;;  %3789 = vmatpush.bf16.msra.mxu1 %v11379_v5 }
 0xb37   :  { %3810 = vmatpush.bf16.msra.mxu3 %v11447_v59  ;;  %v13730_v59 = vld [vmem:[%s20648_s9 + $0x10] sm:$0xf0] }
 0xb38   :  { %3798 = vmatpush.bf16.msra.mxu2 %v11431_v9  ;;  %v11375_v61 = vor.u32 %v13730_v59, %v11374_v58 }
 0xb3a   :  { %3649 = vmatpush.bf16.msra.mxu0 %v11279_v32  ;;  %3790 = vmatpush.bf16.msra.mxu1 %v11367_v33 }
 0xb3b   :  { %3811 = vmatpush.bf16.msra.mxu3 %v11435_v17 }
 0xb3c   :  { %3799 = vmatpush.bf16.msra.mxu2 %v11419_v37 }
 0xb3f   :  { %3812 = vmatpush.bf16.msra.mxu3 %v11423_v53 }
 0xb40   :  { %3800 = vmatpush.bf16.msra.mxu2 %v11407_v40  ;;  %v11582_v40 = vor.u32 %v13806_v1, %v11581_v39 }
 0xb42   :  { %4082 = vmatpush.bf16.msrb.mxu0 %v11582_v40  ;;  %v11543_v40 = vld [vmem:[%s20640_s6 + $0x98] sm:$0xf0] }
 0xb43   :  { %3813 = vmatpush.bf16.msra.mxu3 %v11411_v19  ;;  %v11583_v19 = vld [vmem:[%s20640_s6 + $0xf0] sm:$0xf0] }
 0xb44   :  { %3801 = vmatpush.bf16.msra.mxu2 %v11395_v46  ;;  %v11586_v44 = vor.u32 %v13804_v62, %v11583_v19  ;;  %v11591_v46 = vld [vmem:[%s20640_s6 + $0xf8] sm:$0xf0]  ;;  %v13793_v62 = vld [vmem:[%s20640_s6 + $0x8c] sm:$0xf] }
 0xb45   :  { %v11546_v19 = vor.u32 %v13793_v62, %v11543_v40  ;;  %v11471_v40 = vld [vmem:[%s20640_s6 + $0x10] sm:$0xf0] }
 0xb46   :  { %4095 = vmatpush.bf16.msrb.mxu1 %v11586_v44  ;;  %v11519_v44 = vld [vmem:[%s20640_s6 + $0x70] sm:$0xf0] }
 0xb47   :  { %3814 = vmatpush.bf16.msra.mxu3 %v11399_v49 }
 0xb48   :  { %3802 = vmatpush.bf16.msra.mxu2 %v11383_v26 }
 0xb4c   :  { %3803 = vmatpush.bf16.msra.mxu2 %v11371_v60 }
 0xbaa   :  { %v3340_v13 = vpop.f32.mrf.mxu0  ;;  %v3353_v15 = vpop.f32.mrf.mxu1 }
 0xbab   :  { %v3357_v27 = vadd.f32 %v11060_v7, %v3340_v13  ;;  %v3358_v28 = vadd.f32 %v11061_v18, %v3353_v15  ;;  %v13733_v7 = vld [vmem:[%s20648_s9 + $0x28] sm:$0xf0] }
 0xbac   :  { %v11387_v14 = vor.u32 %v13733_v7, %v11386_v51  ;;  %v11565_v51 = vld [vmem:[%s20640_s6 + $0xc0] sm:$0xf]  ;;  %v13802_v7 = vld [vmem:[%s20640_s6 + $0xcc] sm:$0xf0] }
 0xbad   :  { %v11266_v23 = vmul.f32 -1.442695, %v3357_v27  ;;  %v11267_v35 = vmul.f32 -1.442695, %v3358_v28  ;;  %v11566_v26 = vor.u32 %v13802_v7, %v11565_v51  ;;  %v13789_v51 = vld [vmem:[%s20640_s6 + $0x6c] sm:$0xf] }
 0xbae   :  { %3815 = vmatpush.bf16.msra.mxu3 %v11387_v14  ;;  %v11567_v14 = vld [vmem:[%s20640_s6 + $0xd0] sm:$0xf0]  ;;  %v11527_v7 = vld [vmem:[%s20640_s6 + $0x78] sm:$0xf0] }
 0xbaf   :  { %14514 = vpow2.f32 %v11266_v23  ;;  %4083 = vmatpush.bf16.msrb.mxu0 %v11566_v26 }
 0xbb0   :  { %14516 = vpow2.f32 %v11267_v35 }
 0xbb2   :  { %v3342_v42 = vpop.f32.mrf.mxu0  ;;  %v3355_v43 = vpop.f32.mrf.mxu1  ;;  %3816 = vmatpush.bf16.msra.mxu3 %v11375_v61 }
 0xbb3   :  { %v13807_v42 = vld [vmem:[%s20640_s6 + $0xf4] sm:$0xf0]  ;;  %v2863_v43 = vperm.slane %v16975_v57, 0 }
 0xbb4   :  { %v11590_v45 = vor.u32 %v13807_v42, %v11589_v41  ;;  %v11517_v41 = vld [vmem:[%s20640_s6 + $0x60] sm:$0xf]  ;;  %v13790_v42 = vld [vmem:[%s20640_s6 + $0x6c] sm:$0xf0] }
 0xbb5   :  { %v14515_v52 = vpop.eup %14514  ;;  %v2869_v58 = vadd.f32 %v2863_v43, %v16481_v3  ;;  %v11549_v3 = vld [vmem:[%s20640_s6 + $0xa0] sm:$0xf]  ;;  %v13788_v43 = vld [vmem:[%s20640_s6 + $0x64] sm:$0xf] }
 0xbb6   :  { %v14517_v8 = vpop.eup %14516  ;;  %v3365_v47 = vadd.f32 1.0, %v14515_v52  ;;  %v13805_v52 = vld [vmem:[%s20640_s6 + $0xec] sm:$0xf] }
 0xbb7   :  { %v3366_v18 = vadd.f32 1.0, %v14517_v8  ;;  %v11594_v50 = vor.u32 %v13805_v52, %v11591_v46  ;;  %v13791_v52 = vld [vmem:[%s20640_s6 + $0x74] sm:$0xf0] }
 0xbb8   :  { %14518 = vrcp.f32 %v3365_v47  ;;  %v3378_v6 = vand.u32 2147483648, %v3365_v47  ;;  %v3376_v11 = vand.u32 2147483647, %v3365_v47  ;;  %vm3372_vm8 = vweird.f32 %v3365_v47 }
 0xbb9   :  { %14520 = vrcp.f32 %v3366_v18  ;;  %v3393_v12 = vand.u32 2147483648, %v3366_v18  ;;  %v3391_v15 = vand.u32 2147483647, %v3366_v18  ;;  %vm3387_vm10 = vweird.f32 %v3366_v18 }
 0xbba   :  { %v3379_v20 = vor.u32 1.1754944e-38, %v3378_v6  ;;  %vm3377_vm12 = vcmp.eq.f32.partialorder %v3376_v11, 8.507059e+37  ;;  %v13798_v6 = vld [vmem:[%s20640_s6 + $0xac] sm:$0xf0]  ;;  %v11551_v11 = vld [vmem:[%s20640_s6 + $0xb0] sm:$0xf0] }
 0xbbb   :  { %v3394_v27 = vor.u32 1.1754944e-38, %v3393_v12  ;;  %vm3392_vm13 = vcmp.eq.f32.partialorder %v3391_v15, 8.507059e+37  ;;  %v11557_v12 = vld [vmem:[%s20640_s6 + $0xa8] sm:$0xf] }
 0xbbe   :  { %v14519_v63 = vpop.eup %14518 }
 0xbbf   :  { %v14521_v0 = vpop.eup %14520  ;;  %v3368_v5 = vmul.f32 %v14519_v63, %v3365_v47  ;;  %vm3373_vm14 = vweird.f32 %v14519_v63 }
 0xbc0   :  { %v3383_v4 = vmul.f32 %v14521_v0, %v3366_v18  ;;  %vm3388_vm15 = vweird.f32 %v14521_v0  ;;  %vm3374_vm9 = vmor %vm3372_vm8, %vm3373_vm14  ;;  %v13800_v18 = vld [vmem:[%s20640_s6 + $0xc4] sm:$0xf] }
 0xbc1   :  { %v3369_v24 = vsub.f32 1.0, %v3368_v5  ;;  %vm3389_vm11 = vmor %vm3387_vm10, %vm3388_vm15  ;;  %v11570_v61 = vor.u32 %v13800_v18, %v11567_v14  ;;  %v11575_v5 = vld [vmem:[%s20640_s6 + $0xd8] sm:$0xf0] }
 0xbc2   :  { %v3384_v9 = vsub.f32 1.0, %v3383_v4 }
 0xbc3   :  { %v3370_v10 = vmul.f32 %v14519_v63, %v3369_v24  ;;  %4096 = vmatpush.bf16.msrb.mxu1 %v11570_v61 }
 0xbc4   :  { %v3385_v13 = vmul.f32 %v14521_v0, %v3384_v9  ;;  %v13796_v9 = vld [vmem:[%s20640_s6 + $0xa4] sm:$0xf] }
 0xbc5   :  { %v3371_v17 = vadd.f32 %v14519_v63, %v3370_v10  ;;  %v11550_v10 = vor.u32 %v13798_v6, %v11549_v3  ;;  %v13785_v3 = vld [vmem:[%s20640_s6 + $0x4c] sm:$0xf] }
 0xbc6   :  { %v3386_v22 = vadd.f32 %v14521_v0, %v3385_v13  ;;  %v13799_v13 = vld [vmem:[%s20640_s6 + $0xb4] sm:$0xf0] }
 0xbc7   :  { %v3375_v28 = vsel %vm3374_vm9, %v14519_v63, %v3371_v17  ;;  %v11574_v63 = vor.u32 %v13803_v55, %v11573_v54  ;;  %v11554_v17 = vor.u32 %v13796_v9, %v11551_v11  ;;  %4084 = vmatpush.bf16.msrb.mxu0 %v11550_v10  ;;  %v11530_v54 = vor.u32 %v13789_v51, %v11527_v7  ;;  %v11485_v11 = vld [vmem:[%s20640_s6 + $0x20] sm:$0xf] }
 0xbc8   :  { %v3390_v2 = vsel %vm3389_vm11, %v14521_v0, %v3386_v22  ;;  %v3380_v31 = vsel %vm3377_vm12, %v3379_v20, %v3375_v28  ;;  %v13801_v0 = vld [vmem:[%s20640_s6 + $0xcc] sm:$0xf]  ;;  %v11558_v20 = vor.u32 %v13799_v13, %v11557_v12  ;;  %v13782_v12 = vld [vmem:[%s20640_s6 + $0x2c] sm:$0xf0]  ;;  %v13780_v13 = vld [vmem:[%s20640_s6 + $0x24] sm:$0xf] }
 0xbc9   :  { %v3395_v16 = vsel %vm3392_vm13, %v3394_v27, %v3390_v2  ;;  %v3397_v32 = vmul.f32 %v11058_v25, %v3380_v31  ;;  %v11578_v4 = vor.u32 %v13801_v0, %v11575_v5  ;;  %v13797_v22 = vld [vmem:[%s20640_s6 + $0xac] sm:$0xf]  ;;  %v11559_v25 = vld [vmem:[%s20640_s6 + $0xb8] sm:$0xf0]  ;;  %4097 = vmatpush.bf16.msrb.mxu1 %v11554_v17  ;;  %v11533_v31 = vld [vmem:[%s20640_s6 + $0x80] sm:$0xf] }
 0xbca   :  { %v3421_v33 = vmul.f32 %v16703_v34, %v3395_v16  ;;  %v16980_v34 = vld [vmem:[%s20652_s11] sm:$0x7]  ;;  %v11562_v2 = vor.u32 %v13797_v22, %v11559_v25  ;;  %v13794_v16 = vld [vmem:[%s20640_s6 + $0x8c] sm:$0xf0]  ;;  %v11487_v17 = vld [vmem:[%s20640_s6 + $0x30] sm:$0xf0] }
 0xbcb   :  { %v3422_v23 = vpack.c.bf16 %v3397_v32, %v3397_v32  ;;  %v3824_v36 = vperm.slane %v16980_v34, 0  ;;  %v13792_v32 = vld [vmem:[%s20640_s6 + $0x84] sm:$0xf]  ;;  %v13783_v22 = vld [vmem:[%s20640_s6 + $0x34] sm:$0xf0] }
 0xbcc   :  { %v3455_v35 = vpack.c.bf16 %v3421_v33, %v3421_v33  ;;  %v11534_v33 = vor.u32 %v13794_v16, %v11533_v31  ;;  %v11495_v31 = vld [vmem:[%s20640_s6 + $0x38] sm:$0xf0] }
 0xbcd   :  { %3791 = vmatmul.bf16.vlgmr.msra.gmra.mxu1 %v3422_v23 }
 0xbce   :  { %3624 = vmatmul.bf16.vlgmr.msrb.gmra.mxu2 %v3455_v35  ;;  %3637 = vmatmul.bf16.vlgmr.msrb.gmra.mxu3 %v3455_v35 }
 0xbcf   :  { %3650 = vmatmul.bf16.vlgmr.msra.gmra.mxu0 %v3455_v35  ;;  %4108 = vmatpush.bf16.msrb.mxu2 %v11590_v45  ;;  %v11541_v35 = vld [vmem:[%s20640_s6 + $0x88] sm:$0xf] }
 0xbd0   :  { %4121 = vmatpush.bf16.msrb.mxu3 %v11594_v50  ;;  %4085 = vmatpush.bf16.msrb.mxu0 %v11534_v33  ;;  %v11525_v45 = vld [vmem:[%s20640_s6 + $0x68] sm:$0xf]  ;;  %v3825_v50 = vperm.slane %v16980_v34, 1 }
 0xbd3   :  { %4109 = vmatpush.bf16.msrb.mxu2 %v11574_v63 }
 0xbd4   :  { %4122 = vmatpush.bf16.msrb.mxu3 %v11578_v4  ;;  %v11509_v4 = vld [vmem:[%s20640_s6 + $0x48] sm:$0xf] }
 0xbd7   :  { %4110 = vmatpush.bf16.msrb.mxu2 %v11558_v20  ;;  %v11493_v20 = vld [vmem:[%s20640_s6 + $0x28] sm:$0xf] }
 0xbd8   :  { %4123 = vmatpush.bf16.msrb.mxu3 %v11562_v2  ;;  %v13781_v2 = vld [vmem:[%s20640_s6 + $0x2c] sm:$0xf] }
 0xbdc   :  { %4124 = vmatpush.bf16.msrb.mxu3 %v11546_v19  ;;  %v11477_v19 = vld [vmem:[%s20640_s6 + $0x8] sm:$0xf] }
 0xbde   :  { %3804 = vmatmul.bf16.vlgmr.msra.gmra.mxu2 %v3422_v23  ;;  %3817 = vmatmul.bf16.vlgmr.msra.gmra.mxu3 %v3422_v23  ;;  %v11535_v23 = vld [vmem:[%s20640_s6 + $0x90] sm:$0xf0] }
 0xbdf   :  { %v11538_v39 = vor.u32 %v13792_v32, %v11535_v23  ;;  %v11498_v23 = vor.u32 %v13781_v2, %v11495_v31 }
 0xbe0   :  { %4125 = vmatpush.bf16.msrb.mxu3 %v11530_v54 }
 0xbe1   :  { %4098 = vmatpush.bf16.msrb.mxu1 %v11538_v39  ;;  %v13778_v39 = vld [vmem:[%s20640_s6 + $0xc] sm:$0xf0] }
 0xc4a   :  { %v3792_v37 = vpop.f32.mrf.mxu1 }
 0xc4c   :  { %v16970_v53 = vpop.f32.mrf.mxu0 }
 0xc51   :  { %v3625_v49 = vpop.f32.mrf.mxu2  ;;  %v17008_v48 = vpop.f32.mrf.mxu3 }
 0xc52   :  { %v3793_v8 = vadd.f32 %v3792_v37, %v3625_v49  ;;  %v3794_v47 = vpop.f32.mrf.mxu1  ;;  %v13795_v37 = vld [vmem:[%s20640_s6 + $0x94] sm:$0xf0]  ;;  %v2864_v49 = vperm.slane %v16975_v57, 1 }
 0xc53   :  { %v11542_v1 = vor.u32 %v13795_v37, %v11541_v35  ;;  %v11526_v47 = vor.u32 %v13791_v52, %v11525_v45  ;;  %v11469_v37 = vld [vmem:[%s20640_s6] sm:$0xf] }
 0xc54   :  { %v3830_v59 = vadd.f32 %v3824_v36, %v3793_v8  ;;  %v3653_v60 = vpop.f32.mrf.mxu0  ;;  %v11518_v36 = vor.u32 %v13790_v42, %v11517_v41  ;;  %v11522_v8 = vor.u32 %v13788_v43, %v11519_v44  ;;  %v2870_v61 = vadd.f32 %v2864_v49, %v16486_v29  ;;  %v11511_v29 = vld [vmem:[%s20640_s6 + $0x58] sm:$0xf0]  ;;  %v13779_v43 = vld [vmem:[%s20640_s6 + $0x14] sm:$0xf0] }
 0xc55   :  { %4111 = vmatpush.bf16.msrb.mxu2 %v11542_v1  ;;  %v13784_v60 = vld [vmem:[%s20640_s6 + $0x44] sm:$0xf]  ;;  %v11514_v10 = vor.u32 %v13785_v3, %v11511_v29  ;;  %v11470_v62 = vor.u32 %v13778_v39, %v11469_v37  ;;  %v2865_v44 = vperm.slane %v16975_v57, 2  ;;  %v11478_v52 = vor.u32 %v13779_v43, %v11477_v19 }
 0xc56   :  { %v3833_v24 = vadd.f32 %v3830_v59, %v2869_v58  ;;  %4086 = vmatpush.bf16.msrb.mxu0 %v11518_v36  ;;  %4099 = vmatpush.bf16.msrb.mxu1 %v11522_v8  ;;  %v11501_v58 = vld [vmem:[%s20640_s6 + $0x40] sm:$0xf]  ;;  %v13786_v59 = vld [vmem:[%s20640_s6 + $0x4c] sm:$0xf0]  ;;  %v13776_v1 = vld [vmem:[%s20640_s6 + $0x4] sm:$0xf] }
 0xc57   :  { %v11502_v0 = vor.u32 %v13786_v59, %v11501_v58  ;;  %4126 = vmatpush.bf16.msrb.mxu3 %v11514_v10  ;;  %v11474_v42 = vor.u32 %v13776_v1, %v11471_v40  ;;  %v13777_v36 = vld [vmem:[%s20640_s6 + $0xc] sm:$0xf] }
 0xc58   :  { %v11460_v15 = vmul.f32 -1.442695, %v3833_v24  ;;  %v13787_v24 = vld [vmem:[%s20640_s6 + $0x54] sm:$0xf0] }
 0xc59   :  { %v3627_v27 = vpop.f32.mrf.mxu2  ;;  %v3640_v28 = vpop.f32.mrf.mxu3  ;;  %4112 = vmatpush.bf16.msrb.mxu2 %v11526_v47  ;;  %v11510_v6 = vor.u32 %v13787_v24, %v11509_v4 }
 0xc5a   :  { %14522 = vpow2.f32 %v11460_v15  ;;  %4087 = vmatpush.bf16.msrb.mxu0 %v11502_v0  ;;  %v11486_v15 = vor.u32 %v13782_v12, %v11485_v11  ;;  %v11490_v27 = vor.u32 %v13780_v13, %v11487_v17  ;;  %v11494_v28 = vor.u32 %v13783_v22, %v11493_v20  ;;  %v11464_v13 = vld [vmem:[%s20642_s1 + $0x18] sm:$0xff]  ;;  %v14393_v17 = vld [vmem:[%s20643_s3 + $0x8] sm:$0xff]  }
 0xc5b   :  { %4127 = vmatpush.bf16.msrb.mxu3 %v11498_v23  ;;  %v14394_v23 = vld [vmem:[%s20643_s3 + $0x10] sm:$0xff]  }
 0xc5d   :  { %4113 = vmatpush.bf16.msrb.mxu2 %v11510_v6 }
 0xc5e   :  { %4088 = vmatpush.bf16.msrb.mxu0 %v11486_v15  ;;  %v14305_v15 = vld [vmem:[%s20643_s3] sm:$0xff]  }
 0xc5f   :  { %v14307_v2 = vunpack.c.h.bf16 %v14305_v15 }
 0xc60   :  { %v14523_v46 = vpop.eup %14522 }
 0xc61   :  { %v17109_v18 = vadd.f32 1.0, %v14523_v46  ;;  %v3805_v26 = vpop.f32.mrf.mxu2  ;;  %v17111_v14 = vpop.f32.mrf.mxu3  ;;  %4114 = vmatpush.bf16.msrb.mxu2 %v11494_v28  ;;  %v11479_v46 = vld [vmem:[%s20640_s6 + $0x18] sm:$0xf0]  ;;  %v14310_v28 = vunpack.c.l.bf16 %v14393_v17 }
 0xc62   :  { %v3806_v55 = vadd.f32 %v3805_v26, %v17008_v48  ;;  %v11503_v48 = vld [vmem:[%s20640_s6 + $0x50] sm:$0xf0]  ;;  %4089 = vmatpush.bf16.msrb.mxu0 %v11470_v62  ;;  %v11482_v8 = vor.u32 %v13777_v36, %v11479_v46  ;;  %v2871_v26 = vadd.f32 %v2865_v44, %v16488_v30  ;;  %v3819_v59 = vadd.f32 %v17111_v14, %v16970_v53 }
 0xc63   :  { %14524 = vrcp.f32 %v17109_v18  ;;  %v11506_v5 = vor.u32 %v13784_v60, %v11503_v48  ;;  %v3849_v45 = vand.u32 2147483648, %v17109_v18  ;;  %vm3843_vm15 = vweird.f32 %v17109_v18 }
 0xc64   :  { %v3831_v63 = vadd.f32 %v3825_v50, %v3806_v55  ;;  %v3847_v50 = vand.u32 2147483647, %v17109_v18  ;;  %4128 = vmatpush.bf16.msrb.mxu3 %v11482_v8  ;;  %v3826_v60 = vperm.slane %v16980_v34, 2 }
 0xc65   :  { %4100 = vmatpush.bf16.msrb.mxu1 %v11506_v5  ;;  %4115 = vmatpush.bf16.msrb.mxu2 %v11478_v52  ;;  %v3850_v7 = vor.u32 1.1754944e-38, %v3849_v45 }
 0xc66   :  { %v3853_v9 = vadd.f32 %v3831_v63, %v2870_v61  ;;  %vm3848_vm9 = vcmp.eq.f32.partialorder %v3847_v50, 8.507059e+37  ;;  %v3832_v61 = vadd.f32 %v3826_v60, %v3819_v59 }
 0xc68   :  { %v11461_v25 = vmul.f32 -1.442695, %v3853_v9  ;;  %v14723_v9 = vld [vmem:[%s20653_s13 + $0x8] sm:$0xff] }
 0xc69   :  { %v14525_v16 = vpop.eup %14524  ;;  %v3807_v32 = vpop.f32.mrf.mxu2  ;;  %4101 = vmatpush.bf16.msrb.mxu1 %v11490_v27  ;;  %v14306_v27 = vunpack.c.l.bf16 %v14305_v15 }
 0xc6a   :  { %v3820_v33 = vpop.f32.mrf.mxu3  ;;  %14526 = vpow2.f32 %v11461_v25  ;;  %v3839_v35 = vmul.f32 %v14525_v16, %v17109_v18  ;;  %vm3844_vm14 = vweird.f32 %v14525_v16 }
 0xc6b   :  { %vm3845_vm8 = vmor %vm3843_vm15, %vm3844_vm14  ;;  %vm20695_vm14 = vcmask 64512  }
 0xc6c   :  { %v3840_v41 = vsub.f32 1.0, %v3839_v35  ;;  %v14311_v35 = vunpack.c.h.bf16 %v14393_v17  ;;  %vm20696_vm15 = vmmov %vm20695_vm14 }
 0xc6d   :  { %4102 = vmatpush.bf16.msrb.mxu1 %v11474_v42 }
 0xc6e   :  { %v3841_v49 = vmul.f32 %v14525_v16, %v3840_v41  ;;  %v14315_v41 = vunpack.c.h.bf16 %v14394_v23 }
 0xc70   :  { %v14527_v47 = vpop.eup %14526  ;;  %v3842_v51 = vadd.f32 %v14525_v16, %v3841_v49  ;;  %v14314_v49 = vunpack.c.l.bf16 %v14394_v23 }
 0xc71   :  { %v3857_v57 = vadd.f32 1.0, %v14527_v47 }
 0xc72   :  { %v3846_v54 = vsel %vm3845_vm8, %v14525_v16, %v3842_v51  ;;  %v14413_v51 = vld [vmem:[%s20641_s7] ss:$0 sm:$0xff]  ;;  %vm20697_vm8 = vcmask 1043456  }
 0xc73   :  { %14528 = vrcp.f32 %v3857_v57  ;;  %v3851_v55 = vsel %vm3848_vm9, %v3850_v7, %v3846_v54  ;;  %v3869_v5 = vand.u32 2147483648, %v3857_v57  ;;  %v3867_v24 = vand.u32 2147483647, %v3857_v57  ;;  %vm20698_vm9 = vmmov %vm20697_vm8 }
 0xc74   :  { %v3873_v58 = vmul.f32 %v3851_v55, %v2871_v26  ;;  %vm3863_vm11 = vweird.f32 %v3857_v57 }
 0xc75   :  { %v3870_v3 = vor.u32 1.1754944e-38, %v3869_v5  ;;  %vm3868_vm13 = vcmp.eq.f32.partialorder %v3867_v24, 8.507059e+37 }
 0xc76   :  { %v3874_v18 = vadd.f32 %v3873_v58, %v3832_v61 }
 0xc78   :  { %14530 = vtanh.f32 %v3874_v18 }
 0xc79   :  { %v14529_v48 = vpop.eup %14528 }
 0xc7a   :  { %v3859_v63 = vmul.f32 %v14529_v48, %v3857_v57  ;;  %vm3864_vm10 = vweird.f32 %v14529_v48  ;;  %v14395_v57 = vld [vmem:[%s20643_s3 + $0x18] sm:$0xff]  }
 0xc7b   :  { %vm3865_vm12 = vmor %vm3863_vm11, %vm3864_vm10  ;;  %v14318_v58 = vunpack.c.l.bf16 %v14395_v57  ;;  %v14319_v5 = vunpack.c.h.bf16 %v14395_v57 }
 0xc7c   :  { %v3860_v0 = vsub.f32 1.0, %v3859_v63  ;;  %vm20699_vm10 = vmmov %vm20697_vm8 }
 0xc7d   :  { %vm20700_vm11 = vmmov %vm20697_vm8 }
 0xc7e   :  { %v3861_v4 = vmul.f32 %v14529_v48, %v3860_v0  ;;  %v14531_v14 = vpop.eup %14530 }
 0xc80   :  { %v3862_v30 = vadd.f32 %v14529_v48, %v3861_v4 }
 0xc82   :  { %v3866_v6 = vsel %vm3865_vm12, %v14529_v48, %v3862_v30  ;;  %vm20701_vm12 = vmmov %vm20697_vm8 }
 0xc83   :  { %v3871_v29 = vsel %vm3868_vm13, %v3870_v3, %v3866_v6  ;;  %vm20702_vm13 = vmmov %vm20697_vm8 }
 0xc84   :  { %v3876_v53 = vsub.f32 1.0, %v3871_v29  ;;  %v3878_v10 = vmul.f32 %v14723_v9, %v3871_v29 }
 0xc86   :  { %v3877_v34 = vmul.f32 %v14531_v14, %v3876_v53 }
 0xc88   :  { %v3879_v11 = vadd.f32 %v3878_v10, %v3877_v34 }
 0xc8a   :  { %11462 = vst [vmem:[%s20653_s13 + $0x10] sm:$0xff] %v3879_v11  ;;  %v3889_v12 = vpack.c.bf16 %v3879_v11, %v3879_v11 }
 0xc8c   :  { %4090 = vmatmul.bf16.vlgmr.msrb.gmra.mxu0 %v3889_v12  ;;  %4103 = vmatmul.bf16.vlgmr.msrb.gmra.mxu1 %v3889_v12 }
 0xc8d   :  { %4116 = vmatmul.bf16.vlgmr.msrb.gmra.mxu2 %v3889_v12  ;;  %4129 = vmatmul.bf16.vlgmr.msrb.gmra.mxu3 %v3889_v12 }
 0xd09   :  { %v4091_v20 = vpop.f32.mrf.mxu0  ;;  %v17212_v22 = vpop.f32.mrf.mxu1 }
 0xd0a   :  { %v4145_v25 = vadd.f32 %v11464_v13, %v4091_v20 }
 0xd0c   :  { %v4170_v31 = vperm.slane %v4145_v25, 0  ;;  %v4164_v16 = vrot.slane %v4145_v25, 2  ;;  %v4163_v32 = vrot.slane %v4145_v25, 1  ;;  %v4165_v33 = vrot.slane %v4145_v25, 3 }
 0xd0d   :  { %v4167_v37 = vrot.slane %v4145_v25, 5  ;;  %v4166_v39 = vrot.slane %v4145_v25, 4  ;;  %v4168_v47 = vrot.slane %v4145_v25, 6  ;;  %v4169_v54 = vrot.slane %v4145_v25, 7 }
 0xd0e   :  { %v4186_v1 = vadd.f32 %v14306_v27, %v4170_v31  ;;  %v4172_v62 = vperm.slane %v4164_v16, 0  ;;  %v4171_v40 = vperm.slane %v4163_v32, 0  ;;  %v4173_v19 = vperm.slane %v4165_v33, 0 }
 0xd0f   :  { %v4175_v45 = vperm.slane %v4167_v37, 0  ;;  %v4174_v50 = vperm.slane %v4166_v39, 0  ;;  %v4176_v59 = vperm.slane %v4168_v47, 0  ;;  %v4177_v4 = vperm.slane %v4169_v54, 0  ;;  %v4292_v54 = vld [vmem:[%s20645_s4] sm:$0xf] }
 0xd10   :  { %v17217_v42 = vpop.f32.mrf.mxu2  ;;  %v17219_v43 = vpop.f32.mrf.mxu3  ;;  %14532 = vtanh.f32 %v4186_v1  ;;  %v4188_v36 = vadd.f32 %v14310_v28, %v4172_v62  ;;  %v4187_v44 = vadd.f32 %v14307_v2, %v4171_v40  ;;  %v4189_v8 = vadd.f32 %v14311_v35, %v4173_v19 }
 0xd11   :  { %v4093_v52 = vpop.f32.mrf.mxu0  ;;  %v4106_v46 = vpop.f32.mrf.mxu1  ;;  %v4191_v7 = vadd.f32 %v14315_v41, %v4175_v45  ;;  %v4190_v26 = vadd.f32 %v14314_v49, %v4174_v50  ;;  %v4192_v30 = vadd.f32 %v14318_v58, %v4176_v59  ;;  %v4193_v6 = vadd.f32 %v14319_v5, %v4177_v4  ;;  %v4297_v5 = vld [vmem:[%s20645_s4 + $0x14] sm:$0xf] }
 0xd12   :  { %14534 = vtanh.f32 %v4188_v36  ;;  %v4306_v59 = vsel %vm20699_vm10, %v4292_v54, 0 }
 0xd13   :  { %14536 = vtanh.f32 %v4187_v44  ;;  %4315 = vmatpush.bf16.msra.mxu0 %v4306_v59  ;;  %v13818_v59 = vld [vmem:[%s20646_s8 + $0x54] sm:$0xf] }
 0xd14   :  { %14538 = vtanh.f32 %v4189_v8 }
 0xd15   :  { %14540 = vtanh.f32 %v4191_v7  ;;  %v4294_v7 = vld [vmem:[%s20645_s4 + $0x8] sm:$0xf] }
 0xd16   :  { %v14533_v55 = vpop.eup %14532  ;;  %14542 = vtanh.f32 %v4190_v26  ;;  %v4295_v26 = vld [vmem:[%s20645_s4 + $0xc] sm:$0xf] }
 0xd17   :  { %v4206_v60 = vmul.f32 %v14533_v55, %v14413_v51  ;;  %14544 = vtanh.f32 %v4192_v30  ;;  %v4348_v55 = vsel %vm20697_vm8, %v4294_v7, 0  ;;  %v4369_v58 = vsel %vm20698_vm9, %v4295_v26, 0  ;;  %v11659_v26 = vld [vmem:[%s20646_s8 + $0x68] sm:$0xf0] }
 0xd18   :  { %v14535_v48 = vpop.eup %14534  ;;  %v4119_v61 = vpop.f32.mrf.mxu2  ;;  %14546 = vtanh.f32 %v4193_v6  ;;  %4357 = vmatpush.bf16.msra.mxu2 %v4348_v55  ;;  %4378 = vmatpush.bf16.msra.mxu3 %v4369_v58  ;;  %vm20706_vm9 = vcmask 64512   ;;  %v11649_v55 = vld [vmem:[%s20646_s8 + $0x50] sm:$0xf]  ;;  %v13819_v58 = vld [vmem:[%s20646_s8 + $0x54] sm:$0xf0] }
 0xd19   :  { %v4132_v63 = vpop.f32.mrf.mxu3  ;;  %v14537_v18 = vpop.eup %14536  ;;  %4214 = vadd.xlane.f32.xlu0 %v4206_v60  ;;  %v4208_v0 = vmul.f32 %v14535_v48, %v14413_v51  ;;  %v4293_v60 = vld [vmem:[%s20645_s4 + $0x4] sm:$0xf]  ;;  %v4298_v61 = vld [vmem:[%s20645_s4 + $0x18] sm:$0xf]  ;;  %vm20707_vm10 = vmmov %vm20706_vm9 }
 0xd1a   :  { %v4207_v24 = vmul.f32 %v14537_v18, %v14413_v51  ;;  %v14539_v3 = vpop.eup %14538  ;;  %v4327_v48 = vsel %vm20700_vm11, %v4293_v60, 0  ;;  %v4432_v63 = vsel %vm20701_vm12, %v4298_v61, 0  ;;  %v4299_v18 = vld [vmem:[%s20645_s4 + $0x1c] sm:$0xf]  ;;  %vm20708_vm11 = vmmov %vm20706_vm9  ;;  %v11650_v60 = vor.u32 %v13819_v58, %v11649_v55  ;;  %v11737_v58 = vld [vmem:[%s20647_s10 + $0x84] sm:$0xf0] }
 0xd1b   :  { %4218 = vadd.xlane.f32.xlu2 %v4208_v0  ;;  %v14541_v29 = vpop.eup %14540  ;;  %v4209_v14 = vmul.f32 %v14539_v3, %v14413_v51  ;;  %4336 = vmatpush.bf16.msra.mxu1 %v4327_v48  ;;  %v4296_v0 = vld [vmem:[%s20645_s4 + $0x10] sm:$0xf]  ;;  %v4453_v4 = vsel %vm20702_vm13, %v4299_v18, 0  ;;  %vm20709_vm12 = vmmov %vm20706_vm9  ;;  %v11651_v48 = vld [vmem:[%s20646_s8 + $0x58] sm:$0xf0] }
 0xd1c   :  { %4216 = vadd.xlane.f32.xlu1 %v4207_v24  ;;  %v14543_v53 = vpop.eup %14542  ;;  %v4211_v34 = vmul.f32 %v14541_v29, %v14413_v51  ;;  %4441 = vmatpush.bf16.msrb.mxu2 %v4432_v63  ;;  %vm20710_vm13 = vmmov %vm20706_vm9  ;;  %v11654_v61 = vor.u32 %v13818_v59, %v11651_v48  ;;  %v11641_v63 = vld [vmem:[%s20646_s8 + $0x40] sm:$0xf]  ;;  %v13817_v18 = vld [vmem:[%s20646_s8 + $0x44] sm:$0xf0] }
 0xd1d   :  { %v4210_v9 = vmul.f32 %v14543_v53, %v14413_v51  ;;  %v14545_v10 = vpop.eup %14544  ;;  %4462 = vmatpush.bf16.msrb.mxu3 %v4453_v4  ;;  %v11643_v4 = vld [vmem:[%s20646_s8 + $0x48] sm:$0xf0]  ;;  %v13863_v55 = vld [vmem:[%s20647_s10 + $0x7c] sm:$0xf] }
 0xd1e   :  { %v14547_v11 = vpop.eup %14546  ;;  %v4212_v12 = vmul.f32 %v14545_v10, %v14413_v51 }
 0xd1f   :  { %v4213_v13 = vmul.f32 %v14547_v11, %v14413_v51 }
 0xd21   :  { %4220 = vadd.xlane.f32.xlu0 %v4209_v14 }
 0xd23   :  { %4224 = vadd.xlane.f32.xlu2 %v4211_v34 }
 0xd24   :  { %4222 = vadd.xlane.f32.xlu1 %v4210_v9 }
 0xd29   :  { %4226 = vadd.xlane.f32.xlu0 %v4212_v12 }
 0xd2c   :  { %4228 = vadd.xlane.f32.xlu1 %v4213_v13 }
 0xd8c   :  { %v4215_v15 = vpop.xlane.xlu0 %4214 }
 0xd8d   :  { %v4238_v27 = vperm.slane %v4215_v15, %v14868_v21 }
 0xd8e   :  { %v4219_v17 = vpop.xlane.xlu2 %4218 }
 0xd8f   :  { %v4217_v20 = vpop.xlane.xlu1 %4216  ;;  %v4240_v28 = vperm.slane %v4219_v17, %v14868_v21 }
 0xd90   :  { %v4239_v25 = vperm.slane %v4217_v20, %v14868_v21 }
 0xd92   :  { %v4246_v2 = vsel %vm418_vm0, %v4239_v25, %v4238_v27 }
 0xd93   :  { %v4247_v32 = vsel %vm420_vm1, %v4240_v28, %v4246_v2 }
 0xd94   :  { %v4221_v31 = vpop.xlane.xlu0 %4220 }
 0xd95   :  { %v4241_v16 = vperm.slane %v4221_v31, %v14868_v21 }
 0xd96   :  { %v4225_v33 = vpop.xlane.xlu2 %4224 }
 0xd97   :  { %v4223_v23 = vpop.xlane.xlu1 %4222  ;;  %v4248_v35 = vsel %vm422_vm2, %v4241_v16, %v4247_v32  ;;  %v4243_v39 = vperm.slane %v4225_v33, %v14868_v21 }
 0xd98   :  { %v4242_v37 = vperm.slane %v4223_v23, %v14868_v21 }
 0xd9a   :  { %v4249_v1 = vsel %vm424_vm3, %v4242_v37, %v4248_v35 }
 0xd9b   :  { %v4250_v19 = vsel %vm426_vm4, %v4243_v39, %v4249_v1 }
 0xd9c   :  { %v4227_v62 = vpop.xlane.xlu0 %4226 }
 0xd9d   :  { %v4244_v40 = vperm.slane %v4227_v62, %v14868_v21 }
 0xd9f   :  { %v4229_v41 = vpop.xlane.xlu1 %4228  ;;  %v4251_v36 = vsel %vm428_vm5, %v4244_v40, %v4250_v19 }
 0xda0   :  { %v4245_v44 = vperm.slane %v4229_v41, %v14868_v21 }
 0xda2   :  { %v4252_v45 = vsel %vm430_vm6, %v4245_v44, %v4251_v36 }
 0xda3   :  { %v4254_v52 = vsel %vm51_vm7, %v4252_v45, -1e+30  ;;  %v11665_v45 = vld [vmem:[%s20646_s8 + $0x70] sm:$0xf] }
 0xda4   :  { %v4255_v46 = vsel %vm20695_vm14, %v4254_v52, -inf  ;;  %vm20703_vm14 = vmmov %vm20697_vm8 }
 0xda5   :  { %4256 = vmax.xlane.f32.xlu2 %v4255_v46  ;;  %v4390_v24 = vsel %vm20703_vm14, %v4296_v0, 0  ;;  %vm20711_vm14 = vmmov %vm20706_vm9  ;;  %v13822_v46 = vld [vmem:[%s20646_s8 + $0x74] sm:$0xf]  ;;  %v13816_v0 = vld [vmem:[%s20646_s8 + $0x44] sm:$0xf] }
 0xda6   :  { %4399 = vmatpush.bf16.msrb.mxu0 %v4390_v24  ;;  %v11646_v24 = vor.u32 %v13816_v0, %v11643_v4  ;;  %v11740_v0 = vor.u32 %v13863_v55, %v11737_v58  ;;  %v13861_v55 = vld [vmem:[%s20647_s10 + $0x68] sm:$0xf0] }
 0xe18   :  { %v4257_v49 = vpop.xlane.xlu2 %4256 }
 0xe19   :  { %v4258_v50 = vsub.f32 %v4254_v52, %v4257_v49  ;;  %v13823_v52 = vld [vmem:[%s20646_s8 + $0x74] sm:$0xf0] }
 0xe1a   :  { %v11666_v49 = vor.u32 %v13823_v52, %v11665_v45  ;;  %v13867_v45 = vld [vmem:[%s20647_s10 + $0x98] sm:$0xf0] }
 0xe1b   :  { %v4259_v8 = vmul.f32 1.442695, %v4258_v50  ;;  %v11667_v50 = vld [vmem:[%s20646_s8 + $0x78] sm:$0xf0] }
 0xe1d   :  { %14548 = vpow2.f32 %v4259_v8  ;;  %v11670_v8 = vor.u32 %v13822_v46, %v11667_v50  ;;  %v13866_v46 = vld [vmem:[%s20647_s10 + $0x94] sm:$0xf] }
 0xe23   :  { %v14549_v47 = vpop.eup %14548 }
 0xe24   :  { %v4261_v51 = vmul.f32 %v14549_v47, %v15038_v56  ;;  %v11657_v47 = vld [vmem:[%s20646_s8 + $0x60] sm:$0xf] }
 0xe26   :  { %v4262_v57 = vsel %vm20696_vm15, %v4261_v51, 0.0  ;;  %vm20704_vm15 = vmmov %vm20697_vm8  ;;  %vm20705_vm8 = vcmask 1040384  }
 0xe27   :  { %4263 = vadd.xlane.f32.xlu0 %v4262_v57  ;;  %v4411_v30 = vsel %vm20704_vm15, %v4297_v5, 0  ;;  %vm20712_vm15 = vmmov %vm20706_vm9  ;;  %v13820_v57 = vld [vmem:[%s20646_s8 + $0x64] sm:$0xf]  ;;  %v11642_v5 = vor.u32 %v13817_v18, %v11641_v63 }
 0xe28   :  { %4420 = vmatpush.bf16.msrb.mxu1 %v4411_v30  ;;  %v11662_v54 = vor.u32 %v13820_v57, %v11659_v26  ;;  %v11633_v30 = vld [vmem:[%s20646_s8 + $0x30] sm:$0xf]  ;;  %v11735_v57 = vld [vmem:[%s20647_s10 + $0x78] sm:$0xf] }
 0xe9a   :  { %v4264_v3 = vpop.xlane.xlu0 %4263 }
 0xe9b   :  { %v4265_v6 = vadd.f32 1e-30, %v4264_v3  ;;  %v13815_v3 = vld [vmem:[%s20646_s8 + $0x34] sm:$0xf0] }
 0xe9d   :  { %14550 = vrcp.f32 %v4265_v6  ;;  %v13814_v6 = vld [vmem:[%s20646_s8 + $0x34] sm:$0xf] }
 0xea3   :  { %v14551_v29 = vpop.eup %14550 }
 0xea4   :  { %v4267_v53 = vmul.f32 %v14551_v29, %v4261_v51  ;;  %v13821_v51 = vld [vmem:[%s20646_s8 + $0x64] sm:$0xf0]  ;;  %v11634_v29 = vor.u32 %v13815_v3, %v11633_v30 }
 0xea5   :  { %v11658_v7 = vor.u32 %v13821_v51, %v11657_v47 }
 0xea6   :  { %v4268_v14 = vpack.c.bf16 %v4267_v53, %v4267_v53  ;;  %v11635_v53 = vld [vmem:[%s20646_s8 + $0x38] sm:$0xf0] }
 0xea8   :  { %v4270_v34 = vrot.slane %v4268_v14, 3 }
 0xeaa   :  { %v4273_v9 = vsel %vm20705_vm8, %v4268_v14, %v4270_v34  ;;  %v4275_v10 = vsel %vm418_vm0, %v4268_v14, %v4270_v34  ;;  %v4278_v31 = vsel %vm420_vm1, %v4268_v14, %v4270_v34  ;;  %v4281_v32 = vsel %vm422_vm2, %v4268_v14, %v4270_v34  ;;  %vm20713_vm8 = vmmov %vm20706_vm9  ;;  %v11625_v34 = vld [vmem:[%s20646_s8 + $0x20] sm:$0xf] }
 0xeab   :  { %v11595_v11 = vpack.i.b16 %v4273_v9, %v4273_v9  ;;  %v4285_v12 = vunpack.i.h.s16 %v4273_v9  ;;  %v4277_v13 = vrot.slane %v4275_v10, 1  ;;  %v4280_v33 = vrot.slane %v4278_v31, 2  ;;  %v13813_v9 = vld [vmem:[%s20646_s8 + $0x24] sm:$0xf0]  ;;  %v13812_v10 = vld [vmem:[%s20646_s8 + $0x24] sm:$0xf] }
 0xeac   :  { %v4283_v23 = vrot.slane %v4281_v32, 3  ;;  %v11638_v14 = vor.u32 %v13814_v6, %v11635_v53  ;;  %v13809_v32 = vld [vmem:[%s20646_s8 + $0x4] sm:$0xf0] }
 0xead   :  { %v4301_v15 = vperm.slane %v11595_v11, 0  ;;  %v4321_v17 = vpack.i.b16 %v4285_v12, %v4285_v12  ;;  %v11598_v20 = vpack.i.b16 %v4277_v13, %v4277_v13  ;;  %v4287_v25 = vunpack.i.h.s16 %v4277_v13  ;;  %v11627_v12 = vld [vmem:[%s20646_s8 + $0x28] sm:$0xf0] }
 0xeae   :  { %v4289_v35 = vunpack.i.h.s16 %v4280_v33  ;;  %v11601_v37 = vpack.i.b16 %v4280_v33, %v4280_v33  ;;  %v4291_v39 = vunpack.i.h.s16 %v4283_v23  ;;  %v11604_v62 = vpack.i.b16 %v4283_v23, %v4283_v23  ;;  %v13808_v33 = vld [vmem:[%s20646_s8 + $0x4] sm:$0xf] }
 0xeaf   :  { %11596 = vmatmul.msk.bf16.vlgmr.msra.gmra.mxu0 %vm20706_vm9, %v4301_v15  ;;  %v4322_v27 = vperm.slane %v4321_v17, 0  ;;  %v4343_v28 = vperm.slane %v11598_v20, 0  ;;  %v4363_v2 = vpack.i.b16 %v4287_v25, %v4287_v25  ;;  %v11626_v11 = vor.u32 %v13813_v9, %v11625_v34  ;;  %v11617_v15 = vld [vmem:[%s20646_s8 + $0x10] sm:$0xf]  ;;  %v13811_v17 = vld [vmem:[%s20646_s8 + $0x14] sm:$0xf0] }
 0xeb0   :  { %v4405_v1 = vpack.i.b16 %v4289_v35, %v4289_v35  ;;  %v4385_v40 = vperm.slane %v11601_v37, 0  ;;  %v4447_v19 = vpack.i.b16 %v4291_v39, %v4291_v39  ;;  %v4427_v36 = vperm.slane %v11604_v62, 0  ;;  %4604 = vmatpush.bf16.msra.mxu0 %v11666_v49  ;;  %v13810_v20 = vld [vmem:[%s20646_s8 + $0x14] sm:$0xf]  ;;  %v11611_v37 = vld [vmem:[%s20646_s8 + $0x8] sm:$0xf0] }
 0xeb1   :  { %11597 = vmatmul.msk.bf16.vlgmr.msra.gmra.mxu1 %vm20707_vm10, %v4322_v27  ;;  %11599 = vmatmul.msk.bf16.vlgmr.msra.gmra.mxu2 %vm20708_vm11, %v4343_v28  ;;  %v4364_v16 = vperm.slane %v4363_v2, 0  ;;  %v11630_v13 = vor.u32 %v13812_v10, %v11627_v12  ;;  %v11618_v27 = vor.u32 %v13811_v17, %v11617_v15  ;;  %v11619_v28 = vld [vmem:[%s20646_s8 + $0x18] sm:$0xf0]  ;;  %v11614_v39 = vor.u32 %v13808_v33, %v11611_v37  ;;  %v13870_v62 = vld [vmem:[%s20647_s10 + $0xb0] sm:$0xf0] }
 0xeb2   :  { %v4406_v41 = vperm.slane %v4405_v1, 0  ;;  %v4448_v44 = vperm.slane %v4447_v19, 0  ;;  %4617 = vmatpush.bf16.msra.mxu1 %v11670_v8  ;;  %v11622_v2 = vor.u32 %v13810_v20, %v11619_v28  ;;  %v11759_v1 = vld [vmem:[%s20647_s10 + $0xa8] sm:$0xf]  ;;  %v11749_v49 = vld [vmem:[%s20647_s10 + $0x9c] sm:$0xf0] }
 0xeb3   :  { %11600 = vmatmul.msk.bf16.vlgmr.msra.gmra.mxu3 %vm20709_vm12, %v4364_v16  ;;  %v11609_v16 = vld [vmem:[%s20646_s8] sm:$0xf]  ;;  %v11752_v51 = vor.u32 %v13866_v46, %v11749_v49 }
 0xeb4   :  { %4605 = vmatpush.bf16.msra.mxu0 %v11658_v7  ;;  %v11610_v35 = vor.u32 %v13809_v32, %v11609_v16  ;;  %v13864_v7 = vld [vmem:[%s20647_s10 + $0x80] sm:$0xf0] }
 0xeb5   :  { %v11736_v18 = vor.u32 %v13864_v7, %v11735_v57 }
 0xeb6   :  { %4618 = vmatpush.bf16.msra.mxu1 %v11662_v54 }
 0xeb8   :  { %4606 = vmatpush.bf16.msra.mxu0 %v11650_v60 }
 0xeba   :  { %4619 = vmatpush.bf16.msra.mxu1 %v11654_v61 }
 0xebc   :  { %4607 = vmatpush.bf16.msra.mxu0 %v11642_v5 }
 0xebe   :  { %4620 = vmatpush.bf16.msra.mxu1 %v11646_v24 }
 0xebf   :  { %11602 = vmatmul.msk.bf16.vlgmr.msrb.gmra.mxu0 %vm20710_vm13, %v4385_v40  ;;  %v13869_v40 = vld [vmem:[%s20647_s10 + $0xac] sm:$0xf] }
 0xec0   :  { %4608 = vmatpush.bf16.msra.mxu0 %v11634_v29 }
 0xec1   :  { %11603 = vmatmul.msk.bf16.vlgmr.msrb.gmra.mxu1 %vm20711_vm14, %v4406_v41  ;;  %11605 = vmatmul.msk.bf16.vlgmr.msrb.gmra.mxu2 %vm20712_vm15, %v4427_v36  ;;  %v11760_v41 = vor.u32 %v13870_v62, %v11759_v1  ;;  %v11761_v36 = vld [vmem:[%s20647_s10 + $0xb4] sm:$0xf0] }
 0xec2   :  { %4621 = vmatpush.bf16.msra.mxu1 %v11638_v14  ;;  %v11764_v52 = vor.u32 %v13869_v40, %v11761_v36 }
 0xec3   :  { %11606 = vmatmul.msk.bf16.vlgmr.msrb.gmra.mxu3 %vm20713_vm8, %v4448_v44  ;;  %v11747_v44 = vld [vmem:[%s20647_s10 + $0x90] sm:$0xf]  ;;  %4889 = vmatpush.bf16.msra.mxu2 %v11760_v41 }
 0xec4   :  { %4609 = vmatpush.bf16.msra.mxu0 %v11626_v11  ;;  %v11748_v50 = vor.u32 %v13867_v45, %v11747_v44  ;;  %4902 = vmatpush.bf16.msra.mxu3 %v11764_v52 }
 0xec6   :  { %4622 = vmatpush.bf16.msra.mxu1 %v11630_v13 }
 0xec7   :  { %4890 = vmatpush.bf16.msra.mxu2 %v11748_v50 }
 0xec8   :  { %4610 = vmatpush.bf16.msra.mxu0 %v11618_v27  ;;  %4903 = vmatpush.bf16.msra.mxu3 %v11752_v51 }
 0xeca   :  { %4623 = vmatpush.bf16.msra.mxu1 %v11622_v2 }
 0xecb   :  { %4891 = vmatpush.bf16.msra.mxu2 %v11736_v18  ;;  %v11855_v18 = vld [vmem:[%s20648_s9 + $0xa8] sm:$0xf] }
 0xecc   :  { %4611 = vmatpush.bf16.msra.mxu0 %v11610_v35  ;;  %4904 = vmatpush.bf16.msra.mxu3 %v11740_v0  ;;  %v13846_v0 = vld [vmem:[%s20648_s9 + $0xb0] sm:$0xf0] }
 0xece   :  { %4624 = vmatpush.bf16.msra.mxu1 %v11614_v39 }
 0xf2c   :  { %v4317_v25 = vpop.f32.mrf.mxu0 }
 0xf2d   :  { %v4468_v30 = vpack.c.bf16 %v4317_v25, %v4317_v25 }
 0xf2e   :  { %v4338_v31 = vpop.f32.mrf.mxu1 }
 0xf2f   :  { %v4679_v23 = vrot.slane %v4338_v31, 7  ;;  %v4469_v26 = vpack.c.bf16 %v4338_v31, %v4338_v31  ;;  %v4500_v10 = vunpack.c.l.b16 %v4468_v30  ;;  %v13858_v30 = vld [vmem:[%s20647_s10 + $0x50] sm:$0xf0] }
 0xf31   :  { %v4680_v19 = vsel %vm418_vm0, %v4679_v23, %v4317_v25  ;;  %v4501_v5 = vunpack.c.l.b16 %v4469_v26 }
 0xf33   :  { %v4508_v53 = vrot.slane %v4501_v5, 7 }
 0xf34   :  { %v4319_v8 = vpop.f32.mrf.mxu0  ;;  %v4359_v47 = vpop.f32.mrf.mxu2 }
 0xf35   :  { %v4681_v54 = vrot.slane %v4359_v47, 6  ;;  %v4470_v59 = vpack.c.bf16 %v4359_v47, %v4359_v47  ;;  %v4509_v25 = vsel %vm418_vm0, %v4508_v53, %v4500_v10  ;;  %v11755_v53 = vld [vmem:[%s20647_s10 + $0x98] sm:$0xf]  ;;  %v11843_v10 = vld [vmem:[%s20648_s9 + $0x90] sm:$0xf] }
 0xf36   :  { %v4340_v60 = vpop.f32.mrf.mxu1  ;;  %v4380_v48 = vpop.f32.mrf.mxu3 }
 0xf37   :  { %v4682_v61 = vsel %vm420_vm1, %v4681_v54, %v4680_v19  ;;  %v4683_v63 = vrot.slane %v4380_v48, 5  ;;  %v4471_v4 = vpack.c.bf16 %v4380_v48, %v4380_v48  ;;  %v4502_v3 = vunpack.c.l.b16 %v4470_v59  ;;  %v11723_v54 = vld [vmem:[%s20647_s10 + $0x60] sm:$0xf]  ;;  %v13860_v59 = vld [vmem:[%s20647_s10 + $0x64] sm:$0xf] }
 0xf38   :  { %v11724_v58 = vor.u32 %v13861_v55, %v11723_v54  ;;  %v11725_v60 = vld [vmem:[%s20647_s10 + $0x6c] sm:$0xf0]  ;;  %v11807_v54 = vld [vmem:[%s20648_s9 + $0x48] sm:$0xf]  ;;  %v13834_v55 = vld [vmem:[%s20648_s9 + $0x50] sm:$0xf0] }
 0xf39   :  { %v4684_v24 = vsel %vm422_vm2, %v4683_v63, %v4682_v61  ;;  %v4503_v14 = vunpack.c.l.b16 %v4471_v4  ;;  %v4510_v11 = vrot.slane %v4502_v3, 6  ;;  %v11767_v48 = vld [vmem:[%s20647_s10 + $0xb0] sm:$0xf]  ;;  %v11728_v61 = vor.u32 %v13860_v59, %v11725_v60  ;;  %v13871_v63 = vld [vmem:[%s20647_s10 + $0xb8] sm:$0xf0] }
 0xf3a   :  { %4892 = vmatpush.bf16.msra.mxu2 %v11724_v58  ;;  %v11768_v5 = vor.u32 %v13871_v63, %v11767_v48  ;;  %v11856_v4 = vor.u32 %v13846_v0, %v11855_v18  ;;  %v13857_v3 = vld [vmem:[%s20647_s10 + $0x4c] sm:$0xf]  ;;  %v11808_v59 = vor.u32 %v13834_v55, %v11807_v54  ;;  %v11857_v60 = vld [vmem:[%s20648_s9 + $0xb4] sm:$0xf0]  ;;  %v11863_v48 = vld [vmem:[%s20648_s9 + $0xb0] sm:$0xf] }
 0xf3b   :  { %v4512_v28 = vrot.slane %v4503_v14, 5  ;;  %v4511_v31 = vsel %vm420_vm1, %v4510_v11, %v4509_v25  ;;  %4905 = vmatpush.bf16.msra.mxu3 %v11728_v61  ;;  %v13868_v14 = vld [vmem:[%s20647_s10 + $0xa0] sm:$0xf0]  ;;  %v13843_v11 = vld [vmem:[%s20648_s9 + $0x98] sm:$0xf0] }
 0xf3c   :  { %v4361_v6 = vpop.f32.mrf.mxu2  ;;  %v4401_v29 = vpop.f32.mrf.mxu0  ;;  %4915 = vmatpush.bf16.msrb.mxu0 %v11768_v5  ;;  %5056 = vmatpush.bf16.msrb.mxu1 %v11856_v4  ;;  %v11743_v25 = vld [vmem:[%s20647_s10 + $0x80] sm:$0xf]  ;;  %v13845_v58 = vld [vmem:[%s20648_s9 + $0xac] sm:$0xf]  ;;  %v13847_v61 = vld [vmem:[%s20648_s9 + $0xb8] sm:$0xf0] }
 0xf3d   :  { %v4472_v34 = vpack.c.bf16 %v4401_v29, %v4401_v29  ;;  %v4685_v9 = vrot.slane %v4401_v29, 4  ;;  %v4513_v35 = vsel %vm422_vm2, %v4512_v28, %v4511_v31  ;;  %v11713_v29 = vld [vmem:[%s20647_s10 + $0x54] sm:$0xf0]  ;;  %v13865_v28 = vld [vmem:[%s20647_s10 + $0x88] sm:$0xf0]  ;;  %v11860_v63 = vor.u32 %v13845_v58, %v11857_v60 }
 0xf3e   :  { %v4382_v12 = vpop.f32.mrf.mxu3  ;;  %v4422_v13 = vpop.f32.mrf.mxu1  ;;  %v11744_v31 = vor.u32 %v13865_v28, %v11743_v25  ;;  %v11864_v18 = vor.u32 %v13847_v61, %v11863_v48  ;;  %v11707_v0 = vld [vmem:[%s20647_s10 + $0x38] sm:$0xf]  ;;  %v13856_v5 = vld [vmem:[%s20647_s10 + $0x40] sm:$0xf0]  ;;  %v11795_v4 = vld [vmem:[%s20648_s9 + $0x30] sm:$0xf] }
 0xf3f   :  { %v4504_v15 = vunpack.c.l.b16 %v4472_v34  ;;  %v4686_v17 = vsel %vm424_vm3, %v4685_v9, %v4684_v24  ;;  %v4473_v20 = vpack.c.bf16 %v4422_v13, %v4422_v13  ;;  %v4687_v27 = vrot.slane %v4422_v13, 3  ;;  %v11711_v24 = vld [vmem:[%s20647_s10 + $0x48] sm:$0xf]  ;;  %v11699_v13 = vld [vmem:[%s20647_s10 + $0x30] sm:$0xf] }
 0xf40   :  { %v11712_v6 = vor.u32 %v13858_v30, %v11711_v24  ;;  %v11716_v34 = vor.u32 %v13857_v3, %v11713_v29  ;;  %v11756_v9 = vor.u32 %v13868_v14, %v11755_v53  ;;  %v11844_v12 = vor.u32 %v13843_v11, %v11843_v10  ;;  %v13831_v30 = vld [vmem:[%s20648_s9 + $0x38] sm:$0xf0]  ;;  %v13842_v3 = vld [vmem:[%s20648_s9 + $0x94] sm:$0xf]  ;;  %v13844_v10 = vld [vmem:[%s20648_s9 + $0xa0] sm:$0xf0] }
 0xf41   :  { %v4688_v2 = vsel %vm426_vm4, %v4687_v27, %v4686_v17  ;;  %v4514_v16 = vrot.slane %v4504_v15, 4  ;;  %v4505_v32 = vunpack.c.l.b16 %v4473_v20  ;;  %v13855_v15 = vld [vmem:[%s20647_s10 + $0x38] sm:$0xf0]  ;;  %v13854_v17 = vld [vmem:[%s20647_s10 + $0x34] sm:$0xf]  ;;  %v11708_v24 = vor.u32 %v13856_v5, %v11707_v0 }
 0xf42   :  { %4893 = vmatpush.bf16.msra.mxu2 %v11712_v6  ;;  %4906 = vmatpush.bf16.msra.mxu3 %v11716_v34  ;;  %v11700_v20 = vor.u32 %v13855_v15, %v11699_v13  ;;  %v11701_v27 = vld [vmem:[%s20647_s10 + $0x3c] sm:$0xf0]  ;;  %v11465_v29 = vld [vmem:[%s20649_s2 + $0x30] sm:$0xff]  ;;  %v11466_v53 = vld [vmem:[%s20649_s2 + $0x38] sm:$0xff]  ;;  %v11796_v14 = vor.u32 %v13831_v30, %v11795_v4 }
 0xf43   :  { %v4515_v1 = vsel %vm424_vm3, %v4514_v16, %v4513_v35  ;;  %v4516_v62 = vrot.slane %v4505_v32, 3  ;;  %4916 = vmatpush.bf16.msrb.mxu0 %v11756_v9  ;;  %5057 = vmatpush.bf16.msrb.mxu1 %v11844_v12  ;;  %v11831_v16 = vld [vmem:[%s20648_s9 + $0x78] sm:$0xf]  ;;  %v13840_v32 = vld [vmem:[%s20648_s9 + $0x80] sm:$0xf0] }
 0xf44   :  { %v4403_v33 = vpop.f32.mrf.mxu0  ;;  %v4443_v23 = vpop.f32.mrf.mxu2  ;;  %v13852_v35 = vld [vmem:[%s20647_s10 + $0x20] sm:$0xf0]  ;;  %v11845_v6 = vld [vmem:[%s20648_s9 + $0x9c] sm:$0xf0]  ;;  %v11851_v9 = vld [vmem:[%s20648_s9 + $0x98] sm:$0xf] }
 0xf45   :  { %v4474_v37 = vpack.c.bf16 %v4443_v23, %v4443_v23  ;;  %v4689_v39 = vrot.slane %v4443_v23, 2  ;;  %v4517_v50 = vsel %vm426_vm4, %v4516_v62, %v4515_v1  ;;  %v11832_v33 = vor.u32 %v13840_v32, %v11831_v16  ;;  %v11687_v23 = vld [vmem:[%s20647_s10 + $0x18] sm:$0xf]  ;;  %v11689_v1 = vld [vmem:[%s20647_s10 + $0x24] sm:$0xf0] }
 0xf46   :  { %v4424_v40 = vpop.f32.mrf.mxu1  ;;  %v4464_v19 = vpop.f32.mrf.mxu3  ;;  %4894 = vmatpush.bf16.msra.mxu2 %v11700_v20  ;;  %v11731_v62 = vld [vmem:[%s20647_s10 + $0x68] sm:$0xf]  ;;  %v11848_v34 = vor.u32 %v13842_v3, %v11845_v6  ;;  %v11695_v11 = vld [vmem:[%s20647_s10 + $0x20] sm:$0xf]  ;;  %v11852_v12 = vor.u32 %v13844_v10, %v11851_v9  ;;  %v13853_v13 = vld [vmem:[%s20647_s10 + $0x28] sm:$0xf0] }
 0xf47   :  { %v4506_v41 = vunpack.c.l.b16 %v4474_v37  ;;  %v4690_v36 = vsel %vm428_vm5, %v4689_v39, %v4688_v2  ;;  %v4475_v44 = vpack.c.bf16 %v4464_v19, %v4464_v19  ;;  %v4691_v45 = vrot.slane %v4464_v19, 1  ;;  %v13851_v37 = vld [vmem:[%s20647_s10 + $0x1c] sm:$0xf]  ;;  %4917 = vmatpush.bf16.msrb.mxu0 %v11744_v31  ;;  %5058 = vmatpush.bf16.msrb.mxu1 %v11832_v33  ;;  %v13862_v40 = vld [vmem:[%s20647_s10 + $0x70] sm:$0xf0] }
 0xf48   :  { %v11704_v2 = vor.u32 %v13854_v17, %v11701_v27  ;;  %v11688_v39 = vor.u32 %v13852_v35, %v11687_v23  ;;  %v11692_v19 = vor.u32 %v13851_v37, %v11689_v1  ;;  %v11783_v15 = vld [vmem:[%s20648_s9 + $0x18] sm:$0xf]  ;;  %v13828_v17 = vld [vmem:[%s20648_s9 + $0x20] sm:$0xf0]  ;;  %v11696_v20 = vor.u32 %v13853_v13, %v11695_v11  ;;  %v13839_v25 = vld [vmem:[%s20648_s9 + $0x7c] sm:$0xf] }
 0xf49   :  { %v4518_v52 = vrot.slane %v4506_v41, 2  ;;  %v4507_v46 = vunpack.c.l.b16 %v4475_v44  ;;  %v17434_v49 = vsel %vm430_vm6, %v4691_v45, %v4690_v36  ;;  %v11732_v41 = vor.u32 %v13862_v40, %v11731_v62  ;;  %v11819_v36 = vld [vmem:[%s20648_s9 + $0x60] sm:$0xf]  ;;  %v13837_v44 = vld [vmem:[%s20648_s9 + $0x68] sm:$0xf0] }
 0xf4a   :  { %4907 = vmatpush.bf16.msra.mxu3 %v11704_v2  ;;  %4895 = vmatpush.bf16.msra.mxu2 %v11688_v39  ;;  %v11820_v45 = vor.u32 %v13837_v44, %v11819_v36  ;;  %v11784_v27 = vor.u32 %v13828_v17, %v11783_v15  ;;  %v11833_v28 = vld [vmem:[%s20648_s9 + $0x84] sm:$0xf0]  ;;  %v11839_v2 = vld [vmem:[%s20648_s9 + $0x80] sm:$0xf]  ;;  %v13841_v16 = vld [vmem:[%s20648_s9 + $0x88] sm:$0xf0] }
 0xf4b   :  { %v4519_v8 = vsel %vm428_vm5, %v4518_v52, %v4517_v50  ;;  %v4520_v47 = vrot.slane %v4507_v46, 1  ;;  %v11675_v52 = vld [vmem:[%s20647_s10] sm:$0xf]  ;;  %v13849_v46 = vld [vmem:[%s20647_s10 + $0x8] sm:$0xf0]  ;;  %4918 = vmatpush.bf16.msrb.mxu0 %v11732_v41  ;;  %v11836_v31 = vor.u32 %v13839_v25, %v11833_v28  ;;  %v11840_v37 = vor.u32 %v13841_v16, %v11839_v2 }
 0xf4c   :  { %v4445_v51 = vpop.f32.mrf.mxu2  ;;  %v13848_v50 = vld [vmem:[%s20647_s10 + $0x4] sm:$0xf]  ;;  %5059 = vmatpush.bf16.msrb.mxu1 %v11820_v45  ;;  %v11683_v32 = vld [vmem:[%s20647_s10 + $0x8] sm:$0xf]  ;;  %v13850_v33 = vld [vmem:[%s20647_s10 + $0x10] sm:$0xf0] }
 0xf4d   :  { %v4521_v57 = vsel %vm430_vm6, %v4520_v47, %v4519_v8  ;;  %v11676_v8 = vor.u32 %v13849_v46, %v11675_v52  ;;  %v11677_v47 = vld [vmem:[%s20647_s10 + $0xc] sm:$0xf0]  ;;  %v11771_v39 = vld [vmem:[%s20648_s9] sm:$0xf]  ;;  %v13825_v1 = vld [vmem:[%s20648_s9 + $0x8] sm:$0xf0]  ;;  %v11684_v45 = vor.u32 %v13850_v33, %v11683_v32 }
 0xf4e   :  { %v4522_v7 = vpack.c.b16 %v4521_v57, %v4521_v57  ;;  %v4466_v26 = vpop.f32.mrf.mxu3  ;;  %4908 = vmatpush.bf16.msra.mxu3 %v11692_v19  ;;  %v11719_v51 = vld [vmem:[%s20647_s10 + $0x50] sm:$0xf]  ;;  %v13859_v57 = vld [vmem:[%s20647_s10 + $0x58] sm:$0xf0]  ;;  %v13836_v62 = vld [vmem:[%s20648_s9 + $0x64] sm:$0xf]  ;;  %v11772_v52 = vor.u32 %v13825_v1, %v11771_v39 }
 0xf4f   :  { %v11720_v26 = vor.u32 %v13859_v57, %v11719_v51  ;;  %4896 = vmatpush.bf16.msra.mxu2 %v11676_v8  ;;  %v11821_v41 = vld [vmem:[%s20648_s9 + $0x6c] sm:$0xf0]  ;;  %v11827_v36 = vld [vmem:[%s20648_s9 + $0x68] sm:$0xf]  ;;  %v13838_v44 = vld [vmem:[%s20648_s9 + $0x70] sm:$0xf0] }
 0xf50   :  { %4612 = vmatmul.bf16.vlgmr.msra.gmra.mxu0 %v4522_v7  ;;  %4625 = vmatmul.bf16.vlgmr.msra.gmra.mxu1 %v4522_v7  ;;  %v11680_v7 = vor.u32 %v13848_v50, %v11677_v47  ;;  %v11824_v8 = vor.u32 %v13836_v62, %v11821_v41  ;;  %v11828_v47 = vor.u32 %v13838_v44, %v11827_v36  ;;  %v13833_v51 = vld [vmem:[%s20648_s9 + $0x4c] sm:$0xf]  ;;  %v11809_v57 = vld [vmem:[%s20648_s9 + $0x54] sm:$0xf0]  ;;  %v13830_v58 = vld [vmem:[%s20648_s9 + $0x34] sm:$0xf] }
 0xf51   :  { %4919 = vmatpush.bf16.msrb.mxu0 %v11720_v26  ;;  %5060 = vmatpush.bf16.msrb.mxu1 %v11808_v59  ;;  %v13835_v26 = vld [vmem:[%s20648_s9 + $0x58] sm:$0xf0]  ;;  %v11812_v54 = vor.u32 %v13833_v51, %v11809_v57  ;;  %v11797_v48 = vld [vmem:[%s20648_s9 + $0x3c] sm:$0xf0]  ;;  %v11803_v61 = vld [vmem:[%s20648_s9 + $0x38] sm:$0xf] }
 0xf52   :  { %4909 = vmatpush.bf16.msra.mxu3 %v11680_v7  ;;  %v11815_v7 = vld [vmem:[%s20648_s9 + $0x50] sm:$0xf]  ;;  %v11800_v0 = vor.u32 %v13830_v58, %v11797_v48  ;;  %v13827_v4 = vld [vmem:[%s20648_s9 + $0x1c] sm:$0xf]  ;;  %v11791_v6 = vld [vmem:[%s20648_s9 + $0x20] sm:$0xf] }
 0xf53   :  { %5069 = vmatpush.bf16.msrb.mxu2 %v11860_v63  ;;  %v11816_v55 = vor.u32 %v13835_v26, %v11815_v7  ;;  %v13832_v63 = vld [vmem:[%s20648_s9 + $0x40] sm:$0xf0]  ;;  %v11773_v10 = vld [vmem:[%s20648_s9 + $0xc] sm:$0xf0]  ;;  %v11779_v11 = vld [vmem:[%s20648_s9 + $0x8] sm:$0xf] }
 0xf54   :  { %v11804_v5 = vor.u32 %v13832_v63, %v11803_v61  ;;  %v13824_v9 = vld [vmem:[%s20648_s9 + $0x4] sm:$0xf]  ;;  %v11463_v62 = vld [vmem:[%s20650_s0 + $0x18] sm:$0xff]  ;;  %v17706_v51 = vld [vmem:[%s20651_s12] sm:$0x7] }
 0xf55   :  { %4920 = vmatpush.bf16.msrb.mxu0 %v11708_v24  ;;  %5061 = vmatpush.bf16.msrb.mxu1 %v11796_v14  ;;  %v11785_v24 = vld [vmem:[%s20648_s9 + $0x24] sm:$0xf0]  ;;  %v11776_v13 = vor.u32 %v13824_v9, %v11773_v10  ;;  %v11986_v57 = vld [vmem:[%s20640_s6 + $0xe0] sm:$0xf]  ;;  %v13902_v7 = vld [vmem:[%s20640_s6 + $0xec] sm:$0xf0] }
 0xf56   :  { %5082 = vmatpush.bf16.msrb.mxu3 %v11864_v18  ;;  %v11788_v14 = vor.u32 %v13827_v4, %v11785_v24  ;;  %v13900_v26 = vld [vmem:[%s20640_s6 + $0xe4] sm:$0xf]  ;;  %v11994_v58 = vld [vmem:[%s20640_s6 + $0xe8] sm:$0xf]  ;;  %v13899_v10 = vld [vmem:[%s20640_s6 + $0xd4] sm:$0xf0] }
 0xf57   :  { %5070 = vmatpush.bf16.msrb.mxu2 %v11848_v34  ;;  %v11978_v9 = vld [vmem:[%s20640_s6 + $0xc8] sm:$0xf] }
 0xf59   :  { %4921 = vmatpush.bf16.msrb.mxu0 %v11696_v20  ;;  %5062 = vmatpush.bf16.msrb.mxu1 %v11784_v27 }
 0xf5a   :  { %5083 = vmatpush.bf16.msrb.mxu3 %v11852_v12  ;;  %v13826_v12 = vld [vmem:[%s20648_s9 + $0x10] sm:$0xf0] }
 0xf5b   :  { %5071 = vmatpush.bf16.msrb.mxu2 %v11836_v31  ;;  %v11780_v15 = vor.u32 %v13826_v12, %v11779_v11 }
 0xf5d   :  { %4922 = vmatpush.bf16.msrb.mxu0 %v11684_v45  ;;  %5063 = vmatpush.bf16.msrb.mxu1 %v11772_v52 }
 0xf5e   :  { %5084 = vmatpush.bf16.msrb.mxu3 %v11840_v37 }
 0xf5f   :  { %5072 = vmatpush.bf16.msrb.mxu2 %v11824_v8 }
 0xf62   :  { %5085 = vmatpush.bf16.msrb.mxu3 %v11828_v47 }
 0xf63   :  { %5073 = vmatpush.bf16.msrb.mxu2 %v11812_v54  ;;  %v11987_v54 = vor.u32 %v13902_v7, %v11986_v57 }
 0xf65   :  { %5355 = vmatpush.bf16.msra.mxu0 %v11987_v54  ;;  %v11948_v54 = vld [vmem:[%s20640_s6 + $0x98] sm:$0xf0] }
 0xf66   :  { %5086 = vmatpush.bf16.msrb.mxu3 %v11816_v55  ;;  %v11988_v55 = vld [vmem:[%s20640_s6 + $0xf0] sm:$0xf0] }
 0xf67   :  { %5074 = vmatpush.bf16.msrb.mxu2 %v11800_v0  ;;  %v11991_v61 = vor.u32 %v13900_v26, %v11988_v55  ;;  %v11996_v0 = vld [vmem:[%s20640_s6 + $0xf8] sm:$0xf0]  ;;  %v13889_v26 = vld [vmem:[%s20640_s6 + $0x8c] sm:$0xf] }
 0xf68   :  { %v11951_v55 = vor.u32 %v13889_v26, %v11948_v54  ;;  %v11876_v54 = vld [vmem:[%s20640_s6 + $0x10] sm:$0xf0] }
 0xf69   :  { %5368 = vmatpush.bf16.msra.mxu1 %v11991_v61  ;;  %v11924_v61 = vld [vmem:[%s20640_s6 + $0x70] sm:$0xf0] }
 0xf6a   :  { %5087 = vmatpush.bf16.msrb.mxu3 %v11804_v5 }
 0xf6b   :  { %5075 = vmatpush.bf16.msrb.mxu2 %v11788_v14 }
 0xf6f   :  { %5076 = vmatpush.bf16.msrb.mxu2 %v11776_v13 }
 0xfcd   :  { %v4613_v23 = vpop.f32.mrf.mxu0  ;;  %v4626_v35 = vpop.f32.mrf.mxu1 }
 0xfce   :  { %v4630_v40 = vadd.f32 %v11465_v29, %v4613_v23  ;;  %v4631_v19 = vadd.f32 %v11466_v53, %v4626_v35  ;;  %v13829_v29 = vld [vmem:[%s20648_s9 + $0x28] sm:$0xf0] }
 0xfcf   :  { %v11792_v34 = vor.u32 %v13829_v29, %v11791_v6  ;;  %v11970_v6 = vld [vmem:[%s20640_s6 + $0xc0] sm:$0xf]  ;;  %v13898_v29 = vld [vmem:[%s20640_s6 + $0xcc] sm:$0xf0] }
 0xfd0   :  { %v11671_v46 = vmul.f32 -1.442695, %v4630_v40  ;;  %v11672_v50 = vmul.f32 -1.442695, %v4631_v19  ;;  %v11971_v14 = vor.u32 %v13898_v29, %v11970_v6  ;;  %v13885_v6 = vld [vmem:[%s20640_s6 + $0x6c] sm:$0xf] }
 0xfd1   :  { %5088 = vmatpush.bf16.msrb.mxu3 %v11792_v34  ;;  %v11972_v34 = vld [vmem:[%s20640_s6 + $0xd0] sm:$0xf0]  ;;  %v11932_v29 = vld [vmem:[%s20640_s6 + $0x78] sm:$0xf0] }
 0xfd2   :  { %14552 = vpow2.f32 %v11671_v46  ;;  %5356 = vmatpush.bf16.msra.mxu0 %v11971_v14 }
 0xfd3   :  { %14554 = vpow2.f32 %v11672_v50 }
 0xfd5   :  { %v4615_v59 = vpop.f32.mrf.mxu0  ;;  %v4628_v60 = vpop.f32.mrf.mxu1  ;;  %5089 = vmatpush.bf16.msrb.mxu3 %v11780_v15 }
 0xfd6   :  { %v13903_v59 = vld [vmem:[%s20640_s6 + $0xf4] sm:$0xf0]  ;;  %v4136_v60 = vperm.slane %v17706_v51, 0 }
 0xfd7   :  { %v11995_v63 = vor.u32 %v13903_v59, %v11994_v58  ;;  %v11922_v58 = vld [vmem:[%s20640_s6 + $0x60] sm:$0xf]  ;;  %v13886_v59 = vld [vmem:[%s20640_s6 + $0x6c] sm:$0xf0] }
 0xfd8   :  { %v14553_v18 = vpop.eup %14552  ;;  %v4142_v11 = vadd.f32 %v4136_v60, %v17212_v22  ;;  %v11954_v22 = vld [vmem:[%s20640_s6 + $0xa0] sm:$0xf]  ;;  %v13884_v60 = vld [vmem:[%s20640_s6 + $0x64] sm:$0xf] }
 0xfd9   :  { %v14555_v30 = vpop.eup %14554  ;;  %v4638_v3 = vadd.f32 1.0, %v14553_v18  ;;  %v13901_v18 = vld [vmem:[%s20640_s6 + $0xec] sm:$0xf] }
 0xfda   :  { %v4639_v53 = vadd.f32 1.0, %v14555_v30  ;;  %v11999_v24 = vor.u32 %v13901_v18, %v11996_v0  ;;  %v13887_v18 = vld [vmem:[%s20640_s6 + $0x74] sm:$0xf0] }
 0xfdb   :  { %14556 = vrcp.f32 %v4638_v3  ;;  %v4651_v2 = vand.u32 2147483648, %v4638_v3  ;;  %v4649_v32 = vand.u32 2147483647, %v4638_v3  ;;  %vm4645_vm11 = vweird.f32 %v4638_v3 }
 0xfdc   :  { %14558 = vrcp.f32 %v4639_v53  ;;  %v4666_v33 = vand.u32 2147483648, %v4639_v53  ;;  %v4664_v35 = vand.u32 2147483647, %v4639_v53  ;;  %vm4660_vm13 = vweird.f32 %v4639_v53 }
 0xfdd   :  { %v4652_v39 = vor.u32 1.1754944e-38, %v4651_v2  ;;  %vm4650_vm15 = vcmp.eq.f32.partialorder %v4649_v32, 8.507059e+37  ;;  %v13894_v2 = vld [vmem:[%s20640_s6 + $0xac] sm:$0xf0]  ;;  %v11956_v32 = vld [vmem:[%s20640_s6 + $0xb0] sm:$0xf0] }
 0xfde   :  { %v4667_v40 = vor.u32 1.1754944e-38, %v4666_v33  ;;  %vm4665_vm8 = vcmp.eq.f32.partialorder %v4664_v35, 8.507059e+37  ;;  %v11962_v33 = vld [vmem:[%s20640_s6 + $0xa8] sm:$0xf] }
 0xfe1   :  { %v14557_v17 = vpop.eup %14556 }
 0xfe2   :  { %v14559_v20 = vpop.eup %14558  ;;  %v4641_v27 = vmul.f32 %v14557_v17, %v4638_v3  ;;  %vm4646_vm9 = vweird.f32 %v14557_v17 }
 0xfe3   :  { %v4656_v25 = vmul.f32 %v14559_v20, %v4639_v53  ;;  %vm4661_vm10 = vweird.f32 %v14559_v20  ;;  %vm4647_vm12 = vmor %vm4645_vm11, %vm4646_vm9  ;;  %v13896_v53 = vld [vmem:[%s20640_s6 + $0xc4] sm:$0xf] }
 0xfe4   :  { %v4642_v28 = vsub.f32 1.0, %v4641_v27  ;;  %vm4662_vm14 = vmor %vm4660_vm13, %vm4661_vm10  ;;  %v11975_v15 = vor.u32 %v13896_v53, %v11972_v34  ;;  %v11980_v27 = vld [vmem:[%s20640_s6 + $0xd8] sm:$0xf0] }
 0xfe5   :  { %v4657_v31 = vsub.f32 1.0, %v4656_v25 }
 0xfe6   :  { %v4643_v16 = vmul.f32 %v14557_v17, %v4642_v28  ;;  %5369 = vmatpush.bf16.msra.mxu1 %v11975_v15 }
 0xfe7   :  { %v4658_v23 = vmul.f32 %v14559_v20, %v4657_v31  ;;  %v13892_v31 = vld [vmem:[%s20640_s6 + $0xa4] sm:$0xf] }
 0xfe8   :  { %v4644_v37 = vadd.f32 %v14557_v17, %v4643_v16  ;;  %v11955_v16 = vor.u32 %v13894_v2, %v11954_v22  ;;  %v13881_v22 = vld [vmem:[%s20640_s6 + $0x4c] sm:$0xf] }
 0xfe9   :  { %v4659_v1 = vadd.f32 %v14559_v20, %v4658_v23  ;;  %v13895_v23 = vld [vmem:[%s20640_s6 + $0xb4] sm:$0xf0] }
 0xfea   :  { %v4648_v19 = vsel %vm4647_vm12, %v14557_v17, %v4644_v37  ;;  %v11979_v17 = vor.u32 %v13899_v10, %v11978_v9  ;;  %v11959_v37 = vor.u32 %v13892_v31, %v11956_v32  ;;  %5357 = vmatpush.bf16.msra.mxu0 %v11955_v16  ;;  %v11935_v9 = vor.u32 %v13885_v6, %v11932_v29  ;;  %v11890_v32 = vld [vmem:[%s20640_s6 + $0x20] sm:$0xf] }
 0xfeb   :  { %v4663_v41 = vsel %vm4662_vm14, %v14559_v20, %v4659_v1  ;;  %v4653_v36 = vsel %vm4650_vm15, %v4652_v39, %v4648_v19  ;;  %v13897_v20 = vld [vmem:[%s20640_s6 + $0xcc] sm:$0xf]  ;;  %v11963_v39 = vor.u32 %v13895_v23, %v11962_v33  ;;  %v13878_v33 = vld [vmem:[%s20640_s6 + $0x2c] sm:$0xf0]  ;;  %v13876_v23 = vld [vmem:[%s20640_s6 + $0x24] sm:$0xf] }
 0xfec   :  { %v4668_v44 = vsel %vm4665_vm8, %v4667_v40, %v4663_v41  ;;  %v4670_v45 = vmul.f32 %v11463_v62, %v4653_v36  ;;  %v11983_v25 = vor.u32 %v13897_v20, %v11980_v27  ;;  %v13893_v1 = vld [vmem:[%s20640_s6 + $0xac] sm:$0xf]  ;;  %v11964_v62 = vld [vmem:[%s20640_s6 + $0xb8] sm:$0xf0]  ;;  %5370 = vmatpush.bf16.msra.mxu1 %v11959_v37  ;;  %v11938_v36 = vld [vmem:[%s20640_s6 + $0x80] sm:$0xf] }
 0xfed   :  { %v4694_v52 = vmul.f32 %v17434_v49, %v4668_v44  ;;  %v17711_v49 = vld [vmem:[%s20652_s11] sm:$0x7]  ;;  %v11967_v41 = vor.u32 %v13893_v1, %v11964_v62  ;;  %v13890_v44 = vld [vmem:[%s20640_s6 + $0x8c] sm:$0xf0]  ;;  %v11892_v37 = vld [vmem:[%s20640_s6 + $0x30] sm:$0xf0] }
 0xfee   :  { %v4695_v46 = vpack.c.bf16 %v4670_v45, %v4670_v45  ;;  %v5097_v48 = vperm.slane %v17711_v49, 0  ;;  %v13888_v45 = vld [vmem:[%s20640_s6 + $0x84] sm:$0xf]  ;;  %v13879_v1 = vld [vmem:[%s20640_s6 + $0x34] sm:$0xf0] }
 0xfef   :  { %v4728_v50 = vpack.c.bf16 %v4694_v52, %v4694_v52  ;;  %v11939_v52 = vor.u32 %v13890_v44, %v11938_v36  ;;  %v11900_v36 = vld [vmem:[%s20640_s6 + $0x38] sm:$0xf0] }
 0xff0   :  { %5064 = vmatmul.bf16.vlgmr.msrb.gmra.mxu1 %v4695_v46 }
 0xff1   :  { %4897 = vmatmul.bf16.vlgmr.msra.gmra.mxu2 %v4728_v50  ;;  %4910 = vmatmul.bf16.vlgmr.msra.gmra.mxu3 %v4728_v50 }
 0xff2   :  { %4923 = vmatmul.bf16.vlgmr.msrb.gmra.mxu0 %v4728_v50  ;;  %5381 = vmatpush.bf16.msra.mxu2 %v11995_v63  ;;  %v11946_v50 = vld [vmem:[%s20640_s6 + $0x88] sm:$0xf] }
 0xff3   :  { %5394 = vmatpush.bf16.msra.mxu3 %v11999_v24  ;;  %5358 = vmatpush.bf16.msra.mxu0 %v11939_v52  ;;  %v11930_v63 = vld [vmem:[%s20640_s6 + $0x68] sm:$0xf]  ;;  %v5098_v24 = vperm.slane %v17711_v49, 1 }
 0xff6   :  { %5382 = vmatpush.bf16.msra.mxu2 %v11979_v17 }
 0xff7   :  { %5395 = vmatpush.bf16.msra.mxu3 %v11983_v25  ;;  %v11914_v25 = vld [vmem:[%s20640_s6 + $0x48] sm:$0xf] }
 0xffa   :  { %5383 = vmatpush.bf16.msra.mxu2 %v11963_v39  ;;  %v11898_v39 = vld [vmem:[%s20640_s6 + $0x28] sm:$0xf] }
 0xffb   :  { %5396 = vmatpush.bf16.msra.mxu3 %v11967_v41  ;;  %v13877_v41 = vld [vmem:[%s20640_s6 + $0x2c] sm:$0xf] }
 0xfff   :  { %5397 = vmatpush.bf16.msra.mxu3 %v11951_v55  ;;  %v11882_v55 = vld [vmem:[%s20640_s6 + $0x8] sm:$0xf] }
0x1001   :  { %5077 = vmatmul.bf16.vlgmr.msrb.gmra.mxu2 %v4695_v46  ;;  %5090 = vmatmul.bf16.vlgmr.msrb.gmra.mxu3 %v4695_v46  ;;  %v11940_v46 = vld [vmem:[%s20640_s6 + $0x90] sm:$0xf0] }
0x1002   :  { %v11943_v57 = vor.u32 %v13888_v45, %v11940_v46  ;;  %v11903_v46 = vor.u32 %v13877_v41, %v11900_v36 }
0x1003   :  { %5398 = vmatpush.bf16.msra.mxu3 %v11935_v9 }
0x1004   :  { %5371 = vmatpush.bf16.msra.mxu1 %v11943_v57  ;;  %v13874_v57 = vld [vmem:[%s20640_s6 + $0xc] sm:$0xf0] }
0x106d   :  { %v5065_v8 = vpop.f32.mrf.mxu1 }
0x106f   :  { %v17701_v47 = vpop.f32.mrf.mxu0 }
0x1074   :  { %v4898_v5 = vpop.f32.mrf.mxu2  ;;  %v17739_v4 = vpop.f32.mrf.mxu3 }
0x1075   :  { %v5066_v30 = vadd.f32 %v5065_v8, %v4898_v5  ;;  %v5067_v3 = vpop.f32.mrf.mxu1  ;;  %v13891_v8 = vld [vmem:[%s20640_s6 + $0x94] sm:$0xf0]  ;;  %v4137_v5 = vperm.slane %v17706_v51, 1 }
0x1076   :  { %v11947_v7 = vor.u32 %v13891_v8, %v11946_v50  ;;  %v11931_v3 = vor.u32 %v13887_v18, %v11930_v63  ;;  %v11874_v8 = vld [vmem:[%s20640_s6] sm:$0xf] }
0x1077   :  { %v5103_v12 = vadd.f32 %v5097_v48, %v5066_v30  ;;  %v4926_v13 = vpop.f32.mrf.mxu0  ;;  %v11923_v48 = vor.u32 %v13886_v59, %v11922_v58  ;;  %v11927_v30 = vor.u32 %v13884_v60, %v11924_v61  ;;  %v4143_v15 = vadd.f32 %v4137_v5, %v17217_v42  ;;  %v11916_v42 = vld [vmem:[%s20640_s6 + $0x58] sm:$0xf0]  ;;  %v13875_v60 = vld [vmem:[%s20640_s6 + $0x14] sm:$0xf0] }
0x1078   :  { %5384 = vmatpush.bf16.msra.mxu2 %v11947_v7  ;;  %v13880_v13 = vld [vmem:[%s20640_s6 + $0x44] sm:$0xf]  ;;  %v11919_v16 = vor.u32 %v13881_v22, %v11916_v42  ;;  %v11875_v26 = vor.u32 %v13874_v57, %v11874_v8  ;;  %v4138_v61 = vperm.slane %v17706_v51, 2  ;;  %v11883_v18 = vor.u32 %v13875_v60, %v11882_v55 }
0x1079   :  { %v5106_v28 = vadd.f32 %v5103_v12, %v4142_v11  ;;  %5359 = vmatpush.bf16.msra.mxu0 %v11923_v48  ;;  %5372 = vmatpush.bf16.msra.mxu1 %v11927_v30  ;;  %v11906_v11 = vld [vmem:[%s20640_s6 + $0x40] sm:$0xf]  ;;  %v13882_v12 = vld [vmem:[%s20640_s6 + $0x4c] sm:$0xf0]  ;;  %v13872_v7 = vld [vmem:[%s20640_s6 + $0x4] sm:$0xf] }
0x107a   :  { %v11907_v20 = vor.u32 %v13882_v12, %v11906_v11  ;;  %5399 = vmatpush.bf16.msra.mxu3 %v11919_v16  ;;  %v11879_v59 = vor.u32 %v13872_v7, %v11876_v54  ;;  %v13873_v48 = vld [vmem:[%s20640_s6 + $0xc] sm:$0xf] }
0x107b   :  { %v11865_v35 = vmul.f32 -1.442695, %v5106_v28  ;;  %v13883_v28 = vld [vmem:[%s20640_s6 + $0x54] sm:$0xf0] }
0x107c   :  { %v4900_v40 = vpop.f32.mrf.mxu2  ;;  %v4913_v19 = vpop.f32.mrf.mxu3  ;;  %5385 = vmatpush.bf16.msra.mxu2 %v11931_v3  ;;  %v11915_v2 = vor.u32 %v13883_v28, %v11914_v25 }
0x107d   :  { %14560 = vpow2.f32 %v11865_v35  ;;  %5360 = vmatpush.bf16.msra.mxu0 %v11907_v20  ;;  %v11891_v35 = vor.u32 %v13878_v33, %v11890_v32  ;;  %v11895_v40 = vor.u32 %v13876_v23, %v11892_v37  ;;  %v11899_v19 = vor.u32 %v13879_v1, %v11898_v39  ;;  %v11869_v23 = vld [vmem:[%s20642_s1 + $0x20] sm:$0xff]  ;;  %v14396_v37 = vld [vmem:[%s20643_s3 + $0x8] sm:$0xff]  }
0x107e   :  { %5400 = vmatpush.bf16.msra.mxu3 %v11903_v46  ;;  %v14397_v46 = vld [vmem:[%s20643_s3 + $0x10] sm:$0xff]  }
0x1080   :  { %5386 = vmatpush.bf16.msra.mxu2 %v11915_v2 }
0x1081   :  { %5361 = vmatpush.bf16.msra.mxu0 %v11891_v35  ;;  %v14321_v35 = vld [vmem:[%s20643_s3] sm:$0xff]  }
0x1082   :  { %v14323_v41 = vunpack.c.h.bf16 %v14321_v35 }
0x1083   :  { %v14561_v0 = vpop.eup %14560 }
0x1084   :  { %v17840_v53 = vadd.f32 1.0, %v14561_v0  ;;  %v5078_v14 = vpop.f32.mrf.mxu2  ;;  %v17842_v34 = vpop.f32.mrf.mxu3  ;;  %5387 = vmatpush.bf16.msra.mxu2 %v11899_v19  ;;  %v11884_v0 = vld [vmem:[%s20640_s6 + $0x18] sm:$0xf0]  ;;  %v14326_v19 = vunpack.c.l.bf16 %v14396_v37 }
0x1085   :  { %v5079_v10 = vadd.f32 %v5078_v14, %v17739_v4  ;;  %v11908_v4 = vld [vmem:[%s20640_s6 + $0x50] sm:$0xf0]  ;;  %5362 = vmatpush.bf16.msra.mxu0 %v11875_v26  ;;  %v11887_v30 = vor.u32 %v13873_v48, %v11884_v0  ;;  %v4144_v14 = vadd.f32 %v4138_v61, %v17219_v43  ;;  %v5092_v12 = vadd.f32 %v17842_v34, %v17701_v47 }
0x1086   :  { %14562 = vrcp.f32 %v17840_v53  ;;  %v11911_v27 = vor.u32 %v13880_v13, %v11908_v4  ;;  %v5122_v63 = vand.u32 2147483648, %v17840_v53  ;;  %vm5116_vm10 = vweird.f32 %v17840_v53 }
0x1087   :  { %v5104_v17 = vadd.f32 %v5098_v24, %v5079_v10  ;;  %v5120_v24 = vand.u32 2147483647, %v17840_v53  ;;  %5401 = vmatpush.bf16.msra.mxu3 %v11887_v30  ;;  %v5099_v13 = vperm.slane %v17711_v49, 2 }
0x1088   :  { %5373 = vmatpush.bf16.msra.mxu1 %v11911_v27  ;;  %5388 = vmatpush.bf16.msra.mxu2 %v11883_v18  ;;  %v5123_v29 = vor.u32 1.1754944e-38, %v5122_v63 }
0x1089   :  { %v5126_v31 = vadd.f32 %v5104_v17, %v4143_v15  ;;  %vm5121_vm12 = vcmp.eq.f32.partialorder %v5120_v24, 8.507059e+37  ;;  %v5105_v15 = vadd.f32 %v5099_v13, %v5092_v12 }
0x108b   :  { %v11866_v62 = vmul.f32 -1.442695, %v5126_v31  ;;  %v14724_v31 = vld [vmem:[%s20653_s13 + $0x10] sm:$0xff] }
0x108c   :  { %v14563_v44 = vpop.eup %14562  ;;  %v5080_v45 = vpop.f32.mrf.mxu2  ;;  %5374 = vmatpush.bf16.msra.mxu1 %v11895_v40  ;;  %v14322_v40 = vunpack.c.l.bf16 %v14321_v35 }
0x108d   :  { %v5093_v52 = vpop.f32.mrf.mxu3  ;;  %14564 = vpow2.f32 %v11866_v62  ;;  %v5112_v50 = vmul.f32 %v14563_v44, %v17840_v53  ;;  %vm5117_vm9 = vweird.f32 %v14563_v44 }
0x108e   :  { %vm5118_vm11 = vmor %vm5116_vm10, %vm5117_vm9  ;;  %vm20714_vm9 = vcmask 64512  }
0x108f   :  { %v5113_v58 = vsub.f32 1.0, %v5112_v50  ;;  %v14327_v50 = vunpack.c.h.bf16 %v14396_v37  ;;  %vm20715_vm10 = vmmov %vm20714_vm9 }
0x1090   :  { %5375 = vmatpush.bf16.msra.mxu1 %v11879_v59 }
0x1091   :  { %v5114_v5 = vmul.f32 %v14563_v44, %v5113_v58  ;;  %v14331_v58 = vunpack.c.h.bf16 %v14397_v46 }
0x1093   :  { %v14565_v3 = vpop.eup %14564  ;;  %v5115_v6 = vadd.f32 %v14563_v44, %v5114_v5  ;;  %v14330_v5 = vunpack.c.l.bf16 %v14397_v46 }
0x1094   :  { %v5130_v51 = vadd.f32 1.0, %v14565_v3 }
0x1095   :  { %v5119_v9 = vsel %vm5118_vm11, %v14563_v44, %v5115_v6  ;;  %v14414_v6 = vld [vmem:[%s20641_s7] ss:$0 sm:$0xff]  ;;  %vm20716_vm11 = vcmask 1043456  }
0x1096   :  { %14566 = vrcp.f32 %v5130_v51  ;;  %v5124_v10 = vsel %vm5121_vm12, %v5123_v29, %v5119_v9  ;;  %v5142_v27 = vand.u32 2147483648, %v5130_v51  ;;  %v5140_v28 = vand.u32 2147483647, %v5130_v51  ;;  %vm20717_vm12 = vmmov %vm20716_vm11 }
0x1097   :  { %v5146_v11 = vmul.f32 %v5124_v10, %v4144_v14  ;;  %vm5136_vm14 = vweird.f32 %v5130_v51 }
0x1098   :  { %v5143_v22 = vor.u32 1.1754944e-38, %v5142_v27  ;;  %vm5141_vm8 = vcmp.eq.f32.partialorder %v5140_v28, 8.507059e+37 }
0x1099   :  { %v5147_v53 = vadd.f32 %v5146_v11, %v5105_v15 }
0x109b   :  { %14568 = vtanh.f32 %v5147_v53 }
0x109c   :  { %v14567_v4 = vpop.eup %14566 }
0x109d   :  { %v5132_v17 = vmul.f32 %v14567_v4, %v5130_v51  ;;  %vm5137_vm13 = vweird.f32 %v14567_v4  ;;  %v14398_v51 = vld [vmem:[%s20643_s3 + $0x18] sm:$0xff]  }
0x109e   :  { %vm5138_vm15 = vmor %vm5136_vm14, %vm5137_vm13  ;;  %v14334_v11 = vunpack.c.l.bf16 %v14398_v51  ;;  %v14335_v27 = vunpack.c.h.bf16 %v14398_v51 }
0x109f   :  { %v5133_v20 = vsub.f32 1.0, %v5132_v17  ;;  %vm20718_vm13 = vmmov %vm20716_vm11 }
0x10a0   :  { %vm20719_vm14 = vmmov %vm20716_vm11 }
0x10a1   :  { %v5134_v25 = vmul.f32 %v14567_v4, %v5133_v20  ;;  %v14569_v34 = vpop.eup %14568 }
0x10a3   :  { %v5135_v43 = vadd.f32 %v14567_v4, %v5134_v25 }
0x10a5   :  { %v5139_v2 = vsel %vm5138_vm15, %v14567_v4, %v5135_v43  ;;  %vm20720_vm15 = vmmov %vm20716_vm11 }
0x10a6   :  { %v5144_v42 = vsel %vm5141_vm8, %v5143_v22, %v5139_v2  ;;  %vm20721_vm8 = vmmov %vm20716_vm11 }
0x10a7   :  { %v5149_v47 = vsub.f32 1.0, %v5144_v42  ;;  %v5151_v16 = vmul.f32 %v14724_v31, %v5144_v42 }
0x10a9   :  { %v5150_v49 = vmul.f32 %v14569_v34, %v5149_v47 }
0x10ab   :  { %v5152_v32 = vadd.f32 %v5151_v16, %v5150_v49 }
0x10ad   :  { %11867 = vst [vmem:[%s20653_s13 + $0x18] sm:$0xff] %v5152_v32  ;;  %v5162_v33 = vpack.c.bf16 %v5152_v32, %v5152_v32 }
0x10af   :  { %5363 = vmatmul.bf16.vlgmr.msra.gmra.mxu0 %v5162_v33  ;;  %5376 = vmatmul.bf16.vlgmr.msra.gmra.mxu1 %v5162_v33 }
0x10b0   :  { %5389 = vmatmul.bf16.vlgmr.msra.gmra.mxu2 %v5162_v33  ;;  %5402 = vmatmul.bf16.vlgmr.msra.gmra.mxu3 %v5162_v33 }
0x112c   :  { %v5364_v39 = vpop.f32.mrf.mxu0  ;;  %v17943_v1 = vpop.f32.mrf.mxu1 }
0x112d   :  { %v5418_v62 = vadd.f32 %v11869_v23, %v5364_v39 }
0x112f   :  { %v5443_v36 = vperm.slane %v5418_v62, 0  ;;  %v5437_v44 = vrot.slane %v5418_v62, 2  ;;  %v5436_v45 = vrot.slane %v5418_v62, 1  ;;  %v5438_v52 = vrot.slane %v5418_v62, 3 }
0x1130   :  { %v5440_v8 = vrot.slane %v5418_v62, 5  ;;  %v5439_v57 = vrot.slane %v5418_v62, 4  ;;  %v5441_v3 = vrot.slane %v5418_v62, 6  ;;  %v5442_v9 = vrot.slane %v5418_v62, 7 }
0x1131   :  { %v5459_v7 = vadd.f32 %v14322_v40, %v5443_v36  ;;  %v5445_v26 = vperm.slane %v5437_v44, 0  ;;  %v5444_v54 = vperm.slane %v5436_v45, 0  ;;  %v5446_v55 = vperm.slane %v5438_v52, 0 }
0x1132   :  { %v5448_v63 = vperm.slane %v5440_v8, 0  ;;  %v5447_v24 = vperm.slane %v5439_v57, 0  ;;  %v5449_v12 = vperm.slane %v5441_v3, 0  ;;  %v5450_v25 = vperm.slane %v5442_v9, 0  ;;  %v5565_v9 = vld [vmem:[%s20645_s4] sm:$0xf] }
0x1133   :  { %v17948_v59 = vpop.f32.mrf.mxu2  ;;  %v17950_v60 = vpop.f32.mrf.mxu3  ;;  %14570 = vtanh.f32 %v5459_v7  ;;  %v5461_v48 = vadd.f32 %v14326_v19, %v5445_v26  ;;  %v5460_v61 = vadd.f32 %v14323_v41, %v5444_v54  ;;  %v5462_v30 = vadd.f32 %v14327_v50, %v5446_v55 }
0x1134   :  { %v5366_v18 = vpop.f32.mrf.mxu0  ;;  %v5379_v0 = vpop.f32.mrf.mxu1  ;;  %v5464_v29 = vadd.f32 %v14331_v58, %v5448_v63  ;;  %v5463_v14 = vadd.f32 %v14330_v5, %v5447_v24  ;;  %v5465_v43 = vadd.f32 %v14334_v11, %v5449_v12  ;;  %v5466_v2 = vadd.f32 %v14335_v27, %v5450_v25  ;;  %v5570_v27 = vld [vmem:[%s20645_s4 + $0x14] sm:$0xf] }
0x1135   :  { %14572 = vtanh.f32 %v5461_v48  ;;  %v5579_v12 = vsel %vm20718_vm13, %v5565_v9, 0 }
0x1136   :  { %14574 = vtanh.f32 %v5460_v61  ;;  %5588 = vmatpush.bf16.msrb.mxu0 %v5579_v12  ;;  %v13914_v12 = vld [vmem:[%s20646_s8 + $0x54] sm:$0xf] }
0x1137   :  { %14576 = vtanh.f32 %v5462_v30 }
0x1138   :  { %14578 = vtanh.f32 %v5464_v29  ;;  %v5567_v29 = vld [vmem:[%s20645_s4 + $0x8] sm:$0xf] }
0x1139   :  { %v14571_v10 = vpop.eup %14570  ;;  %14580 = vtanh.f32 %v5463_v14  ;;  %v5568_v14 = vld [vmem:[%s20645_s4 + $0xc] sm:$0xf] }
0x113a   :  { %v5479_v13 = vmul.f32 %v14571_v10, %v14414_v6  ;;  %14582 = vtanh.f32 %v5465_v43  ;;  %v5621_v10 = vsel %vm20716_vm11, %v5567_v29, 0  ;;  %v5642_v11 = vsel %vm20717_vm12, %v5568_v14, 0  ;;  %v12064_v14 = vld [vmem:[%s20646_s8 + $0x68] sm:$0xf0] }
0x113b   :  { %v14573_v4 = vpop.eup %14572  ;;  %v5392_v15 = vpop.f32.mrf.mxu2  ;;  %14584 = vtanh.f32 %v5466_v2  ;;  %5630 = vmatpush.bf16.msrb.mxu2 %v5621_v10  ;;  %5651 = vmatpush.bf16.msrb.mxu3 %v5642_v11  ;;  %vm20724_vm11 = vcmask 1040384   ;;  %vm20725_vm12 = vcmask 64512   ;;  %v12054_v10 = vld [vmem:[%s20646_s8 + $0x50] sm:$0xf]  ;;  %v13915_v11 = vld [vmem:[%s20646_s8 + $0x54] sm:$0xf0] }
0x113c   :  { %v5405_v17 = vpop.f32.mrf.mxu3  ;;  %v14575_v53 = vpop.eup %14574  ;;  %5487 = vadd.xlane.f32.xlu1 %v5479_v13  ;;  %v5481_v20 = vmul.f32 %v14573_v4, %v14414_v6  ;;  %v5566_v13 = vld [vmem:[%s20645_s4 + $0x4] sm:$0xf]  ;;  %v5571_v15 = vld [vmem:[%s20645_s4 + $0x18] sm:$0xf]  ;;  %vm20726_vm13 = vmmov %vm20725_vm12 }
0x113d   :  { %v5480_v28 = vmul.f32 %v14575_v53, %v14414_v6  ;;  %v14577_v22 = vpop.eup %14576  ;;  %v5600_v4 = vsel %vm20719_vm14, %v5566_v13, 0  ;;  %v5705_v17 = vsel %vm20720_vm15, %v5571_v15, 0  ;;  %v5572_v53 = vld [vmem:[%s20645_s4 + $0x1c] sm:$0xf]  ;;  %vm20727_vm14 = vmmov %vm20725_vm12  ;;  %v12055_v13 = vor.u32 %v13915_v11, %v12054_v10  ;;  %v12142_v11 = vld [vmem:[%s20647_s10 + $0x84] sm:$0xf0] }
0x113e   :  { %5491 = vadd.xlane.f32.xlu0 %v5481_v20  ;;  %v14579_v42 = vpop.eup %14578  ;;  %v5482_v34 = vmul.f32 %v14577_v22, %v14414_v6  ;;  %5609 = vmatpush.bf16.msrb.mxu1 %v5600_v4  ;;  %v5569_v20 = vld [vmem:[%s20645_s4 + $0x10] sm:$0xf]  ;;  %v5726_v25 = vsel %vm20721_vm8, %v5572_v53, 0  ;;  %vm20728_vm15 = vmmov %vm20725_vm12  ;;  %v12056_v4 = vld [vmem:[%s20646_s8 + $0x58] sm:$0xf0] }
0x113f   :  { %5489 = vadd.xlane.f32.xlu2 %v5480_v28  ;;  %v14581_v47 = vpop.eup %14580  ;;  %v5484_v49 = vmul.f32 %v14579_v42, %v14414_v6  ;;  %5714 = vmatpush.bf16.msra.mxu2 %v5705_v17  ;;  %v12059_v15 = vor.u32 %v13914_v12, %v12056_v4  ;;  %v12046_v17 = vld [vmem:[%s20646_s8 + $0x40] sm:$0xf]  ;;  %v13913_v53 = vld [vmem:[%s20646_s8 + $0x44] sm:$0xf0]  ;;  %v13959_v10 = vld [vmem:[%s20647_s10 + $0x7c] sm:$0xf] }
0x1140   :  { %v5483_v31 = vmul.f32 %v14581_v47, %v14414_v6  ;;  %v14583_v16 = vpop.eup %14582  ;;  %5735 = vmatpush.bf16.msra.mxu3 %v5726_v25  ;;  %v12048_v25 = vld [vmem:[%s20646_s8 + $0x48] sm:$0xf0] }
0x1141   :  { %v14585_v32 = vpop.eup %14584  ;;  %v5485_v33 = vmul.f32 %v14583_v16, %v14414_v6 }
0x1142   :  { %v5486_v23 = vmul.f32 %v14585_v32, %v14414_v6 }
0x1144   :  { %5493 = vadd.xlane.f32.xlu1 %v5482_v34 }
0x1146   :  { %5497 = vadd.xlane.f32.xlu0 %v5484_v49 }
0x1147   :  { %5495 = vadd.xlane.f32.xlu2 %v5483_v31 }
0x114c   :  { %5499 = vadd.xlane.f32.xlu1 %v5485_v33 }
0x114f   :  { %5501 = vadd.xlane.f32.xlu2 %v5486_v23 }
0x11af   :  { %v5488_v35 = vpop.xlane.xlu1 %5487 }
0x11b0   :  { %v5511_v40 = vperm.slane %v5488_v35, %v14868_v21 }
0x11b1   :  { %v5492_v37 = vpop.xlane.xlu0 %5491 }
0x11b2   :  { %v5490_v39 = vpop.xlane.xlu2 %5489  ;;  %v5513_v19 = vperm.slane %v5492_v37, %v14868_v21 }
0x11b3   :  { %v5512_v62 = vperm.slane %v5490_v39, %v14868_v21 }
0x11b5   :  { %v5519_v41 = vsel %vm418_vm0, %v5512_v62, %v5511_v40 }
0x11b6   :  { %v5520_v45 = vsel %vm420_vm1, %v5513_v19, %v5519_v41 }
0x11b7   :  { %v5494_v36 = vpop.xlane.xlu1 %5493 }
0x11b8   :  { %v5514_v44 = vperm.slane %v5494_v36, %v14868_v21 }
0x11b9   :  { %v5498_v52 = vpop.xlane.xlu0 %5497 }
0x11ba   :  { %v5496_v46 = vpop.xlane.xlu2 %5495  ;;  %v5521_v50 = vsel %vm422_vm2, %v5514_v44, %v5520_v45  ;;  %v5516_v57 = vperm.slane %v5498_v52, %v14868_v21 }
0x11bb   :  { %v5515_v8 = vperm.slane %v5496_v46, %v14868_v21 }
0x11bd   :  { %v5522_v7 = vsel %vm424_vm3, %v5515_v8, %v5521_v50 }
0x11be   :  { %v5523_v55 = vsel %vm426_vm4, %v5516_v57, %v5522_v7 }
0x11bf   :  { %v5500_v26 = vpop.xlane.xlu1 %5499 }
0x11c0   :  { %v5517_v54 = vperm.slane %v5500_v26, %v14868_v21 }
0x11c2   :  { %v5502_v58 = vpop.xlane.xlu2 %5501  ;;  %v5524_v48 = vsel %vm428_vm5, %v5517_v54, %v5523_v55 }
0x11c3   :  { %v5518_v61 = vperm.slane %v5502_v58, %v14868_v21 }
0x11c5   :  { %v5525_v63 = vsel %vm430_vm6, %v5518_v61, %v5524_v48 }
0x11c6   :  { %v5527_v18 = vsel %vm51_vm7, %v5525_v63, -1e+30  ;;  %v12070_v63 = vld [vmem:[%s20646_s8 + $0x70] sm:$0xf] }
0x11c7   :  { %v5528_v0 = vsel %vm20714_vm9, %v5527_v18, -inf  ;;  %vm20722_vm9 = vmmov %vm20721_vm8 }
0x11c8   :  { %5529 = vmax.xlane.f32.xlu0 %v5528_v0  ;;  %v5663_v28 = vsel %vm20722_vm9, %v5569_v20, 0  ;;  %v13918_v0 = vld [vmem:[%s20646_s8 + $0x74] sm:$0xf]  ;;  %v13912_v20 = vld [vmem:[%s20646_s8 + $0x44] sm:$0xf] }
0x11c9   :  { %5672 = vmatpush.bf16.msra.mxu0 %v5663_v28  ;;  %v12051_v28 = vor.u32 %v13912_v20, %v12048_v25  ;;  %v12145_v20 = vor.u32 %v13959_v10, %v12142_v11  ;;  %v13957_v10 = vld [vmem:[%s20647_s10 + $0x68] sm:$0xf0] }
0x123b   :  { %v5530_v5 = vpop.xlane.xlu0 %5529 }
0x123c   :  { %v5531_v24 = vsub.f32 %v5527_v18, %v5530_v5  ;;  %v13919_v18 = vld [vmem:[%s20646_s8 + $0x74] sm:$0xf0] }
0x123d   :  { %v12071_v5 = vor.u32 %v13919_v18, %v12070_v63  ;;  %v13963_v63 = vld [vmem:[%s20647_s10 + $0x98] sm:$0xf0] }
0x123e   :  { %v5532_v30 = vmul.f32 1.442695, %v5531_v24  ;;  %v12072_v24 = vld [vmem:[%s20646_s8 + $0x78] sm:$0xf0] }
0x1240   :  { %14586 = vpow2.f32 %v5532_v30  ;;  %v12075_v30 = vor.u32 %v13918_v0, %v12072_v24  ;;  %v13962_v0 = vld [vmem:[%s20647_s10 + $0x94] sm:$0xf] }
0x1246   :  { %v14587_v3 = vpop.eup %14586 }
0x1247   :  { %v5534_v6 = vmul.f32 %v14587_v3, %v15038_v56  ;;  %v12062_v3 = vld [vmem:[%s20646_s8 + $0x60] sm:$0xf] }
0x1249   :  { %v5535_v51 = vsel %vm20715_vm10, %v5534_v6, 0.0  ;;  %vm20723_vm10 = vmmov %vm20721_vm8 }
0x124a   :  { %5536 = vadd.xlane.f32.xlu1 %v5535_v51  ;;  %v5684_v43 = vsel %vm20723_vm10, %v5570_v27, 0  ;;  %vm20729_vm8 = vmmov %vm20725_vm12  ;;  %v13916_v51 = vld [vmem:[%s20646_s8 + $0x64] sm:$0xf]  ;;  %v12047_v27 = vor.u32 %v13913_v53, %v12046_v17 }
0x124b   :  { %5693 = vmatpush.bf16.msra.mxu1 %v5684_v43  ;;  %vm20730_vm9 = vmmov %vm20729_vm8  ;;  %v12067_v9 = vor.u32 %v13916_v51, %v12064_v14  ;;  %v12038_v43 = vld [vmem:[%s20646_s8 + $0x30] sm:$0xf]  ;;  %v12140_v51 = vld [vmem:[%s20647_s10 + $0x78] sm:$0xf] }
0x124c   :  { %vm20731_vm10 = vmmov %vm20729_vm8 }
0x12bd   :  { %v5537_v22 = vpop.xlane.xlu1 %5536 }
0x12be   :  { %v5538_v2 = vadd.f32 1e-30, %v5537_v22  ;;  %v13911_v22 = vld [vmem:[%s20646_s8 + $0x34] sm:$0xf0] }
0x12c0   :  { %14588 = vrcp.f32 %v5538_v2  ;;  %v13910_v2 = vld [vmem:[%s20646_s8 + $0x34] sm:$0xf] }
0x12c6   :  { %v14589_v42 = vpop.eup %14588 }
0x12c7   :  { %v5540_v47 = vmul.f32 %v14589_v42, %v5534_v6  ;;  %v13917_v6 = vld [vmem:[%s20646_s8 + $0x64] sm:$0xf0]  ;;  %v12039_v42 = vor.u32 %v13911_v22, %v12038_v43 }
0x12c8   :  { %v12063_v29 = vor.u32 %v13917_v6, %v12062_v3 }
0x12c9   :  { %v5541_v34 = vpack.c.bf16 %v5540_v47, %v5540_v47  ;;  %v12040_v47 = vld [vmem:[%s20646_s8 + $0x38] sm:$0xf0] }
0x12cb   :  { %v5543_v49 = vrot.slane %v5541_v34, 3 }
0x12cd   :  { %v5546_v31 = vsel %vm20724_vm11, %v5541_v34, %v5543_v49  ;;  %v5548_v16 = vsel %vm418_vm0, %v5541_v34, %v5543_v49  ;;  %v5551_v36 = vsel %vm420_vm1, %v5541_v34, %v5543_v49  ;;  %v5554_v45 = vsel %vm422_vm2, %v5541_v34, %v5543_v49  ;;  %vm20732_vm11 = vmmov %vm20729_vm8  ;;  %v12030_v49 = vld [vmem:[%s20646_s8 + $0x20] sm:$0xf] }
0x12ce   :  { %v12000_v32 = vpack.i.b16 %v5546_v31, %v5546_v31  ;;  %v5558_v33 = vunpack.i.h.s16 %v5546_v31  ;;  %v5550_v23 = vrot.slane %v5548_v16, 1  ;;  %v5553_v52 = vrot.slane %v5551_v36, 2  ;;  %v13909_v31 = vld [vmem:[%s20646_s8 + $0x24] sm:$0xf0]  ;;  %v13908_v16 = vld [vmem:[%s20646_s8 + $0x24] sm:$0xf] }
0x12cf   :  { %v5556_v46 = vrot.slane %v5554_v45, 3  ;;  %v12043_v34 = vor.u32 %v13910_v2, %v12040_v47  ;;  %v13905_v45 = vld [vmem:[%s20646_s8 + $0x4] sm:$0xf0] }
0x12d0   :  { %v5574_v35 = vperm.slane %v12000_v32, 0  ;;  %v5594_v37 = vpack.i.b16 %v5558_v33, %v5558_v33  ;;  %v12003_v39 = vpack.i.b16 %v5550_v23, %v5550_v23  ;;  %v5560_v62 = vunpack.i.h.s16 %v5550_v23  ;;  %v12032_v33 = vld [vmem:[%s20646_s8 + $0x28] sm:$0xf0] }
0x12d1   :  { %v5562_v50 = vunpack.i.h.s16 %v5553_v52  ;;  %v12006_v8 = vpack.i.b16 %v5553_v52, %v5553_v52  ;;  %v5564_v57 = vunpack.i.h.s16 %v5556_v46  ;;  %v12009_v26 = vpack.i.b16 %v5556_v46, %v5556_v46  ;;  %v13904_v52 = vld [vmem:[%s20646_s8 + $0x4] sm:$0xf] }
0x12d2   :  { %12001 = vmatmul.msk.bf16.vlgmr.msrb.gmra.mxu0 %vm20725_vm12, %v5574_v35  ;;  %v5595_v40 = vperm.slane %v5594_v37, 0  ;;  %v5616_v19 = vperm.slane %v12003_v39, 0  ;;  %v5636_v41 = vpack.i.b16 %v5560_v62, %v5560_v62  ;;  %v12031_v32 = vor.u32 %v13909_v31, %v12030_v49  ;;  %v12022_v35 = vld [vmem:[%s20646_s8 + $0x10] sm:$0xf]  ;;  %v13907_v37 = vld [vmem:[%s20646_s8 + $0x14] sm:$0xf0] }
0x12d3   :  { %v5678_v7 = vpack.i.b16 %v5562_v50, %v5562_v50  ;;  %v5658_v54 = vperm.slane %v12006_v8, 0  ;;  %v5720_v55 = vpack.i.b16 %v5564_v57, %v5564_v57  ;;  %v5700_v48 = vperm.slane %v12009_v26, 0  ;;  %5877 = vmatpush.bf16.msrb.mxu0 %v12071_v5  ;;  %v13906_v39 = vld [vmem:[%s20646_s8 + $0x14] sm:$0xf]  ;;  %v12016_v8 = vld [vmem:[%s20646_s8 + $0x8] sm:$0xf0] }
0x12d4   :  { %12002 = vmatmul.msk.bf16.vlgmr.msrb.gmra.mxu1 %vm20726_vm13, %v5595_v40  ;;  %12004 = vmatmul.msk.bf16.vlgmr.msrb.gmra.mxu2 %vm20727_vm14, %v5616_v19  ;;  %v5637_v44 = vperm.slane %v5636_v41, 0  ;;  %v12035_v23 = vor.u32 %v13908_v16, %v12032_v33  ;;  %v12023_v40 = vor.u32 %v13907_v37, %v12022_v35  ;;  %v12024_v19 = vld [vmem:[%s20646_s8 + $0x18] sm:$0xf0]  ;;  %v12019_v57 = vor.u32 %v13904_v52, %v12016_v8  ;;  %v13966_v26 = vld [vmem:[%s20647_s10 + $0xb0] sm:$0xf0] }
0x12d5   :  { %v5679_v58 = vperm.slane %v5678_v7, 0  ;;  %v5721_v61 = vperm.slane %v5720_v55, 0  ;;  %5890 = vmatpush.bf16.msrb.mxu1 %v12075_v30  ;;  %v12027_v41 = vor.u32 %v13906_v39, %v12024_v19  ;;  %v12164_v7 = vld [vmem:[%s20647_s10 + $0xa8] sm:$0xf]  ;;  %v12154_v5 = vld [vmem:[%s20647_s10 + $0x9c] sm:$0xf0] }
0x12d6   :  { %12005 = vmatmul.msk.bf16.vlgmr.msrb.gmra.mxu3 %vm20728_vm15, %v5637_v44  ;;  %v12014_v44 = vld [vmem:[%s20646_s8] sm:$0xf]  ;;  %v12157_v6 = vor.u32 %v13962_v0, %v12154_v5 }
0x12d7   :  { %5878 = vmatpush.bf16.msrb.mxu0 %v12063_v29  ;;  %v12015_v50 = vor.u32 %v13905_v45, %v12014_v44  ;;  %v13960_v29 = vld [vmem:[%s20647_s10 + $0x80] sm:$0xf0] }
0x12d8   :  { %v12141_v53 = vor.u32 %v13960_v29, %v12140_v51 }
0x12d9   :  { %5891 = vmatpush.bf16.msrb.mxu1 %v12067_v9 }
0x12db   :  { %5879 = vmatpush.bf16.msrb.mxu0 %v12055_v13 }
0x12dd   :  { %5892 = vmatpush.bf16.msrb.mxu1 %v12059_v15 }
0x12df   :  { %5880 = vmatpush.bf16.msrb.mxu0 %v12047_v27 }
0x12e1   :  { %5893 = vmatpush.bf16.msrb.mxu1 %v12051_v28 }
0x12e2   :  { %12007 = vmatmul.msk.bf16.vlgmr.msra.gmra.mxu0 %vm20729_vm8, %v5658_v54  ;;  %v13965_v54 = vld [vmem:[%s20647_s10 + $0xac] sm:$0xf] }
0x12e3   :  { %5881 = vmatpush.bf16.msrb.mxu0 %v12039_v42 }
0x12e4   :  { %12008 = vmatmul.msk.bf16.vlgmr.msra.gmra.mxu1 %vm20730_vm9, %v5679_v58  ;;  %12010 = vmatmul.msk.bf16.vlgmr.msra.gmra.mxu2 %vm20731_vm10, %v5700_v48  ;;  %v12165_v58 = vor.u32 %v13966_v26, %v12164_v7  ;;  %v12166_v48 = vld [vmem:[%s20647_s10 + $0xb4] sm:$0xf0] }
0x12e5   :  { %5894 = vmatpush.bf16.msrb.mxu1 %v12043_v34  ;;  %v12169_v18 = vor.u32 %v13965_v54, %v12166_v48 }
0x12e6   :  { %12011 = vmatmul.msk.bf16.vlgmr.msra.gmra.mxu3 %vm20732_vm11, %v5721_v61  ;;  %v12152_v61 = vld [vmem:[%s20647_s10 + $0x90] sm:$0xf]  ;;  %6162 = vmatpush.bf16.msrb.mxu2 %v12165_v58 }
0x12e7   :  { %5882 = vmatpush.bf16.msrb.mxu0 %v12031_v32  ;;  %v12153_v24 = vor.u32 %v13963_v63, %v12152_v61  ;;  %6175 = vmatpush.bf16.msrb.mxu3 %v12169_v18 }
0x12e9   :  { %5895 = vmatpush.bf16.msrb.mxu1 %v12035_v23 }
0x12ea   :  { %6163 = vmatpush.bf16.msrb.mxu2 %v12153_v24 }
0x12eb   :  { %5883 = vmatpush.bf16.msrb.mxu0 %v12023_v40  ;;  %6176 = vmatpush.bf16.msrb.mxu3 %v12157_v6 }
0x12ed   :  { %5896 = vmatpush.bf16.msrb.mxu1 %v12027_v41 }
0x12ee   :  { %6164 = vmatpush.bf16.msrb.mxu2 %v12141_v53  ;;  %v12260_v53 = vld [vmem:[%s20648_s9 + $0xa8] sm:$0xf] }
0x12ef   :  { %5884 = vmatpush.bf16.msrb.mxu0 %v12015_v50  ;;  %6177 = vmatpush.bf16.msrb.mxu3 %v12145_v20  ;;  %v13942_v20 = vld [vmem:[%s20648_s9 + $0xb0] sm:$0xf0] }
0x12f1   :  { %5897 = vmatpush.bf16.msrb.mxu1 %v12019_v57 }
0x134f   :  { %v5590_v62 = vpop.f32.mrf.mxu0 }
0x1350   :  { %v5741_v43 = vpack.c.bf16 %v5590_v62, %v5590_v62 }
0x1351   :  { %v5611_v36 = vpop.f32.mrf.mxu1 }
0x1352   :  { %v5952_v46 = vrot.slane %v5611_v36, 7  ;;  %v5742_v14 = vpack.c.bf16 %v5611_v36, %v5611_v36  ;;  %v5773_v16 = vunpack.c.l.b16 %v5741_v43  ;;  %v13954_v43 = vld [vmem:[%s20647_s10 + $0x50] sm:$0xf0] }
0x1354   :  { %v5953_v55 = vsel %vm418_vm0, %v5952_v46, %v5590_v62  ;;  %v5774_v27 = vunpack.c.l.b16 %v5742_v14 }
0x1356   :  { %v5781_v47 = vrot.slane %v5774_v27, 7 }
0x1357   :  { %v5592_v30 = vpop.f32.mrf.mxu0  ;;  %v5632_v3 = vpop.f32.mrf.mxu2 }
0x1358   :  { %v5954_v9 = vrot.slane %v5632_v3, 6  ;;  %v5743_v12 = vpack.c.bf16 %v5632_v3, %v5632_v3  ;;  %v5782_v62 = vsel %vm418_vm0, %v5781_v47, %v5773_v16  ;;  %v12160_v47 = vld [vmem:[%s20647_s10 + $0x98] sm:$0xf]  ;;  %v12248_v16 = vld [vmem:[%s20648_s9 + $0x90] sm:$0xf] }
0x1359   :  { %v5613_v13 = vpop.f32.mrf.mxu1  ;;  %v5653_v4 = vpop.f32.mrf.mxu3 }
0x135a   :  { %v5955_v15 = vsel %vm420_vm1, %v5954_v9, %v5953_v55  ;;  %v5956_v17 = vrot.slane %v5653_v4, 5  ;;  %v5744_v25 = vpack.c.bf16 %v5653_v4, %v5653_v4  ;;  %v5775_v22 = vunpack.c.l.b16 %v5743_v12  ;;  %v12128_v9 = vld [vmem:[%s20647_s10 + $0x60] sm:$0xf]  ;;  %v13956_v12 = vld [vmem:[%s20647_s10 + $0x64] sm:$0xf] }
0x135b   :  { %v12129_v11 = vor.u32 %v13957_v10, %v12128_v9  ;;  %v12130_v13 = vld [vmem:[%s20647_s10 + $0x6c] sm:$0xf0]  ;;  %v12212_v9 = vld [vmem:[%s20648_s9 + $0x48] sm:$0xf]  ;;  %v13930_v10 = vld [vmem:[%s20648_s9 + $0x50] sm:$0xf0] }
0x135c   :  { %v5957_v28 = vsel %vm422_vm2, %v5956_v17, %v5955_v15  ;;  %v5776_v34 = vunpack.c.l.b16 %v5744_v25  ;;  %v5783_v32 = vrot.slane %v5775_v22, 6  ;;  %v12172_v4 = vld [vmem:[%s20647_s10 + $0xb0] sm:$0xf]  ;;  %v12133_v15 = vor.u32 %v13956_v12, %v12130_v13  ;;  %v13967_v17 = vld [vmem:[%s20647_s10 + $0xb8] sm:$0xf0] }
0x135d   :  { %6165 = vmatpush.bf16.msrb.mxu2 %v12129_v11  ;;  %v12173_v27 = vor.u32 %v13967_v17, %v12172_v4  ;;  %v12261_v25 = vor.u32 %v13942_v20, %v12260_v53  ;;  %v13953_v22 = vld [vmem:[%s20647_s10 + $0x4c] sm:$0xf]  ;;  %v12213_v12 = vor.u32 %v13930_v10, %v12212_v9  ;;  %v12262_v13 = vld [vmem:[%s20648_s9 + $0xb4] sm:$0xf0]  ;;  %v12268_v4 = vld [vmem:[%s20648_s9 + $0xb0] sm:$0xf] }
0x135e   :  { %v5785_v19 = vrot.slane %v5776_v34, 5  ;;  %v5784_v36 = vsel %vm420_vm1, %v5783_v32, %v5782_v62  ;;  %6178 = vmatpush.bf16.msrb.mxu3 %v12133_v15  ;;  %v13964_v34 = vld [vmem:[%s20647_s10 + $0xa0] sm:$0xf0]  ;;  %v13939_v32 = vld [vmem:[%s20648_s9 + $0x98] sm:$0xf0] }
0x135f   :  { %v5634_v2 = vpop.f32.mrf.mxu2  ;;  %v5674_v42 = vpop.f32.mrf.mxu0  ;;  %6188 = vmatpush.bf16.msra.mxu0 %v12173_v27  ;;  %6329 = vmatpush.bf16.msra.mxu1 %v12261_v25  ;;  %v12148_v62 = vld [vmem:[%s20647_s10 + $0x80] sm:$0xf]  ;;  %v13941_v11 = vld [vmem:[%s20648_s9 + $0xac] sm:$0xf]  ;;  %v13943_v15 = vld [vmem:[%s20648_s9 + $0xb8] sm:$0xf0] }
0x1360   :  { %v5745_v49 = vpack.c.bf16 %v5674_v42, %v5674_v42  ;;  %v5958_v31 = vrot.slane %v5674_v42, 4  ;;  %v5786_v50 = vsel %vm422_vm2, %v5785_v19, %v5784_v36  ;;  %v12118_v42 = vld [vmem:[%s20647_s10 + $0x54] sm:$0xf0]  ;;  %v13961_v19 = vld [vmem:[%s20647_s10 + $0x88] sm:$0xf0]  ;;  %v12265_v17 = vor.u32 %v13941_v11, %v12262_v13 }
0x1361   :  { %v5655_v33 = vpop.f32.mrf.mxu3  ;;  %v5695_v23 = vpop.f32.mrf.mxu1  ;;  %v12149_v36 = vor.u32 %v13961_v19, %v12148_v62  ;;  %v12269_v53 = vor.u32 %v13943_v15, %v12268_v4  ;;  %v12112_v20 = vld [vmem:[%s20647_s10 + $0x38] sm:$0xf]  ;;  %v13952_v27 = vld [vmem:[%s20647_s10 + $0x40] sm:$0xf0]  ;;  %v12200_v25 = vld [vmem:[%s20648_s9 + $0x30] sm:$0xf] }
0x1362   :  { %v5777_v35 = vunpack.c.l.b16 %v5745_v49  ;;  %v5959_v37 = vsel %vm424_vm3, %v5958_v31, %v5957_v28  ;;  %v5746_v39 = vpack.c.bf16 %v5695_v23, %v5695_v23  ;;  %v5960_v40 = vrot.slane %v5695_v23, 3  ;;  %v12116_v28 = vld [vmem:[%s20647_s10 + $0x48] sm:$0xf]  ;;  %v12104_v23 = vld [vmem:[%s20647_s10 + $0x30] sm:$0xf] }
0x1363   :  { %v12117_v2 = vor.u32 %v13954_v43, %v12116_v28  ;;  %v12121_v49 = vor.u32 %v13953_v22, %v12118_v42  ;;  %v12161_v31 = vor.u32 %v13964_v34, %v12160_v47  ;;  %v12249_v33 = vor.u32 %v13939_v32, %v12248_v16  ;;  %v13927_v43 = vld [vmem:[%s20648_s9 + $0x38] sm:$0xf0]  ;;  %v13938_v22 = vld [vmem:[%s20648_s9 + $0x94] sm:$0xf]  ;;  %v11870_v42 = vld [vmem:[%s20649_s2 + $0x40] sm:$0xff] }
0x1364   :  { %v5961_v41 = vsel %vm426_vm4, %v5960_v40, %v5959_v37  ;;  %v5787_v44 = vrot.slane %v5777_v35, 4  ;;  %v5778_v45 = vunpack.c.l.b16 %v5746_v39  ;;  %v13951_v35 = vld [vmem:[%s20647_s10 + $0x38] sm:$0xf0]  ;;  %v13950_v37 = vld [vmem:[%s20647_s10 + $0x34] sm:$0xf]  ;;  %v12113_v28 = vor.u32 %v13952_v27, %v12112_v20  ;;  %v11871_v47 = vld [vmem:[%s20649_s2 + $0x48] sm:$0xff] }
0x1365   :  { %6166 = vmatpush.bf16.msrb.mxu2 %v12117_v2  ;;  %6179 = vmatpush.bf16.msrb.mxu3 %v12121_v49  ;;  %v12105_v39 = vor.u32 %v13951_v35, %v12104_v23  ;;  %v12106_v40 = vld [vmem:[%s20647_s10 + $0x3c] sm:$0xf0]  ;;  %v12201_v34 = vor.u32 %v13927_v43, %v12200_v25  ;;  %v13940_v16 = vld [vmem:[%s20648_s9 + $0xa0] sm:$0xf0]  ;;  %v13949_v23 = vld [vmem:[%s20647_s10 + $0x28] sm:$0xf0] }
0x1366   :  { %v5788_v7 = vsel %vm424_vm3, %v5787_v44, %v5786_v50  ;;  %v5789_v26 = vrot.slane %v5778_v45, 3  ;;  %6189 = vmatpush.bf16.msra.mxu0 %v12161_v31  ;;  %6330 = vmatpush.bf16.msra.mxu1 %v12249_v33  ;;  %v12236_v44 = vld [vmem:[%s20648_s9 + $0x78] sm:$0xf]  ;;  %v13936_v45 = vld [vmem:[%s20648_s9 + $0x80] sm:$0xf0] }
0x1367   :  { %v5676_v52 = vpop.f32.mrf.mxu0  ;;  %v5716_v46 = vpop.f32.mrf.mxu2  ;;  %v13948_v50 = vld [vmem:[%s20647_s10 + $0x20] sm:$0xf0]  ;;  %v12250_v2 = vld [vmem:[%s20648_s9 + $0x9c] sm:$0xf0]  ;;  %v12256_v31 = vld [vmem:[%s20648_s9 + $0x98] sm:$0xf] }
0x1368   :  { %v5747_v8 = vpack.c.bf16 %v5716_v46, %v5716_v46  ;;  %v5962_v57 = vrot.slane %v5716_v46, 2  ;;  %v5790_v24 = vsel %vm426_vm4, %v5789_v26, %v5788_v7  ;;  %v12237_v52 = vor.u32 %v13936_v45, %v12236_v44  ;;  %v12092_v46 = vld [vmem:[%s20647_s10 + $0x18] sm:$0xf]  ;;  %v12094_v7 = vld [vmem:[%s20647_s10 + $0x24] sm:$0xf0] }
0x1369   :  { %v5697_v54 = vpop.f32.mrf.mxu1  ;;  %v5737_v55 = vpop.f32.mrf.mxu3  ;;  %6167 = vmatpush.bf16.msrb.mxu2 %v12105_v39  ;;  %v12136_v26 = vld [vmem:[%s20647_s10 + $0x68] sm:$0xf]  ;;  %v12253_v49 = vor.u32 %v13938_v22, %v12250_v2  ;;  %v12100_v32 = vld [vmem:[%s20647_s10 + $0x20] sm:$0xf]  ;;  %v12257_v33 = vor.u32 %v13940_v16, %v12256_v31  ;;  %v12188_v35 = vld [vmem:[%s20648_s9 + $0x18] sm:$0xf] }
0x136a   :  { %v5779_v58 = vunpack.c.l.b16 %v5747_v8  ;;  %v5963_v48 = vsel %vm428_vm5, %v5962_v57, %v5961_v41  ;;  %v5748_v61 = vpack.c.bf16 %v5737_v55, %v5737_v55  ;;  %v5964_v63 = vrot.slane %v5737_v55, 1  ;;  %v13947_v8 = vld [vmem:[%s20647_s10 + $0x1c] sm:$0xf]  ;;  %6190 = vmatpush.bf16.msra.mxu0 %v12149_v36  ;;  %6331 = vmatpush.bf16.msra.mxu1 %v12237_v52  ;;  %v13958_v54 = vld [vmem:[%s20647_s10 + $0x70] sm:$0xf0] }
0x136b   :  { %v12109_v41 = vor.u32 %v13950_v37, %v12106_v40  ;;  %v12093_v57 = vor.u32 %v13948_v50, %v12092_v46  ;;  %v12097_v55 = vor.u32 %v13947_v8, %v12094_v7  ;;  %v13924_v37 = vld [vmem:[%s20648_s9 + $0x20] sm:$0xf0]  ;;  %v12101_v39 = vor.u32 %v13949_v23, %v12100_v32  ;;  %v13935_v62 = vld [vmem:[%s20648_s9 + $0x7c] sm:$0xf]  ;;  %v12238_v19 = vld [vmem:[%s20648_s9 + $0x84] sm:$0xf0] }
0x136c   :  { %v5791_v18 = vrot.slane %v5779_v58, 2  ;;  %v5780_v0 = vunpack.c.l.b16 %v5748_v61  ;;  %v18165_v5 = vsel %vm430_vm6, %v5964_v63, %v5963_v48  ;;  %v12137_v58 = vor.u32 %v13958_v54, %v12136_v26  ;;  %v12224_v48 = vld [vmem:[%s20648_s9 + $0x60] sm:$0xf]  ;;  %v13933_v61 = vld [vmem:[%s20648_s9 + $0x68] sm:$0xf0] }
0x136d   :  { %6180 = vmatpush.bf16.msrb.mxu3 %v12109_v41  ;;  %6168 = vmatpush.bf16.msrb.mxu2 %v12093_v57  ;;  %v12225_v63 = vor.u32 %v13933_v61, %v12224_v48  ;;  %v12189_v40 = vor.u32 %v13924_v37, %v12188_v35  ;;  %v12244_v41 = vld [vmem:[%s20648_s9 + $0x80] sm:$0xf]  ;;  %v12241_v36 = vor.u32 %v13935_v62, %v12238_v19  ;;  %v13937_v44 = vld [vmem:[%s20648_s9 + $0x88] sm:$0xf0]  ;;  %v12088_v45 = vld [vmem:[%s20647_s10 + $0x8] sm:$0xf] }
0x136e   :  { %v5792_v30 = vsel %vm428_vm5, %v5791_v18, %v5790_v24  ;;  %v5793_v3 = vrot.slane %v5780_v0, 1  ;;  %v12080_v18 = vld [vmem:[%s20647_s10] sm:$0xf]  ;;  %v13945_v0 = vld [vmem:[%s20647_s10 + $0x8] sm:$0xf0]  ;;  %6191 = vmatpush.bf16.msra.mxu0 %v12137_v58  ;;  %v12245_v8 = vor.u32 %v13937_v44, %v12244_v41 }
0x136f   :  { %v5718_v6 = vpop.f32.mrf.mxu2  ;;  %v13944_v24 = vld [vmem:[%s20647_s10 + $0x4] sm:$0xf]  ;;  %6332 = vmatpush.bf16.msra.mxu1 %v12225_v63  ;;  %v13946_v52 = vld [vmem:[%s20647_s10 + $0x10] sm:$0xf0]  ;;  %v12176_v57 = vld [vmem:[%s20648_s9] sm:$0xf] }
0x1370   :  { %v5794_v51 = vsel %vm430_vm6, %v5793_v3, %v5792_v30  ;;  %v12081_v30 = vor.u32 %v13945_v0, %v12080_v18  ;;  %v12082_v3 = vld [vmem:[%s20647_s10 + $0xc] sm:$0xf0]  ;;  %v13921_v7 = vld [vmem:[%s20648_s9 + $0x8] sm:$0xf0]  ;;  %v13932_v26 = vld [vmem:[%s20648_s9 + $0x64] sm:$0xf]  ;;  %v12089_v63 = vor.u32 %v13946_v52, %v12088_v45 }
0x1371   :  { %v5795_v29 = vpack.c.b16 %v5794_v51, %v5794_v51  ;;  %v5739_v14 = vpop.f32.mrf.mxu3  ;;  %6181 = vmatpush.bf16.msrb.mxu3 %v12097_v55  ;;  %v12124_v6 = vld [vmem:[%s20647_s10 + $0x50] sm:$0xf]  ;;  %v13955_v51 = vld [vmem:[%s20647_s10 + $0x58] sm:$0xf0]  ;;  %v12232_v48 = vld [vmem:[%s20648_s9 + $0x68] sm:$0xf]  ;;  %v12177_v18 = vor.u32 %v13921_v7, %v12176_v57 }
0x1372   :  { %v12125_v14 = vor.u32 %v13955_v51, %v12124_v6  ;;  %6169 = vmatpush.bf16.msrb.mxu2 %v12081_v30  ;;  %v12226_v58 = vld [vmem:[%s20648_s9 + $0x6c] sm:$0xf0]  ;;  %v13934_v61 = vld [vmem:[%s20648_s9 + $0x70] sm:$0xf0]  ;;  %v13929_v6 = vld [vmem:[%s20648_s9 + $0x4c] sm:$0xf] }
0x1373   :  { %5885 = vmatmul.bf16.vlgmr.msrb.gmra.mxu0 %v5795_v29  ;;  %5898 = vmatmul.bf16.vlgmr.msrb.gmra.mxu1 %v5795_v29  ;;  %v12085_v29 = vor.u32 %v13944_v24, %v12082_v3  ;;  %v12229_v30 = vor.u32 %v13932_v26, %v12226_v58  ;;  %v12233_v3 = vor.u32 %v13934_v61, %v12232_v48  ;;  %v12214_v51 = vld [vmem:[%s20648_s9 + $0x54] sm:$0xf0]  ;;  %v13926_v11 = vld [vmem:[%s20648_s9 + $0x34] sm:$0xf]  ;;  %v12202_v4 = vld [vmem:[%s20648_s9 + $0x3c] sm:$0xf0] }
0x1374   :  { %6192 = vmatpush.bf16.msra.mxu0 %v12125_v14  ;;  %6333 = vmatpush.bf16.msra.mxu1 %v12213_v12  ;;  %v13931_v14 = vld [vmem:[%s20648_s9 + $0x58] sm:$0xf0]  ;;  %v12217_v9 = vor.u32 %v13929_v6, %v12214_v51  ;;  %v12208_v15 = vld [vmem:[%s20648_s9 + $0x38] sm:$0xf]  ;;  %v12205_v20 = vor.u32 %v13926_v11, %v12202_v4  ;;  %v12196_v2 = vld [vmem:[%s20648_s9 + $0x20] sm:$0xf] }
0x1375   :  { %6182 = vmatpush.bf16.msrb.mxu3 %v12085_v29  ;;  %v12220_v29 = vld [vmem:[%s20648_s9 + $0x50] sm:$0xf]  ;;  %v13923_v25 = vld [vmem:[%s20648_s9 + $0x1c] sm:$0xf]  ;;  %v13920_v31 = vld [vmem:[%s20648_s9 + $0x4] sm:$0xf] }
0x1376   :  { %6342 = vmatpush.bf16.msra.mxu2 %v12265_v17  ;;  %v12221_v10 = vor.u32 %v13931_v14, %v12220_v29  ;;  %v13928_v17 = vld [vmem:[%s20648_s9 + $0x40] sm:$0xf0]  ;;  %v12178_v16 = vld [vmem:[%s20648_s9 + $0xc] sm:$0xf0]  ;;  %v12184_v32 = vld [vmem:[%s20648_s9 + $0x8] sm:$0xf] }
0x1377   :  { %v12209_v27 = vor.u32 %v13928_v17, %v12208_v15  ;;  %v12181_v23 = vor.u32 %v13920_v31, %v12178_v16  ;;  %v11868_v26 = vld [vmem:[%s20650_s0 + $0x20] sm:$0xff]  ;;  %v13998_v29 = vld [vmem:[%s20640_s6 + $0xec] sm:$0xf0]  ;;  %v12399_v11 = vld [vmem:[%s20640_s6 + $0xe8] sm:$0xf] }
0x1378   :  { %6193 = vmatpush.bf16.msra.mxu0 %v12113_v28  ;;  %6334 = vmatpush.bf16.msra.mxu1 %v12201_v34  ;;  %v12190_v28 = vld [vmem:[%s20648_s9 + $0x24] sm:$0xf0]  ;;  %v18437_v6 = vld [vmem:[%s20651_s12] sm:$0x7]  ;;  %v13996_v14 = vld [vmem:[%s20640_s6 + $0xe4] sm:$0xf] }
0x1379   :  { %6355 = vmatpush.bf16.msra.mxu3 %v12269_v53  ;;  %v12193_v34 = vor.u32 %v13923_v25, %v12190_v28  ;;  %v12391_v51 = vld [vmem:[%s20640_s6 + $0xe0] sm:$0xf]  ;;  %v12383_v31 = vld [vmem:[%s20640_s6 + $0xc8] sm:$0xf]  ;;  %v13995_v16 = vld [vmem:[%s20640_s6 + $0xd4] sm:$0xf0] }
0x137a   :  { %6343 = vmatpush.bf16.msra.mxu2 %v12253_v49 }
0x137c   :  { %6194 = vmatpush.bf16.msra.mxu0 %v12101_v39  ;;  %6335 = vmatpush.bf16.msra.mxu1 %v12189_v40 }
0x137d   :  { %6356 = vmatpush.bf16.msra.mxu3 %v12257_v33  ;;  %v13922_v33 = vld [vmem:[%s20648_s9 + $0x10] sm:$0xf0] }
0x137e   :  { %6344 = vmatpush.bf16.msra.mxu2 %v12241_v36  ;;  %v12185_v35 = vor.u32 %v13922_v33, %v12184_v32 }
0x1380   :  { %6195 = vmatpush.bf16.msra.mxu0 %v12089_v63  ;;  %6336 = vmatpush.bf16.msra.mxu1 %v12177_v18 }
0x1381   :  { %6357 = vmatpush.bf16.msra.mxu3 %v12245_v8 }
0x1382   :  { %6345 = vmatpush.bf16.msra.mxu2 %v12229_v30 }
0x1385   :  { %6358 = vmatpush.bf16.msra.mxu3 %v12233_v3 }
0x1386   :  { %6346 = vmatpush.bf16.msra.mxu2 %v12217_v9  ;;  %v12392_v9 = vor.u32 %v13998_v29, %v12391_v51 }
0x1388   :  { %6628 = vmatpush.bf16.msrb.mxu0 %v12392_v9  ;;  %v12353_v9 = vld [vmem:[%s20640_s6 + $0x98] sm:$0xf0] }
0x1389   :  { %6359 = vmatpush.bf16.msra.mxu3 %v12221_v10  ;;  %v12393_v10 = vld [vmem:[%s20640_s6 + $0xf0] sm:$0xf0] }
0x138a   :  { %6347 = vmatpush.bf16.msra.mxu2 %v12205_v20  ;;  %v12396_v15 = vor.u32 %v13996_v14, %v12393_v10  ;;  %v12401_v20 = vld [vmem:[%s20640_s6 + $0xf8] sm:$0xf0]  ;;  %v13985_v14 = vld [vmem:[%s20640_s6 + $0x8c] sm:$0xf] }
0x138b   :  { %v12356_v10 = vor.u32 %v13985_v14, %v12353_v9  ;;  %v12281_v9 = vld [vmem:[%s20640_s6 + $0x10] sm:$0xf0] }
0x138c   :  { %6641 = vmatpush.bf16.msrb.mxu1 %v12396_v15  ;;  %v12329_v15 = vld [vmem:[%s20640_s6 + $0x70] sm:$0xf0] }
0x138d   :  { %6360 = vmatpush.bf16.msra.mxu3 %v12209_v27 }
0x138e   :  { %6348 = vmatpush.bf16.msra.mxu2 %v12193_v34 }
0x1392   :  { %6349 = vmatpush.bf16.msra.mxu2 %v12181_v23 }
0x13f0   :  { %v5886_v46 = vpop.f32.mrf.mxu0  ;;  %v5899_v50 = vpop.f32.mrf.mxu1 }
0x13f1   :  { %v5903_v54 = vadd.f32 %v11870_v42, %v5886_v46  ;;  %v5904_v55 = vadd.f32 %v11871_v47, %v5899_v50  ;;  %v13925_v42 = vld [vmem:[%s20648_s9 + $0x28] sm:$0xf0] }
0x13f2   :  { %v12197_v49 = vor.u32 %v13925_v42, %v12196_v2  ;;  %v12375_v2 = vld [vmem:[%s20640_s6 + $0xc0] sm:$0xf]  ;;  %v13994_v42 = vld [vmem:[%s20640_s6 + $0xcc] sm:$0xf0] }
0x13f3   :  { %v12076_v0 = vmul.f32 -1.442695, %v5903_v54  ;;  %v12077_v24 = vmul.f32 -1.442695, %v5904_v55  ;;  %v12376_v34 = vor.u32 %v13994_v42, %v12375_v2  ;;  %v13981_v2 = vld [vmem:[%s20640_s6 + $0x6c] sm:$0xf] }
0x13f4   :  { %6361 = vmatpush.bf16.msra.mxu3 %v12197_v49  ;;  %v12377_v49 = vld [vmem:[%s20640_s6 + $0xd0] sm:$0xf0]  ;;  %v12337_v42 = vld [vmem:[%s20640_s6 + $0x78] sm:$0xf0] }
0x13f5   :  { %14590 = vpow2.f32 %v12076_v0  ;;  %6629 = vmatpush.bf16.msrb.mxu0 %v12376_v34 }
0x13f6   :  { %14592 = vpow2.f32 %v12077_v24 }
0x13f8   :  { %v5888_v12 = vpop.f32.mrf.mxu0  ;;  %v5901_v13 = vpop.f32.mrf.mxu1  ;;  %6362 = vmatpush.bf16.msra.mxu3 %v12185_v35 }
0x13f9   :  { %v13999_v12 = vld [vmem:[%s20640_s6 + $0xf4] sm:$0xf0]  ;;  %v5409_v13 = vperm.slane %v18437_v6, 0 }
0x13fa   :  { %v12400_v17 = vor.u32 %v13999_v12, %v12399_v11  ;;  %v12327_v11 = vld [vmem:[%s20640_s6 + $0x60] sm:$0xf]  ;;  %v13982_v12 = vld [vmem:[%s20640_s6 + $0x6c] sm:$0xf0] }
0x13fb   :  { %v14591_v53 = vpop.eup %14590  ;;  %v5415_v32 = vadd.f32 %v5409_v13, %v17943_v1  ;;  %v12359_v1 = vld [vmem:[%s20640_s6 + $0xa0] sm:$0xf]  ;;  %v13980_v13 = vld [vmem:[%s20640_s6 + $0x64] sm:$0xf] }
0x13fc   :  { %v14593_v43 = vpop.eup %14592  ;;  %v5911_v22 = vadd.f32 1.0, %v14591_v53  ;;  %v13997_v53 = vld [vmem:[%s20640_s6 + $0xec] sm:$0xf] }
0x13fd   :  { %v5912_v47 = vadd.f32 1.0, %v14593_v43  ;;  %v12404_v28 = vor.u32 %v13997_v53, %v12401_v20  ;;  %v13983_v53 = vld [vmem:[%s20640_s6 + $0x74] sm:$0xf0] }
0x13fe   :  { %14594 = vrcp.f32 %v5911_v22  ;;  %v5924_v41 = vand.u32 2147483648, %v5911_v22  ;;  %v5922_v45 = vand.u32 2147483647, %v5911_v22  ;;  %vm5918_vm14 = vweird.f32 %v5911_v22 }
0x13ff   :  { %14596 = vrcp.f32 %v5912_v47  ;;  %v5939_v52 = vand.u32 2147483648, %v5912_v47  ;;  %v5937_v50 = vand.u32 2147483647, %v5912_v47  ;;  %vm5933_vm8 = vweird.f32 %v5912_v47 }
0x1400   :  { %v5925_v57 = vor.u32 1.1754944e-38, %v5924_v41  ;;  %vm5923_vm10 = vcmp.eq.f32.partialorder %v5922_v45, 8.507059e+37  ;;  %v13990_v41 = vld [vmem:[%s20640_s6 + $0xac] sm:$0xf0]  ;;  %v12361_v45 = vld [vmem:[%s20640_s6 + $0xb0] sm:$0xf0] }
0x1401   :  { %v5940_v54 = vor.u32 1.1754944e-38, %v5939_v52  ;;  %vm5938_vm11 = vcmp.eq.f32.partialorder %v5937_v50, 8.507059e+37  ;;  %v12367_v52 = vld [vmem:[%s20640_s6 + $0xa8] sm:$0xf] }
0x1404   :  { %v14595_v37 = vpop.eup %14594 }
0x1405   :  { %v14597_v39 = vpop.eup %14596  ;;  %v5914_v40 = vmul.f32 %v14595_v37, %v5911_v22  ;;  %vm5919_vm12 = vweird.f32 %v14595_v37 }
0x1406   :  { %v5929_v62 = vmul.f32 %v14597_v39, %v5912_v47  ;;  %vm5934_vm13 = vweird.f32 %v14597_v39  ;;  %vm5920_vm15 = vmor %vm5918_vm14, %vm5919_vm12  ;;  %v13992_v47 = vld [vmem:[%s20640_s6 + $0xc4] sm:$0xf] }
0x1407   :  { %v5915_v19 = vsub.f32 1.0, %v5914_v40  ;;  %vm5935_vm9 = vmor %vm5933_vm8, %vm5934_vm13  ;;  %v12380_v35 = vor.u32 %v13992_v47, %v12377_v49  ;;  %v12385_v40 = vld [vmem:[%s20640_s6 + $0xd8] sm:$0xf0] }
0x1408   :  { %v5930_v36 = vsub.f32 1.0, %v5929_v62 }
0x1409   :  { %v5916_v44 = vmul.f32 %v14595_v37, %v5915_v19  ;;  %6642 = vmatpush.bf16.msrb.mxu1 %v12380_v35 }
0x140a   :  { %v5931_v46 = vmul.f32 %v14597_v39, %v5930_v36  ;;  %v13988_v36 = vld [vmem:[%s20640_s6 + $0xa4] sm:$0xf] }
0x140b   :  { %v5917_v8 = vadd.f32 %v14595_v37, %v5916_v44  ;;  %v12360_v44 = vor.u32 %v13990_v41, %v12359_v1  ;;  %v13977_v1 = vld [vmem:[%s20640_s6 + $0x4c] sm:$0xf] }
0x140c   :  { %v5932_v7 = vadd.f32 %v14597_v39, %v5931_v46  ;;  %v13991_v46 = vld [vmem:[%s20640_s6 + $0xb4] sm:$0xf0] }
0x140d   :  { %v5921_v55 = vsel %vm5920_vm15, %v14595_v37, %v5917_v8  ;;  %v12384_v37 = vor.u32 %v13995_v16, %v12383_v31  ;;  %v12364_v8 = vor.u32 %v13988_v36, %v12361_v45  ;;  %6630 = vmatpush.bf16.msrb.mxu0 %v12360_v44  ;;  %v12340_v31 = vor.u32 %v13981_v2, %v12337_v42  ;;  %v12295_v45 = vld [vmem:[%s20640_s6 + $0x20] sm:$0xf] }
0x140e   :  { %v5936_v58 = vsel %vm5935_vm9, %v14597_v39, %v5932_v7  ;;  %v5926_v48 = vsel %vm5923_vm10, %v5925_v57, %v5921_v55  ;;  %v13993_v39 = vld [vmem:[%s20640_s6 + $0xcc] sm:$0xf]  ;;  %v12368_v57 = vor.u32 %v13991_v46, %v12367_v52  ;;  %v13974_v52 = vld [vmem:[%s20640_s6 + $0x2c] sm:$0xf0]  ;;  %v13972_v46 = vld [vmem:[%s20640_s6 + $0x24] sm:$0xf] }
0x140f   :  { %v5941_v61 = vsel %vm5938_vm11, %v5940_v54, %v5936_v58  ;;  %v5943_v63 = vmul.f32 %v11868_v26, %v5926_v48  ;;  %v12388_v62 = vor.u32 %v13993_v39, %v12385_v40  ;;  %v13989_v7 = vld [vmem:[%s20640_s6 + $0xac] sm:$0xf]  ;;  %v12369_v26 = vld [vmem:[%s20640_s6 + $0xb8] sm:$0xf0]  ;;  %6643 = vmatpush.bf16.msrb.mxu1 %v12364_v8  ;;  %v12343_v48 = vld [vmem:[%s20640_s6 + $0x80] sm:$0xf] }
0x1410   :  { %v5967_v18 = vmul.f32 %v18165_v5, %v5941_v61  ;;  %v18442_v5 = vld [vmem:[%s20652_s11] sm:$0x7]  ;;  %v12372_v58 = vor.u32 %v13989_v7, %v12369_v26  ;;  %v13986_v61 = vld [vmem:[%s20640_s6 + $0x8c] sm:$0xf0]  ;;  %v12297_v8 = vld [vmem:[%s20640_s6 + $0x30] sm:$0xf0] }
0x1411   :  { %v5968_v0 = vpack.c.bf16 %v5943_v63, %v5943_v63  ;;  %v6370_v4 = vperm.slane %v18442_v5, 0  ;;  %v13984_v63 = vld [vmem:[%s20640_s6 + $0x84] sm:$0xf]  ;;  %v13975_v7 = vld [vmem:[%s20640_s6 + $0x34] sm:$0xf0] }
0x1412   :  { %v6001_v24 = vpack.c.bf16 %v5967_v18, %v5967_v18  ;;  %v12344_v18 = vor.u32 %v13986_v61, %v12343_v48  ;;  %v12305_v48 = vld [vmem:[%s20640_s6 + $0x38] sm:$0xf0] }
0x1413   :  { %6337 = vmatmul.bf16.vlgmr.msra.gmra.mxu1 %v5968_v0 }
0x1414   :  { %6170 = vmatmul.bf16.vlgmr.msrb.gmra.mxu2 %v6001_v24  ;;  %6183 = vmatmul.bf16.vlgmr.msrb.gmra.mxu3 %v6001_v24 }
0x1415   :  { %6196 = vmatmul.bf16.vlgmr.msra.gmra.mxu0 %v6001_v24  ;;  %6654 = vmatpush.bf16.msrb.mxu2 %v12400_v17  ;;  %v12351_v24 = vld [vmem:[%s20640_s6 + $0x88] sm:$0xf] }
0x1416   :  { %6667 = vmatpush.bf16.msrb.mxu3 %v12404_v28  ;;  %6631 = vmatpush.bf16.msrb.mxu0 %v12344_v18  ;;  %v12335_v17 = vld [vmem:[%s20640_s6 + $0x68] sm:$0xf]  ;;  %v6371_v28 = vperm.slane %v18442_v5, 1 }
0x1419   :  { %6655 = vmatpush.bf16.msrb.mxu2 %v12384_v37 }
0x141a   :  { %6668 = vmatpush.bf16.msrb.mxu3 %v12388_v62  ;;  %v12319_v62 = vld [vmem:[%s20640_s6 + $0x48] sm:$0xf] }
0x141d   :  { %6656 = vmatpush.bf16.msrb.mxu2 %v12368_v57  ;;  %v12303_v57 = vld [vmem:[%s20640_s6 + $0x28] sm:$0xf] }
0x141e   :  { %6669 = vmatpush.bf16.msrb.mxu3 %v12372_v58  ;;  %v13973_v58 = vld [vmem:[%s20640_s6 + $0x2c] sm:$0xf] }
0x1422   :  { %6670 = vmatpush.bf16.msrb.mxu3 %v12356_v10  ;;  %v12287_v10 = vld [vmem:[%s20640_s6 + $0x8] sm:$0xf] }
0x1424   :  { %6350 = vmatmul.bf16.vlgmr.msra.gmra.mxu2 %v5968_v0  ;;  %6363 = vmatmul.bf16.vlgmr.msra.gmra.mxu3 %v5968_v0  ;;  %v12345_v0 = vld [vmem:[%s20640_s6 + $0x90] sm:$0xf0] }
0x1425   :  { %v12348_v51 = vor.u32 %v13984_v63, %v12345_v0  ;;  %v12308_v0 = vor.u32 %v13973_v58, %v12305_v48 }
0x1426   :  { %6671 = vmatpush.bf16.msrb.mxu3 %v12340_v31 }
0x1427   :  { %6644 = vmatpush.bf16.msrb.mxu1 %v12348_v51  ;;  %v13970_v51 = vld [vmem:[%s20640_s6 + $0xc] sm:$0xf0] }
0x1490   :  { %v6338_v30 = vpop.f32.mrf.mxu1 }
0x1492   :  { %v18432_v3 = vpop.f32.mrf.mxu0 }
0x1497   :  { %v6171_v27 = vpop.f32.mrf.mxu2  ;;  %v18470_v25 = vpop.f32.mrf.mxu3 }
0x1498   :  { %v6339_v43 = vadd.f32 %v6338_v30, %v6171_v27  ;;  %v6340_v22 = vpop.f32.mrf.mxu1  ;;  %v13987_v30 = vld [vmem:[%s20640_s6 + $0x94] sm:$0xf0]  ;;  %v5410_v27 = vperm.slane %v18437_v6, 1 }
0x1499   :  { %v12352_v29 = vor.u32 %v13987_v30, %v12351_v24  ;;  %v12336_v22 = vor.u32 %v13983_v53, %v12335_v17  ;;  %v12279_v30 = vld [vmem:[%s20640_s6] sm:$0xf] }
0x149a   :  { %v6376_v33 = vadd.f32 %v6370_v4, %v6339_v43  ;;  %v6199_v23 = vpop.f32.mrf.mxu0  ;;  %v12328_v4 = vor.u32 %v13982_v12, %v12327_v11  ;;  %v12332_v43 = vor.u32 %v13980_v13, %v12329_v15  ;;  %v5416_v35 = vadd.f32 %v5410_v27, %v17948_v59  ;;  %v12321_v59 = vld [vmem:[%s20640_s6 + $0x58] sm:$0xf0]  ;;  %v13971_v13 = vld [vmem:[%s20640_s6 + $0x14] sm:$0xf0] }
0x149b   :  { %6657 = vmatpush.bf16.msrb.mxu2 %v12352_v29  ;;  %v13976_v23 = vld [vmem:[%s20640_s6 + $0x44] sm:$0xf]  ;;  %v12324_v44 = vor.u32 %v13977_v1, %v12321_v59  ;;  %v12280_v14 = vor.u32 %v13970_v51, %v12279_v30  ;;  %v5411_v15 = vperm.slane %v18437_v6, 2  ;;  %v12288_v53 = vor.u32 %v13971_v13, %v12287_v10 }
0x149c   :  { %v6379_v19 = vadd.f32 %v6376_v33, %v5415_v32  ;;  %6632 = vmatpush.bf16.msrb.mxu0 %v12328_v4  ;;  %6645 = vmatpush.bf16.msrb.mxu1 %v12332_v43  ;;  %v12311_v32 = vld [vmem:[%s20640_s6 + $0x40] sm:$0xf]  ;;  %v13978_v33 = vld [vmem:[%s20640_s6 + $0x4c] sm:$0xf0]  ;;  %v13968_v29 = vld [vmem:[%s20640_s6 + $0x4] sm:$0xf] }
0x149d   :  { %v12312_v39 = vor.u32 %v13978_v33, %v12311_v32  ;;  %6672 = vmatpush.bf16.msrb.mxu3 %v12324_v44  ;;  %v12284_v12 = vor.u32 %v13968_v29, %v12281_v9  ;;  %v13969_v4 = vld [vmem:[%s20640_s6 + $0xc] sm:$0xf] }
0x149e   :  { %v12270_v50 = vmul.f32 -1.442695, %v6379_v19  ;;  %v13979_v19 = vld [vmem:[%s20640_s6 + $0x54] sm:$0xf0] }
0x149f   :  { %v6173_v54 = vpop.f32.mrf.mxu2  ;;  %v6186_v55 = vpop.f32.mrf.mxu3  ;;  %6658 = vmatpush.bf16.msrb.mxu2 %v12336_v22  ;;  %v12320_v41 = vor.u32 %v13979_v19, %v12319_v62 }
0x14a0   :  { %14598 = vpow2.f32 %v12270_v50  ;;  %6633 = vmatpush.bf16.msrb.mxu0 %v12312_v39  ;;  %v12296_v50 = vor.u32 %v13974_v52, %v12295_v45  ;;  %v12300_v54 = vor.u32 %v13972_v46, %v12297_v8  ;;  %v12304_v55 = vor.u32 %v13975_v7, %v12303_v57  ;;  %v12274_v46 = vld [vmem:[%s20642_s1 + $0x28] sm:$0xff] }
0x14a1   :  { %6673 = vmatpush.bf16.msrb.mxu3 %v12308_v0  ;;  %v14399_v8 = vld [vmem:[%s20643_s3 + $0x8] sm:$0xff]   ;;  %v14400_v0 = vld [vmem:[%s20643_s3 + $0x10] sm:$0xff]  }
0x14a3   :  { %6659 = vmatpush.bf16.msrb.mxu2 %v12320_v41 }
0x14a4   :  { %6634 = vmatpush.bf16.msrb.mxu0 %v12296_v50  ;;  %v14337_v50 = vld [vmem:[%s20643_s3] sm:$0xff]  }
0x14a5   :  { %v14339_v58 = vunpack.c.h.bf16 %v14337_v50 }
0x14a6   :  { %v14599_v20 = vpop.eup %14598 }
0x14a7   :  { %v18571_v47 = vadd.f32 1.0, %v14599_v20  ;;  %v6351_v34 = vpop.f32.mrf.mxu2  ;;  %v18573_v49 = vpop.f32.mrf.mxu3  ;;  %6660 = vmatpush.bf16.msrb.mxu2 %v12304_v55  ;;  %v12289_v20 = vld [vmem:[%s20640_s6 + $0x18] sm:$0xf0]  ;;  %v14342_v55 = vunpack.c.l.bf16 %v14399_v8 }
0x14a8   :  { %v6352_v16 = vadd.f32 %v6351_v34, %v18470_v25  ;;  %v12313_v25 = vld [vmem:[%s20640_s6 + $0x50] sm:$0xf0]  ;;  %6635 = vmatpush.bf16.msrb.mxu0 %v12280_v14  ;;  %v12292_v43 = vor.u32 %v13969_v4, %v12289_v20  ;;  %v5417_v34 = vadd.f32 %v5411_v15, %v17950_v60  ;;  %v6365_v33 = vadd.f32 %v18573_v49, %v18432_v3 }
0x14a9   :  { %14600 = vrcp.f32 %v18571_v47  ;;  %v12316_v40 = vor.u32 %v13976_v23, %v12313_v25  ;;  %v6395_v17 = vand.u32 2147483648, %v18571_v47  ;;  %vm6389_vm13 = vweird.f32 %v18571_v47 }
0x14aa   :  { %v6377_v37 = vadd.f32 %v6371_v28, %v6352_v16  ;;  %v6393_v28 = vand.u32 2147483647, %v18571_v47  ;;  %6674 = vmatpush.bf16.msrb.mxu3 %v12292_v43  ;;  %v6372_v23 = vperm.slane %v18442_v5, 2 }
0x14ab   :  { %6646 = vmatpush.bf16.msrb.mxu1 %v12316_v40  ;;  %6661 = vmatpush.bf16.msrb.mxu2 %v12288_v53  ;;  %v6396_v42 = vor.u32 1.1754944e-38, %v6395_v17 }
0x14ac   :  { %v6399_v36 = vadd.f32 %v6377_v37, %v5416_v35  ;;  %vm6394_vm15 = vcmp.eq.f32.partialorder %v6393_v28, 8.507059e+37  ;;  %v6378_v35 = vadd.f32 %v6372_v23, %v6365_v33 }
0x14ae   :  { %v12271_v26 = vmul.f32 -1.442695, %v6399_v36  ;;  %v14725_v36 = vld [vmem:[%s20653_s13 + $0x18] sm:$0xff] }
0x14af   :  { %v14601_v61 = vpop.eup %14600  ;;  %v6353_v63 = vpop.f32.mrf.mxu2  ;;  %6647 = vmatpush.bf16.msrb.mxu1 %v12300_v54  ;;  %v14338_v54 = vunpack.c.l.bf16 %v14337_v50 }
0x14b0   :  { %v6366_v18 = vpop.f32.mrf.mxu3  ;;  %14602 = vpow2.f32 %v12271_v26  ;;  %v6385_v24 = vmul.f32 %v14601_v61, %v18571_v47  ;;  %vm6390_vm12 = vweird.f32 %v14601_v61 }
0x14b1   :  { %vm6391_vm14 = vmor %vm6389_vm13, %vm6390_vm12  ;;  %vm20733_vm12 = vcmask 64512  }
0x14b2   :  { %v6386_v11 = vsub.f32 1.0, %v6385_v24  ;;  %v14343_v24 = vunpack.c.h.bf16 %v14399_v8  ;;  %vm20734_vm13 = vmmov %vm20733_vm12 }
0x14b3   :  { %6648 = vmatpush.bf16.msrb.mxu1 %v12284_v12 }
0x14b4   :  { %v6387_v27 = vmul.f32 %v14601_v61, %v6386_v11  ;;  %v14347_v11 = vunpack.c.h.bf16 %v14400_v0 }
0x14b6   :  { %v14603_v22 = vpop.eup %14602  ;;  %v6388_v2 = vadd.f32 %v14601_v61, %v6387_v27  ;;  %v14346_v27 = vunpack.c.l.bf16 %v14400_v0 }
0x14b7   :  { %v6403_v6 = vadd.f32 1.0, %v14603_v22 }
0x14b8   :  { %v6392_v31 = vsel %vm6391_vm14, %v14601_v61, %v6388_v2  ;;  %v14415_v2 = vld [vmem:[%s20641_s7] ss:$0 sm:$0xff]  ;;  %vm20735_vm14 = vcmask 1043456  }
0x14b9   :  { %14604 = vrcp.f32 %v6403_v6  ;;  %v6397_v16 = vsel %vm6394_vm15, %v6396_v42, %v6392_v31  ;;  %v6415_v40 = vand.u32 2147483648, %v6403_v6  ;;  %v6413_v19 = vand.u32 2147483647, %v6403_v6  ;;  %vm20736_vm15 = vmmov %vm20735_vm14 }
0x14ba   :  { %v6419_v32 = vmul.f32 %v6397_v16, %v5417_v34  ;;  %vm6409_vm9 = vweird.f32 %v6403_v6 }
0x14bb   :  { %v6416_v1 = vor.u32 1.1754944e-38, %v6415_v40  ;;  %vm6414_vm11 = vcmp.eq.f32.partialorder %v6413_v19, 8.507059e+37 }
0x14bc   :  { %v6420_v47 = vadd.f32 %v6419_v32, %v6378_v35 }
0x14be   :  { %14606 = vtanh.f32 %v6420_v47 }
0x14bf   :  { %v14605_v25 = vpop.eup %14604 }
0x14c0   :  { %v6405_v37 = vmul.f32 %v14605_v25, %v6403_v6  ;;  %vm6410_vm8 = vweird.f32 %v14605_v25  ;;  %v14401_v6 = vld [vmem:[%s20643_s3 + $0x18] sm:$0xff]  }
0x14c1   :  { %vm6411_vm10 = vmor %vm6409_vm9, %vm6410_vm8  ;;  %v14350_v32 = vunpack.c.l.bf16 %v14401_v6  ;;  %v14351_v40 = vunpack.c.h.bf16 %v14401_v6 }
0x14c2   :  { %v6406_v39 = vsub.f32 1.0, %v6405_v37  ;;  %vm20737_vm8 = vmmov %vm20735_vm14 }
0x14c3   :  { %vm20738_vm9 = vmmov %vm20737_vm8 }
0x14c4   :  { %v6407_v62 = vmul.f32 %v14605_v25, %v6406_v39  ;;  %v14607_v49 = vpop.eup %14606 }
0x14c6   :  { %v6408_v60 = vadd.f32 %v14605_v25, %v6407_v62 }
0x14c8   :  { %v6412_v41 = vsel %vm6411_vm10, %v14605_v25, %v6408_v60  ;;  %vm20739_vm10 = vmmov %vm20737_vm8 }
0x14c9   :  { %v6417_v59 = vsel %vm6414_vm11, %v6416_v1, %v6412_v41  ;;  %vm20740_vm11 = vmmov %vm20737_vm8 }
0x14ca   :  { %v6422_v3 = vsub.f32 1.0, %v6417_v59  ;;  %v6424_v44 = vmul.f32 %v14725_v36, %v6417_v59 }
0x14cc   :  { %v6423_v5 = vmul.f32 %v14607_v49, %v6422_v3 }
0x14ce   :  { %v6425_v45 = vadd.f32 %v6424_v44, %v6423_v5 }
0x14d0   :  { %12272 = vst [vmem:[%s20653_s13 + $0x20] sm:$0xff] %v6425_v45  ;;  %v6435_v52 = vpack.c.bf16 %v6425_v45, %v6425_v45 }
0x14d2   :  { %6636 = vmatmul.bf16.vlgmr.msrb.gmra.mxu0 %v6435_v52  ;;  %6649 = vmatmul.bf16.vlgmr.msrb.gmra.mxu1 %v6435_v52 }
0x14d3   :  { %6662 = vmatmul.bf16.vlgmr.msrb.gmra.mxu2 %v6435_v52  ;;  %6675 = vmatmul.bf16.vlgmr.msrb.gmra.mxu3 %v6435_v52 }
0x154f   :  { %v6637_v57 = vpop.f32.mrf.mxu0  ;;  %v18674_v7 = vpop.f32.mrf.mxu1 }
0x1550   :  { %v6691_v26 = vadd.f32 %v12274_v46, %v6637_v57 }
0x1552   :  { %v6716_v48 = vperm.slane %v6691_v26, 0  ;;  %v6710_v61 = vrot.slane %v6691_v26, 2  ;;  %v6709_v63 = vrot.slane %v6691_v26, 1  ;;  %v6711_v18 = vrot.slane %v6691_v26, 3 }
0x1553   :  { %v6713_v30 = vrot.slane %v6691_v26, 5  ;;  %v6712_v51 = vrot.slane %v6691_v26, 4  ;;  %v6714_v22 = vrot.slane %v6691_v26, 6  ;;  %v6715_v31 = vrot.slane %v6691_v26, 7 }
0x1554   :  { %v6732_v29 = vadd.f32 %v14338_v54, %v6716_v48  ;;  %v6718_v14 = vperm.slane %v6710_v61, 0  ;;  %v6717_v9 = vperm.slane %v6709_v63, 0  ;;  %v6719_v10 = vperm.slane %v6711_v18, 0 }
0x1555   :  { %v6721_v17 = vperm.slane %v6713_v30, 0  ;;  %v6720_v28 = vperm.slane %v6712_v51, 0  ;;  %v6722_v33 = vperm.slane %v6714_v22, 0  ;;  %v6723_v62 = vperm.slane %v6715_v31, 0  ;;  %v6838_v31 = vld [vmem:[%s20645_s4] sm:$0xf] }
0x1556   :  { %v18679_v12 = vpop.f32.mrf.mxu2  ;;  %v18681_v13 = vpop.f32.mrf.mxu3  ;;  %14608 = vtanh.f32 %v6732_v29  ;;  %v6734_v4 = vadd.f32 %v14342_v55, %v6718_v14  ;;  %v6733_v15 = vadd.f32 %v14339_v58, %v6717_v9  ;;  %v6735_v43 = vadd.f32 %v14343_v24, %v6719_v10 }
0x1557   :  { %v6639_v53 = vpop.f32.mrf.mxu0  ;;  %v6652_v20 = vpop.f32.mrf.mxu1  ;;  %v6737_v42 = vadd.f32 %v14347_v11, %v6721_v17  ;;  %v6736_v34 = vadd.f32 %v14346_v27, %v6720_v28  ;;  %v6738_v60 = vadd.f32 %v14350_v32, %v6722_v33  ;;  %v6739_v41 = vadd.f32 %v14351_v40, %v6723_v62  ;;  %v6843_v40 = vld [vmem:[%s20645_s4 + $0x14] sm:$0xf] }
0x1558   :  { %14610 = vtanh.f32 %v6734_v4  ;;  %v6852_v33 = vsel %vm20737_vm8, %v6838_v31, 0 }
0x1559   :  { %14612 = vtanh.f32 %v6733_v15  ;;  %6861 = vmatpush.bf16.msra.mxu0 %v6852_v33  ;;  %v14010_v33 = vld [vmem:[%s20646_s8 + $0x54] sm:$0xf] }
0x155a   :  { %14614 = vtanh.f32 %v6735_v43 }
0x155b   :  { %14616 = vtanh.f32 %v6737_v42  ;;  %v6840_v42 = vld [vmem:[%s20645_s4 + $0x8] sm:$0xf] }
0x155c   :  { %v14609_v16 = vpop.eup %14608  ;;  %14618 = vtanh.f32 %v6736_v34  ;;  %v6841_v34 = vld [vmem:[%s20645_s4 + $0xc] sm:$0xf] }
0x155d   :  { %v6752_v23 = vmul.f32 %v14609_v16, %v14415_v2  ;;  %14620 = vtanh.f32 %v6738_v60  ;;  %v6894_v16 = vsel %vm20735_vm14, %v6840_v42, 0  ;;  %v6915_v32 = vsel %vm20736_vm15, %v6841_v34, 0  ;;  %v12469_v34 = vld [vmem:[%s20646_s8 + $0x68] sm:$0xf0] }
0x155e   :  { %v14611_v25 = vpop.eup %14610  ;;  %v6665_v35 = vpop.f32.mrf.mxu2  ;;  %14622 = vtanh.f32 %v6739_v41  ;;  %6903 = vmatpush.bf16.msra.mxu2 %v6894_v16  ;;  %6924 = vmatpush.bf16.msra.mxu3 %v6915_v32  ;;  %vm20743_vm14 = vcmask 1040384   ;;  %vm20744_vm15 = vcmask 64512   ;;  %v12459_v16 = vld [vmem:[%s20646_s8 + $0x50] sm:$0xf]  ;;  %v14011_v32 = vld [vmem:[%s20646_s8 + $0x54] sm:$0xf0] }
0x155f   :  { %v6678_v37 = vpop.f32.mrf.mxu3  ;;  %v14613_v47 = vpop.eup %14612  ;;  %6760 = vadd.xlane.f32.xlu2 %v6752_v23  ;;  %v6754_v39 = vmul.f32 %v14611_v25, %v14415_v2  ;;  %v6839_v23 = vld [vmem:[%s20645_s4 + $0x4] sm:$0xf]  ;;  %v6844_v35 = vld [vmem:[%s20645_s4 + $0x18] sm:$0xf] }
0x1560   :  { %v6753_v19 = vmul.f32 %v14613_v47, %v14415_v2  ;;  %v14615_v1 = vpop.eup %14614  ;;  %v6873_v25 = vsel %vm20738_vm9, %v6839_v23, 0  ;;  %v6978_v37 = vsel %vm20739_vm10, %v6844_v35, 0  ;;  %v6845_v47 = vld [vmem:[%s20645_s4 + $0x1c] sm:$0xf]  ;;  %v12460_v23 = vor.u32 %v14011_v32, %v12459_v16  ;;  %v12547_v32 = vld [vmem:[%s20647_s10 + $0x84] sm:$0xf0] }
0x1561   :  { %6764 = vadd.xlane.f32.xlu1 %v6754_v39  ;;  %v14617_v59 = vpop.eup %14616  ;;  %v6755_v49 = vmul.f32 %v14615_v1, %v14415_v2  ;;  %6882 = vmatpush.bf16.msra.mxu1 %v6873_v25  ;;  %v6842_v39 = vld [vmem:[%s20645_s4 + $0x10] sm:$0xf]  ;;  %v6999_v62 = vsel %vm20740_vm11, %v6845_v47, 0  ;;  %v12461_v25 = vld [vmem:[%s20646_s8 + $0x58] sm:$0xf0] }
0x1562   :  { %6762 = vadd.xlane.f32.xlu0 %v6753_v19  ;;  %v14619_v3 = vpop.eup %14618  ;;  %v6757_v5 = vmul.f32 %v14617_v59, %v14415_v2  ;;  %6987 = vmatpush.bf16.msrb.mxu2 %v6978_v37  ;;  %v12464_v35 = vor.u32 %v14010_v33, %v12461_v25  ;;  %v12451_v37 = vld [vmem:[%s20646_s8 + $0x40] sm:$0xf]  ;;  %v14009_v47 = vld [vmem:[%s20646_s8 + $0x44] sm:$0xf0]  ;;  %v14055_v16 = vld [vmem:[%s20647_s10 + $0x7c] sm:$0xf] }
0x1563   :  { %v6756_v36 = vmul.f32 %v14619_v3, %v14415_v2  ;;  %v14621_v44 = vpop.eup %14620  ;;  %7008 = vmatpush.bf16.msrb.mxu3 %v6999_v62  ;;  %v12453_v62 = vld [vmem:[%s20646_s8 + $0x48] sm:$0xf0] }
0x1564   :  { %v14623_v45 = vpop.eup %14622  ;;  %v6758_v52 = vmul.f32 %v14621_v44, %v14415_v2 }
0x1565   :  { %v6759_v46 = vmul.f32 %v14623_v45, %v14415_v2 }
0x1567   :  { %6766 = vadd.xlane.f32.xlu2 %v6755_v49 }
0x1569   :  { %6770 = vadd.xlane.f32.xlu1 %v6757_v5 }
0x156a   :  { %6768 = vadd.xlane.f32.xlu0 %v6756_v36 }
0x156f   :  { %6772 = vadd.xlane.f32.xlu2 %v6758_v52 }
0x1572   :  { %6774 = vadd.xlane.f32.xlu0 %v6759_v46 }
0x15d2   :  { %v6761_v50 = vpop.xlane.xlu2 %6760 }
0x15d3   :  { %v6784_v54 = vperm.slane %v6761_v50, %v14868_v21 }
0x15d4   :  { %v6765_v8 = vpop.xlane.xlu1 %6764 }
0x15d5   :  { %v6763_v57 = vpop.xlane.xlu0 %6762  ;;  %v6786_v55 = vperm.slane %v6765_v8, %v14868_v21 }
0x15d6   :  { %v6785_v26 = vperm.slane %v6763_v57, %v14868_v21 }
0x15d8   :  { %v6792_v58 = vsel %vm418_vm0, %v6785_v26, %v6784_v54 }
0x15d9   :  { %v6793_v63 = vsel %vm420_vm1, %v6786_v55, %v6792_v58 }
0x15da   :  { %v6767_v48 = vpop.xlane.xlu2 %6766 }
0x15db   :  { %v6787_v61 = vperm.slane %v6767_v48, %v14868_v21 }
0x15dc   :  { %v6771_v18 = vpop.xlane.xlu1 %6770 }
0x15dd   :  { %v6769_v0 = vpop.xlane.xlu0 %6768  ;;  %v6794_v24 = vsel %vm422_vm2, %v6787_v61, %v6793_v63  ;;  %v6789_v51 = vperm.slane %v6771_v18, %v14868_v21 }
0x15de   :  { %v6788_v30 = vperm.slane %v6769_v0, %v14868_v21 }
0x15e0   :  { %v6795_v29 = vsel %vm424_vm3, %v6788_v30, %v6794_v24 }
0x15e1   :  { %v6796_v10 = vsel %vm426_vm4, %v6789_v51, %v6795_v29 }
0x15e2   :  { %v6773_v14 = vpop.xlane.xlu2 %6772 }
0x15e3   :  { %v6790_v9 = vperm.slane %v6773_v14, %v14868_v21 }
0x15e5   :  { %v6775_v11 = vpop.xlane.xlu0 %6774  ;;  %v6797_v4 = vsel %vm428_vm5, %v6790_v9, %v6796_v10 }
0x15e6   :  { %v6791_v15 = vperm.slane %v6775_v11, %v14868_v21 }
0x15e8   :  { %v6798_v17 = vsel %vm430_vm6, %v6791_v15, %v6797_v4 }
0x15e9   :  { %v6800_v53 = vsel %vm51_vm7, %v6798_v17, -1e+30  ;;  %v12475_v17 = vld [vmem:[%s20646_s8 + $0x70] sm:$0xf] }
0x15ea   :  { %v6801_v20 = vsel %vm20733_vm12, %v6800_v53, -inf  ;;  %vm20741_vm12 = vmmov %vm20737_vm8 }
0x15eb   :  { %6802 = vmax.xlane.f32.xlu1 %v6801_v20  ;;  %v6936_v19 = vsel %vm20741_vm12, %v6842_v39, 0  ;;  %v14014_v20 = vld [vmem:[%s20646_s8 + $0x74] sm:$0xf]  ;;  %v14008_v39 = vld [vmem:[%s20646_s8 + $0x44] sm:$0xf] }
0x15ec   :  { %6945 = vmatpush.bf16.msrb.mxu0 %v6936_v19  ;;  %v12456_v19 = vor.u32 %v14008_v39, %v12453_v62  ;;  %v12550_v39 = vor.u32 %v14055_v16, %v12547_v32  ;;  %v14053_v16 = vld [vmem:[%s20647_s10 + $0x68] sm:$0xf0] }
0x165e   :  { %v6803_v27 = vpop.xlane.xlu1 %6802 }
0x165f   :  { %v6804_v28 = vsub.f32 %v6800_v53, %v6803_v27  ;;  %v14015_v53 = vld [vmem:[%s20646_s8 + $0x74] sm:$0xf0] }
0x1660   :  { %v12476_v27 = vor.u32 %v14015_v53, %v12475_v17  ;;  %v14059_v17 = vld [vmem:[%s20647_s10 + $0x98] sm:$0xf0] }
0x1661   :  { %v6805_v43 = vmul.f32 1.442695, %v6804_v28  ;;  %v12477_v28 = vld [vmem:[%s20646_s8 + $0x78] sm:$0xf0] }
0x1663   :  { %14624 = vpow2.f32 %v6805_v43  ;;  %v12480_v43 = vor.u32 %v14014_v20, %v12477_v28  ;;  %v14058_v20 = vld [vmem:[%s20647_s10 + $0x94] sm:$0xf] }
0x1669   :  { %v14625_v22 = vpop.eup %14624 }
0x166a   :  { %v6807_v2 = vmul.f32 %v14625_v22, %v15038_v56  ;;  %v12467_v22 = vld [vmem:[%s20646_s8 + $0x60] sm:$0xf] }
0x166c   :  { %v6808_v6 = vsel %vm20734_vm13, %v6807_v2, 0.0  ;;  %vm20742_vm13 = vmmov %vm20737_vm8 }
0x166d   :  { %6809 = vadd.xlane.f32.xlu2 %v6808_v6  ;;  %v6957_v60 = vsel %vm20742_vm13, %v6843_v40, 0  ;;  %vm20745_vm8 = vmmov %vm20744_vm15  ;;  %v14012_v6 = vld [vmem:[%s20646_s8 + $0x64] sm:$0xf]  ;;  %v12452_v40 = vor.u32 %v14009_v47, %v12451_v37 }
0x166e   :  { %6966 = vmatpush.bf16.msrb.mxu1 %v6957_v60  ;;  %vm20746_vm9 = vmmov %vm20745_vm8  ;;  %v12472_v31 = vor.u32 %v14012_v6, %v12469_v34  ;;  %v12443_v60 = vld [vmem:[%s20646_s8 + $0x30] sm:$0xf]  ;;  %v12545_v6 = vld [vmem:[%s20647_s10 + $0x78] sm:$0xf] }
0x166f   :  { %vm20747_vm10 = vmmov %vm20745_vm8 }
0x1670   :  { %vm20748_vm11 = vmmov %vm20745_vm8 }
0x1671   :  { %vm20749_vm12 = vmmov %vm20745_vm8 }
0x1672   :  { %vm20750_vm13 = vmmov %vm20745_vm8 }
0x16e0   :  { %v6810_v1 = vpop.xlane.xlu2 %6809 }
0x16e1   :  { %v6811_v41 = vadd.f32 1e-30, %v6810_v1  ;;  %v14007_v1 = vld [vmem:[%s20646_s8 + $0x34] sm:$0xf0] }
0x16e3   :  { %14626 = vrcp.f32 %v6811_v41  ;;  %v14006_v41 = vld [vmem:[%s20646_s8 + $0x34] sm:$0xf] }
0x16e9   :  { %v14627_v59 = vpop.eup %14626 }
0x16ea   :  { %v6813_v3 = vmul.f32 %v14627_v59, %v6807_v2  ;;  %v14013_v2 = vld [vmem:[%s20646_s8 + $0x64] sm:$0xf0]  ;;  %v12444_v59 = vor.u32 %v14007_v1, %v12443_v60 }
0x16eb   :  { %v12468_v42 = vor.u32 %v14013_v2, %v12467_v22 }
0x16ec   :  { %v6814_v49 = vpack.c.bf16 %v6813_v3, %v6813_v3  ;;  %v12445_v3 = vld [vmem:[%s20646_s8 + $0x38] sm:$0xf0] }
0x16ee   :  { %v6816_v5 = vrot.slane %v6814_v49, 3 }
0x16f0   :  { %v6819_v36 = vsel %vm20743_vm14, %v6814_v49, %v6816_v5  ;;  %v6821_v44 = vsel %vm418_vm0, %v6814_v49, %v6816_v5  ;;  %v6824_v48 = vsel %vm420_vm1, %v6814_v49, %v6816_v5  ;;  %v6827_v63 = vsel %vm422_vm2, %v6814_v49, %v6816_v5  ;;  %vm20751_vm14 = vmmov %vm20745_vm8  ;;  %v12435_v5 = vld [vmem:[%s20646_s8 + $0x20] sm:$0xf] }
0x16f1   :  { %v12405_v45 = vpack.i.b16 %v6819_v36, %v6819_v36  ;;  %v6831_v52 = vunpack.i.h.s16 %v6819_v36  ;;  %v6823_v46 = vrot.slane %v6821_v44, 1  ;;  %v6826_v18 = vrot.slane %v6824_v48, 2  ;;  %v14005_v36 = vld [vmem:[%s20646_s8 + $0x24] sm:$0xf0]  ;;  %v14004_v44 = vld [vmem:[%s20646_s8 + $0x24] sm:$0xf] }
0x16f2   :  { %v6829_v0 = vrot.slane %v6827_v63, 3  ;;  %v12448_v49 = vor.u32 %v14006_v41, %v12445_v3  ;;  %v14001_v63 = vld [vmem:[%s20646_s8 + $0x4] sm:$0xf0] }
0x16f3   :  { %v6847_v50 = vperm.slane %v12405_v45, 0  ;;  %v6867_v8 = vpack.i.b16 %v6831_v52, %v6831_v52  ;;  %v12408_v57 = vpack.i.b16 %v6823_v46, %v6823_v46  ;;  %v6833_v26 = vunpack.i.h.s16 %v6823_v46  ;;  %v12437_v52 = vld [vmem:[%s20646_s8 + $0x28] sm:$0xf0] }
0x16f4   :  { %v6835_v24 = vunpack.i.h.s16 %v6826_v18  ;;  %v12411_v30 = vpack.i.b16 %v6826_v18, %v6826_v18  ;;  %v6837_v51 = vunpack.i.h.s16 %v6829_v0  ;;  %v12414_v14 = vpack.i.b16 %v6829_v0, %v6829_v0  ;;  %v14000_v18 = vld [vmem:[%s20646_s8 + $0x4] sm:$0xf] }
0x16f5   :  { %12406 = vmatmul.msk.bf16.vlgmr.msra.gmra.mxu0 %vm20744_vm15, %v6847_v50  ;;  %v6868_v54 = vperm.slane %v6867_v8, 0  ;;  %v6889_v55 = vperm.slane %v12408_v57, 0  ;;  %v6909_v58 = vpack.i.b16 %v6833_v26, %v6833_v26  ;;  %v12436_v45 = vor.u32 %v14005_v36, %v12435_v5  ;;  %v12427_v50 = vld [vmem:[%s20646_s8 + $0x10] sm:$0xf]  ;;  %v14003_v8 = vld [vmem:[%s20646_s8 + $0x14] sm:$0xf0] }
0x16f6   :  { %v6951_v29 = vpack.i.b16 %v6835_v24, %v6835_v24  ;;  %v6931_v9 = vperm.slane %v12411_v30, 0  ;;  %v6993_v10 = vpack.i.b16 %v6837_v51, %v6837_v51  ;;  %v6973_v4 = vperm.slane %v12414_v14, 0  ;;  %7150 = vmatpush.bf16.msra.mxu0 %v12476_v27  ;;  %v14002_v57 = vld [vmem:[%s20646_s8 + $0x14] sm:$0xf]  ;;  %v12421_v30 = vld [vmem:[%s20646_s8 + $0x8] sm:$0xf0] }
0x16f7   :  { %12407 = vmatmul.msk.bf16.vlgmr.msra.gmra.mxu1 %vm20745_vm8, %v6868_v54  ;;  %12409 = vmatmul.msk.bf16.vlgmr.msra.gmra.mxu2 %vm20746_vm9, %v6889_v55  ;;  %v6910_v61 = vperm.slane %v6909_v58, 0  ;;  %v12440_v46 = vor.u32 %v14004_v44, %v12437_v52  ;;  %v12428_v54 = vor.u32 %v14003_v8, %v12427_v50  ;;  %v12429_v55 = vld [vmem:[%s20646_s8 + $0x18] sm:$0xf0]  ;;  %v12424_v51 = vor.u32 %v14000_v18, %v12421_v30  ;;  %v14062_v14 = vld [vmem:[%s20647_s10 + $0xb0] sm:$0xf0] }
0x16f8   :  { %v6952_v11 = vperm.slane %v6951_v29, 0  ;;  %v6994_v15 = vperm.slane %v6993_v10, 0  ;;  %7163 = vmatpush.bf16.msra.mxu1 %v12480_v43  ;;  %v12432_v58 = vor.u32 %v14002_v57, %v12429_v55  ;;  %v12569_v29 = vld [vmem:[%s20647_s10 + $0xa8] sm:$0xf]  ;;  %v12559_v27 = vld [vmem:[%s20647_s10 + $0x9c] sm:$0xf0] }
0x16f9   :  { %12410 = vmatmul.msk.bf16.vlgmr.msra.gmra.mxu3 %vm20747_vm10, %v6910_v61  ;;  %v12419_v61 = vld [vmem:[%s20646_s8] sm:$0xf]  ;;  %v12562_v2 = vor.u32 %v14058_v20, %v12559_v27 }
0x16fa   :  { %7151 = vmatpush.bf16.msra.mxu0 %v12468_v42  ;;  %v12420_v24 = vor.u32 %v14001_v63, %v12419_v61  ;;  %v14056_v42 = vld [vmem:[%s20647_s10 + $0x80] sm:$0xf0] }
0x16fb   :  { %v12546_v47 = vor.u32 %v14056_v42, %v12545_v6 }
0x16fc   :  { %7164 = vmatpush.bf16.msra.mxu1 %v12472_v31 }
0x16fe   :  { %7152 = vmatpush.bf16.msra.mxu0 %v12460_v23 }
0x1700   :  { %7165 = vmatpush.bf16.msra.mxu1 %v12464_v35 }
0x1702   :  { %7153 = vmatpush.bf16.msra.mxu0 %v12452_v40 }
0x1704   :  { %7166 = vmatpush.bf16.msra.mxu1 %v12456_v19 }
0x1705   :  { %12412 = vmatmul.msk.bf16.vlgmr.msrb.gmra.mxu0 %vm20748_vm11, %v6931_v9  ;;  %v14061_v9 = vld [vmem:[%s20647_s10 + $0xac] sm:$0xf] }
0x1706   :  { %7154 = vmatpush.bf16.msra.mxu0 %v12444_v59 }
0x1707   :  { %12413 = vmatmul.msk.bf16.vlgmr.msrb.gmra.mxu1 %vm20749_vm12, %v6952_v11  ;;  %12415 = vmatmul.msk.bf16.vlgmr.msrb.gmra.mxu2 %vm20750_vm13, %v6973_v4  ;;  %v12570_v11 = vor.u32 %v14062_v14, %v12569_v29  ;;  %v12571_v4 = vld [vmem:[%s20647_s10 + $0xb4] sm:$0xf0] }
0x1708   :  { %7167 = vmatpush.bf16.msra.mxu1 %v12448_v49  ;;  %v12574_v53 = vor.u32 %v14061_v9, %v12571_v4 }
0x1709   :  { %12416 = vmatmul.msk.bf16.vlgmr.msrb.gmra.mxu3 %vm20751_vm14, %v6994_v15  ;;  %v12557_v15 = vld [vmem:[%s20647_s10 + $0x90] sm:$0xf]  ;;  %7435 = vmatpush.bf16.msra.mxu2 %v12570_v11 }
0x170a   :  { %7155 = vmatpush.bf16.msra.mxu0 %v12436_v45  ;;  %v12558_v28 = vor.u32 %v14059_v17, %v12557_v15  ;;  %7448 = vmatpush.bf16.msra.mxu3 %v12574_v53 }
0x170c   :  { %7168 = vmatpush.bf16.msra.mxu1 %v12440_v46 }
0x170d   :  { %7436 = vmatpush.bf16.msra.mxu2 %v12558_v28 }
0x170e   :  { %7156 = vmatpush.bf16.msra.mxu0 %v12428_v54  ;;  %7449 = vmatpush.bf16.msra.mxu3 %v12562_v2 }
0x1710   :  { %7169 = vmatpush.bf16.msra.mxu1 %v12432_v58 }
0x1711   :  { %7437 = vmatpush.bf16.msra.mxu2 %v12546_v47  ;;  %v12665_v47 = vld [vmem:[%s20648_s9 + $0xa8] sm:$0xf] }
0x1712   :  { %7157 = vmatpush.bf16.msra.mxu0 %v12420_v24  ;;  %7450 = vmatpush.bf16.msra.mxu3 %v12550_v39  ;;  %v14038_v39 = vld [vmem:[%s20648_s9 + $0xb0] sm:$0xf0] }
0x1714   :  { %7170 = vmatpush.bf16.msra.mxu1 %v12424_v51 }
0x1772   :  { %v6863_v26 = vpop.f32.mrf.mxu0 }
0x1773   :  { %v7014_v60 = vpack.c.bf16 %v6863_v26, %v6863_v26 }
0x1774   :  { %v6884_v48 = vpop.f32.mrf.mxu1 }
0x1775   :  { %v7225_v0 = vrot.slane %v6884_v48, 7  ;;  %v7015_v34 = vpack.c.bf16 %v6884_v48, %v6884_v48  ;;  %v7046_v44 = vunpack.c.l.b16 %v7014_v60  ;;  %v14050_v60 = vld [vmem:[%s20647_s10 + $0x50] sm:$0xf0] }
0x1777   :  { %v7226_v10 = vsel %vm418_vm0, %v7225_v0, %v6863_v26  ;;  %v7047_v40 = vunpack.c.l.b16 %v7015_v34 }
0x1779   :  { %v7054_v3 = vrot.slane %v7047_v40, 7 }
0x177a   :  { %v6865_v43 = vpop.f32.mrf.mxu0  ;;  %v6905_v22 = vpop.f32.mrf.mxu2 }
0x177b   :  { %v7227_v31 = vrot.slane %v6905_v22, 6  ;;  %v7016_v33 = vpack.c.bf16 %v6905_v22, %v6905_v22  ;;  %v7055_v26 = vsel %vm418_vm0, %v7054_v3, %v7046_v44  ;;  %v12565_v3 = vld [vmem:[%s20647_s10 + $0x98] sm:$0xf]  ;;  %v12653_v44 = vld [vmem:[%s20648_s9 + $0x90] sm:$0xf] }
0x177c   :  { %v6886_v23 = vpop.f32.mrf.mxu1  ;;  %v6926_v25 = vpop.f32.mrf.mxu3 }
0x177d   :  { %v7228_v35 = vsel %vm420_vm1, %v7227_v31, %v7226_v10  ;;  %v7229_v37 = vrot.slane %v6926_v25, 5  ;;  %v7017_v62 = vpack.c.bf16 %v6926_v25, %v6926_v25  ;;  %v7048_v1 = vunpack.c.l.b16 %v7016_v33  ;;  %v12533_v31 = vld [vmem:[%s20647_s10 + $0x60] sm:$0xf]  ;;  %v14052_v33 = vld [vmem:[%s20647_s10 + $0x64] sm:$0xf] }
0x177e   :  { %v12534_v32 = vor.u32 %v14053_v16, %v12533_v31  ;;  %v12535_v23 = vld [vmem:[%s20647_s10 + $0x6c] sm:$0xf0]  ;;  %v12617_v31 = vld [vmem:[%s20648_s9 + $0x48] sm:$0xf]  ;;  %v14026_v16 = vld [vmem:[%s20648_s9 + $0x50] sm:$0xf0] }
0x177f   :  { %v7230_v19 = vsel %vm422_vm2, %v7229_v37, %v7228_v35  ;;  %v7049_v49 = vunpack.c.l.b16 %v7017_v62  ;;  %v7056_v45 = vrot.slane %v7048_v1, 6  ;;  %v12577_v25 = vld [vmem:[%s20647_s10 + $0xb0] sm:$0xf]  ;;  %v12538_v35 = vor.u32 %v14052_v33, %v12535_v23  ;;  %v14063_v37 = vld [vmem:[%s20647_s10 + $0xb8] sm:$0xf0] }
0x1780   :  { %7438 = vmatpush.bf16.msra.mxu2 %v12534_v32  ;;  %v12578_v40 = vor.u32 %v14063_v37, %v12577_v25  ;;  %v12666_v62 = vor.u32 %v14038_v39, %v12665_v47  ;;  %v14049_v1 = vld [vmem:[%s20647_s10 + $0x4c] sm:$0xf]  ;;  %v12618_v33 = vor.u32 %v14026_v16, %v12617_v31  ;;  %v12667_v23 = vld [vmem:[%s20648_s9 + $0xb4] sm:$0xf0]  ;;  %v12673_v25 = vld [vmem:[%s20648_s9 + $0xb0] sm:$0xf] }
0x1781   :  { %v7058_v55 = vrot.slane %v7049_v49, 5  ;;  %v7057_v48 = vsel %vm420_vm1, %v7056_v45, %v7055_v26  ;;  %7451 = vmatpush.bf16.msra.mxu3 %v12538_v35  ;;  %v14060_v49 = vld [vmem:[%s20647_s10 + $0xa0] sm:$0xf0]  ;;  %v14035_v45 = vld [vmem:[%s20648_s9 + $0x98] sm:$0xf0] }
0x1782   :  { %v6907_v41 = vpop.f32.mrf.mxu2  ;;  %v6947_v59 = vpop.f32.mrf.mxu0  ;;  %7461 = vmatpush.bf16.msrb.mxu0 %v12578_v40  ;;  %7602 = vmatpush.bf16.msrb.mxu1 %v12666_v62  ;;  %v12553_v26 = vld [vmem:[%s20647_s10 + $0x80] sm:$0xf]  ;;  %v14037_v32 = vld [vmem:[%s20648_s9 + $0xac] sm:$0xf]  ;;  %v14039_v35 = vld [vmem:[%s20648_s9 + $0xb8] sm:$0xf0] }
0x1783   :  { %v7018_v5 = vpack.c.bf16 %v6947_v59, %v6947_v59  ;;  %v7231_v36 = vrot.slane %v6947_v59, 4  ;;  %v7059_v24 = vsel %vm422_vm2, %v7058_v55, %v7057_v48  ;;  %v12523_v59 = vld [vmem:[%s20647_s10 + $0x54] sm:$0xf0]  ;;  %v14057_v55 = vld [vmem:[%s20647_s10 + $0x88] sm:$0xf0]  ;;  %v12670_v37 = vor.u32 %v14037_v32, %v12667_v23 }
0x1784   :  { %v6928_v52 = vpop.f32.mrf.mxu3  ;;  %v6968_v46 = vpop.f32.mrf.mxu1  ;;  %v12554_v48 = vor.u32 %v14057_v55, %v12553_v26  ;;  %v12674_v47 = vor.u32 %v14039_v35, %v12673_v25  ;;  %v12517_v39 = vld [vmem:[%s20647_s10 + $0x38] sm:$0xf]  ;;  %v14048_v40 = vld [vmem:[%s20647_s10 + $0x40] sm:$0xf0]  ;;  %v12605_v62 = vld [vmem:[%s20648_s9 + $0x30] sm:$0xf] }
0x1785   :  { %v7050_v50 = vunpack.c.l.b16 %v7018_v5  ;;  %v7232_v8 = vsel %vm424_vm3, %v7231_v36, %v7230_v19  ;;  %v7019_v57 = vpack.c.bf16 %v6968_v46, %v6968_v46  ;;  %v7233_v54 = vrot.slane %v6968_v46, 3  ;;  %v12521_v19 = vld [vmem:[%s20647_s10 + $0x48] sm:$0xf]  ;;  %v12509_v46 = vld [vmem:[%s20647_s10 + $0x30] sm:$0xf] }
0x1786   :  { %v12522_v41 = vor.u32 %v14050_v60, %v12521_v19  ;;  %v12526_v5 = vor.u32 %v14049_v1, %v12523_v59  ;;  %v12566_v36 = vor.u32 %v14060_v49, %v12565_v3  ;;  %v12654_v52 = vor.u32 %v14035_v45, %v12653_v44  ;;  %v14023_v60 = vld [vmem:[%s20648_s9 + $0x38] sm:$0xf0]  ;;  %v14034_v1 = vld [vmem:[%s20648_s9 + $0x94] sm:$0xf]  ;;  %v14036_v44 = vld [vmem:[%s20648_s9 + $0xa0] sm:$0xf0] }
0x1787   :  { %v7234_v58 = vsel %vm426_vm4, %v7233_v54, %v7232_v8  ;;  %v7060_v61 = vrot.slane %v7050_v50, 4  ;;  %v7051_v63 = vunpack.c.l.b16 %v7019_v57  ;;  %v14047_v50 = vld [vmem:[%s20647_s10 + $0x38] sm:$0xf0]  ;;  %v14046_v8 = vld [vmem:[%s20647_s10 + $0x34] sm:$0xf]  ;;  %v12518_v19 = vor.u32 %v14048_v40, %v12517_v39 }
0x1788   :  { %7439 = vmatpush.bf16.msra.mxu2 %v12522_v41  ;;  %7452 = vmatpush.bf16.msra.mxu3 %v12526_v5  ;;  %v12510_v57 = vor.u32 %v14047_v50, %v12509_v46  ;;  %v12511_v54 = vld [vmem:[%s20647_s10 + $0x3c] sm:$0xf0]  ;;  %v12275_v59 = vld [vmem:[%s20649_s2 + $0x50] sm:$0xff]  ;;  %v12276_v3 = vld [vmem:[%s20649_s2 + $0x58] sm:$0xff]  ;;  %v12606_v49 = vor.u32 %v14023_v60, %v12605_v62 }
0x1789   :  { %v7061_v29 = vsel %vm424_vm3, %v7060_v61, %v7059_v24  ;;  %v7062_v14 = vrot.slane %v7051_v63, 3  ;;  %7462 = vmatpush.bf16.msrb.mxu0 %v12566_v36  ;;  %7603 = vmatpush.bf16.msrb.mxu1 %v12654_v52  ;;  %v12641_v61 = vld [vmem:[%s20648_s9 + $0x78] sm:$0xf]  ;;  %v14032_v63 = vld [vmem:[%s20648_s9 + $0x80] sm:$0xf0] }
0x178a   :  { %v6949_v18 = vpop.f32.mrf.mxu0  ;;  %v6989_v0 = vpop.f32.mrf.mxu2  ;;  %v14044_v24 = vld [vmem:[%s20647_s10 + $0x20] sm:$0xf0]  ;;  %v12655_v41 = vld [vmem:[%s20648_s9 + $0x9c] sm:$0xf0]  ;;  %v12661_v36 = vld [vmem:[%s20648_s9 + $0x98] sm:$0xf] }
0x178b   :  { %v7020_v30 = vpack.c.bf16 %v6989_v0, %v6989_v0  ;;  %v7235_v51 = vrot.slane %v6989_v0, 2  ;;  %v7063_v28 = vsel %vm426_vm4, %v7062_v14, %v7061_v29  ;;  %v12642_v18 = vor.u32 %v14032_v63, %v12641_v61  ;;  %v12497_v0 = vld [vmem:[%s20647_s10 + $0x18] sm:$0xf]  ;;  %v12499_v29 = vld [vmem:[%s20647_s10 + $0x24] sm:$0xf0] }
0x178c   :  { %v6970_v9 = vpop.f32.mrf.mxu1  ;;  %v7010_v10 = vpop.f32.mrf.mxu3  ;;  %7440 = vmatpush.bf16.msra.mxu2 %v12510_v57  ;;  %v12541_v14 = vld [vmem:[%s20647_s10 + $0x68] sm:$0xf]  ;;  %v12658_v5 = vor.u32 %v14034_v1, %v12655_v41  ;;  %v12505_v45 = vld [vmem:[%s20647_s10 + $0x20] sm:$0xf]  ;;  %v12662_v52 = vor.u32 %v14036_v44, %v12661_v36  ;;  %v14045_v46 = vld [vmem:[%s20647_s10 + $0x28] sm:$0xf0] }
0x178d   :  { %v7052_v11 = vunpack.c.l.b16 %v7020_v30  ;;  %v7236_v4 = vsel %vm428_vm5, %v7235_v51, %v7234_v58  ;;  %v7021_v15 = vpack.c.bf16 %v7010_v10, %v7010_v10  ;;  %v7237_v17 = vrot.slane %v7010_v10, 1  ;;  %v14043_v30 = vld [vmem:[%s20647_s10 + $0x1c] sm:$0xf]  ;;  %7463 = vmatpush.bf16.msrb.mxu0 %v12554_v48  ;;  %7604 = vmatpush.bf16.msrb.mxu1 %v12642_v18  ;;  %v14054_v9 = vld [vmem:[%s20647_s10 + $0x70] sm:$0xf0] }
0x178e   :  { %v12514_v58 = vor.u32 %v14046_v8, %v12511_v54  ;;  %v12498_v51 = vor.u32 %v14044_v24, %v12497_v0  ;;  %v12502_v10 = vor.u32 %v14043_v30, %v12499_v29  ;;  %v12593_v50 = vld [vmem:[%s20648_s9 + $0x18] sm:$0xf]  ;;  %v14020_v8 = vld [vmem:[%s20648_s9 + $0x20] sm:$0xf0]  ;;  %v12506_v57 = vor.u32 %v14045_v46, %v12505_v45  ;;  %v14031_v26 = vld [vmem:[%s20648_s9 + $0x7c] sm:$0xf] }
0x178f   :  { %v7064_v53 = vrot.slane %v7052_v11, 2  ;;  %v7053_v20 = vunpack.c.l.b16 %v7021_v15  ;;  %v18896_v27 = vsel %vm430_vm6, %v7237_v17, %v7236_v4  ;;  %v12542_v11 = vor.u32 %v14054_v9, %v12541_v14  ;;  %v12629_v4 = vld [vmem:[%s20648_s9 + $0x60] sm:$0xf]  ;;  %v14029_v15 = vld [vmem:[%s20648_s9 + $0x68] sm:$0xf0] }
0x1790   :  { %7453 = vmatpush.bf16.msra.mxu3 %v12514_v58  ;;  %7441 = vmatpush.bf16.msra.mxu2 %v12498_v51  ;;  %v12630_v17 = vor.u32 %v14029_v15, %v12629_v4  ;;  %v12594_v54 = vor.u32 %v14020_v8, %v12593_v50  ;;  %v12643_v55 = vld [vmem:[%s20648_s9 + $0x84] sm:$0xf0]  ;;  %v12649_v58 = vld [vmem:[%s20648_s9 + $0x80] sm:$0xf]  ;;  %v14033_v61 = vld [vmem:[%s20648_s9 + $0x88] sm:$0xf0] }
0x1791   :  { %v7065_v43 = vsel %vm428_vm5, %v7064_v53, %v7063_v28  ;;  %v7066_v22 = vrot.slane %v7053_v20, 1  ;;  %v12485_v53 = vld [vmem:[%s20647_s10] sm:$0xf]  ;;  %v14041_v20 = vld [vmem:[%s20647_s10 + $0x8] sm:$0xf0]  ;;  %7464 = vmatpush.bf16.msrb.mxu0 %v12542_v11  ;;  %v12646_v48 = vor.u32 %v14031_v26, %v12643_v55  ;;  %v12650_v30 = vor.u32 %v14033_v61, %v12649_v58 }
0x1792   :  { %v6991_v2 = vpop.f32.mrf.mxu2  ;;  %v14040_v28 = vld [vmem:[%s20647_s10 + $0x4] sm:$0xf]  ;;  %7605 = vmatpush.bf16.msrb.mxu1 %v12630_v17  ;;  %v12493_v63 = vld [vmem:[%s20647_s10 + $0x8] sm:$0xf]  ;;  %v14042_v18 = vld [vmem:[%s20647_s10 + $0x10] sm:$0xf0] }
0x1793   :  { %v7067_v6 = vsel %vm430_vm6, %v7066_v22, %v7065_v43  ;;  %v12486_v43 = vor.u32 %v14041_v20, %v12485_v53  ;;  %v12487_v22 = vld [vmem:[%s20647_s10 + $0xc] sm:$0xf0]  ;;  %v12581_v51 = vld [vmem:[%s20648_s9] sm:$0xf]  ;;  %v14017_v29 = vld [vmem:[%s20648_s9 + $0x8] sm:$0xf0]  ;;  %v12494_v17 = vor.u32 %v14042_v18, %v12493_v63 }
0x1794   :  { %v7068_v42 = vpack.c.b16 %v7067_v6, %v7067_v6  ;;  %v7012_v34 = vpop.f32.mrf.mxu3  ;;  %7454 = vmatpush.bf16.msra.mxu3 %v12502_v10  ;;  %v12529_v2 = vld [vmem:[%s20647_s10 + $0x50] sm:$0xf]  ;;  %v14051_v6 = vld [vmem:[%s20647_s10 + $0x58] sm:$0xf0]  ;;  %v14028_v14 = vld [vmem:[%s20648_s9 + $0x64] sm:$0xf]  ;;  %v12582_v53 = vor.u32 %v14017_v29, %v12581_v51 }
0x1795   :  { %v12530_v34 = vor.u32 %v14051_v6, %v12529_v2  ;;  %7442 = vmatpush.bf16.msra.mxu2 %v12486_v43  ;;  %v12631_v11 = vld [vmem:[%s20648_s9 + $0x6c] sm:$0xf0]  ;;  %v12637_v4 = vld [vmem:[%s20648_s9 + $0x68] sm:$0xf]  ;;  %v14030_v15 = vld [vmem:[%s20648_s9 + $0x70] sm:$0xf0] }
0x1796   :  { %7158 = vmatmul.bf16.vlgmr.msra.gmra.mxu0 %v7068_v42  ;;  %7171 = vmatmul.bf16.vlgmr.msra.gmra.mxu1 %v7068_v42  ;;  %v12490_v42 = vor.u32 %v14040_v28, %v12487_v22  ;;  %v12634_v43 = vor.u32 %v14028_v14, %v12631_v11  ;;  %v12638_v22 = vor.u32 %v14030_v15, %v12637_v4  ;;  %v14025_v2 = vld [vmem:[%s20648_s9 + $0x4c] sm:$0xf]  ;;  %v12619_v6 = vld [vmem:[%s20648_s9 + $0x54] sm:$0xf0]  ;;  %v14022_v32 = vld [vmem:[%s20648_s9 + $0x34] sm:$0xf] }
0x1797   :  { %7465 = vmatpush.bf16.msrb.mxu0 %v12530_v34  ;;  %7606 = vmatpush.bf16.msrb.mxu1 %v12618_v33  ;;  %v14027_v34 = vld [vmem:[%s20648_s9 + $0x58] sm:$0xf0]  ;;  %v12622_v31 = vor.u32 %v14025_v2, %v12619_v6  ;;  %v12607_v25 = vld [vmem:[%s20648_s9 + $0x3c] sm:$0xf0]  ;;  %v12613_v35 = vld [vmem:[%s20648_s9 + $0x38] sm:$0xf] }
0x1798   :  { %7455 = vmatpush.bf16.msra.mxu3 %v12490_v42  ;;  %v12625_v42 = vld [vmem:[%s20648_s9 + $0x50] sm:$0xf]  ;;  %v12610_v39 = vor.u32 %v14022_v32, %v12607_v25  ;;  %v14019_v62 = vld [vmem:[%s20648_s9 + $0x1c] sm:$0xf]  ;;  %v12601_v41 = vld [vmem:[%s20648_s9 + $0x20] sm:$0xf] }
0x1799   :  { %7615 = vmatpush.bf16.msrb.mxu2 %v12670_v37  ;;  %v12626_v16 = vor.u32 %v14027_v34, %v12625_v42  ;;  %v14024_v37 = vld [vmem:[%s20648_s9 + $0x40] sm:$0xf0]  ;;  %v12583_v44 = vld [vmem:[%s20648_s9 + $0xc] sm:$0xf0]  ;;  %v12589_v45 = vld [vmem:[%s20648_s9 + $0x8] sm:$0xf] }
0x179a   :  { %v12614_v40 = vor.u32 %v14024_v37, %v12613_v35  ;;  %v14016_v36 = vld [vmem:[%s20648_s9 + $0x4] sm:$0xf]  ;;  %v12273_v14 = vld [vmem:[%s20650_s0 + $0x28] sm:$0xff]  ;;  %v19168_v2 = vld [vmem:[%s20651_s12] sm:$0x7] }
0x179b   :  { %7466 = vmatpush.bf16.msrb.mxu0 %v12518_v19  ;;  %7607 = vmatpush.bf16.msrb.mxu1 %v12606_v49  ;;  %v12595_v19 = vld [vmem:[%s20648_s9 + $0x24] sm:$0xf0]  ;;  %v12586_v46 = vor.u32 %v14016_v36, %v12583_v44  ;;  %v12796_v6 = vld [vmem:[%s20640_s6 + $0xe0] sm:$0xf]  ;;  %v14094_v42 = vld [vmem:[%s20640_s6 + $0xec] sm:$0xf0] }
0x179c   :  { %7628 = vmatpush.bf16.msrb.mxu3 %v12674_v47  ;;  %v12598_v49 = vor.u32 %v14019_v62, %v12595_v19  ;;  %v14092_v34 = vld [vmem:[%s20640_s6 + $0xe4] sm:$0xf]  ;;  %v12804_v32 = vld [vmem:[%s20640_s6 + $0xe8] sm:$0xf]  ;;  %v14091_v44 = vld [vmem:[%s20640_s6 + $0xd4] sm:$0xf0] }
0x179d   :  { %7616 = vmatpush.bf16.msrb.mxu2 %v12658_v5  ;;  %v12788_v36 = vld [vmem:[%s20640_s6 + $0xc8] sm:$0xf] }
0x179f   :  { %7467 = vmatpush.bf16.msrb.mxu0 %v12506_v57  ;;  %7608 = vmatpush.bf16.msrb.mxu1 %v12594_v54 }
0x17a0   :  { %7629 = vmatpush.bf16.msrb.mxu3 %v12662_v52  ;;  %v14018_v52 = vld [vmem:[%s20648_s9 + $0x10] sm:$0xf0] }
0x17a1   :  { %7617 = vmatpush.bf16.msrb.mxu2 %v12646_v48  ;;  %v12590_v50 = vor.u32 %v14018_v52, %v12589_v45 }
0x17a3   :  { %7468 = vmatpush.bf16.msrb.mxu0 %v12494_v17  ;;  %7609 = vmatpush.bf16.msrb.mxu1 %v12582_v53 }
0x17a4   :  { %7630 = vmatpush.bf16.msrb.mxu3 %v12650_v30 }
0x17a5   :  { %7618 = vmatpush.bf16.msrb.mxu2 %v12634_v43 }
0x17a8   :  { %7631 = vmatpush.bf16.msrb.mxu3 %v12638_v22 }
0x17a9   :  { %7619 = vmatpush.bf16.msrb.mxu2 %v12622_v31  ;;  %v12797_v31 = vor.u32 %v14094_v42, %v12796_v6 }
0x17ab   :  { %7901 = vmatpush.bf16.msra.mxu0 %v12797_v31  ;;  %v12758_v31 = vld [vmem:[%s20640_s6 + $0x98] sm:$0xf0] }
0x17ac   :  { %7632 = vmatpush.bf16.msrb.mxu3 %v12626_v16  ;;  %v12798_v16 = vld [vmem:[%s20640_s6 + $0xf0] sm:$0xf0] }
0x17ad   :  { %7620 = vmatpush.bf16.msrb.mxu2 %v12610_v39  ;;  %v12801_v35 = vor.u32 %v14092_v34, %v12798_v16  ;;  %v12806_v39 = vld [vmem:[%s20640_s6 + $0xf8] sm:$0xf0]  ;;  %v14081_v34 = vld [vmem:[%s20640_s6 + $0x8c] sm:$0xf] }
0x17ae   :  { %v12761_v16 = vor.u32 %v14081_v34, %v12758_v31  ;;  %v12686_v31 = vld [vmem:[%s20640_s6 + $0x10] sm:$0xf0] }
0x17af   :  { %7914 = vmatpush.bf16.msra.mxu1 %v12801_v35  ;;  %v12734_v35 = vld [vmem:[%s20640_s6 + $0x70] sm:$0xf0] }
0x17b0   :  { %7633 = vmatpush.bf16.msrb.mxu3 %v12614_v40 }
0x17b1   :  { %7621 = vmatpush.bf16.msrb.mxu2 %v12598_v49 }
0x17b5   :  { %7622 = vmatpush.bf16.msrb.mxu2 %v12586_v46 }
0x1813   :  { %v7159_v0 = vpop.f32.mrf.mxu0  ;;  %v7172_v24 = vpop.f32.mrf.mxu1 }
0x1814   :  { %v7176_v9 = vadd.f32 %v12275_v59, %v7159_v0  ;;  %v7177_v10 = vadd.f32 %v12276_v3, %v7172_v24  ;;  %v14021_v59 = vld [vmem:[%s20648_s9 + $0x28] sm:$0xf0] }
0x1815   :  { %v12602_v5 = vor.u32 %v14021_v59, %v12601_v41  ;;  %v12780_v41 = vld [vmem:[%s20640_s6 + $0xc0] sm:$0xf]  ;;  %v14090_v59 = vld [vmem:[%s20640_s6 + $0xcc] sm:$0xf0] }
0x1816   :  { %v12481_v20 = vmul.f32 -1.442695, %v7176_v9  ;;  %v12482_v28 = vmul.f32 -1.442695, %v7177_v10  ;;  %v12781_v49 = vor.u32 %v14090_v59, %v12780_v41  ;;  %v14077_v41 = vld [vmem:[%s20640_s6 + $0x6c] sm:$0xf] }
0x1817   :  { %7634 = vmatpush.bf16.msrb.mxu3 %v12602_v5  ;;  %v12782_v5 = vld [vmem:[%s20640_s6 + $0xd0] sm:$0xf0]  ;;  %v12742_v59 = vld [vmem:[%s20640_s6 + $0x78] sm:$0xf0] }
0x1818   :  { %14628 = vpow2.f32 %v12481_v20  ;;  %7902 = vmatpush.bf16.msra.mxu0 %v12781_v49 }
0x1819   :  { %14630 = vpow2.f32 %v12482_v28 }
0x181b   :  { %v7161_v33 = vpop.f32.mrf.mxu0  ;;  %v7174_v23 = vpop.f32.mrf.mxu1  ;;  %7635 = vmatpush.bf16.msrb.mxu3 %v12590_v50 }
0x181c   :  { %v14095_v33 = vld [vmem:[%s20640_s6 + $0xf4] sm:$0xf0]  ;;  %v6682_v23 = vperm.slane %v19168_v2, 0 }
0x181d   :  { %v12805_v37 = vor.u32 %v14095_v33, %v12804_v32  ;;  %v12732_v32 = vld [vmem:[%s20640_s6 + $0x60] sm:$0xf]  ;;  %v14078_v33 = vld [vmem:[%s20640_s6 + $0x6c] sm:$0xf0] }
0x181e   :  { %v14629_v47 = vpop.eup %14628  ;;  %v6688_v45 = vadd.f32 %v6682_v23, %v18674_v7  ;;  %v12764_v7 = vld [vmem:[%s20640_s6 + $0xa0] sm:$0xf]  ;;  %v14076_v23 = vld [vmem:[%s20640_s6 + $0x64] sm:$0xf] }
0x181f   :  { %v14631_v60 = vpop.eup %14630  ;;  %v7184_v1 = vadd.f32 1.0, %v14629_v47  ;;  %v14093_v47 = vld [vmem:[%s20640_s6 + $0xec] sm:$0xf] }
0x1820   :  { %v7185_v3 = vadd.f32 1.0, %v14631_v60  ;;  %v12809_v19 = vor.u32 %v14093_v47, %v12806_v39  ;;  %v14079_v47 = vld [vmem:[%s20640_s6 + $0x74] sm:$0xf0] }
0x1821   :  { %14632 = vrcp.f32 %v7184_v1  ;;  %v7197_v58 = vand.u32 2147483648, %v7184_v1  ;;  %v7195_v63 = vand.u32 2147483647, %v7184_v1  ;;  %vm7191_vm9 = vweird.f32 %v7184_v1 }
0x1822   :  { %14634 = vrcp.f32 %v7185_v3  ;;  %v7212_v18 = vand.u32 2147483648, %v7185_v3  ;;  %v7210_v24 = vand.u32 2147483647, %v7185_v3  ;;  %vm7206_vm11 = vweird.f32 %v7185_v3 }
0x1823   :  { %v7198_v51 = vor.u32 1.1754944e-38, %v7197_v58  ;;  %vm7196_vm13 = vcmp.eq.f32.partialorder %v7195_v63, 8.507059e+37  ;;  %v14086_v58 = vld [vmem:[%s20640_s6 + $0xac] sm:$0xf0]  ;;  %v12766_v63 = vld [vmem:[%s20640_s6 + $0xb0] sm:$0xf0] }
0x1824   :  { %v7213_v9 = vor.u32 1.1754944e-38, %v7212_v18  ;;  %vm7211_vm14 = vcmp.eq.f32.partialorder %v7210_v24, 8.507059e+37  ;;  %v12772_v18 = vld [vmem:[%s20640_s6 + $0xa8] sm:$0xf] }
0x1827   :  { %v14633_v8 = vpop.eup %14632 }
0x1828   :  { %v14635_v57 = vpop.eup %14634  ;;  %v7187_v54 = vmul.f32 %v14633_v8, %v7184_v1  ;;  %vm7192_vm15 = vweird.f32 %v14633_v8 }
0x1829   :  { %v7202_v26 = vmul.f32 %v14635_v57, %v7185_v3  ;;  %vm7207_vm8 = vweird.f32 %v14635_v57  ;;  %vm7193_vm10 = vmor %vm7191_vm9, %vm7192_vm15  ;;  %v14088_v3 = vld [vmem:[%s20640_s6 + $0xc4] sm:$0xf] }
0x182a   :  { %v7188_v55 = vsub.f32 1.0, %v7187_v54  ;;  %vm7208_vm12 = vmor %vm7206_vm11, %vm7207_vm8  ;;  %v12785_v50 = vor.u32 %v14088_v3, %v12782_v5  ;;  %v12790_v54 = vld [vmem:[%s20640_s6 + $0xd8] sm:$0xf0] }
0x182b   :  { %v7203_v48 = vsub.f32 1.0, %v7202_v26 }
0x182c   :  { %v7189_v61 = vmul.f32 %v14633_v8, %v7188_v55  ;;  %7915 = vmatpush.bf16.msra.mxu1 %v12785_v50 }
0x182d   :  { %v7204_v0 = vmul.f32 %v14635_v57, %v7203_v48  ;;  %v14084_v48 = vld [vmem:[%s20640_s6 + $0xa4] sm:$0xf] }
0x182e   :  { %v7190_v30 = vadd.f32 %v14633_v8, %v7189_v61  ;;  %v12765_v61 = vor.u32 %v14086_v58, %v12764_v7  ;;  %v14073_v7 = vld [vmem:[%s20640_s6 + $0x4c] sm:$0xf] }
0x182f   :  { %v7205_v29 = vadd.f32 %v14635_v57, %v7204_v0  ;;  %v14087_v0 = vld [vmem:[%s20640_s6 + $0xb4] sm:$0xf0] }
0x1830   :  { %v7194_v10 = vsel %vm7193_vm10, %v14633_v8, %v7190_v30  ;;  %v12789_v8 = vor.u32 %v14091_v44, %v12788_v36  ;;  %v12769_v30 = vor.u32 %v14084_v48, %v12766_v63  ;;  %7903 = vmatpush.bf16.msra.mxu0 %v12765_v61  ;;  %v12745_v36 = vor.u32 %v14077_v41, %v12742_v59  ;;  %v12700_v63 = vld [vmem:[%s20640_s6 + $0x20] sm:$0xf] }
0x1831   :  { %v7209_v11 = vsel %vm7208_vm12, %v14635_v57, %v7205_v29  ;;  %v7199_v4 = vsel %vm7196_vm13, %v7198_v51, %v7194_v10  ;;  %v14089_v57 = vld [vmem:[%s20640_s6 + $0xcc] sm:$0xf]  ;;  %v12773_v51 = vor.u32 %v14087_v0, %v12772_v18  ;;  %v14070_v18 = vld [vmem:[%s20640_s6 + $0x2c] sm:$0xf0]  ;;  %v14068_v0 = vld [vmem:[%s20640_s6 + $0x24] sm:$0xf] }
0x1832   :  { %v7214_v15 = vsel %vm7211_vm14, %v7213_v9, %v7209_v11  ;;  %v7216_v17 = vmul.f32 %v12273_v14, %v7199_v4  ;;  %v12793_v26 = vor.u32 %v14089_v57, %v12790_v54  ;;  %v14085_v29 = vld [vmem:[%s20640_s6 + $0xac] sm:$0xf]  ;;  %v12774_v14 = vld [vmem:[%s20640_s6 + $0xb8] sm:$0xf0]  ;;  %7916 = vmatpush.bf16.msra.mxu1 %v12769_v30  ;;  %v12748_v4 = vld [vmem:[%s20640_s6 + $0x80] sm:$0xf] }
0x1833   :  { %v7240_v53 = vmul.f32 %v18896_v27, %v7214_v15  ;;  %v19173_v27 = vld [vmem:[%s20652_s11] sm:$0x7]  ;;  %v12777_v11 = vor.u32 %v14085_v29, %v12774_v14  ;;  %v14082_v15 = vld [vmem:[%s20640_s6 + $0x8c] sm:$0xf0]  ;;  %v12702_v30 = vld [vmem:[%s20640_s6 + $0x30] sm:$0xf0] }
0x1834   :  { %v7241_v20 = vpack.c.bf16 %v7216_v17, %v7216_v17  ;;  %v7643_v25 = vperm.slane %v19173_v27, 0  ;;  %v14080_v17 = vld [vmem:[%s20640_s6 + $0x84] sm:$0xf]  ;;  %v14071_v29 = vld [vmem:[%s20640_s6 + $0x34] sm:$0xf0] }
0x1835   :  { %v7274_v28 = vpack.c.bf16 %v7240_v53, %v7240_v53  ;;  %v12749_v53 = vor.u32 %v14082_v15, %v12748_v4  ;;  %v12710_v4 = vld [vmem:[%s20640_s6 + $0x38] sm:$0xf0] }
0x1836   :  { %7610 = vmatmul.bf16.vlgmr.msrb.gmra.mxu1 %v7241_v20 }
0x1837   :  { %7443 = vmatmul.bf16.vlgmr.msra.gmra.mxu2 %v7274_v28  ;;  %7456 = vmatmul.bf16.vlgmr.msra.gmra.mxu3 %v7274_v28 }
0x1838   :  { %7469 = vmatmul.bf16.vlgmr.msrb.gmra.mxu0 %v7274_v28  ;;  %7927 = vmatpush.bf16.msra.mxu2 %v12805_v37  ;;  %v12756_v28 = vld [vmem:[%s20640_s6 + $0x88] sm:$0xf] }
0x1839   :  { %7940 = vmatpush.bf16.msra.mxu3 %v12809_v19  ;;  %7904 = vmatpush.bf16.msra.mxu0 %v12749_v53  ;;  %v12740_v37 = vld [vmem:[%s20640_s6 + $0x68] sm:$0xf]  ;;  %v7644_v19 = vperm.slane %v19173_v27, 1 }
0x183c   :  { %7928 = vmatpush.bf16.msra.mxu2 %v12789_v8 }
0x183d   :  { %7941 = vmatpush.bf16.msra.mxu3 %v12793_v26  ;;  %v12724_v26 = vld [vmem:[%s20640_s6 + $0x48] sm:$0xf] }
0x1840   :  { %7929 = vmatpush.bf16.msra.mxu2 %v12773_v51  ;;  %v12708_v51 = vld [vmem:[%s20640_s6 + $0x28] sm:$0xf] }
0x1841   :  { %7942 = vmatpush.bf16.msra.mxu3 %v12777_v11  ;;  %v14069_v11 = vld [vmem:[%s20640_s6 + $0x2c] sm:$0xf] }
0x1845   :  { %7943 = vmatpush.bf16.msra.mxu3 %v12761_v16  ;;  %v12692_v16 = vld [vmem:[%s20640_s6 + $0x8] sm:$0xf] }
0x1847   :  { %7623 = vmatmul.bf16.vlgmr.msrb.gmra.mxu2 %v7241_v20  ;;  %7636 = vmatmul.bf16.vlgmr.msrb.gmra.mxu3 %v7241_v20  ;;  %v12750_v20 = vld [vmem:[%s20640_s6 + $0x90] sm:$0xf0] }
0x1848   :  { %v12753_v6 = vor.u32 %v14080_v17, %v12750_v20  ;;  %v12713_v20 = vor.u32 %v14069_v11, %v12710_v4 }
0x1849   :  { %7944 = vmatpush.bf16.msra.mxu3 %v12745_v36 }
0x184a   :  { %7917 = vmatpush.bf16.msra.mxu1 %v12753_v6  ;;  %v14066_v6 = vld [vmem:[%s20640_s6 + $0xc] sm:$0xf0] }
0x18b3   :  { %v7611_v43 = vpop.f32.mrf.mxu1 }
0x18b5   :  { %v19163_v22 = vpop.f32.mrf.mxu0 }
0x18ba   :  { %v7444_v40 = vpop.f32.mrf.mxu2  ;;  %v19201_v62 = vpop.f32.mrf.mxu3 }
0x18bb   :  { %v7612_v60 = vadd.f32 %v7611_v43, %v7444_v40  ;;  %v7613_v1 = vpop.f32.mrf.mxu1  ;;  %v14083_v43 = vld [vmem:[%s20640_s6 + $0x94] sm:$0xf0]  ;;  %v6683_v40 = vperm.slane %v19168_v2, 1 }
0x18bc   :  { %v12757_v42 = vor.u32 %v14083_v43, %v12756_v28  ;;  %v12741_v1 = vor.u32 %v14079_v47, %v12740_v37  ;;  %v12684_v43 = vld [vmem:[%s20640_s6] sm:$0xf] }
0x18bd   :  { %v7649_v52 = vadd.f32 %v7643_v25, %v7612_v60  ;;  %v7472_v46 = vpop.f32.mrf.mxu0  ;;  %v12733_v25 = vor.u32 %v14078_v33, %v12732_v32  ;;  %v12737_v60 = vor.u32 %v14076_v23, %v12734_v35  ;;  %v6689_v50 = vadd.f32 %v6683_v40, %v18679_v12  ;;  %v12726_v12 = vld [vmem:[%s20640_s6 + $0x58] sm:$0xf0]  ;;  %v14067_v23 = vld [vmem:[%s20640_s6 + $0x14] sm:$0xf0] }
0x18be   :  { %7930 = vmatpush.bf16.msra.mxu2 %v12757_v42  ;;  %v14072_v46 = vld [vmem:[%s20640_s6 + $0x44] sm:$0xf]  ;;  %v12729_v61 = vor.u32 %v14073_v7, %v12726_v12  ;;  %v12685_v34 = vor.u32 %v14066_v6, %v12684_v43  ;;  %v6684_v35 = vperm.slane %v19168_v2, 2  ;;  %v12693_v47 = vor.u32 %v14067_v23, %v12692_v16 }
0x18bf   :  { %v7652_v55 = vadd.f32 %v7649_v52, %v6688_v45  ;;  %7905 = vmatpush.bf16.msra.mxu0 %v12733_v25  ;;  %7918 = vmatpush.bf16.msra.mxu1 %v12737_v60  ;;  %v12716_v45 = vld [vmem:[%s20640_s6 + $0x40] sm:$0xf]  ;;  %v14074_v52 = vld [vmem:[%s20640_s6 + $0x4c] sm:$0xf0]  ;;  %v14064_v42 = vld [vmem:[%s20640_s6 + $0x4] sm:$0xf] }
0x18c0   :  { %v12717_v57 = vor.u32 %v14074_v52, %v12716_v45  ;;  %7945 = vmatpush.bf16.msra.mxu3 %v12729_v61  ;;  %v12689_v33 = vor.u32 %v14064_v42, %v12686_v31  ;;  %v14065_v25 = vld [vmem:[%s20640_s6 + $0xc] sm:$0xf] }
0x18c1   :  { %v12675_v24 = vmul.f32 -1.442695, %v7652_v55  ;;  %v14075_v55 = vld [vmem:[%s20640_s6 + $0x54] sm:$0xf0] }
0x18c2   :  { %v7446_v9 = vpop.f32.mrf.mxu2  ;;  %v7459_v10 = vpop.f32.mrf.mxu3  ;;  %7931 = vmatpush.bf16.msra.mxu2 %v12741_v1  ;;  %v12725_v58 = vor.u32 %v14075_v55, %v12724_v26 }
0x18c3   :  { %14636 = vpow2.f32 %v12675_v24  ;;  %7906 = vmatpush.bf16.msra.mxu0 %v12717_v57  ;;  %v12701_v24 = vor.u32 %v14070_v18, %v12700_v63  ;;  %v12705_v9 = vor.u32 %v14068_v0, %v12702_v30  ;;  %v12709_v10 = vor.u32 %v14071_v29, %v12708_v51  ;;  %v12679_v0 = vld [vmem:[%s20642_s1 + $0x30] sm:$0xff]  ;;  %v14402_v30 = vld [vmem:[%s20643_s3 + $0x8] sm:$0xff]  }
0x18c4   :  { %7946 = vmatpush.bf16.msra.mxu3 %v12713_v20  ;;  %v14403_v20 = vld [vmem:[%s20643_s3 + $0x10] sm:$0xff]  }
0x18c6   :  { %7932 = vmatpush.bf16.msra.mxu2 %v12725_v58 }
0x18c7   :  { %7907 = vmatpush.bf16.msra.mxu0 %v12701_v24  ;;  %v14353_v24 = vld [vmem:[%s20643_s3] sm:$0xff]  }
0x18c8   :  { %v14355_v11 = vunpack.c.h.bf16 %v14353_v24 }
0x18c9   :  { %v14637_v39 = vpop.eup %14636 }
0x18ca   :  { %v19302_v3 = vadd.f32 1.0, %v14637_v39  ;;  %v7624_v49 = vpop.f32.mrf.mxu2  ;;  %v19304_v5 = vpop.f32.mrf.mxu3  ;;  %7933 = vmatpush.bf16.msra.mxu2 %v12709_v10  ;;  %v12694_v39 = vld [vmem:[%s20640_s6 + $0x18] sm:$0xf0]  ;;  %v14358_v10 = vunpack.c.l.bf16 %v14402_v30 }
0x18cb   :  { %v7625_v44 = vadd.f32 %v7624_v49, %v19201_v62  ;;  %v12718_v62 = vld [vmem:[%s20640_s6 + $0x50] sm:$0xf0]  ;;  %7908 = vmatpush.bf16.msra.mxu0 %v12685_v34  ;;  %v12697_v60 = vor.u32 %v14065_v25, %v12694_v39  ;;  %v6690_v49 = vadd.f32 %v6684_v35, %v18681_v13  ;;  %v7638_v52 = vadd.f32 %v19304_v5, %v19163_v22 }
0x18cc   :  { %14638 = vrcp.f32 %v19302_v3  ;;  %v12721_v54 = vor.u32 %v14072_v46, %v12718_v62  ;;  %v7668_v37 = vand.u32 2147483648, %v19302_v3  ;;  %vm7662_vm8 = vweird.f32 %v19302_v3 }
0x18cd   :  { %v7650_v8 = vadd.f32 %v7644_v19, %v7625_v44  ;;  %v7666_v19 = vand.u32 2147483647, %v19302_v3  ;;  %7947 = vmatpush.bf16.msra.mxu3 %v12697_v60  ;;  %v7645_v46 = vperm.slane %v19173_v27, 2 }
0x18ce   :  { %7919 = vmatpush.bf16.msra.mxu1 %v12721_v54  ;;  %7934 = vmatpush.bf16.msra.mxu2 %v12693_v47  ;;  %v7669_v59 = vor.u32 1.1754944e-38, %v7668_v37 }
0x18cf   :  { %v7672_v48 = vadd.f32 %v7650_v8, %v6689_v50  ;;  %vm7667_vm10 = vcmp.eq.f32.partialorder %v7666_v19, 8.507059e+37  ;;  %v7651_v50 = vadd.f32 %v7645_v46, %v7638_v52 }
0x18d1   :  { %v12676_v14 = vmul.f32 -1.442695, %v7672_v48  ;;  %v14726_v48 = vld [vmem:[%s20653_s13 + $0x20] sm:$0xff] }
0x18d2   :  { %v14639_v15 = vpop.eup %14638  ;;  %v7626_v17 = vpop.f32.mrf.mxu2  ;;  %7920 = vmatpush.bf16.msra.mxu1 %v12705_v9  ;;  %v14354_v9 = vunpack.c.l.bf16 %v14353_v24 }
0x18d3   :  { %v7639_v53 = vpop.f32.mrf.mxu3  ;;  %14640 = vpow2.f32 %v12676_v14  ;;  %v7658_v28 = vmul.f32 %v14639_v15, %v19302_v3  ;;  %vm7663_vm15 = vweird.f32 %v14639_v15 }
0x18d4   :  { %vm7664_vm9 = vmor %vm7662_vm8, %vm7663_vm15  ;;  %vm20752_vm15 = vcmask 64512  }
0x18d5   :  { %v7659_v32 = vsub.f32 1.0, %v7658_v28  ;;  %v14359_v28 = vunpack.c.h.bf16 %v14402_v30  ;;  %vm20753_vm8 = vmmov %vm20752_vm15 }
0x18d6   :  { %7921 = vmatpush.bf16.msra.mxu1 %v12689_v33 }
0x18d7   :  { %v7660_v40 = vmul.f32 %v14639_v15, %v7659_v32  ;;  %v14363_v32 = vunpack.c.h.bf16 %v14403_v20 }
0x18d9   :  { %v14641_v1 = vpop.eup %14640  ;;  %v7661_v41 = vadd.f32 %v14639_v15, %v7660_v40  ;;  %v14362_v40 = vunpack.c.l.bf16 %v14403_v20 }
0x18da   :  { %v7676_v2 = vadd.f32 1.0, %v14641_v1 }
0x18db   :  { %v7665_v36 = vsel %vm7664_vm9, %v14639_v15, %v7661_v41  ;;  %v14416_v41 = vld [vmem:[%s20641_s7] ss:$0 sm:$0xff]  ;;  %vm20754_vm9 = vcmask 1043456  }
0x18dc   :  { %14642 = vrcp.f32 %v7676_v2  ;;  %v7670_v44 = vsel %vm7667_vm10, %v7669_v59, %v7665_v36  ;;  %v7688_v54 = vand.u32 2147483648, %v7676_v2  ;;  %v7686_v55 = vand.u32 2147483647, %v7676_v2  ;;  %vm20755_vm10 = vmmov %vm20754_vm9 }
0x18dd   :  { %v7692_v45 = vmul.f32 %v7670_v44, %v6690_v49  ;;  %vm7682_vm12 = vweird.f32 %v7676_v2 }
0x18de   :  { %v7689_v7 = vor.u32 1.1754944e-38, %v7688_v54  ;;  %vm7687_vm14 = vcmp.eq.f32.partialorder %v7686_v55, 8.507059e+37 }
0x18df   :  { %v7693_v3 = vadd.f32 %v7692_v45, %v7651_v50 }
0x18e1   :  { %14644 = vtanh.f32 %v7693_v3 }
0x18e2   :  { %v14643_v62 = vpop.eup %14642 }
0x18e3   :  { %v7678_v8 = vmul.f32 %v14643_v62, %v7676_v2  ;;  %vm7683_vm11 = vweird.f32 %v14643_v62  ;;  %v14404_v2 = vld [vmem:[%s20643_s3 + $0x18] sm:$0xff]  }
0x18e4   :  { %vm7684_vm13 = vmor %vm7682_vm12, %vm7683_vm11  ;;  %v14366_v45 = vunpack.c.l.bf16 %v14404_v2  ;;  %v14367_v54 = vunpack.c.h.bf16 %v14404_v2 }
0x18e5   :  { %v7679_v57 = vsub.f32 1.0, %v7678_v8  ;;  %vm20756_vm11 = vmmov %vm20754_vm9 }
0x18e6   :  { %vm20757_vm12 = vmmov %vm20754_vm9 }
0x18e7   :  { %v7680_v26 = vmul.f32 %v14643_v62, %v7679_v57  ;;  %v14645_v5 = vpop.eup %14644 }
0x18e9   :  { %v7681_v13 = vadd.f32 %v14643_v62, %v7680_v26 }
0x18eb   :  { %v7685_v58 = vsel %vm7684_vm13, %v14643_v62, %v7681_v13  ;;  %vm20758_vm13 = vmmov %vm20754_vm9 }
0x18ec   :  { %v7690_v12 = vsel %vm7687_vm14, %v7689_v7, %v7685_v58  ;;  %vm20759_vm14 = vmmov %vm20754_vm9 }
0x18ed   :  { %v7695_v22 = vsub.f32 1.0, %v7690_v12  ;;  %v7697_v61 = vmul.f32 %v14726_v48, %v7690_v12 }
0x18ef   :  { %v7696_v27 = vmul.f32 %v14645_v5, %v7695_v22 }
0x18f1   :  { %v7698_v63 = vadd.f32 %v7697_v61, %v7696_v27 }
0x18f3   :  { %12677 = vst [vmem:[%s20653_s13 + $0x28] sm:$0xff] %v7698_v63  ;;  %v7708_v18 = vpack.c.bf16 %v7698_v63, %v7698_v63 }
0x18f5   :  { %7909 = vmatmul.bf16.vlgmr.msra.gmra.mxu0 %v7708_v18  ;;  %7922 = vmatmul.bf16.vlgmr.msra.gmra.mxu1 %v7708_v18 }
0x18f6   :  { %7935 = vmatmul.bf16.vlgmr.msra.gmra.mxu2 %v7708_v18  ;;  %7948 = vmatmul.bf16.vlgmr.msra.gmra.mxu3 %v7708_v18 }
0x1972   :  { %v7910_v51 = vpop.f32.mrf.mxu0  ;;  %v19405_v29 = vpop.f32.mrf.mxu1 }
0x1973   :  { %v7964_v14 = vadd.f32 %v12679_v0, %v7910_v51 }
0x1975   :  { %v7989_v4 = vperm.slane %v7964_v14, 0  ;;  %v7983_v15 = vrot.slane %v7964_v14, 2  ;;  %v7982_v17 = vrot.slane %v7964_v14, 1  ;;  %v7984_v53 = vrot.slane %v7964_v14, 3 }
0x1976   :  { %v7986_v43 = vrot.slane %v7964_v14, 5  ;;  %v7985_v6 = vrot.slane %v7964_v14, 4  ;;  %v7987_v1 = vrot.slane %v7964_v14, 6  ;;  %v7988_v36 = vrot.slane %v7964_v14, 7 }
0x1977   :  { %v8005_v42 = vadd.f32 %v14354_v9, %v7989_v4  ;;  %v7991_v34 = vperm.slane %v7983_v15, 0  ;;  %v7990_v31 = vperm.slane %v7982_v17, 0  ;;  %v7992_v16 = vperm.slane %v7984_v53, 0 }
0x1978   :  { %v7994_v37 = vperm.slane %v7986_v43, 0  ;;  %v7993_v19 = vperm.slane %v7985_v6, 0  ;;  %v7995_v52 = vperm.slane %v7987_v1, 0  ;;  %v7996_v26 = vperm.slane %v7988_v36, 0  ;;  %v8111_v36 = vld [vmem:[%s20645_s4] sm:$0xf] }
0x1979   :  { %v19410_v33 = vpop.f32.mrf.mxu2  ;;  %v19412_v23 = vpop.f32.mrf.mxu3  ;;  %14646 = vtanh.f32 %v8005_v42  ;;  %v8007_v25 = vadd.f32 %v14358_v10, %v7991_v34  ;;  %v8006_v35 = vadd.f32 %v14355_v11, %v7990_v31  ;;  %v8008_v60 = vadd.f32 %v14359_v28, %v7992_v16 }
0x197a   :  { %v7912_v47 = vpop.f32.mrf.mxu0  ;;  %v7925_v39 = vpop.f32.mrf.mxu1  ;;  %v8010_v59 = vadd.f32 %v14363_v32, %v7994_v37  ;;  %v8009_v49 = vadd.f32 %v14362_v40, %v7993_v19  ;;  %v8011_v13 = vadd.f32 %v14366_v45, %v7995_v52  ;;  %v8012_v58 = vadd.f32 %v14367_v54, %v7996_v26  ;;  %v8116_v54 = vld [vmem:[%s20645_s4 + $0x14] sm:$0xf] }
0x197b   :  { %14648 = vtanh.f32 %v8007_v25  ;;  %v8125_v52 = vsel %vm20756_vm11, %v8111_v36, 0 }
0x197c   :  { %14650 = vtanh.f32 %v8006_v35  ;;  %8134 = vmatpush.bf16.msrb.mxu0 %v8125_v52  ;;  %v14106_v52 = vld [vmem:[%s20646_s8 + $0x54] sm:$0xf] }
0x197d   :  { %14652 = vtanh.f32 %v8008_v60 }
0x197e   :  { %14654 = vtanh.f32 %v8010_v59  ;;  %v8113_v59 = vld [vmem:[%s20645_s4 + $0x8] sm:$0xf] }
0x197f   :  { %v14647_v44 = vpop.eup %14646  ;;  %14656 = vtanh.f32 %v8009_v49  ;;  %v8114_v49 = vld [vmem:[%s20645_s4 + $0xc] sm:$0xf] }
0x1980   :  { %v8025_v46 = vmul.f32 %v14647_v44, %v14416_v41  ;;  %14658 = vtanh.f32 %v8011_v13  ;;  %v8167_v44 = vsel %vm20754_vm9, %v8113_v59, 0  ;;  %v8188_v45 = vsel %vm20755_vm10, %v8114_v49, 0  ;;  %v12874_v49 = vld [vmem:[%s20646_s8 + $0x68] sm:$0xf0] }
0x1981   :  { %v14649_v62 = vpop.eup %14648  ;;  %v7938_v50 = vpop.f32.mrf.mxu2  ;;  %14660 = vtanh.f32 %v8012_v58  ;;  %8176 = vmatpush.bf16.msrb.mxu2 %v8167_v44  ;;  %8197 = vmatpush.bf16.msrb.mxu3 %v8188_v45  ;;  %vm20763_vm10 = vcmask 64512   ;;  %v12864_v44 = vld [vmem:[%s20646_s8 + $0x50] sm:$0xf]  ;;  %v14107_v45 = vld [vmem:[%s20646_s8 + $0x54] sm:$0xf0] }
0x1982   :  { %v7951_v8 = vpop.f32.mrf.mxu3  ;;  %v14651_v3 = vpop.eup %14650  ;;  %8033 = vadd.xlane.f32.xlu0 %v8025_v46  ;;  %v8027_v57 = vmul.f32 %v14649_v62, %v14416_v41  ;;  %v8112_v46 = vld [vmem:[%s20645_s4 + $0x4] sm:$0xf]  ;;  %v8117_v50 = vld [vmem:[%s20645_s4 + $0x18] sm:$0xf]  ;;  %vm20764_vm11 = vmmov %vm20763_vm10 }
0x1983   :  { %v8026_v55 = vmul.f32 %v14651_v3, %v14416_v41  ;;  %v14653_v7 = vpop.eup %14652  ;;  %v8146_v62 = vsel %vm20757_vm12, %v8112_v46, 0  ;;  %v8251_v8 = vsel %vm20758_vm13, %v8117_v50, 0  ;;  %v8118_v3 = vld [vmem:[%s20645_s4 + $0x1c] sm:$0xf]  ;;  %vm20765_vm12 = vmmov %vm20763_vm10  ;;  %v12865_v46 = vor.u32 %v14107_v45, %v12864_v44  ;;  %v12952_v45 = vld [vmem:[%s20647_s10 + $0x84] sm:$0xf0] }
0x1984   :  { %8037 = vadd.xlane.f32.xlu2 %v8027_v57  ;;  %v14655_v12 = vpop.eup %14654  ;;  %v8028_v5 = vmul.f32 %v14653_v7, %v14416_v41  ;;  %8155 = vmatpush.bf16.msrb.mxu1 %v8146_v62  ;;  %v8115_v57 = vld [vmem:[%s20645_s4 + $0x10] sm:$0xf]  ;;  %v8272_v26 = vsel %vm20759_vm14, %v8118_v3, 0  ;;  %vm20766_vm13 = vmmov %vm20763_vm10  ;;  %v12866_v62 = vld [vmem:[%s20646_s8 + $0x58] sm:$0xf0] }
0x1985   :  { %8035 = vadd.xlane.f32.xlu1 %v8026_v55  ;;  %v14657_v22 = vpop.eup %14656  ;;  %v8030_v27 = vmul.f32 %v14655_v12, %v14416_v41  ;;  %8260 = vmatpush.bf16.msra.mxu2 %v8251_v8  ;;  %vm20767_vm14 = vmmov %vm20763_vm10  ;;  %v12869_v50 = vor.u32 %v14106_v52, %v12866_v62  ;;  %v12856_v8 = vld [vmem:[%s20646_s8 + $0x40] sm:$0xf]  ;;  %v14105_v3 = vld [vmem:[%s20646_s8 + $0x44] sm:$0xf0] }
0x1986   :  { %v8029_v48 = vmul.f32 %v14657_v22, %v14416_v41  ;;  %v14659_v61 = vpop.eup %14658  ;;  %8281 = vmatpush.bf16.msra.mxu3 %v8272_v26  ;;  %v12858_v26 = vld [vmem:[%s20646_s8 + $0x48] sm:$0xf0]  ;;  %v14151_v44 = vld [vmem:[%s20647_s10 + $0x7c] sm:$0xf] }
0x1987   :  { %v14661_v63 = vpop.eup %14660  ;;  %v8031_v18 = vmul.f32 %v14659_v61, %v14416_v41 }
0x1988   :  { %v8032_v0 = vmul.f32 %v14661_v63, %v14416_v41 }
0x198a   :  { %8039 = vadd.xlane.f32.xlu0 %v8028_v5 }
0x198c   :  { %8043 = vadd.xlane.f32.xlu2 %v8030_v27 }
0x198d   :  { %8041 = vadd.xlane.f32.xlu1 %v8029_v48 }
0x1992   :  { %8045 = vadd.xlane.f32.xlu0 %v8031_v18 }
0x1995   :  { %8047 = vadd.xlane.f32.xlu1 %v8032_v0 }
0x19f5   :  { %v8034_v24 = vpop.xlane.xlu0 %8033 }
0x19f6   :  { %v8057_v9 = vperm.slane %v8034_v24, %v14868_v21 }
0x19f7   :  { %v8038_v30 = vpop.xlane.xlu2 %8037 }
0x19f8   :  { %v8036_v51 = vpop.xlane.xlu1 %8035  ;;  %v8059_v10 = vperm.slane %v8038_v30, %v14868_v21 }
0x19f9   :  { %v8058_v14 = vperm.slane %v8036_v51, %v14868_v21 }
0x19fb   :  { %v8065_v11 = vsel %vm418_vm0, %v8058_v14, %v8057_v9 }
0x19fc   :  { %v8066_v17 = vsel %vm420_vm1, %v8059_v10, %v8065_v11 }
0x19fd   :  { %v8040_v4 = vpop.xlane.xlu0 %8039 }
0x19fe   :  { %v8060_v15 = vperm.slane %v8040_v4, %v14868_v21 }
0x19ff   :  { %v8044_v53 = vpop.xlane.xlu2 %8043 }
0x1a00   :  { %v8042_v20 = vpop.xlane.xlu1 %8041  ;;  %v8067_v28 = vsel %vm422_vm2, %v8060_v15, %v8066_v17  ;;  %v8062_v6 = vperm.slane %v8044_v53, %v14868_v21 }
0x1a01   :  { %v8061_v43 = vperm.slane %v8042_v20, %v14868_v21 }
0x1a03   :  { %v8068_v42 = vsel %vm424_vm3, %v8061_v43, %v8067_v28 }
0x1a04   :  { %v8069_v16 = vsel %vm426_vm4, %v8062_v6, %v8068_v42 }
0x1a05   :  { %v8046_v34 = vpop.xlane.xlu0 %8045 }
0x1a06   :  { %v8063_v31 = vperm.slane %v8046_v34, %v14868_v21 }
0x1a08   :  { %v8048_v32 = vpop.xlane.xlu1 %8047  ;;  %v8070_v25 = vsel %vm428_vm5, %v8063_v31, %v8069_v16 }
0x1a09   :  { %v8064_v35 = vperm.slane %v8048_v32, %v14868_v21 }
0x1a0b   :  { %v8071_v37 = vsel %vm430_vm6, %v8064_v35, %v8070_v25 }
0x1a0c   :  { %v8073_v47 = vsel %vm51_vm7, %v8071_v37, -1e+30  ;;  %v12880_v37 = vld [vmem:[%s20646_s8 + $0x70] sm:$0xf] }
0x1a0d   :  { %v8074_v39 = vsel %vm20752_vm15, %v8073_v47, -inf  ;;  %vm20760_vm15 = vmmov %vm20754_vm9 }
0x1a0e   :  { %8075 = vmax.xlane.f32.xlu2 %v8074_v39  ;;  %v8209_v55 = vsel %vm20760_vm15, %v8115_v57, 0  ;;  %vm20768_vm15 = vmmov %vm20763_vm10  ;;  %v14110_v39 = vld [vmem:[%s20646_s8 + $0x74] sm:$0xf]  ;;  %v14104_v57 = vld [vmem:[%s20646_s8 + $0x44] sm:$0xf] }
0x1a0f   :  { %8218 = vmatpush.bf16.msra.mxu0 %v8209_v55  ;;  %v12861_v55 = vor.u32 %v14104_v57, %v12858_v26  ;;  %v12955_v57 = vor.u32 %v14151_v44, %v12952_v45  ;;  %v14149_v44 = vld [vmem:[%s20647_s10 + $0x68] sm:$0xf0] }
0x1a81   :  { %v8076_v40 = vpop.xlane.xlu2 %8075 }
0x1a82   :  { %v8077_v19 = vsub.f32 %v8073_v47, %v8076_v40  ;;  %v14111_v47 = vld [vmem:[%s20646_s8 + $0x74] sm:$0xf0] }
0x1a83   :  { %v12881_v40 = vor.u32 %v14111_v47, %v12880_v37  ;;  %v14155_v37 = vld [vmem:[%s20647_s10 + $0x98] sm:$0xf0] }
0x1a84   :  { %v8078_v60 = vmul.f32 1.442695, %v8077_v19  ;;  %v12882_v19 = vld [vmem:[%s20646_s8 + $0x78] sm:$0xf0] }
0x1a86   :  { %14662 = vpow2.f32 %v8078_v60  ;;  %v12885_v60 = vor.u32 %v14110_v39, %v12882_v19  ;;  %v14154_v39 = vld [vmem:[%s20647_s10 + $0x94] sm:$0xf] }
0x1a8c   :  { %v14663_v1 = vpop.eup %14662 }
0x1a8d   :  { %v8080_v41 = vmul.f32 %v14663_v1, %v15038_v56  ;;  %v12872_v1 = vld [vmem:[%s20646_s8 + $0x60] sm:$0xf] }
0x1a8f   :  { %v8081_v2 = vsel %vm20753_vm8, %v8080_v41, 0.0  ;;  %vm20761_vm8 = vmmov %vm20754_vm9  ;;  %vm20762_vm9 = vcmask 1040384  }
0x1a90   :  { %8082 = vadd.xlane.f32.xlu0 %v8081_v2  ;;  %v8230_v13 = vsel %vm20761_vm8, %v8116_v54, 0  ;;  %vm20769_vm8 = vmmov %vm20763_vm10  ;;  %v14108_v2 = vld [vmem:[%s20646_s8 + $0x64] sm:$0xf]  ;;  %v12857_v54 = vor.u32 %v14105_v3, %v12856_v8 }
0x1a91   :  { %8239 = vmatpush.bf16.msra.mxu1 %v8230_v13  ;;  %v12877_v36 = vor.u32 %v14108_v2, %v12874_v49  ;;  %v12848_v13 = vld [vmem:[%s20646_s8 + $0x30] sm:$0xf]  ;;  %v12950_v2 = vld [vmem:[%s20647_s10 + $0x78] sm:$0xf] }
0x1b03   :  { %v8083_v7 = vpop.xlane.xlu0 %8082 }
0x1b04   :  { %v8084_v58 = vadd.f32 1e-30, %v8083_v7  ;;  %v14103_v7 = vld [vmem:[%s20646_s8 + $0x34] sm:$0xf0] }
0x1b06   :  { %14664 = vrcp.f32 %v8084_v58  ;;  %v14102_v58 = vld [vmem:[%s20646_s8 + $0x34] sm:$0xf] }
0x1b0c   :  { %v14665_v12 = vpop.eup %14664 }
0x1b0d   :  { %v8086_v22 = vmul.f32 %v14665_v12, %v8080_v41  ;;  %v14109_v41 = vld [vmem:[%s20646_s8 + $0x64] sm:$0xf0]  ;;  %v12849_v12 = vor.u32 %v14103_v7, %v12848_v13 }
0x1b0e   :  { %v12873_v59 = vor.u32 %v14109_v41, %v12872_v1 }
0x1b0f   :  { %v8087_v5 = vpack.c.bf16 %v8086_v22, %v8086_v22  ;;  %v12850_v22 = vld [vmem:[%s20646_s8 + $0x38] sm:$0xf0] }
0x1b11   :  { %v8089_v27 = vrot.slane %v8087_v5, 3 }
0x1b13   :  { %v8092_v48 = vsel %vm20762_vm9, %v8087_v5, %v8089_v27  ;;  %v8094_v61 = vsel %vm418_vm0, %v8087_v5, %v8089_v27  ;;  %v8097_v4 = vsel %vm420_vm1, %v8087_v5, %v8089_v27  ;;  %v8100_v17 = vsel %vm422_vm2, %v8087_v5, %v8089_v27  ;;  %vm20770_vm9 = vmmov %vm20769_vm8  ;;  %v12840_v27 = vld [vmem:[%s20646_s8 + $0x20] sm:$0xf] }
0x1b14   :  { %v12810_v63 = vpack.i.b16 %v8092_v48, %v8092_v48  ;;  %v8104_v18 = vunpack.i.h.s16 %v8092_v48  ;;  %v8096_v0 = vrot.slane %v8094_v61, 1  ;;  %v8099_v53 = vrot.slane %v8097_v4, 2  ;;  %v14101_v48 = vld [vmem:[%s20646_s8 + $0x24] sm:$0xf0]  ;;  %v14100_v61 = vld [vmem:[%s20646_s8 + $0x24] sm:$0xf] }
0x1b15   :  { %v8102_v20 = vrot.slane %v8100_v17, 3  ;;  %v12853_v5 = vor.u32 %v14102_v58, %v12850_v22  ;;  %v14097_v17 = vld [vmem:[%s20646_s8 + $0x4] sm:$0xf0] }
0x1b16   :  { %v8120_v24 = vperm.slane %v12810_v63, 0  ;;  %v8140_v30 = vpack.i.b16 %v8104_v18, %v8104_v18  ;;  %v12813_v51 = vpack.i.b16 %v8096_v0, %v8096_v0  ;;  %v8106_v14 = vunpack.i.h.s16 %v8096_v0  ;;  %v12842_v18 = vld [vmem:[%s20646_s8 + $0x28] sm:$0xf0] }
0x1b17   :  { %v8108_v28 = vunpack.i.h.s16 %v8099_v53  ;;  %v12816_v43 = vpack.i.b16 %v8099_v53, %v8099_v53  ;;  %v8110_v6 = vunpack.i.h.s16 %v8102_v20  ;;  %v12819_v34 = vpack.i.b16 %v8102_v20, %v8102_v20  ;;  %v14096_v53 = vld [vmem:[%s20646_s8 + $0x4] sm:$0xf] }
0x1b18   :  { %12811 = vmatmul.msk.bf16.vlgmr.msrb.gmra.mxu0 %vm20763_vm10, %v8120_v24  ;;  %v8141_v9 = vperm.slane %v8140_v30, 0  ;;  %v8162_v10 = vperm.slane %v12813_v51, 0  ;;  %v8182_v11 = vpack.i.b16 %v8106_v14, %v8106_v14  ;;  %v12841_v63 = vor.u32 %v14101_v48, %v12840_v27  ;;  %v12832_v24 = vld [vmem:[%s20646_s8 + $0x10] sm:$0xf]  ;;  %v14099_v30 = vld [vmem:[%s20646_s8 + $0x14] sm:$0xf0] }
0x1b19   :  { %v8224_v42 = vpack.i.b16 %v8108_v28, %v8108_v28  ;;  %v8204_v31 = vperm.slane %v12816_v43, 0  ;;  %v8266_v16 = vpack.i.b16 %v8110_v6, %v8110_v6  ;;  %v8246_v25 = vperm.slane %v12819_v34, 0  ;;  %8423 = vmatpush.bf16.msrb.mxu0 %v12881_v40  ;;  %v14098_v51 = vld [vmem:[%s20646_s8 + $0x14] sm:$0xf]  ;;  %v12826_v43 = vld [vmem:[%s20646_s8 + $0x8] sm:$0xf0] }
0x1b1a   :  { %12812 = vmatmul.msk.bf16.vlgmr.msrb.gmra.mxu1 %vm20764_vm11, %v8141_v9  ;;  %12814 = vmatmul.msk.bf16.vlgmr.msrb.gmra.mxu2 %vm20765_vm12, %v8162_v10  ;;  %v8183_v15 = vperm.slane %v8182_v11, 0  ;;  %v12845_v0 = vor.u32 %v14100_v61, %v12842_v18  ;;  %v12833_v9 = vor.u32 %v14099_v30, %v12832_v24  ;;  %v12834_v10 = vld [vmem:[%s20646_s8 + $0x18] sm:$0xf0]  ;;  %v12829_v6 = vor.u32 %v14096_v53, %v12826_v43  ;;  %v14158_v34 = vld [vmem:[%s20647_s10 + $0xb0] sm:$0xf0] }
0x1b1b   :  { %v8225_v32 = vperm.slane %v8224_v42, 0  ;;  %v8267_v35 = vperm.slane %v8266_v16, 0  ;;  %8436 = vmatpush.bf16.msrb.mxu1 %v12885_v60  ;;  %v12837_v11 = vor.u32 %v14098_v51, %v12834_v10  ;;  %v12974_v42 = vld [vmem:[%s20647_s10 + $0xa8] sm:$0xf]  ;;  %v12964_v40 = vld [vmem:[%s20647_s10 + $0x9c] sm:$0xf0] }
0x1b1c   :  { %12815 = vmatmul.msk.bf16.vlgmr.msrb.gmra.mxu3 %vm20766_vm13, %v8183_v15  ;;  %v12824_v15 = vld [vmem:[%s20646_s8] sm:$0xf]  ;;  %v12967_v41 = vor.u32 %v14154_v39, %v12964_v40 }
0x1b1d   :  { %8424 = vmatpush.bf16.msrb.mxu0 %v12873_v59  ;;  %v12825_v28 = vor.u32 %v14097_v17, %v12824_v15  ;;  %v14152_v59 = vld [vmem:[%s20647_s10 + $0x80] sm:$0xf0] }
0x1b1e   :  { %v12951_v3 = vor.u32 %v14152_v59, %v12950_v2 }
0x1b1f   :  { %8437 = vmatpush.bf16.msrb.mxu1 %v12877_v36 }
0x1b21   :  { %8425 = vmatpush.bf16.msrb.mxu0 %v12865_v46 }
0x1b23   :  { %8438 = vmatpush.bf16.msrb.mxu1 %v12869_v50 }
0x1b25   :  { %8426 = vmatpush.bf16.msrb.mxu0 %v12857_v54 }
0x1b27   :  { %8439 = vmatpush.bf16.msrb.mxu1 %v12861_v55 }
0x1b28   :  { %12817 = vmatmul.msk.bf16.vlgmr.msra.gmra.mxu0 %vm20767_vm14, %v8204_v31  ;;  %v14157_v31 = vld [vmem:[%s20647_s10 + $0xac] sm:$0xf] }
0x1b29   :  { %8427 = vmatpush.bf16.msrb.mxu0 %v12849_v12 }
0x1b2a   :  { %12818 = vmatmul.msk.bf16.vlgmr.msra.gmra.mxu1 %vm20768_vm15, %v8225_v32  ;;  %12820 = vmatmul.msk.bf16.vlgmr.msra.gmra.mxu2 %vm20769_vm8, %v8246_v25  ;;  %v12975_v32 = vor.u32 %v14158_v34, %v12974_v42  ;;  %v12976_v25 = vld [vmem:[%s20647_s10 + $0xb4] sm:$0xf0] }
0x1b2b   :  { %8440 = vmatpush.bf16.msrb.mxu1 %v12853_v5  ;;  %v12979_v47 = vor.u32 %v14157_v31, %v12976_v25 }
0x1b2c   :  { %12821 = vmatmul.msk.bf16.vlgmr.msra.gmra.mxu3 %vm20770_vm9, %v8267_v35  ;;  %v12962_v35 = vld [vmem:[%s20647_s10 + $0x90] sm:$0xf]  ;;  %8708 = vmatpush.bf16.msrb.mxu2 %v12975_v32 }
0x1b2d   :  { %8428 = vmatpush.bf16.msrb.mxu0 %v12841_v63  ;;  %v12963_v19 = vor.u32 %v14155_v37, %v12962_v35  ;;  %8721 = vmatpush.bf16.msrb.mxu3 %v12979_v47 }
0x1b2f   :  { %8441 = vmatpush.bf16.msrb.mxu1 %v12845_v0 }
0x1b30   :  { %8709 = vmatpush.bf16.msrb.mxu2 %v12963_v19 }
0x1b31   :  { %8429 = vmatpush.bf16.msrb.mxu0 %v12833_v9  ;;  %8722 = vmatpush.bf16.msrb.mxu3 %v12967_v41 }
0x1b33   :  { %8442 = vmatpush.bf16.msrb.mxu1 %v12837_v11 }
0x1b34   :  { %8710 = vmatpush.bf16.msrb.mxu2 %v12951_v3  ;;  %v13070_v3 = vld [vmem:[%s20648_s9 + $0xa8] sm:$0xf] }
0x1b35   :  { %8430 = vmatpush.bf16.msrb.mxu0 %v12825_v28  ;;  %8723 = vmatpush.bf16.msrb.mxu3 %v12955_v57  ;;  %v14134_v57 = vld [vmem:[%s20648_s9 + $0xb0] sm:$0xf0] }
0x1b37   :  { %8443 = vmatpush.bf16.msrb.mxu1 %v12829_v6 }
0x1b95   :  { %v8136_v14 = vpop.f32.mrf.mxu0 }
0x1b96   :  { %v8287_v13 = vpack.c.bf16 %v8136_v14, %v8136_v14 }
0x1b97   :  { %v8157_v4 = vpop.f32.mrf.mxu1 }
0x1b98   :  { %v8498_v20 = vrot.slane %v8157_v4, 7  ;;  %v8288_v49 = vpack.c.bf16 %v8157_v4, %v8157_v4  ;;  %v8319_v61 = vunpack.c.l.b16 %v8287_v13  ;;  %v14146_v13 = vld [vmem:[%s20647_s10 + $0x50] sm:$0xf0] }
0x1b9a   :  { %v8499_v16 = vsel %vm418_vm0, %v8498_v20, %v8136_v14  ;;  %v8320_v54 = vunpack.c.l.b16 %v8288_v49 }
0x1b9c   :  { %v8327_v22 = vrot.slane %v8320_v54, 7 }
0x1b9d   :  { %v8138_v60 = vpop.f32.mrf.mxu0  ;;  %v8178_v1 = vpop.f32.mrf.mxu2 }
0x1b9e   :  { %v8500_v36 = vrot.slane %v8178_v1, 6  ;;  %v8289_v52 = vpack.c.bf16 %v8178_v1, %v8178_v1  ;;  %v8328_v14 = vsel %vm418_vm0, %v8327_v22, %v8319_v61  ;;  %v12970_v22 = vld [vmem:[%s20647_s10 + $0x98] sm:$0xf]  ;;  %v13058_v61 = vld [vmem:[%s20648_s9 + $0x90] sm:$0xf] }
0x1b9f   :  { %v8159_v46 = vpop.f32.mrf.mxu1  ;;  %v8199_v62 = vpop.f32.mrf.mxu3 }
0x1ba0   :  { %v8501_v50 = vsel %vm420_vm1, %v8500_v36, %v8499_v16  ;;  %v8502_v8 = vrot.slane %v8199_v62, 5  ;;  %v8290_v26 = vpack.c.bf16 %v8199_v62, %v8199_v62  ;;  %v8321_v7 = vunpack.c.l.b16 %v8289_v52  ;;  %v12938_v36 = vld [vmem:[%s20647_s10 + $0x60] sm:$0xf]  ;;  %v14148_v52 = vld [vmem:[%s20647_s10 + $0x64] sm:$0xf] }
0x1ba1   :  { %v12939_v45 = vor.u32 %v14149_v44, %v12938_v36  ;;  %v12940_v46 = vld [vmem:[%s20647_s10 + $0x6c] sm:$0xf0]  ;;  %v13022_v36 = vld [vmem:[%s20648_s9 + $0x48] sm:$0xf]  ;;  %v14122_v44 = vld [vmem:[%s20648_s9 + $0x50] sm:$0xf0] }
0x1ba2   :  { %v8503_v55 = vsel %vm422_vm2, %v8502_v8, %v8501_v50  ;;  %v8322_v5 = vunpack.c.l.b16 %v8290_v26  ;;  %v8329_v63 = vrot.slane %v8321_v7, 6  ;;  %v12982_v62 = vld [vmem:[%s20647_s10 + $0xb0] sm:$0xf]  ;;  %v12943_v50 = vor.u32 %v14148_v52, %v12940_v46  ;;  %v14159_v8 = vld [vmem:[%s20647_s10 + $0xb8] sm:$0xf0] }
0x1ba3   :  { %8711 = vmatpush.bf16.msrb.mxu2 %v12939_v45  ;;  %v12983_v54 = vor.u32 %v14159_v8, %v12982_v62  ;;  %v13071_v26 = vor.u32 %v14134_v57, %v13070_v3  ;;  %v14145_v7 = vld [vmem:[%s20647_s10 + $0x4c] sm:$0xf]  ;;  %v13023_v52 = vor.u32 %v14122_v44, %v13022_v36  ;;  %v13072_v46 = vld [vmem:[%s20648_s9 + $0xb4] sm:$0xf0]  ;;  %v13078_v62 = vld [vmem:[%s20648_s9 + $0xb0] sm:$0xf] }
0x1ba4   :  { %v8331_v10 = vrot.slane %v8322_v5, 5  ;;  %v8330_v4 = vsel %vm420_vm1, %v8329_v63, %v8328_v14  ;;  %8724 = vmatpush.bf16.msrb.mxu3 %v12943_v50  ;;  %v14156_v5 = vld [vmem:[%s20647_s10 + $0xa0] sm:$0xf0]  ;;  %v14131_v63 = vld [vmem:[%s20648_s9 + $0x98] sm:$0xf0] }
0x1ba5   :  { %v8180_v58 = vpop.f32.mrf.mxu2  ;;  %v8220_v12 = vpop.f32.mrf.mxu0  ;;  %8734 = vmatpush.bf16.msra.mxu0 %v12983_v54  ;;  %8875 = vmatpush.bf16.msra.mxu1 %v13071_v26  ;;  %v12958_v14 = vld [vmem:[%s20647_s10 + $0x80] sm:$0xf]  ;;  %v14133_v45 = vld [vmem:[%s20648_s9 + $0xac] sm:$0xf]  ;;  %v14135_v50 = vld [vmem:[%s20648_s9 + $0xb8] sm:$0xf0] }
0x1ba6   :  { %v8291_v27 = vpack.c.bf16 %v8220_v12, %v8220_v12  ;;  %v8504_v48 = vrot.slane %v8220_v12, 4  ;;  %v8332_v28 = vsel %vm422_vm2, %v8331_v10, %v8330_v4  ;;  %v12928_v12 = vld [vmem:[%s20647_s10 + $0x54] sm:$0xf0]  ;;  %v14153_v10 = vld [vmem:[%s20647_s10 + $0x88] sm:$0xf0]  ;;  %v13075_v8 = vor.u32 %v14133_v45, %v13072_v46 }
0x1ba7   :  { %v8201_v18 = vpop.f32.mrf.mxu3  ;;  %v8241_v0 = vpop.f32.mrf.mxu1  ;;  %v12959_v4 = vor.u32 %v14153_v10, %v12958_v14  ;;  %v13079_v3 = vor.u32 %v14135_v50, %v13078_v62  ;;  %v12922_v57 = vld [vmem:[%s20647_s10 + $0x38] sm:$0xf]  ;;  %v14144_v54 = vld [vmem:[%s20647_s10 + $0x40] sm:$0xf0]  ;;  %v13010_v26 = vld [vmem:[%s20648_s9 + $0x30] sm:$0xf] }
0x1ba8   :  { %v8323_v24 = vunpack.c.l.b16 %v8291_v27  ;;  %v8505_v30 = vsel %vm424_vm3, %v8504_v48, %v8503_v55  ;;  %v8292_v51 = vpack.c.bf16 %v8241_v0, %v8241_v0  ;;  %v8506_v9 = vrot.slane %v8241_v0, 3  ;;  %v12926_v55 = vld [vmem:[%s20647_s10 + $0x48] sm:$0xf]  ;;  %v12914_v0 = vld [vmem:[%s20647_s10 + $0x30] sm:$0xf] }
0x1ba9   :  { %v12927_v58 = vor.u32 %v14146_v13, %v12926_v55  ;;  %v12931_v27 = vor.u32 %v14145_v7, %v12928_v12  ;;  %v12971_v48 = vor.u32 %v14156_v5, %v12970_v22  ;;  %v13059_v18 = vor.u32 %v14131_v63, %v13058_v61  ;;  %v14119_v13 = vld [vmem:[%s20648_s9 + $0x38] sm:$0xf0]  ;;  %v14130_v7 = vld [vmem:[%s20648_s9 + $0x94] sm:$0xf]  ;;  %v12680_v12 = vld [vmem:[%s20649_s2 + $0x60] sm:$0xff] }
0x1baa   :  { %v8507_v11 = vsel %vm426_vm4, %v8506_v9, %v8505_v30  ;;  %v8333_v15 = vrot.slane %v8323_v24, 4  ;;  %v8324_v17 = vunpack.c.l.b16 %v8292_v51  ;;  %v14143_v24 = vld [vmem:[%s20647_s10 + $0x38] sm:$0xf0]  ;;  %v14142_v30 = vld [vmem:[%s20647_s10 + $0x34] sm:$0xf]  ;;  %v12923_v55 = vor.u32 %v14144_v54, %v12922_v57  ;;  %v12681_v22 = vld [vmem:[%s20649_s2 + $0x68] sm:$0xff] }
0x1bab   :  { %8712 = vmatpush.bf16.msrb.mxu2 %v12927_v58  ;;  %8725 = vmatpush.bf16.msrb.mxu3 %v12931_v27  ;;  %v12915_v51 = vor.u32 %v14143_v24, %v12914_v0  ;;  %v12916_v9 = vld [vmem:[%s20647_s10 + $0x3c] sm:$0xf0]  ;;  %v13011_v5 = vor.u32 %v14119_v13, %v13010_v26  ;;  %v14132_v61 = vld [vmem:[%s20648_s9 + $0xa0] sm:$0xf0]  ;;  %v14141_v0 = vld [vmem:[%s20647_s10 + $0x28] sm:$0xf0] }
0x1bac   :  { %v8334_v42 = vsel %vm424_vm3, %v8333_v15, %v8332_v28  ;;  %v8335_v34 = vrot.slane %v8324_v17, 3  ;;  %8735 = vmatpush.bf16.msra.mxu0 %v12971_v48  ;;  %8876 = vmatpush.bf16.msra.mxu1 %v13059_v18  ;;  %v13046_v15 = vld [vmem:[%s20648_s9 + $0x78] sm:$0xf]  ;;  %v14128_v17 = vld [vmem:[%s20648_s9 + $0x80] sm:$0xf0] }
0x1bad   :  { %v8222_v53 = vpop.f32.mrf.mxu0  ;;  %v8262_v20 = vpop.f32.mrf.mxu2  ;;  %v14140_v28 = vld [vmem:[%s20647_s10 + $0x20] sm:$0xf0]  ;;  %v13060_v58 = vld [vmem:[%s20648_s9 + $0x9c] sm:$0xf0]  ;;  %v13066_v48 = vld [vmem:[%s20648_s9 + $0x98] sm:$0xf] }
0x1bae   :  { %v8293_v43 = vpack.c.bf16 %v8262_v20, %v8262_v20  ;;  %v8508_v6 = vrot.slane %v8262_v20, 2  ;;  %v8336_v19 = vsel %vm426_vm4, %v8335_v34, %v8334_v42  ;;  %v13047_v53 = vor.u32 %v14128_v17, %v13046_v15  ;;  %v12902_v20 = vld [vmem:[%s20647_s10 + $0x18] sm:$0xf]  ;;  %v12904_v42 = vld [vmem:[%s20647_s10 + $0x24] sm:$0xf0] }
0x1baf   :  { %v8243_v31 = vpop.f32.mrf.mxu1  ;;  %v8283_v16 = vpop.f32.mrf.mxu3  ;;  %8713 = vmatpush.bf16.msrb.mxu2 %v12915_v51  ;;  %v12946_v34 = vld [vmem:[%s20647_s10 + $0x68] sm:$0xf]  ;;  %v13063_v27 = vor.u32 %v14130_v7, %v13060_v58  ;;  %v12910_v63 = vld [vmem:[%s20647_s10 + $0x20] sm:$0xf]  ;;  %v13067_v18 = vor.u32 %v14132_v61, %v13066_v48  ;;  %v12998_v24 = vld [vmem:[%s20648_s9 + $0x18] sm:$0xf] }
0x1bb0   :  { %v8325_v32 = vunpack.c.l.b16 %v8293_v43  ;;  %v8509_v25 = vsel %vm428_vm5, %v8508_v6, %v8507_v11  ;;  %v8294_v35 = vpack.c.bf16 %v8283_v16, %v8283_v16  ;;  %v8510_v37 = vrot.slane %v8283_v16, 1  ;;  %v14139_v43 = vld [vmem:[%s20647_s10 + $0x1c] sm:$0xf]  ;;  %8736 = vmatpush.bf16.msra.mxu0 %v12959_v4  ;;  %8877 = vmatpush.bf16.msra.mxu1 %v13047_v53  ;;  %v14150_v31 = vld [vmem:[%s20647_s10 + $0x70] sm:$0xf0] }
0x1bb1   :  { %v12919_v11 = vor.u32 %v14142_v30, %v12916_v9  ;;  %v12903_v6 = vor.u32 %v14140_v28, %v12902_v20  ;;  %v12907_v16 = vor.u32 %v14139_v43, %v12904_v42  ;;  %v14116_v30 = vld [vmem:[%s20648_s9 + $0x20] sm:$0xf0]  ;;  %v12911_v51 = vor.u32 %v14141_v0, %v12910_v63  ;;  %v14127_v14 = vld [vmem:[%s20648_s9 + $0x7c] sm:$0xf]  ;;  %v13048_v10 = vld [vmem:[%s20648_s9 + $0x84] sm:$0xf0] }
0x1bb2   :  { %v8337_v47 = vrot.slane %v8325_v32, 2  ;;  %v8326_v39 = vunpack.c.l.b16 %v8294_v35  ;;  %v19627_v40 = vsel %vm430_vm6, %v8510_v37, %v8509_v25  ;;  %v12947_v32 = vor.u32 %v14150_v31, %v12946_v34  ;;  %v13034_v25 = vld [vmem:[%s20648_s9 + $0x60] sm:$0xf]  ;;  %v14125_v35 = vld [vmem:[%s20648_s9 + $0x68] sm:$0xf0] }
0x1bb3   :  { %8726 = vmatpush.bf16.msrb.mxu3 %v12919_v11  ;;  %8714 = vmatpush.bf16.msrb.mxu2 %v12903_v6  ;;  %v13035_v37 = vor.u32 %v14125_v35, %v13034_v25  ;;  %v12999_v9 = vor.u32 %v14116_v30, %v12998_v24  ;;  %v13054_v11 = vld [vmem:[%s20648_s9 + $0x80] sm:$0xf]  ;;  %v13051_v4 = vor.u32 %v14127_v14, %v13048_v10  ;;  %v14129_v15 = vld [vmem:[%s20648_s9 + $0x88] sm:$0xf0]  ;;  %v12898_v17 = vld [vmem:[%s20647_s10 + $0x8] sm:$0xf] }
0x1bb4   :  { %v8338_v60 = vsel %vm428_vm5, %v8337_v47, %v8336_v19  ;;  %v8339_v1 = vrot.slane %v8326_v39, 1  ;;  %v12890_v47 = vld [vmem:[%s20647_s10] sm:$0xf]  ;;  %v14137_v39 = vld [vmem:[%s20647_s10 + $0x8] sm:$0xf0]  ;;  %8737 = vmatpush.bf16.msra.mxu0 %v12947_v32  ;;  %v13055_v43 = vor.u32 %v14129_v15, %v13054_v11 }
0x1bb5   :  { %v8264_v41 = vpop.f32.mrf.mxu2  ;;  %v14136_v19 = vld [vmem:[%s20647_s10 + $0x4] sm:$0xf]  ;;  %8878 = vmatpush.bf16.msra.mxu1 %v13035_v37  ;;  %v14138_v53 = vld [vmem:[%s20647_s10 + $0x10] sm:$0xf0]  ;;  %v12986_v6 = vld [vmem:[%s20648_s9] sm:$0xf] }
0x1bb6   :  { %v8340_v2 = vsel %vm430_vm6, %v8339_v1, %v8338_v60  ;;  %v12891_v60 = vor.u32 %v14137_v39, %v12890_v47  ;;  %v12892_v1 = vld [vmem:[%s20647_s10 + $0xc] sm:$0xf0]  ;;  %v14113_v42 = vld [vmem:[%s20648_s9 + $0x8] sm:$0xf0]  ;;  %v14124_v34 = vld [vmem:[%s20648_s9 + $0x64] sm:$0xf]  ;;  %v12899_v37 = vor.u32 %v14138_v53, %v12898_v17 }
0x1bb7   :  { %v8341_v59 = vpack.c.b16 %v8340_v2, %v8340_v2  ;;  %v8285_v49 = vpop.f32.mrf.mxu3  ;;  %8727 = vmatpush.bf16.msrb.mxu3 %v12907_v16  ;;  %v12934_v41 = vld [vmem:[%s20647_s10 + $0x50] sm:$0xf]  ;;  %v14147_v2 = vld [vmem:[%s20647_s10 + $0x58] sm:$0xf0]  ;;  %v13042_v25 = vld [vmem:[%s20648_s9 + $0x68] sm:$0xf]  ;;  %v12987_v47 = vor.u32 %v14113_v42, %v12986_v6 }
0x1bb8   :  { %v12935_v49 = vor.u32 %v14147_v2, %v12934_v41  ;;  %8715 = vmatpush.bf16.msrb.mxu2 %v12891_v60  ;;  %v13036_v32 = vld [vmem:[%s20648_s9 + $0x6c] sm:$0xf0]  ;;  %v14126_v35 = vld [vmem:[%s20648_s9 + $0x70] sm:$0xf0]  ;;  %v14121_v41 = vld [vmem:[%s20648_s9 + $0x4c] sm:$0xf] }
0x1bb9   :  { %8431 = vmatmul.bf16.vlgmr.msrb.gmra.mxu0 %v8341_v59  ;;  %8444 = vmatmul.bf16.vlgmr.msrb.gmra.mxu1 %v8341_v59  ;;  %v12895_v59 = vor.u32 %v14136_v19, %v12892_v1  ;;  %v13039_v60 = vor.u32 %v14124_v34, %v13036_v32  ;;  %v13043_v1 = vor.u32 %v14126_v35, %v13042_v25  ;;  %v13024_v2 = vld [vmem:[%s20648_s9 + $0x54] sm:$0xf0]  ;;  %v14118_v45 = vld [vmem:[%s20648_s9 + $0x34] sm:$0xf]  ;;  %v13012_v62 = vld [vmem:[%s20648_s9 + $0x3c] sm:$0xf0] }
0x1bba   :  { %8738 = vmatpush.bf16.msra.mxu0 %v12935_v49  ;;  %8879 = vmatpush.bf16.msra.mxu1 %v13023_v52  ;;  %v14123_v49 = vld [vmem:[%s20648_s9 + $0x58] sm:$0xf0]  ;;  %v13027_v36 = vor.u32 %v14121_v41, %v13024_v2  ;;  %v13018_v50 = vld [vmem:[%s20648_s9 + $0x38] sm:$0xf]  ;;  %v13015_v57 = vor.u32 %v14118_v45, %v13012_v62  ;;  %v13006_v58 = vld [vmem:[%s20648_s9 + $0x20] sm:$0xf] }
0x1bbb   :  { %8728 = vmatpush.bf16.msrb.mxu3 %v12895_v59  ;;  %v13030_v59 = vld [vmem:[%s20648_s9 + $0x50] sm:$0xf]  ;;  %v14115_v26 = vld [vmem:[%s20648_s9 + $0x1c] sm:$0xf]  ;;  %v14112_v48 = vld [vmem:[%s20648_s9 + $0x4] sm:$0xf] }
0x1bbc   :  { %8888 = vmatpush.bf16.msra.mxu2 %v13075_v8  ;;  %v13031_v44 = vor.u32 %v14123_v49, %v13030_v59  ;;  %v14120_v8 = vld [vmem:[%s20648_s9 + $0x40] sm:$0xf0]  ;;  %v12988_v61 = vld [vmem:[%s20648_s9 + $0xc] sm:$0xf0]  ;;  %v12994_v63 = vld [vmem:[%s20648_s9 + $0x8] sm:$0xf] }
0x1bbd   :  { %v13019_v54 = vor.u32 %v14120_v8, %v13018_v50  ;;  %v12991_v0 = vor.u32 %v14112_v48, %v12988_v61  ;;  %v12678_v34 = vld [vmem:[%s20650_s0 + $0x30] sm:$0xff]  ;;  %v19899_v41 = vld [vmem:[%s20651_s12] sm:$0x7]  ;;  %v14188_v49 = vld [vmem:[%s20640_s6 + $0xe4] sm:$0xf] }
0x1bbe   :  { %8739 = vmatpush.bf16.msra.mxu0 %v12923_v55  ;;  %8880 = vmatpush.bf16.msra.mxu1 %v13011_v5  ;;  %v13000_v55 = vld [vmem:[%s20648_s9 + $0x24] sm:$0xf0]  ;;  %v13201_v2 = vld [vmem:[%s20640_s6 + $0xe0] sm:$0xf]  ;;  %v14190_v59 = vld [vmem:[%s20640_s6 + $0xec] sm:$0xf0] }
0x1bbf   :  { %8901 = vmatpush.bf16.msra.mxu3 %v13079_v3  ;;  %v13003_v5 = vor.u32 %v14115_v26, %v13000_v55  ;;  %v13209_v45 = vld [vmem:[%s20640_s6 + $0xe8] sm:$0xf]  ;;  %v14187_v61 = vld [vmem:[%s20640_s6 + $0xd4] sm:$0xf0] }
0x1bc0   :  { %8889 = vmatpush.bf16.msra.mxu2 %v13063_v27  ;;  %v13193_v48 = vld [vmem:[%s20640_s6 + $0xc8] sm:$0xf] }
0x1bc2   :  { %8740 = vmatpush.bf16.msra.mxu0 %v12911_v51  ;;  %8881 = vmatpush.bf16.msra.mxu1 %v12999_v9 }
0x1bc3   :  { %8902 = vmatpush.bf16.msra.mxu3 %v13067_v18  ;;  %v14114_v18 = vld [vmem:[%s20648_s9 + $0x10] sm:$0xf0] }
0x1bc4   :  { %8890 = vmatpush.bf16.msra.mxu2 %v13051_v4  ;;  %v12995_v24 = vor.u32 %v14114_v18, %v12994_v63 }
0x1bc6   :  { %8741 = vmatpush.bf16.msra.mxu0 %v12899_v37  ;;  %8882 = vmatpush.bf16.msra.mxu1 %v12987_v47 }
0x1bc7   :  { %8903 = vmatpush.bf16.msra.mxu3 %v13055_v43 }
0x1bc8   :  { %8891 = vmatpush.bf16.msra.mxu2 %v13039_v60 }
0x1bcb   :  { %8904 = vmatpush.bf16.msra.mxu3 %v13043_v1 }
0x1bcc   :  { %8892 = vmatpush.bf16.msra.mxu2 %v13027_v36  ;;  %v13202_v36 = vor.u32 %v14190_v59, %v13201_v2 }
0x1bce   :  { %9174 = vmatpush.bf16.msrb.mxu0 %v13202_v36  ;;  %v13163_v36 = vld [vmem:[%s20640_s6 + $0x98] sm:$0xf0] }
0x1bcf   :  { %8905 = vmatpush.bf16.msra.mxu3 %v13031_v44  ;;  %v13203_v44 = vld [vmem:[%s20640_s6 + $0xf0] sm:$0xf0] }
0x1bd0   :  { %8893 = vmatpush.bf16.msra.mxu2 %v13015_v57  ;;  %v13206_v50 = vor.u32 %v14188_v49, %v13203_v44  ;;  %v13211_v57 = vld [vmem:[%s20640_s6 + $0xf8] sm:$0xf0]  ;;  %v14177_v49 = vld [vmem:[%s20640_s6 + $0x8c] sm:$0xf] }
0x1bd1   :  { %v13166_v44 = vor.u32 %v14177_v49, %v13163_v36  ;;  %v13091_v36 = vld [vmem:[%s20640_s6 + $0x10] sm:$0xf0] }
0x1bd2   :  { %9187 = vmatpush.bf16.msrb.mxu1 %v13206_v50  ;;  %v13139_v50 = vld [vmem:[%s20640_s6 + $0x70] sm:$0xf0] }
0x1bd3   :  { %8906 = vmatpush.bf16.msra.mxu3 %v13019_v54 }
0x1bd4   :  { %8894 = vmatpush.bf16.msra.mxu2 %v13003_v5 }
0x1bd8   :  { %8895 = vmatpush.bf16.msra.mxu2 %v12991_v0 }
0x1c36   :  { %v8432_v20 = vpop.f32.mrf.mxu0  ;;  %v8445_v28 = vpop.f32.mrf.mxu1 }
0x1c37   :  { %v8449_v31 = vadd.f32 %v12680_v12, %v8432_v20  ;;  %v8450_v16 = vadd.f32 %v12681_v22, %v8445_v28  ;;  %v14117_v12 = vld [vmem:[%s20648_s9 + $0x28] sm:$0xf0] }
0x1c38   :  { %v13007_v27 = vor.u32 %v14117_v12, %v13006_v58  ;;  %v13185_v58 = vld [vmem:[%s20640_s6 + $0xc0] sm:$0xf]  ;;  %v14186_v12 = vld [vmem:[%s20640_s6 + $0xcc] sm:$0xf0] }
0x1c39   :  { %v12886_v39 = vmul.f32 -1.442695, %v8449_v31  ;;  %v12887_v19 = vmul.f32 -1.442695, %v8450_v16  ;;  %v13186_v5 = vor.u32 %v14186_v12, %v13185_v58  ;;  %v14173_v58 = vld [vmem:[%s20640_s6 + $0x6c] sm:$0xf] }
0x1c3a   :  { %8907 = vmatpush.bf16.msra.mxu3 %v13007_v27  ;;  %v13187_v27 = vld [vmem:[%s20640_s6 + $0xd0] sm:$0xf0]  ;;  %v13147_v12 = vld [vmem:[%s20640_s6 + $0x78] sm:$0xf0] }
0x1c3b   :  { %14666 = vpow2.f32 %v12886_v39  ;;  %9175 = vmatpush.bf16.msrb.mxu0 %v13186_v5 }
0x1c3c   :  { %14668 = vpow2.f32 %v12887_v19 }
0x1c3e   :  { %v8434_v52 = vpop.f32.mrf.mxu0  ;;  %v8447_v46 = vpop.f32.mrf.mxu1  ;;  %8908 = vmatpush.bf16.msra.mxu3 %v12995_v24 }
0x1c3f   :  { %v14191_v52 = vld [vmem:[%s20640_s6 + $0xf4] sm:$0xf0]  ;;  %v7955_v46 = vperm.slane %v19899_v41, 0 }
0x1c40   :  { %v13210_v8 = vor.u32 %v14191_v52, %v13209_v45  ;;  %v13137_v45 = vld [vmem:[%s20640_s6 + $0x60] sm:$0xf]  ;;  %v14174_v52 = vld [vmem:[%s20640_s6 + $0x6c] sm:$0xf0] }
0x1c41   :  { %v14667_v3 = vpop.eup %14666  ;;  %v7961_v63 = vadd.f32 %v7955_v46, %v19405_v29  ;;  %v13169_v29 = vld [vmem:[%s20640_s6 + $0xa0] sm:$0xf]  ;;  %v14172_v46 = vld [vmem:[%s20640_s6 + $0x64] sm:$0xf] }
0x1c42   :  { %v14669_v13 = vpop.eup %14668  ;;  %v8457_v7 = vadd.f32 1.0, %v14667_v3  ;;  %v14189_v3 = vld [vmem:[%s20640_s6 + $0xec] sm:$0xf] }
0x1c43   :  { %v8458_v22 = vadd.f32 1.0, %v14669_v13  ;;  %v13214_v55 = vor.u32 %v14189_v3, %v13211_v57  ;;  %v14175_v3 = vld [vmem:[%s20640_s6 + $0x74] sm:$0xf0] }
0x1c44   :  { %14670 = vrcp.f32 %v8457_v7  ;;  %v8470_v11 = vand.u32 2147483648, %v8457_v7  ;;  %v8468_v17 = vand.u32 2147483647, %v8457_v7  ;;  %vm8464_vm12 = vweird.f32 %v8457_v7 }
0x1c45   :  { %14672 = vrcp.f32 %v8458_v22  ;;  %v8485_v53 = vand.u32 2147483648, %v8458_v22  ;;  %v8483_v28 = vand.u32 2147483647, %v8458_v22  ;;  %vm8479_vm14 = vweird.f32 %v8458_v22 }
0x1c46   :  { %v8471_v6 = vor.u32 1.1754944e-38, %v8470_v11  ;;  %vm8469_vm8 = vcmp.eq.f32.partialorder %v8468_v17, 8.507059e+37  ;;  %v14182_v11 = vld [vmem:[%s20640_s6 + $0xac] sm:$0xf0]  ;;  %v13171_v17 = vld [vmem:[%s20640_s6 + $0xb0] sm:$0xf0] }
0x1c47   :  { %v8486_v31 = vor.u32 1.1754944e-38, %v8485_v53  ;;  %vm8484_vm9 = vcmp.eq.f32.partialorder %v8483_v28, 8.507059e+37  ;;  %v13177_v53 = vld [vmem:[%s20640_s6 + $0xa8] sm:$0xf] }
0x1c4a   :  { %v14671_v30 = vpop.eup %14670 }
0x1c4b   :  { %v14673_v51 = vpop.eup %14672  ;;  %v8460_v9 = vmul.f32 %v14671_v30, %v8457_v7  ;;  %vm8465_vm10 = vweird.f32 %v14671_v30 }
0x1c4c   :  { %v8475_v14 = vmul.f32 %v14673_v51, %v8458_v22  ;;  %vm8480_vm11 = vweird.f32 %v14673_v51  ;;  %vm8466_vm13 = vmor %vm8464_vm12, %vm8465_vm10  ;;  %v14184_v22 = vld [vmem:[%s20640_s6 + $0xc4] sm:$0xf] }
0x1c4d   :  { %v8461_v10 = vsub.f32 1.0, %v8460_v9  ;;  %vm8481_vm15 = vmor %vm8479_vm14, %vm8480_vm11  ;;  %v13190_v24 = vor.u32 %v14184_v22, %v13187_v27  ;;  %v13195_v9 = vld [vmem:[%s20640_s6 + $0xd8] sm:$0xf0] }
0x1c4e   :  { %v8476_v4 = vsub.f32 1.0, %v8475_v14 }
0x1c4f   :  { %v8462_v15 = vmul.f32 %v14671_v30, %v8461_v10  ;;  %9188 = vmatpush.bf16.msrb.mxu1 %v13190_v24 }
0x1c50   :  { %v8477_v20 = vmul.f32 %v14673_v51, %v8476_v4  ;;  %v14180_v4 = vld [vmem:[%s20640_s6 + $0xa4] sm:$0xf] }
0x1c51   :  { %v8463_v43 = vadd.f32 %v14671_v30, %v8462_v15  ;;  %v13170_v15 = vor.u32 %v14182_v11, %v13169_v29  ;;  %v14169_v29 = vld [vmem:[%s20640_s6 + $0x4c] sm:$0xf] }
0x1c52   :  { %v8478_v42 = vadd.f32 %v14673_v51, %v8477_v20  ;;  %v14183_v20 = vld [vmem:[%s20640_s6 + $0xb4] sm:$0xf0] }
0x1c53   :  { %v8467_v16 = vsel %vm8466_vm13, %v14671_v30, %v8463_v43  ;;  %v13194_v30 = vor.u32 %v14187_v61, %v13193_v48  ;;  %v13174_v43 = vor.u32 %v14180_v4, %v13171_v17  ;;  %9176 = vmatpush.bf16.msrb.mxu0 %v13170_v15  ;;  %v13150_v48 = vor.u32 %v14173_v58, %v13147_v12  ;;  %v13105_v17 = vld [vmem:[%s20640_s6 + $0x20] sm:$0xf] }
0x1c54   :  { %v8482_v32 = vsel %vm8481_vm15, %v14673_v51, %v8478_v42  ;;  %v8472_v25 = vsel %vm8469_vm8, %v8471_v6, %v8467_v16  ;;  %v14185_v51 = vld [vmem:[%s20640_s6 + $0xcc] sm:$0xf]  ;;  %v13178_v6 = vor.u32 %v14183_v20, %v13177_v53  ;;  %v14166_v53 = vld [vmem:[%s20640_s6 + $0x2c] sm:$0xf0]  ;;  %v14164_v20 = vld [vmem:[%s20640_s6 + $0x24] sm:$0xf] }
0x1c55   :  { %v8487_v35 = vsel %vm8484_vm9, %v8486_v31, %v8482_v32  ;;  %v8489_v37 = vmul.f32 %v12678_v34, %v8472_v25  ;;  %v13198_v14 = vor.u32 %v14185_v51, %v13195_v9  ;;  %v14181_v42 = vld [vmem:[%s20640_s6 + $0xac] sm:$0xf]  ;;  %v13179_v34 = vld [vmem:[%s20640_s6 + $0xb8] sm:$0xf0]  ;;  %9189 = vmatpush.bf16.msrb.mxu1 %v13174_v43  ;;  %v13153_v25 = vld [vmem:[%s20640_s6 + $0x80] sm:$0xf] }
0x1c56   :  { %v8513_v47 = vmul.f32 %v19627_v40, %v8487_v35  ;;  %v19904_v40 = vld [vmem:[%s20652_s11] sm:$0x7]  ;;  %v13182_v32 = vor.u32 %v14181_v42, %v13179_v34  ;;  %v14178_v35 = vld [vmem:[%s20640_s6 + $0x8c] sm:$0xf0]  ;;  %v13107_v43 = vld [vmem:[%s20640_s6 + $0x30] sm:$0xf0] }
0x1c57   :  { %v8514_v39 = vpack.c.bf16 %v8489_v37, %v8489_v37  ;;  %v8916_v62 = vperm.slane %v19904_v40, 0  ;;  %v14176_v37 = vld [vmem:[%s20640_s6 + $0x84] sm:$0xf]  ;;  %v14167_v42 = vld [vmem:[%s20640_s6 + $0x34] sm:$0xf0] }
0x1c58   :  { %v8547_v19 = vpack.c.bf16 %v8513_v47, %v8513_v47  ;;  %v13154_v47 = vor.u32 %v14178_v35, %v13153_v25  ;;  %v13115_v25 = vld [vmem:[%s20640_s6 + $0x38] sm:$0xf0] }
0x1c59   :  { %8883 = vmatmul.bf16.vlgmr.msra.gmra.mxu1 %v8514_v39 }
0x1c5a   :  { %8716 = vmatmul.bf16.vlgmr.msrb.gmra.mxu2 %v8547_v19  ;;  %8729 = vmatmul.bf16.vlgmr.msrb.gmra.mxu3 %v8547_v19 }
0x1c5b   :  { %8742 = vmatmul.bf16.vlgmr.msra.gmra.mxu0 %v8547_v19  ;;  %9200 = vmatpush.bf16.msrb.mxu2 %v13210_v8  ;;  %v13161_v19 = vld [vmem:[%s20640_s6 + $0x88] sm:$0xf] }
0x1c5c   :  { %9213 = vmatpush.bf16.msrb.mxu3 %v13214_v55  ;;  %9177 = vmatpush.bf16.msrb.mxu0 %v13154_v47  ;;  %v13145_v8 = vld [vmem:[%s20640_s6 + $0x68] sm:$0xf]  ;;  %v8917_v55 = vperm.slane %v19904_v40, 1 }
0x1c5f   :  { %9201 = vmatpush.bf16.msrb.mxu2 %v13194_v30 }
0x1c60   :  { %9214 = vmatpush.bf16.msrb.mxu3 %v13198_v14  ;;  %v13129_v14 = vld [vmem:[%s20640_s6 + $0x48] sm:$0xf] }
0x1c63   :  { %9202 = vmatpush.bf16.msrb.mxu2 %v13178_v6  ;;  %v13113_v6 = vld [vmem:[%s20640_s6 + $0x28] sm:$0xf] }
0x1c64   :  { %9215 = vmatpush.bf16.msrb.mxu3 %v13182_v32  ;;  %v14165_v32 = vld [vmem:[%s20640_s6 + $0x2c] sm:$0xf] }
0x1c68   :  { %9216 = vmatpush.bf16.msrb.mxu3 %v13166_v44  ;;  %v13097_v44 = vld [vmem:[%s20640_s6 + $0x8] sm:$0xf] }
0x1c6a   :  { %8896 = vmatmul.bf16.vlgmr.msra.gmra.mxu2 %v8514_v39  ;;  %8909 = vmatmul.bf16.vlgmr.msra.gmra.mxu3 %v8514_v39  ;;  %v13155_v39 = vld [vmem:[%s20640_s6 + $0x90] sm:$0xf0] }
0x1c6b   :  { %v13158_v2 = vor.u32 %v14176_v37, %v13155_v39  ;;  %v13118_v39 = vor.u32 %v14165_v32, %v13115_v25 }
0x1c6c   :  { %9217 = vmatpush.bf16.msrb.mxu3 %v13150_v48 }
0x1c6d   :  { %9190 = vmatpush.bf16.msrb.mxu1 %v13158_v2  ;;  %v14162_v2 = vld [vmem:[%s20640_s6 + $0xc] sm:$0xf0] }
0x1cd6   :  { %v8884_v60 = vpop.f32.mrf.mxu1 }
0x1cd8   :  { %v19894_v1 = vpop.f32.mrf.mxu0 }
0x1cdd   :  { %v8717_v54 = vpop.f32.mrf.mxu2  ;;  %v19932_v26 = vpop.f32.mrf.mxu3 }
0x1cde   :  { %v8885_v13 = vadd.f32 %v8884_v60, %v8717_v54  ;;  %v8886_v7 = vpop.f32.mrf.mxu1  ;;  %v14179_v60 = vld [vmem:[%s20640_s6 + $0x94] sm:$0xf0]  ;;  %v7956_v54 = vperm.slane %v19899_v41, 1 }
0x1cdf   :  { %v13162_v59 = vor.u32 %v14179_v60, %v13161_v19  ;;  %v13146_v7 = vor.u32 %v14175_v3, %v13145_v8  ;;  %v13089_v60 = vld [vmem:[%s20640_s6] sm:$0xf] }
0x1ce0   :  { %v8922_v18 = vadd.f32 %v8916_v62, %v8885_v13  ;;  %v8745_v0 = vpop.f32.mrf.mxu0  ;;  %v13138_v62 = vor.u32 %v14174_v52, %v13137_v45  ;;  %v13142_v13 = vor.u32 %v14172_v46, %v13139_v50  ;;  %v7962_v24 = vadd.f32 %v7956_v54, %v19410_v33  ;;  %v13131_v33 = vld [vmem:[%s20640_s6 + $0x58] sm:$0xf0]  ;;  %v14163_v46 = vld [vmem:[%s20640_s6 + $0x14] sm:$0xf0] }
0x1ce1   :  { %9203 = vmatpush.bf16.msrb.mxu2 %v13162_v59  ;;  %v14168_v0 = vld [vmem:[%s20640_s6 + $0x44] sm:$0xf]  ;;  %v13134_v15 = vor.u32 %v14169_v29, %v13131_v33  ;;  %v13090_v49 = vor.u32 %v14162_v2, %v13089_v60  ;;  %v7957_v50 = vperm.slane %v19899_v41, 2  ;;  %v13098_v3 = vor.u32 %v14163_v46, %v13097_v44 }
0x1ce2   :  { %v8925_v10 = vadd.f32 %v8922_v18, %v7961_v63  ;;  %9178 = vmatpush.bf16.msrb.mxu0 %v13138_v62  ;;  %9191 = vmatpush.bf16.msrb.mxu1 %v13142_v13  ;;  %v13121_v63 = vld [vmem:[%s20640_s6 + $0x40] sm:$0xf]  ;;  %v14170_v18 = vld [vmem:[%s20640_s6 + $0x4c] sm:$0xf0]  ;;  %v14160_v59 = vld [vmem:[%s20640_s6 + $0x4] sm:$0xf] }
0x1ce3   :  { %v13122_v51 = vor.u32 %v14170_v18, %v13121_v63  ;;  %9218 = vmatpush.bf16.msrb.mxu3 %v13134_v15  ;;  %v13094_v52 = vor.u32 %v14160_v59, %v13091_v36  ;;  %v14161_v62 = vld [vmem:[%s20640_s6 + $0xc] sm:$0xf] }
0x1ce4   :  { %v13080_v28 = vmul.f32 -1.442695, %v8925_v10  ;;  %v14171_v10 = vld [vmem:[%s20640_s6 + $0x54] sm:$0xf0] }
0x1ce5   :  { %v8719_v31 = vpop.f32.mrf.mxu2  ;;  %v8732_v16 = vpop.f32.mrf.mxu3  ;;  %9204 = vmatpush.bf16.msrb.mxu2 %v13146_v7  ;;  %v13130_v11 = vor.u32 %v14171_v10, %v13129_v14 }
0x1ce6   :  { %14674 = vpow2.f32 %v13080_v28  ;;  %9179 = vmatpush.bf16.msrb.mxu0 %v13122_v51  ;;  %v13106_v28 = vor.u32 %v14166_v53, %v13105_v17  ;;  %v13110_v31 = vor.u32 %v14164_v20, %v13107_v43  ;;  %v13114_v16 = vor.u32 %v14167_v42, %v13113_v6  ;;  %v13084_v20 = vld [vmem:[%s20642_s1 + $0x38] sm:$0xff]  ;;  %v14405_v43 = vld [vmem:[%s20643_s3 + $0x8] sm:$0xff]  }
0x1ce7   :  { %9219 = vmatpush.bf16.msrb.mxu3 %v13118_v39  ;;  %v14406_v39 = vld [vmem:[%s20643_s3 + $0x10] sm:$0xff]  }
0x1ce9   :  { %9205 = vmatpush.bf16.msrb.mxu2 %v13130_v11 }
0x1cea   :  { %9180 = vmatpush.bf16.msrb.mxu0 %v13106_v28  ;;  %v14369_v28 = vld [vmem:[%s20643_s3] sm:$0xff]  }
0x1ceb   :  { %v14371_v32 = vunpack.c.h.bf16 %v14369_v28 }
0x1cec   :  { %v14675_v57 = vpop.eup %14674 }
0x1ced   :  { %v20033_v22 = vadd.f32 1.0, %v14675_v57  ;;  %v8897_v5 = vpop.f32.mrf.mxu2  ;;  %v20035_v27 = vpop.f32.mrf.mxu3  ;;  %9206 = vmatpush.bf16.msrb.mxu2 %v13114_v16  ;;  %v13099_v57 = vld [vmem:[%s20640_s6 + $0x18] sm:$0xf0]  ;;  %v14374_v16 = vunpack.c.l.bf16 %v14405_v43 }
0x1cee   :  { %v8898_v61 = vadd.f32 %v8897_v5, %v19932_v26  ;;  %v13123_v26 = vld [vmem:[%s20640_s6 + $0x50] sm:$0xf0]  ;;  %9181 = vmatpush.bf16.msrb.mxu0 %v13090_v49  ;;  %v13102_v13 = vor.u32 %v14161_v62, %v13099_v57  ;;  %v7963_v5 = vadd.f32 %v7957_v50, %v19412_v23  ;;  %v8911_v18 = vadd.f32 %v20035_v27, %v19894_v1 }
0x1cef   :  { %14676 = vrcp.f32 %v20033_v22  ;;  %v13126_v9 = vor.u32 %v14168_v0, %v13123_v26  ;;  %v8941_v8 = vand.u32 2147483648, %v20033_v22  ;;  %vm8935_vm11 = vweird.f32 %v20033_v22 }
0x1cf0   :  { %v8923_v30 = vadd.f32 %v8917_v55, %v8898_v61  ;;  %v8939_v55 = vand.u32 2147483647, %v20033_v22  ;;  %9220 = vmatpush.bf16.msrb.mxu3 %v13102_v13  ;;  %v8918_v0 = vperm.slane %v19904_v40, 2 }
0x1cf1   :  { %9192 = vmatpush.bf16.msrb.mxu1 %v13126_v9  ;;  %9207 = vmatpush.bf16.msrb.mxu2 %v13098_v3  ;;  %v8942_v12 = vor.u32 1.1754944e-38, %v8941_v8 }
0x1cf2   :  { %v8945_v4 = vadd.f32 %v8923_v30, %v7962_v24  ;;  %vm8940_vm13 = vcmp.eq.f32.partialorder %v8939_v55, 8.507059e+37  ;;  %v8924_v24 = vadd.f32 %v8918_v0, %v8911_v18 }
0x1cf4   :  { %v13081_v34 = vmul.f32 -1.442695, %v8945_v4  ;;  %v14727_v4 = vld [vmem:[%s20653_s13 + $0x28] sm:$0xff] }
0x1cf5   :  { %v14677_v35 = vpop.eup %14676  ;;  %v8899_v37 = vpop.f32.mrf.mxu2  ;;  %9193 = vmatpush.bf16.msrb.mxu1 %v13110_v31  ;;  %v14370_v31 = vunpack.c.l.bf16 %v14369_v28 }
0x1cf6   :  { %v8912_v47 = vpop.f32.mrf.mxu3  ;;  %14678 = vpow2.f32 %v13081_v34  ;;  %v8931_v19 = vmul.f32 %v14677_v35, %v20033_v22  ;;  %vm8936_vm10 = vweird.f32 %v14677_v35 }
0x1cf7   :  { %vm8937_vm12 = vmor %vm8935_vm11, %vm8936_vm10  ;;  %vm20771_vm10 = vcmask 64512  }
0x1cf8   :  { %v8932_v45 = vsub.f32 1.0, %v8931_v19  ;;  %v14375_v19 = vunpack.c.h.bf16 %v14405_v43  ;;  %vm20772_vm11 = vmmov %vm20771_vm10 }
0x1cf9   :  { %9194 = vmatpush.bf16.msrb.mxu1 %v13094_v52 }
0x1cfa   :  { %v8933_v54 = vmul.f32 %v14677_v35, %v8932_v45  ;;  %v14379_v45 = vunpack.c.h.bf16 %v14406_v39 }
0x1cfc   :  { %v14679_v7 = vpop.eup %14678  ;;  %v8934_v58 = vadd.f32 %v14677_v35, %v8933_v54  ;;  %v14378_v54 = vunpack.c.l.bf16 %v14406_v39 }
0x1cfd   :  { %v8949_v41 = vadd.f32 1.0, %v14679_v7 }
0x1cfe   :  { %v8938_v48 = vsel %vm8937_vm12, %v14677_v35, %v8934_v58  ;;  %v14417_v58 = vld [vmem:[%s20641_s7] ss:$0 sm:$0xff] }
0x1cff   :  { %14680 = vrcp.f32 %v8949_v41  ;;  %v8943_v61 = vsel %vm8940_vm13, %v8942_v12, %v8938_v48  ;;  %v8961_v9 = vand.u32 2147483648, %v8949_v41  ;;  %v8959_v10 = vand.u32 2147483647, %v8949_v41 }
0x1d00   :  { %v8965_v63 = vmul.f32 %v8943_v61, %v7963_v5  ;;  %vm8955_vm15 = vweird.f32 %v8949_v41 }
0x1d01   :  { %v8962_v29 = vor.u32 1.1754944e-38, %v8961_v9  ;;  %vm8960_vm9 = vcmp.eq.f32.partialorder %v8959_v10, 8.507059e+37 }
0x1d02   :  { %v8966_v22 = vadd.f32 %v8965_v63, %v8924_v24 }
0x1d04   :  { %14682 = vtanh.f32 %v8966_v22 }
0x1d05   :  { %v14681_v26 = vpop.eup %14680 }
0x1d06   :  { %v8951_v30 = vmul.f32 %v14681_v26, %v8949_v41  ;;  %vm8956_vm14 = vweird.f32 %v14681_v26  ;;  %v14407_v41 = vld [vmem:[%s20643_s3 + $0x18] sm:$0xff]  }
0x1d07   :  { %vm8957_vm8 = vmor %vm8955_vm15, %vm8956_vm14  ;;  %v14382_v63 = vunpack.c.l.bf16 %v14407_v41  ;;  %v14383_v9 = vunpack.c.h.bf16 %v14407_v41 }
0x1d08   :  { %v8952_v51 = vsub.f32 1.0, %v8951_v30 }
0x1d0a   :  { %v8953_v14 = vmul.f32 %v14681_v26, %v8952_v51  ;;  %v14683_v27 = vpop.eup %14682 }
0x1d0c   :  { %v8954_v23 = vadd.f32 %v14681_v26, %v8953_v14 }
0x1d0e   :  { %v8958_v11 = vsel %vm8957_vm8, %v14681_v26, %v8954_v23 }
0x1d0f   :  { %v8963_v33 = vsel %vm8960_vm9, %v8962_v29, %v8958_v11 }
0x1d10   :  { %v8968_v1 = vsub.f32 1.0, %v8963_v33  ;;  %v8970_v15 = vmul.f32 %v14727_v4, %v8963_v33 }
0x1d12   :  { %v8969_v40 = vmul.f32 %v14683_v27, %v8968_v1 }
0x1d14   :  { %v8971_v17 = vadd.f32 %v8970_v15, %v8969_v40 }
0x1d16   :  { %13082 = vst [vmem:[%s20653_s13 + $0x30] sm:$0xff] %v8971_v17  ;;  %v8981_v53 = vpack.c.bf16 %v8971_v17, %v8971_v17 }
0x1d18   :  { %9182 = vmatmul.bf16.vlgmr.msrb.gmra.mxu0 %v8981_v53  ;;  %9195 = vmatmul.bf16.vlgmr.msrb.gmra.mxu1 %v8981_v53 }
0x1d19   :  { %9208 = vmatmul.bf16.vlgmr.msrb.gmra.mxu2 %v8981_v53  ;;  %9221 = vmatmul.bf16.vlgmr.msrb.gmra.mxu3 %v8981_v53 }
0x1d95   :  { %v9183_v6 = vpop.f32.mrf.mxu0  ;;  %v20136_v42 = vpop.f32.mrf.mxu1 }
0x1d96   :  { %v9237_v34 = vadd.f32 %v13084_v20, %v9183_v6 }
0x1d98   :  { %v9262_v25 = vperm.slane %v9237_v34, 0  ;;  %v9256_v35 = vrot.slane %v9237_v34, 2  ;;  %v9255_v37 = vrot.slane %v9237_v34, 1  ;;  %v9257_v47 = vrot.slane %v9237_v34, 3 }
0x1d99   :  { %v9259_v60 = vrot.slane %v9237_v34, 5  ;;  %v9258_v2 = vrot.slane %v9237_v34, 4  ;;  %v9260_v7 = vrot.slane %v9237_v34, 6  ;;  %v9261_v48 = vrot.slane %v9237_v34, 7 }
0x1d9a   :  { %v9278_v59 = vadd.f32 %v14370_v31, %v9262_v25  ;;  %v9264_v49 = vperm.slane %v9256_v35, 0  ;;  %v9263_v36 = vperm.slane %v9255_v37, 0  ;;  %v9265_v44 = vperm.slane %v9257_v47, 0 }
0x1d9b   :  { %v9267_v8 = vperm.slane %v9259_v60, 0  ;;  %v9266_v55 = vperm.slane %v9258_v2, 0  ;;  %v9268_v18 = vperm.slane %v9260_v7, 0  ;;  %v9269_v14 = vperm.slane %v9261_v48, 0 }
0x1d9c   :  { %v20141_v52 = vpop.f32.mrf.mxu2  ;;  %v20143_v46 = vpop.f32.mrf.mxu3  ;;  %14684 = vtanh.f32 %v9278_v59  ;;  %v9280_v62 = vadd.f32 %v14374_v16, %v9264_v49  ;;  %v9279_v50 = vadd.f32 %v14371_v32, %v9263_v36  ;;  %v9281_v13 = vadd.f32 %v14375_v19, %v9265_v44 }
0x1d9d   :  { %v9185_v3 = vpop.f32.mrf.mxu0  ;;  %v9198_v57 = vpop.f32.mrf.mxu1  ;;  %v9283_v12 = vadd.f32 %v14379_v45, %v9267_v8  ;;  %v9282_v5 = vadd.f32 %v14378_v54, %v9266_v55  ;;  %v9284_v23 = vadd.f32 %v14382_v63, %v9268_v18  ;;  %v9285_v11 = vadd.f32 %v14383_v9, %v9269_v14  ;;  %v9390_v18 = vld [vmem:[%s20645_s4 + $0x18] sm:$0xf] }
0x1d9e   :  { %14686 = vtanh.f32 %v9280_v62 }
0x1d9f   :  { %14688 = vtanh.f32 %v9279_v50 }
0x1da0   :  { %14690 = vtanh.f32 %v9281_v13 }
0x1da1   :  { %14692 = vtanh.f32 %v9283_v12  ;;  %v9384_v12 = vld [vmem:[%s20645_s4] sm:$0xf] }
0x1da2   :  { %v14685_v61 = vpop.eup %14684  ;;  %14694 = vtanh.f32 %v9282_v5 }
0x1da3   :  { %v9298_v0 = vmul.f32 %v14685_v61, %v14417_v58  ;;  %14696 = vtanh.f32 %v9284_v23  ;;  %v9385_v61 = vld [vmem:[%s20645_s4 + $0x4] sm:$0xf] }
0x1da4   :  { %v14687_v26 = vpop.eup %14686  ;;  %v9211_v24 = vpop.f32.mrf.mxu2  ;;  %14698 = vtanh.f32 %v9285_v11 }
0x1da5   :  { %v9224_v30 = vpop.f32.mrf.mxu3  ;;  %v14689_v22 = vpop.eup %14688  ;;  %9306 = vadd.xlane.f32.xlu1 %v9298_v0  ;;  %v9300_v51 = vmul.f32 %v14687_v26, %v14417_v58  ;;  %v9391_v26 = vld [vmem:[%s20645_s4 + $0x1c] sm:$0xf]  ;;  %v9388_v24 = vld [vmem:[%s20645_s4 + $0x10] sm:$0xf] }
0x1da6   :  { %v9299_v10 = vmul.f32 %v14689_v22, %v14417_v58  ;;  %v14691_v29 = vpop.eup %14690  ;;  %v9389_v30 = vld [vmem:[%s20645_s4 + $0x14] sm:$0xf] }
0x1da7   :  { %9310 = vadd.xlane.f32.xlu0 %v9300_v51  ;;  %v14693_v33 = vpop.eup %14692  ;;  %v9301_v27 = vmul.f32 %v14691_v29, %v14417_v58 }
0x1da8   :  { %9308 = vadd.xlane.f32.xlu2 %v9299_v10  ;;  %v14695_v1 = vpop.eup %14694  ;;  %v9303_v40 = vmul.f32 %v14693_v33, %v14417_v58 }
0x1da9   :  { %v9302_v4 = vmul.f32 %v14695_v1, %v14417_v58  ;;  %v14697_v15 = vpop.eup %14696 }
0x1daa   :  { %v14699_v17 = vpop.eup %14698  ;;  %v9304_v53 = vmul.f32 %v14697_v15, %v14417_v58 }
0x1dab   :  { %v9305_v20 = vmul.f32 %v14699_v17, %v14417_v58 }
0x1dad   :  { %9312 = vadd.xlane.f32.xlu1 %v9301_v27 }
0x1daf   :  { %9316 = vadd.xlane.f32.xlu0 %v9303_v40 }
0x1db0   :  { %9314 = vadd.xlane.f32.xlu2 %v9302_v4 }
0x1db5   :  { %9318 = vadd.xlane.f32.xlu1 %v9304_v53 }
0x1db8   :  { %9320 = vadd.xlane.f32.xlu2 %v9305_v20 }
0x1e18   :  { %v9307_v28 = vpop.xlane.xlu1 %9306 }
0x1e19   :  { %v9330_v31 = vperm.slane %v9307_v28, %v14868_v21 }
0x1e1a   :  { %v9311_v43 = vpop.xlane.xlu0 %9310 }
0x1e1b   :  { %v9309_v6 = vpop.xlane.xlu2 %9308  ;;  %v9332_v16 = vperm.slane %v9311_v43, %v14868_v21 }
0x1e1c   :  { %v9331_v34 = vperm.slane %v9309_v6, %v14868_v21 }
0x1e1e   :  { %v9338_v32 = vsel %vm418_vm0, %v9331_v34, %v9330_v31 }
0x1e1f   :  { %v9339_v37 = vsel %vm420_vm1, %v9332_v16, %v9338_v32 }
0x1e20   :  { %v9313_v25 = vpop.xlane.xlu1 %9312 }
0x1e21   :  { %v9333_v35 = vperm.slane %v9313_v25, %v14868_v21 }
0x1e22   :  { %v9317_v47 = vpop.xlane.xlu0 %9316 }
0x1e23   :  { %v9315_v39 = vpop.xlane.xlu2 %9314  ;;  %v9340_v19 = vsel %vm422_vm2, %v9333_v35, %v9339_v37  ;;  %v9335_v2 = vperm.slane %v9317_v47, %v14868_v21 }
0x1e24   :  { %v9334_v60 = vperm.slane %v9315_v39, %v14868_v21 }
0x1e26   :  { %v9341_v59 = vsel %vm424_vm3, %v9334_v60, %v9340_v19 }
0x1e27   :  { %v9342_v44 = vsel %vm426_vm4, %v9335_v2, %v9341_v59 }
0x1e28   :  { %v9319_v49 = vpop.xlane.xlu1 %9318 }
0x1e29   :  { %v9336_v36 = vperm.slane %v9319_v49, %v14868_v21 }
0x1e2b   :  { %v9321_v45 = vpop.xlane.xlu2 %9320  ;;  %v9343_v62 = vsel %vm428_vm5, %v9336_v36, %v9342_v44 }
0x1e2c   :  { %v9337_v50 = vperm.slane %v9321_v45, %v14868_v21  ;;  %v9386_v21 = vld [vmem:[%s20645_s4 + $0x8] sm:$0xf]  ;;  %v13285_v45 = vld [vmem:[%s20646_s8 + $0x70] sm:$0xf] }
0x1e2e   :  { %v9344_v8 = vsel %vm430_vm6, %v9337_v50, %v9343_v62  ;;  %v14207_v62 = vld [vmem:[%s20646_s8 + $0x74] sm:$0xf0]  ;;  %v14206_v50 = vld [vmem:[%s20646_s8 + $0x74] sm:$0xf] }
0x1e2f   :  { %v9346_v3 = vsel %vm51_vm7, %v9344_v8, -1e+30  ;;  %vm20773_vm7 = vcmask 1043456   ;;  %v13286_v8 = vor.u32 %v14207_v62, %v13285_v45  ;;  %v13369_v45 = vld [vmem:[%s20647_s10 + $0x9c] sm:$0xf0] }
0x1e30   :  { %v9347_v57 = vsel %vm20771_vm10, %v9346_v3, -inf  ;;  %v9440_v5 = vsel %vm20773_vm7, %v9386_v21, 0  ;;  %vm20774_vm12 = vmmov %vm20773_vm7  ;;  %v13269_v21 = vld [vmem:[%s20646_s8 + $0x50] sm:$0xf] }
0x1e31   :  { %9348 = vmax.xlane.f32.xlu0 %v9347_v57  ;;  %v9461_v48 = vsel %vm20774_vm12, %v9387_v38, 0  ;;  %vm20775_vm13 = vmmov %vm20773_vm7  ;;  %9449 = vmatpush.bf16.msra.mxu2 %v9440_v5  ;;  %v14203_v38 = vld [vmem:[%s20646_s8 + $0x54] sm:$0xf0] }
0x1e32   :  { %9470 = vmatpush.bf16.msra.mxu3 %v9461_v48  ;;  %vm20776_vm14 = vmmov %vm20773_vm7  ;;  %v13270_v5 = vor.u32 %v14203_v38, %v13269_v21  ;;  %v13271_v48 = vld [vmem:[%s20646_s8 + $0x58] sm:$0xf0] }
0x1e33   :  { %v9419_v63 = vsel %vm20776_vm14, %v9385_v61, 0  ;;  %vm20777_vm15 = vmmov %vm20773_vm7  ;;  %v13261_v61 = vld [vmem:[%s20646_s8 + $0x40] sm:$0xf] }
0x1e34   :  { %9428 = vmatpush.bf16.msra.mxu1 %v9419_v63  ;;  %v9524_v0 = vsel %vm20777_vm15, %v9390_v18, 0  ;;  %vm20778_vm8 = vmmov %vm20773_vm7  ;;  %v14201_v63 = vld [vmem:[%s20646_s8 + $0x44] sm:$0xf0]  ;;  %v14200_v18 = vld [vmem:[%s20646_s8 + $0x44] sm:$0xf] }
0x1e35   :  { %9533 = vmatpush.bf16.msrb.mxu2 %v9524_v0  ;;  %v9545_v22 = vsel %vm20778_vm8, %v9391_v26, 0  ;;  %vm20779_vm9 = vmmov %vm20773_vm7  ;;  %v13262_v0 = vor.u32 %v14201_v63, %v13261_v61  ;;  %v13263_v26 = vld [vmem:[%s20646_s8 + $0x48] sm:$0xf0] }
0x1e36   :  { %v9482_v51 = vsel %vm20779_vm9, %v9388_v24, 0  ;;  %vm20780_vm10 = vmmov %vm20773_vm7  ;;  %9554 = vmatpush.bf16.msrb.mxu3 %v9545_v22  ;;  %vm20782_vm7 = vcmask 64512   ;;  %v13266_v24 = vor.u32 %v14200_v18, %v13263_v26  ;;  %v14199_v22 = vld [vmem:[%s20646_s8 + $0x34] sm:$0xf0] }
0x1e37   :  { %v9503_v9 = vsel %vm20780_vm10, %v9389_v30, 0  ;;  %vm20783_vm12 = vmmov %vm20782_vm7  ;;  %v13253_v30 = vld [vmem:[%s20646_s8 + $0x30] sm:$0xf] }
0x1e38   :  { %9512 = vmatpush.bf16.msrb.mxu1 %v9503_v9  ;;  %vm20785_vm14 = vmmov %vm20782_vm7  ;;  %v13254_v9 = vor.u32 %v14199_v22, %v13253_v30 }
0x1e39   :  { %vm20786_vm15 = vmmov %vm20782_vm7 }
0x1e3a   :  { %vm20787_vm8 = vmmov %vm20782_vm7 }
0x1e3b   :  { %vm20788_vm9 = vmmov %vm20782_vm7 }
0x1e3c   :  { %vm20789_vm10 = vmmov %vm20782_vm7 }
0x1ea4   :  { %v9349_v54 = vpop.xlane.xlu0 %9348 }
0x1ea5   :  { %v9350_v55 = vsub.f32 %v9346_v3, %v9349_v54  ;;  %v13287_v3 = vld [vmem:[%s20646_s8 + $0x78] sm:$0xf0]  ;;  %v13277_v54 = vld [vmem:[%s20646_s8 + $0x60] sm:$0xf] }
0x1ea6   :  { %v13290_v57 = vor.u32 %v14206_v50, %v13287_v3 }
0x1ea7   :  { %v9351_v13 = vmul.f32 1.442695, %v9350_v55  ;;  %v14205_v55 = vld [vmem:[%s20646_s8 + $0x64] sm:$0xf0] }
0x1ea9   :  { %14700 = vpow2.f32 %v9351_v13  ;;  %v14204_v13 = vld [vmem:[%s20646_s8 + $0x64] sm:$0xf] }
0x1eaf   :  { %v14701_v7 = vpop.eup %14700 }
0x1eb0   :  { %v9353_v58 = vmul.f32 %v14701_v7, %v15038_v56  ;;  %v9398_v56 = vsel %vm20775_vm13, %v9384_v12, 0  ;;  %vm20784_vm13 = vmmov %vm20782_vm7  ;;  %v13278_v7 = vor.u32 %v14205_v55, %v13277_v54  ;;  %v14202_v12 = vld [vmem:[%s20646_s8 + $0x54] sm:$0xf]  ;;  %v14248_v54 = vld [vmem:[%s20647_s10 + $0x80] sm:$0xf0] }
0x1eb1   :  { %9407 = vmatpush.bf16.msra.mxu0 %v9398_v56  ;;  %v13274_v56 = vor.u32 %v14202_v12, %v13271_v48 }
0x1eb2   :  { %v9354_v41 = vsel %vm20772_vm11, %v9353_v58, 0.0  ;;  %vm20781_vm11 = vcmask 1040384  }
0x1eb3   :  { %9355 = vadd.xlane.f32.xlu1 %v9354_v41 }
0x1eb5   :  { %9491 = vmatpush.bf16.msrb.mxu0 %v9482_v51  ;;  %v14198_v51 = vld [vmem:[%s20646_s8 + $0x34] sm:$0xf] }
0x1f26   :  { %v9356_v14 = vpop.xlane.xlu1 %9355 }
0x1f27   :  { %v9357_v10 = vadd.f32 1e-30, %v9356_v14  ;;  %v13255_v14 = vld [vmem:[%s20646_s8 + $0x38] sm:$0xf0] }
0x1f29   :  { %14702 = vrcp.f32 %v9357_v10  ;;  %v13258_v10 = vor.u32 %v14198_v51, %v13255_v14 }
0x1f2f   :  { %v14703_v23 = vpop.eup %14702 }
0x1f30   :  { %v9359_v29 = vmul.f32 %v14703_v23, %v9353_v58  ;;  %v13279_v58 = vld [vmem:[%s20646_s8 + $0x68] sm:$0xf0]  ;;  %v13245_v23 = vld [vmem:[%s20646_s8 + $0x20] sm:$0xf] }
0x1f31   :  { %v13282_v41 = vor.u32 %v14204_v13, %v13279_v58  ;;  %v13357_v58 = vld [vmem:[%s20647_s10 + $0x84] sm:$0xf0] }
0x1f32   :  { %v9360_v11 = vpack.c.bf16 %v9359_v29, %v9359_v29  ;;  %v14197_v29 = vld [vmem:[%s20646_s8 + $0x24] sm:$0xf0] }
0x1f34   :  { %v9362_v33 = vrot.slane %v9360_v11, 3 }
0x1f36   :  { %v9365_v1 = vsel %vm20781_vm11, %v9360_v11, %v9362_v33  ;;  %v9367_v27 = vsel %vm418_vm0, %v9360_v11, %v9362_v33  ;;  %v9370_v31 = vsel %vm420_vm1, %v9360_v11, %v9362_v33  ;;  %v9373_v32 = vsel %vm422_vm2, %v9360_v11, %v9362_v33  ;;  %v14196_v11 = vld [vmem:[%s20646_s8 + $0x24] sm:$0xf] }
0x1f37   :  { %v13215_v40 = vpack.i.b16 %v9365_v1, %v9365_v1  ;;  %v9377_v4 = vunpack.i.h.s16 %v9365_v1  ;;  %v9369_v15 = vrot.slane %v9367_v27, 1  ;;  %v9372_v25 = vrot.slane %v9370_v31, 2  ;;  %v13247_v1 = vld [vmem:[%s20646_s8 + $0x28] sm:$0xf0]  ;;  %v14192_v31 = vld [vmem:[%s20646_s8 + $0x4] sm:$0xf] }
0x1f38   :  { %v9375_v35 = vrot.slane %v9373_v32, 3  ;;  %v13246_v33 = vor.u32 %v14197_v29, %v13245_v23  ;;  %v13250_v27 = vor.u32 %v14196_v11, %v13247_v1 }
0x1f39   :  { %v9393_v17 = vperm.slane %v13215_v40, 0  ;;  %v9413_v53 = vpack.i.b16 %v9377_v4, %v9377_v4  ;;  %v13218_v20 = vpack.i.b16 %v9369_v15, %v9369_v15  ;;  %v9379_v28 = vunpack.i.h.s16 %v9369_v15  ;;  %v13237_v40 = vld [vmem:[%s20646_s8 + $0x10] sm:$0xf]  ;;  %v14195_v4 = vld [vmem:[%s20646_s8 + $0x14] sm:$0xf0] }
0x1f3a   :  { %v9381_v37 = vunpack.i.h.s16 %v9372_v25  ;;  %v13221_v47 = vpack.i.b16 %v9372_v25, %v9372_v25  ;;  %v9383_v39 = vunpack.i.h.s16 %v9375_v35  ;;  %v13224_v60 = vpack.i.b16 %v9375_v35, %v9375_v35  ;;  %v14194_v15 = vld [vmem:[%s20646_s8 + $0x14] sm:$0xf]  ;;  %v13231_v25 = vld [vmem:[%s20646_s8 + $0x8] sm:$0xf0] }
0x1f3b   :  { %13216 = vmatmul.msk.bf16.vlgmr.msra.gmra.mxu0 %vm20782_vm7, %v9393_v17  ;;  %v9414_v43 = vperm.slane %v9413_v53, 0  ;;  %v9435_v6 = vperm.slane %v13218_v20, 0  ;;  %v9455_v34 = vpack.i.b16 %v9379_v28, %v9379_v28  ;;  %v13238_v53 = vor.u32 %v14195_v4, %v13237_v40  ;;  %v13239_v20 = vld [vmem:[%s20646_s8 + $0x18] sm:$0xf0] }
0x1f3c   :  { %v9497_v19 = vpack.i.b16 %v9381_v37, %v9381_v37  ;;  %v9477_v2 = vperm.slane %v13221_v47, 0  ;;  %v9539_v59 = vpack.i.b16 %v9383_v39, %v9383_v39  ;;  %v9519_v36 = vperm.slane %v13224_v60, 0  ;;  %9696 = vmatpush.bf16.msra.mxu0 %v13286_v8  ;;  %v13379_v37 = vld [vmem:[%s20647_s10 + $0xa8] sm:$0xf]  ;;  %v14254_v47 = vld [vmem:[%s20647_s10 + $0xb0] sm:$0xf0] }
0x1f3d   :  { %13217 = vmatmul.msk.bf16.vlgmr.msra.gmra.mxu1 %vm20783_vm12, %v9414_v43  ;;  %13219 = vmatmul.msk.bf16.vlgmr.msra.gmra.mxu2 %vm20784_vm13, %v9435_v6  ;;  %v9456_v16 = vperm.slane %v9455_v34, 0  ;;  %v13242_v28 = vor.u32 %v14194_v15, %v13239_v20  ;;  %v13229_v6 = vld [vmem:[%s20646_s8] sm:$0xf]  ;;  %v14193_v34 = vld [vmem:[%s20646_s8 + $0x4] sm:$0xf0]  ;;  %v13234_v35 = vor.u32 %v14192_v31, %v13231_v25  ;;  %v13380_v60 = vor.u32 %v14254_v47, %v13379_v37 }
0x1f3e   :  { %v9498_v49 = vperm.slane %v9497_v19, 0  ;;  %v9540_v44 = vperm.slane %v9539_v59, 0  ;;  %9709 = vmatpush.bf16.msra.mxu1 %v13290_v57  ;;  %v13230_v32 = vor.u32 %v14193_v34, %v13229_v6  ;;  %v14253_v39 = vld [vmem:[%s20647_s10 + $0xac] sm:$0xf]  ;;  %v13367_v59 = vld [vmem:[%s20647_s10 + $0x90] sm:$0xf] }
0x1f3f   :  { %13220 = vmatmul.msk.bf16.vlgmr.msra.gmra.mxu3 %vm20785_vm14, %v9456_v16  ;;  %9981 = vmatpush.bf16.msra.mxu2 %v13380_v60  ;;  %v13355_v57 = vld [vmem:[%s20647_s10 + $0x78] sm:$0xf] }
0x1f40   :  { %9697 = vmatpush.bf16.msra.mxu0 %v13278_v7  ;;  %v14247_v7 = vld [vmem:[%s20647_s10 + $0x7c] sm:$0xf]  ;;  %v13356_v48 = vor.u32 %v14248_v54, %v13355_v57  ;;  %v13343_v57 = vld [vmem:[%s20647_s10 + $0x60] sm:$0xf]  ;;  %v14245_v54 = vld [vmem:[%s20647_s10 + $0x68] sm:$0xf0] }
0x1f42   :  { %9710 = vmatpush.bf16.msra.mxu1 %v13282_v41 }
0x1f44   :  { %9698 = vmatpush.bf16.msra.mxu0 %v13270_v5 }
0x1f46   :  { %9711 = vmatpush.bf16.msra.mxu1 %v13274_v56  ;;  %v13360_v56 = vor.u32 %v14247_v7, %v13357_v58  ;;  %v13345_v7 = vld [vmem:[%s20647_s10 + $0x6c] sm:$0xf0] }
0x1f47   :  { %v13387_v58 = vld [vmem:[%s20647_s10 + $0xb0] sm:$0xf] }
0x1f48   :  { %9699 = vmatpush.bf16.msra.mxu0 %v13262_v0 }
0x1f4a   :  { %9712 = vmatpush.bf16.msra.mxu1 %v13266_v24 }
0x1f4b   :  { %13222 = vmatmul.msk.bf16.vlgmr.msrb.gmra.mxu0 %vm20786_vm15, %v9477_v2  ;;  %v13381_v2 = vld [vmem:[%s20647_s10 + $0xb4] sm:$0xf0] }
0x1f4c   :  { %9700 = vmatpush.bf16.msra.mxu0 %v13254_v9 }
0x1f4d   :  { %13223 = vmatmul.msk.bf16.vlgmr.msrb.gmra.mxu1 %vm20787_vm8, %v9498_v49  ;;  %13225 = vmatmul.msk.bf16.vlgmr.msrb.gmra.mxu2 %vm20788_vm9, %v9519_v36  ;;  %v14251_v49 = vld [vmem:[%s20647_s10 + $0x98] sm:$0xf0]  ;;  %v13384_v36 = vor.u32 %v14253_v39, %v13381_v2 }
0x1f4e   :  { %9713 = vmatpush.bf16.msra.mxu1 %v13258_v10  ;;  %v13368_v62 = vor.u32 %v14251_v49, %v13367_v59 }
0x1f4f   :  { %13226 = vmatmul.msk.bf16.vlgmr.msrb.gmra.mxu3 %vm20789_vm10, %v9540_v44  ;;  %v14250_v44 = vld [vmem:[%s20647_s10 + $0x94] sm:$0xf] }
0x1f50   :  { %9701 = vmatpush.bf16.msra.mxu0 %v13246_v33  ;;  %9994 = vmatpush.bf16.msra.mxu3 %v13384_v36  ;;  %v13372_v3 = vor.u32 %v14250_v44, %v13369_v45 }
0x1f51   :  { %9982 = vmatpush.bf16.msra.mxu2 %v13368_v62 }
0x1f52   :  { %9714 = vmatpush.bf16.msra.mxu1 %v13250_v27 }
0x1f54   :  { %9702 = vmatpush.bf16.msra.mxu0 %v13238_v53  ;;  %9995 = vmatpush.bf16.msra.mxu3 %v13372_v3 }
0x1f55   :  { %9983 = vmatpush.bf16.msra.mxu2 %v13356_v48 }
0x1f56   :  { %9715 = vmatpush.bf16.msra.mxu1 %v13242_v28 }
0x1f58   :  { %9703 = vmatpush.bf16.msra.mxu0 %v13230_v32  ;;  %9996 = vmatpush.bf16.msra.mxu3 %v13360_v56  ;;  %v13331_v56 = vld [vmem:[%s20647_s10 + $0x48] sm:$0xf] }
0x1f5a   :  { %9716 = vmatpush.bf16.msra.mxu1 %v13234_v35 }
0x1fb8   :  { %v9409_v17 = vpop.f32.mrf.mxu0 }
0x1fb9   :  { %v9560_v0 = vpack.c.bf16 %v9409_v17, %v9409_v17 }
0x1fba   :  { %v9430_v43 = vpop.f32.mrf.mxu1 }
0x1fbb   :  { %v9771_v16 = vrot.slane %v9430_v43, 7  ;;  %v9561_v55 = vpack.c.bf16 %v9430_v43, %v9430_v43  ;;  %v9592_v10 = vunpack.c.l.b16 %v9560_v0  ;;  %v13333_v0 = vld [vmem:[%s20647_s10 + $0x54] sm:$0xf0] }
0x1fbd   :  { %v9772_v19 = vsel %vm418_vm0, %v9771_v16, %v9409_v17  ;;  %v9593_v61 = vunpack.c.l.b16 %v9561_v55  ;;  %v13344_v55 = vor.u32 %v14245_v54, %v13343_v57  ;;  %v13477_v54 = vld [vmem:[%s20648_s9 + $0xb4] sm:$0xf0] }
0x1fbf   :  { %v9600_v22 = vrot.slane %v9593_v61, 7  ;;  %9984 = vmatpush.bf16.msra.mxu2 %v13344_v55  ;;  %v14242_v61 = vld [vmem:[%s20647_s10 + $0x50] sm:$0xf0]  ;;  %v13483_v55 = vld [vmem:[%s20648_s9 + $0xb0] sm:$0xf] }
0x1fc0   :  { %v9411_v50 = vpop.f32.mrf.mxu0  ;;  %v9451_v8 = vpop.f32.mrf.mxu2 }
0x1fc1   :  { %v9773_v13 = vrot.slane %v9451_v8, 6  ;;  %v9562_v41 = vpack.c.bf16 %v9451_v8, %v9451_v8  ;;  %v9601_v4 = vsel %vm418_vm0, %v9600_v22, %v9592_v10  ;;  %v13319_v10 = vld [vmem:[%s20647_s10 + $0x30] sm:$0xf] }
0x1fc2   :  { %v9432_v21 = vpop.f32.mrf.mxu1  ;;  %v9472_v38 = vpop.f32.mrf.mxu3 }
0x1fc3   :  { %v9774_v12 = vsel %vm420_vm1, %v9773_v13, %v9772_v19  ;;  %v9775_v5 = vrot.slane %v9472_v38, 5  ;;  %v9563_v63 = vpack.c.bf16 %v9472_v38, %v9472_v38  ;;  %v9594_v26 = vunpack.c.l.b16 %v9562_v41  ;;  %v14244_v13 = vld [vmem:[%s20647_s10 + $0x64] sm:$0xf]  ;;  %v14255_v21 = vld [vmem:[%s20647_s10 + $0xb8] sm:$0xf0] }
0x1fc4   :  { %v13348_v41 = vor.u32 %v14244_v13, %v13345_v7  ;;  %v13475_v38 = vld [vmem:[%s20648_s9 + $0xa8] sm:$0xf]  ;;  %v14231_v13 = vld [vmem:[%s20648_s9 + $0xb8] sm:$0xf0] }
0x1fc5   :  { %v9776_v18 = vsel %vm422_vm2, %v9775_v5, %v9774_v12  ;;  %v9595_v51 = vunpack.c.l.b16 %v9563_v63  ;;  %v9602_v23 = vrot.slane %v9594_v26, 6  ;;  %v14230_v12 = vld [vmem:[%s20648_s9 + $0xb0] sm:$0xf0]  ;;  %v13388_v5 = vor.u32 %v14255_v21, %v13387_v58  ;;  %v14241_v63 = vld [vmem:[%s20647_s10 + $0x4c] sm:$0xf] }
0x1fc6   :  { %v13476_v48 = vor.u32 %v14230_v12, %v13475_v38  ;;  %9997 = vmatpush.bf16.msra.mxu3 %v13348_v41  ;;  %v13375_v26 = vld [vmem:[%s20647_s10 + $0x98] sm:$0xf]  ;;  %v13484_v58 = vor.u32 %v14231_v13, %v13483_v55  ;;  %v14240_v21 = vld [vmem:[%s20647_s10 + $0x40] sm:$0xf0]  ;;  %v13415_v38 = vld [vmem:[%s20648_s9 + $0x30] sm:$0xf] }
0x1fc7   :  { %v9604_v15 = vrot.slane %v9595_v51, 5  ;;  %v9603_v53 = vsel %vm420_vm1, %v9602_v23, %v9601_v4  ;;  %10007 = vmatpush.bf16.msrb.mxu0 %v13388_v5  ;;  %v13463_v51 = vld [vmem:[%s20648_s9 + $0x90] sm:$0xf]  ;;  %v14239_v23 = vld [vmem:[%s20647_s10 + $0x38] sm:$0xf0] }
0x1fc8   :  { %v9453_v24 = vpop.f32.mrf.mxu2  ;;  %v9493_v30 = vpop.f32.mrf.mxu0  ;;  %10148 = vmatpush.bf16.msrb.mxu1 %v13476_v48  ;;  %v13327_v41 = vld [vmem:[%s20647_s10 + $0x38] sm:$0xf]  ;;  %v14215_v5 = vld [vmem:[%s20648_s9 + $0x38] sm:$0xf0]  ;;  %v14226_v48 = vld [vmem:[%s20648_s9 + $0x94] sm:$0xf] }
0x1fc9   :  { %v9564_v9 = vpack.c.bf16 %v9493_v30, %v9493_v30  ;;  %v9777_v14 = vrot.slane %v9493_v30, 4  ;;  %v9605_v34 = vsel %vm422_vm2, %v9604_v15, %v9603_v53  ;;  %v14252_v24 = vld [vmem:[%s20647_s10 + $0xa0] sm:$0xf0]  ;;  %v13336_v30 = vor.u32 %v14241_v63, %v13333_v0  ;;  %v13451_v15 = vld [vmem:[%s20648_s9 + $0x78] sm:$0xf] }
0x1fca   :  { %v9474_v29 = vpop.f32.mrf.mxu3  ;;  %v9514_v11 = vpop.f32.mrf.mxu1  ;;  %v13376_v22 = vor.u32 %v14252_v24, %v13375_v26  ;;  %v13328_v12 = vor.u32 %v14240_v21, %v13327_v41  ;;  %v13086_v63 = vld [vmem:[%s20649_s2 + $0x78] sm:$0xff]  ;;  %v14228_v24 = vld [vmem:[%s20648_s9 + $0xa0] sm:$0xf0]  ;;  %v13405_v41 = vld [vmem:[%s20648_s9 + $0x24] sm:$0xf0] }
0x1fcb   :  { %v9596_v33 = vunpack.c.l.b16 %v9564_v9  ;;  %v9778_v1 = vsel %vm424_vm3, %v9777_v14, %v9776_v18  ;;  %v9565_v27 = vpack.c.bf16 %v9514_v11, %v9514_v11  ;;  %v9779_v40 = vrot.slane %v9514_v11, 3  ;;  %v14227_v9 = vld [vmem:[%s20648_s9 + $0x98] sm:$0xf0]  ;;  %9998 = vmatpush.bf16.msra.mxu3 %v13336_v30  ;;  %v14238_v29 = vld [vmem:[%s20647_s10 + $0x34] sm:$0xf] }
0x1fcc   :  { %v13332_v18 = vor.u32 %v14242_v61, %v13331_v56  ;;  %v13464_v14 = vor.u32 %v14227_v9, %v13463_v51  ;;  %10008 = vmatpush.bf16.msrb.mxu0 %v13376_v22  ;;  %v13320_v11 = vor.u32 %v14239_v23, %v13319_v10  ;;  %v13465_v56 = vld [vmem:[%s20648_s9 + $0x9c] sm:$0xf0]  ;;  %v13085_v61 = vld [vmem:[%s20649_s2 + $0x70] sm:$0xff]  ;;  %v13471_v26 = vld [vmem:[%s20648_s9 + $0x98] sm:$0xf] }
0x1fcd   :  { %v9780_v17 = vsel %vm426_vm4, %v9779_v40, %v9778_v1  ;;  %v9606_v20 = vrot.slane %v9596_v33, 4  ;;  %v9597_v28 = vunpack.c.l.b16 %v9565_v27  ;;  %v13321_v33 = vld [vmem:[%s20647_s10 + $0x3c] sm:$0xf0]  ;;  %v14249_v27 = vld [vmem:[%s20647_s10 + $0x88] sm:$0xf0]  ;;  %v13468_v0 = vor.u32 %v14226_v48, %v13465_v56 }
0x1fce   :  { %9985 = vmatpush.bf16.msra.mxu2 %v13332_v18  ;;  %10149 = vmatpush.bf16.msrb.mxu1 %v13464_v14  ;;  %v13363_v1 = vld [vmem:[%s20647_s10 + $0x80] sm:$0xf]  ;;  %v13324_v40 = vor.u32 %v14238_v29, %v13321_v33  ;;  %v13416_v18 = vor.u32 %v14215_v5, %v13415_v38  ;;  %v13472_v22 = vor.u32 %v14228_v24, %v13471_v26  ;;  %v14237_v51 = vld [vmem:[%s20647_s10 + $0x28] sm:$0xf0]  ;;  %v13403_v9 = vld [vmem:[%s20648_s9 + $0x18] sm:$0xf] }
0x1fcf   :  { %v9607_v32 = vsel %vm424_vm3, %v9606_v20, %v9605_v34  ;;  %v9608_v25 = vrot.slane %v9597_v28, 3  ;;  %v13364_v4 = vor.u32 %v14249_v27, %v13363_v1  ;;  %v13307_v20 = vld [vmem:[%s20647_s10 + $0x18] sm:$0xf]  ;;  %v14236_v28 = vld [vmem:[%s20647_s10 + $0x20] sm:$0xf0] }
0x1fd0   :  { %v9495_v43 = vpop.f32.mrf.mxu0  ;;  %v9535_v6 = vpop.f32.mrf.mxu2  ;;  %9999 = vmatpush.bf16.msra.mxu3 %v13324_v40  ;;  %v13309_v34 = vld [vmem:[%s20647_s10 + $0x24] sm:$0xf0]  ;;  %v13315_v30 = vld [vmem:[%s20647_s10 + $0x20] sm:$0xf]  ;;  %v14212_v14 = vld [vmem:[%s20648_s9 + $0x20] sm:$0xf0] }
0x1fd1   :  { %v9566_v31 = vpack.c.bf16 %v9535_v6, %v9535_v6  ;;  %v9781_v16 = vrot.slane %v9535_v6, 2  ;;  %v9609_v36 = vsel %vm426_vm4, %v9608_v25, %v9607_v32  ;;  %v14235_v43 = vld [vmem:[%s20647_s10 + $0x1c] sm:$0xf]  ;;  %10009 = vmatpush.bf16.msrb.mxu0 %v13364_v4  ;;  %v13308_v6 = vor.u32 %v14236_v28, %v13307_v20  ;;  %v13459_v33 = vld [vmem:[%s20648_s9 + $0x80] sm:$0xf] }
0x1fd2   :  { %v9516_v35 = vpop.f32.mrf.mxu1  ;;  %v9556_v37 = vpop.f32.mrf.mxu3  ;;  %9986 = vmatpush.bf16.msra.mxu2 %v13320_v11  ;;  %v13312_v32 = vor.u32 %v14235_v43, %v13309_v34  ;;  %v13316_v10 = vor.u32 %v14237_v51, %v13315_v30  ;;  %v13404_v23 = vor.u32 %v14212_v14, %v13403_v9  ;;  %v14223_v29 = vld [vmem:[%s20648_s9 + $0x7c] sm:$0xf]  ;;  %v13453_v11 = vld [vmem:[%s20648_s9 + $0x84] sm:$0xf0]  ;;  %v14225_v27 = vld [vmem:[%s20648_s9 + $0x88] sm:$0xf0] }
0x1fd3   :  { %v9598_v47 = vunpack.c.l.b16 %v9566_v31  ;;  %v9782_v39 = vsel %vm428_vm5, %v9781_v16, %v9780_v17  ;;  %v9567_v19 = vpack.c.bf16 %v9556_v37, %v9556_v37  ;;  %v9783_v60 = vrot.slane %v9556_v37, 1  ;;  %v14224_v17 = vld [vmem:[%s20648_s9 + $0x80] sm:$0xf0]  ;;  %v13351_v31 = vld [vmem:[%s20647_s10 + $0x68] sm:$0xf] }
0x1fd4   :  { %v13452_v53 = vor.u32 %v14224_v17, %v13451_v15  ;;  %v14246_v16 = vld [vmem:[%s20647_s10 + $0x70] sm:$0xf0]  ;;  %v13439_v35 = vld [vmem:[%s20648_s9 + $0x60] sm:$0xf]  ;;  %v14221_v37 = vld [vmem:[%s20648_s9 + $0x68] sm:$0xf0]  ;;  %10000 = vmatpush.bf16.msra.mxu3 %v13312_v32  ;;  %v13456_v1 = vor.u32 %v14223_v29, %v13453_v11 }
0x1fd5   :  { %v9610_v2 = vrot.slane %v9598_v47, 2  ;;  %v9599_v59 = vunpack.c.l.b16 %v9567_v19  ;;  %v20358_v49 = vsel %vm430_vm6, %v9783_v60, %v9782_v39  ;;  %v13352_v25 = vor.u32 %v14246_v16, %v13351_v31  ;;  %v13295_v39 = vld [vmem:[%s20647_s10] sm:$0xf]  ;;  %v14233_v19 = vld [vmem:[%s20647_s10 + $0x8] sm:$0xf0] }
0x1fd6   :  { %10150 = vmatpush.bf16.msrb.mxu1 %v13452_v53  ;;  %9987 = vmatpush.bf16.msra.mxu2 %v13308_v6  ;;  %v13440_v47 = vor.u32 %v14221_v37, %v13439_v35  ;;  %v14232_v60 = vld [vmem:[%s20647_s10 + $0x4] sm:$0xf]  ;;  %v13303_v40 = vld [vmem:[%s20647_s10 + $0x8] sm:$0xf]  ;;  %v14234_v4 = vld [vmem:[%s20647_s10 + $0x10] sm:$0xf0]  ;;  %v13460_v53 = vor.u32 %v14225_v27, %v13459_v33 }
0x1fd7   :  { %v9611_v44 = vsel %vm428_vm5, %v9610_v2, %v9609_v36  ;;  %v9612_v45 = vrot.slane %v9599_v59, 1  ;;  %10010 = vmatpush.bf16.msrb.mxu0 %v13352_v25  ;;  %v13296_v2 = vor.u32 %v14233_v19, %v13295_v39  ;;  %v13297_v59 = vld [vmem:[%s20647_s10 + $0xc] sm:$0xf0]  ;;  %v13391_v20 = vld [vmem:[%s20648_s9] sm:$0xf]  ;;  %v13304_v25 = vor.u32 %v14234_v4, %v13303_v40 }
0x1fd8   :  { %v9537_v62 = vpop.f32.mrf.mxu2  ;;  %v13339_v36 = vld [vmem:[%s20647_s10 + $0x50] sm:$0xf]  ;;  %v14209_v28 = vld [vmem:[%s20648_s9 + $0x8] sm:$0xf0]  ;;  %v14220_v43 = vld [vmem:[%s20648_s9 + $0x64] sm:$0xf] }
0x1fd9   :  { %v9613_v50 = vsel %vm430_vm6, %v9612_v45, %v9611_v44  ;;  %v14243_v44 = vld [vmem:[%s20647_s10 + $0x58] sm:$0xf0]  ;;  %v13300_v45 = vor.u32 %v14232_v60, %v13297_v59  ;;  %v13441_v31 = vld [vmem:[%s20648_s9 + $0x6c] sm:$0xf0]  ;;  %v13447_v16 = vld [vmem:[%s20648_s9 + $0x68] sm:$0xf]  ;;  %v13392_v35 = vor.u32 %v14209_v28, %v13391_v20 }
0x1fda   :  { %v9614_v8 = vpack.c.b16 %v9613_v50, %v9613_v50  ;;  %v9558_v3 = vpop.f32.mrf.mxu3  ;;  %10151 = vmatpush.bf16.msrb.mxu1 %v13440_v47  ;;  %v13340_v62 = vor.u32 %v14243_v44, %v13339_v36  ;;  %v13427_v50 = vld [vmem:[%s20648_s9 + $0x48] sm:$0xf]  ;;  %9988 = vmatpush.bf16.msra.mxu2 %v13296_v2  ;;  %v14222_v32 = vld [vmem:[%s20648_s9 + $0x70] sm:$0xf0]  ;;  %v13444_v39 = vor.u32 %v14220_v43, %v13441_v31  ;;  %v14217_v60 = vld [vmem:[%s20648_s9 + $0x4c] sm:$0xf] }
0x1fdb   :  { %v14229_v3 = vld [vmem:[%s20648_s9 + $0xac] sm:$0xf]  ;;  %10001 = vmatpush.bf16.msra.mxu3 %v13300_v45  ;;  %v13448_v19 = vor.u32 %v14222_v32, %v13447_v16  ;;  %v13429_v2 = vld [vmem:[%s20648_s9 + $0x54] sm:$0xf0]  ;;  %v13435_v59 = vld [vmem:[%s20648_s9 + $0x50] sm:$0xf] }
0x1fdc   :  { %9704 = vmatmul.bf16.vlgmr.msra.gmra.mxu0 %v9614_v8  ;;  %9717 = vmatmul.bf16.vlgmr.msra.gmra.mxu1 %v9614_v8  ;;  %v14218_v8 = vld [vmem:[%s20648_s9 + $0x50] sm:$0xf0]  ;;  %v13480_v7 = vor.u32 %v14229_v3, %v13477_v54  ;;  %v14219_v36 = vld [vmem:[%s20648_s9 + $0x58] sm:$0xf0]  ;;  %v13432_v44 = vor.u32 %v14217_v60, %v13429_v2  ;;  %v13417_v3 = vld [vmem:[%s20648_s9 + $0x3c] sm:$0xf0] }
0x1fdd   :  { %v13428_v57 = vor.u32 %v14218_v8, %v13427_v50  ;;  %10011 = vmatpush.bf16.msrb.mxu0 %v13340_v62  ;;  %v13436_v45 = vor.u32 %v14219_v36, %v13435_v59  ;;  %v14214_v62 = vld [vmem:[%s20648_s9 + $0x34] sm:$0xf]  ;;  %v14216_v54 = vld [vmem:[%s20648_s9 + $0x40] sm:$0xf0]  ;;  %v14213_v5 = vld [vmem:[%s20648_s9 + $0x28] sm:$0xf0] }
0x1fde   :  { %10161 = vmatpush.bf16.msrb.mxu2 %v13480_v7  ;;  %v13420_v13 = vor.u32 %v14214_v62, %v13417_v3  ;;  %v14210_v26 = vld [vmem:[%s20648_s9 + $0x10] sm:$0xf0] }
0x1fdf   :  { %10152 = vmatpush.bf16.msrb.mxu1 %v13428_v57  ;;  %10174 = vmatpush.bf16.msrb.mxu3 %v13484_v58  ;;  %v13423_v57 = vld [vmem:[%s20648_s9 + $0x38] sm:$0xf]  ;;  %v14211_v58 = vld [vmem:[%s20648_s9 + $0x1c] sm:$0xf] }
0x1fe0   :  { %v13424_v7 = vor.u32 %v14216_v54, %v13423_v57  ;;  %v13408_v56 = vor.u32 %v14211_v58, %v13405_v41 }
0x1fe1   :  { %10012 = vmatpush.bf16.msrb.mxu0 %v13328_v12  ;;  %v13411_v12 = vld [vmem:[%s20648_s9 + $0x20] sm:$0xf] }
0x1fe2   :  { %10162 = vmatpush.bf16.msrb.mxu2 %v13468_v0  ;;  %v13399_v0 = vld [vmem:[%s20648_s9 + $0x8] sm:$0xf] }
0x1fe3   :  { %10153 = vmatpush.bf16.msrb.mxu1 %v13416_v18  ;;  %10175 = vmatpush.bf16.msrb.mxu3 %v13472_v22  ;;  %v13393_v18 = vld [vmem:[%s20648_s9 + $0xc] sm:$0xf0]  ;;  %v13400_v30 = vor.u32 %v14210_v26, %v13399_v0 }
0x1fe5   :  { %10013 = vmatpush.bf16.msrb.mxu0 %v13316_v10 }
0x1fe6   :  { %10163 = vmatpush.bf16.msrb.mxu2 %v13456_v1 }
0x1fe7   :  { %10154 = vmatpush.bf16.msrb.mxu1 %v13404_v23  ;;  %10176 = vmatpush.bf16.msrb.mxu3 %v13460_v53  ;;  %v13083_v53 = vld [vmem:[%s20650_s0 + $0x38] sm:$0xff] }
0x1fe9   :  { %10014 = vmatpush.bf16.msrb.mxu0 %v13304_v25 }
0x1fea   :  { %10164 = vmatpush.bf16.msrb.mxu2 %v13444_v39  ;;  %v10187_v39 = vld [vmem:[%s20652_s11] sm:$0x7] }
0x1feb   :  { %10155 = vmatpush.bf16.msrb.mxu1 %v13392_v35  ;;  %10177 = vmatpush.bf16.msrb.mxu3 %v13448_v19 }
0x1fee   :  { %10165 = vmatpush.bf16.msrb.mxu2 %v13432_v44 }
0x1fef   :  { %10178 = vmatpush.bf16.msrb.mxu3 %v13436_v45 }
0x1ff2   :  { %10166 = vmatpush.bf16.msrb.mxu2 %v13420_v13  ;;  %v10190_v13 = vperm.slane %v10187_v39, 1 }
0x1ff3   :  { %10179 = vmatpush.bf16.msrb.mxu3 %v13424_v7 }
0x1ff6   :  { %10167 = vmatpush.bf16.msrb.mxu2 %v13408_v56 }
0x2059   :  { %v9705_v15 = vpop.f32.mrf.mxu0  ;;  %v9718_v17 = vpop.f32.mrf.mxu1 }
0x205a   :  { %v9722_v6 = vadd.f32 %v13085_v61, %v9705_v15  ;;  %v9723_v34 = vadd.f32 %v13086_v63, %v9718_v17  ;;  %v13412_v61 = vor.u32 %v14213_v5, %v13411_v12  ;;  %v14208_v63 = vld [vmem:[%s20648_s9 + $0x4] sm:$0xf] }
0x205b   :  { %v13396_v24 = vor.u32 %v14208_v63, %v13393_v18 }
0x205c   :  { %v13291_v37 = vmul.f32 -1.442695, %v9722_v6  ;;  %v13292_v47 = vmul.f32 -1.442695, %v9723_v34  ;;  %10180 = vmatpush.bf16.msrb.mxu3 %v13412_v61 }
0x205d   :  { %10168 = vmatpush.bf16.msrb.mxu2 %v13396_v24 }
0x205e   :  { %14704 = vpow2.f32 %v13291_v37 }
0x205f   :  { %14706 = vpow2.f32 %v13292_v47  ;;  %v9226_v47 = vld [vmem:[%s20651_s12] sm:$0x7] }
0x2060   :  { %10181 = vmatpush.bf16.msrb.mxu3 %v13400_v30  ;;  %v9228_v19 = vperm.slane %v9226_v47, 0  ;;  %v9230_v26 = vperm.slane %v9226_v47, 2 }
0x2061   :  { %v9707_v50 = vpop.f32.mrf.mxu0  ;;  %v9720_v8 = vpop.f32.mrf.mxu1 }
0x2062   :  { %v9234_v44 = vadd.f32 %v9228_v19, %v20136_v42 }
0x2064   :  { %v14705_v55 = vpop.eup %14704 }
0x2065   :  { %v14707_v21 = vpop.eup %14706  ;;  %v9730_v38 = vadd.f32 1.0, %v14705_v55  ;;  %v9229_v55 = vperm.slane %v9226_v47, 1 }
0x2066   :  { %v9731_v48 = vadd.f32 1.0, %v14707_v21 }
0x2067   :  { %14708 = vrcp.f32 %v9730_v38  ;;  %v9743_v23 = vand.u32 2147483648, %v9730_v38  ;;  %v9741_v33 = vand.u32 2147483647, %v9730_v38  ;;  %vm9737_vm2 = vweird.f32 %v9730_v38 }
0x2068   :  { %14710 = vrcp.f32 %v9731_v48  ;;  %v9758_v1 = vand.u32 2147483648, %v9731_v48  ;;  %v9756_v40 = vand.u32 2147483647, %v9731_v48  ;;  %vm9752_vm4 = vweird.f32 %v9731_v48 }
0x2069   :  { %v9744_v15 = vor.u32 1.1754944e-38, %v9743_v23  ;;  %vm9742_vm6 = vcmp.eq.f32.partialorder %v9741_v33, 8.507059e+37  ;;  %v10191_v33 = vperm.slane %v10187_v39, 2 }
0x206a   :  { %v9759_v20 = vor.u32 1.1754944e-38, %v9758_v1  ;;  %vm9757_vm11 = vcmp.eq.f32.partialorder %v9756_v40, 8.507059e+37 }
0x206d   :  { %v14709_v22 = vpop.eup %14708 }
0x206e   :  { %v14711_v51 = vpop.eup %14710  ;;  %v9733_v9 = vmul.f32 %v14709_v22, %v9730_v38  ;;  %vm9738_vm0 = vweird.f32 %v14709_v22  ;;  %v9235_v38 = vadd.f32 %v9229_v55, %v20141_v52 }
0x206f   :  { %v9748_v14 = vmul.f32 %v14711_v51, %v9731_v48  ;;  %vm9753_vm1 = vweird.f32 %v14711_v51  ;;  %vm9739_vm3 = vmor %vm9737_vm2, %vm9738_vm0 }
0x2070   :  { %v9734_v10 = vsub.f32 1.0, %v9733_v9  ;;  %vm9754_vm5 = vmor %vm9752_vm4, %vm9753_vm1 }
0x2071   :  { %v9749_v29 = vsub.f32 1.0, %v9748_v14  ;;  %v9236_v14 = vadd.f32 %v9230_v26, %v20143_v46 }
0x2072   :  { %v9735_v11 = vmul.f32 %v14709_v22, %v9734_v10 }
0x2073   :  { %v9750_v27 = vmul.f32 %v14711_v51, %v9749_v29 }
0x2074   :  { %v9736_v4 = vadd.f32 %v14709_v22, %v9735_v11 }
0x2075   :  { %v9751_v17 = vadd.f32 %v14711_v51, %v9750_v27 }
0x2076   :  { %v9740_v28 = vsel %vm9739_vm3, %v14709_v22, %v9736_v4 }
0x2077   :  { %v9755_v43 = vsel %vm9754_vm5, %v14711_v51, %v9751_v17  ;;  %v9745_v6 = vsel %vm9742_vm6, %v9744_v15, %v9740_v28 }
0x2078   :  { %v9760_v34 = vsel %vm9757_vm11, %v9759_v20, %v9755_v43  ;;  %v9762_v31 = vmul.f32 %v13083_v53, %v9745_v6 }
0x2079   :  { %v9786_v16 = vmul.f32 %v20358_v49, %v9760_v34  ;;  %v10189_v49 = vperm.slane %v10187_v39, 0 }
0x207a   :  { %v9787_v32 = vpack.c.bf16 %v9762_v31, %v9762_v31 }
0x207b   :  { %v9820_v25 = vpack.c.bf16 %v9786_v16, %v9786_v16 }
0x207c   :  { %10156 = vmatmul.bf16.vlgmr.msrb.gmra.mxu1 %v9787_v32 }
0x207d   :  { %9989 = vmatmul.bf16.vlgmr.msra.gmra.mxu2 %v9820_v25  ;;  %10002 = vmatmul.bf16.vlgmr.msra.gmra.mxu3 %v9820_v25 }
0x207e   :  { %10015 = vmatmul.bf16.vlgmr.msrb.gmra.mxu0 %v9820_v25 }
0x208d   :  { %10169 = vmatmul.bf16.vlgmr.msrb.gmra.mxu2 %v9787_v32  ;;  %10182 = vmatmul.bf16.vlgmr.msrb.gmra.mxu3 %v9787_v32  ;;  %v14728_v32 = vld [vmem:[%s20653_s13 + $0x30] sm:$0xff] }
0x20f9   :  { %v10157_v35 = vpop.f32.mrf.mxu1 }
0x20fb   :  { %v10016_v37 = vpop.f32.mrf.mxu0 }
0x2100   :  { %v9990_v60 = vpop.f32.mrf.mxu2  ;;  %v10003_v2 = vpop.f32.mrf.mxu3 }
0x2101   :  { %v10158_v59 = vadd.f32 %v10157_v35, %v9990_v60  ;;  %v10159_v36 = vpop.f32.mrf.mxu1 }
0x2103   :  { %v10195_v45 = vadd.f32 %v10189_v49, %v10158_v59  ;;  %v10018_v62 = vpop.f32.mrf.mxu0 }
0x2105   :  { %v10198_v50 = vadd.f32 %v10195_v45, %v9234_v44 }
0x2107   :  { %v13485_v8 = vmul.f32 -1.442695, %v10198_v50 }
0x2108   :  { %v9992_v3 = vpop.f32.mrf.mxu2  ;;  %v10005_v57 = vpop.f32.mrf.mxu3 }
0x2109   :  { %14712 = vpow2.f32 %v13485_v8 }
0x210f   :  { %v14713_v54 = vpop.eup %14712 }
0x2110   :  { %v10202_v7 = vadd.f32 1.0, %v14713_v54  ;;  %v10170_v58 = vpop.f32.mrf.mxu2  ;;  %v10183_v41 = vpop.f32.mrf.mxu3 }
0x2111   :  { %v10171_v21 = vadd.f32 %v10170_v58, %v10003_v2  ;;  %v10184_v11 = vadd.f32 %v10183_v41, %v10016_v37 }
0x2112   :  { %14714 = vrcp.f32 %v10202_v7  ;;  %v10214_v0 = vand.u32 2147483648, %v10202_v7  ;;  %v10212_v30 = vand.u32 2147483647, %v10202_v7  ;;  %vm10208_vm12 = vweird.f32 %v10202_v7 }
0x2113   :  { %v10196_v12 = vadd.f32 %v10190_v13, %v10171_v21  ;;  %v10197_v27 = vadd.f32 %v10191_v33, %v10184_v11 }
0x2114   :  { %v10215_v52 = vor.u32 1.1754944e-38, %v10214_v0  ;;  %vm10213_vm14 = vcmp.eq.f32.partialorder %v10212_v30, 8.507059e+37 }
0x2115   :  { %v10218_v5 = vadd.f32 %v10196_v12, %v9235_v38 }
0x2117   :  { %v13486_v42 = vmul.f32 -1.442695, %v10218_v5 }
0x2118   :  { %v14715_v48 = vpop.eup %14714  ;;  %v10172_v56 = vpop.f32.mrf.mxu2 }
0x2119   :  { %v10185_v61 = vpop.f32.mrf.mxu3  ;;  %14716 = vpow2.f32 %v13486_v42  ;;  %v10204_v63 = vmul.f32 %v14715_v48, %v10202_v7  ;;  %vm10209_vm7 = vweird.f32 %v14715_v48 }
0x211a   :  { %vm10210_vm13 = vmor %vm10208_vm12, %vm10209_vm7 }
0x211b   :  { %v10205_v18 = vsub.f32 1.0, %v10204_v63 }
0x211d   :  { %v10206_v24 = vmul.f32 %v14715_v48, %v10205_v18 }
0x211f   :  { %v14717_v22 = vpop.eup %14716  ;;  %v10207_v51 = vadd.f32 %v14715_v48, %v10206_v24 }
0x2120   :  { %v10222_v9 = vadd.f32 1.0, %v14717_v22 }
0x2121   :  { %v10211_v10 = vsel %vm10210_vm13, %v14715_v48, %v10207_v51 }
0x2122   :  { %14718 = vrcp.f32 %v10222_v9  ;;  %v10216_v23 = vsel %vm10213_vm14, %v10215_v52, %v10211_v10  ;;  %v10234_v17 = vand.u32 2147483648, %v10222_v9  ;;  %v10232_v20 = vand.u32 2147483647, %v10222_v9 }
0x2123   :  { %v10238_v29 = vmul.f32 %v10216_v23, %v9236_v14  ;;  %vm10228_vm8 = vweird.f32 %v10222_v9 }
0x2124   :  { %v10235_v46 = vor.u32 1.1754944e-38, %v10234_v17  ;;  %vm10233_vm10 = vcmp.eq.f32.partialorder %v10232_v20, 8.507059e+37 }
0x2125   :  { %v10239_v4 = vadd.f32 %v10238_v29, %v10197_v27 }
0x2127   :  { %14720 = vtanh.f32 %v10239_v4 }
0x2128   :  { %v14719_v1 = vpop.eup %14718 }
0x2129   :  { %v10224_v40 = vmul.f32 %v14719_v1, %v10222_v9  ;;  %vm10229_vm15 = vweird.f32 %v14719_v1 }
0x212a   :  { %vm10230_vm9 = vmor %vm10228_vm8, %vm10229_vm15 }
0x212b   :  { %v10225_v15 = vsub.f32 1.0, %v10224_v40 }
0x212d   :  { %v10226_v53 = vmul.f32 %v14719_v1, %v10225_v15  ;;  %v14721_v31 = vpop.eup %14720 }
0x212f   :  { %v10227_v28 = vadd.f32 %v14719_v1, %v10226_v53 }
0x2131   :  { %v10231_v43 = vsel %vm10230_vm9, %v14719_v1, %v10227_v28 }
0x2132   :  { %v10236_v6 = vsel %vm10233_vm10, %v10235_v46, %v10231_v43 }
0x2133   :  { %v10241_v34 = vsub.f32 1.0, %v10236_v6  ;;  %v10243_v25 = vmul.f32 %v14728_v32, %v10236_v6 }
0x2135   :  { %v10242_v16 = vmul.f32 %v14721_v31, %v10241_v34 }
0x2137   :  { %v10244_v35 = vadd.f32 %v10243_v25, %v10242_v16 }
0x2139   :  { %13487 = vst [vmem:[%s20653_s13 + $0x38] sm:$0xff] %v10244_v35 }

</bundles_post_ra>
